<compile_context>
chip_gen: v7x
topology: tpu7x:2x2x1
jax: 0.10.0
libtpu: 0.0.40
codegen_flags: <defaults>
</compile_context>

<pallas_src>
import functools

import jax
import jax.numpy as jnp
from jax import lax
from jax.experimental import pallas as pl
from jax.experimental.pallas import tpu as pltpu


def _round_up(x, m):
    return (x + m - 1) // m * m


# --------------------------------------------------------------------------
# Pallas kernel: BasicBlock on one batch element in padded-flat layout.
#   residual = conv0(x); out = relu(bn1(conv1(x))); out = bn2(conv2(out))
#   y = relu(out + residual)
# --------------------------------------------------------------------------
def _basic_block_kernel(x_ref, w01_ref, w2_ref, b1_ref, b2_ref, mask_ref,
                        o_ref, mid_ref, *, spatial):
    D, H, W = spatial
    Hp, Wp = H + 2, W + 2
    max_delta = Hp * Wp + Wp + 1
    base = _round_up(max_delta, 128)
    cout, lcore = o_ref.shape
    lbuf = x_ref.shape[-1]

    # 3x3x3 tap offsets in flattened padded coordinates (static Python ints).
    deltas = [(kd - 1) * Hp * Wp + (kh - 1) * Wp + (kw - 1)
              for kd in range(3) for kh in range(3) for kw in range(3)]

    mask = mask_ref[...]                                # (1, lcore) f32

    # ---- conv0 (residual) + conv1 (BN1-folded), fused weight stack ----------
    # 27 shifted tap matmuls, bf16 MXU operands, f32 accumulation.
    acc01 = jnp.zeros((2 * cout, lcore), jnp.float32)
    for t, dlt in enumerate(deltas):
        s = base + dlt
        acc01 = acc01 + jnp.dot(w01_ref[t], x_ref[:, s:s + lcore],
                                preferred_element_type=jnp.float32)

    residual = acc01[:cout, :]                          # f32
    mid = jnp.maximum(acc01[cout:, :] + b1_ref[...], 0.0) * mask   # f32 epilogue

    # Padded-flat mid buffer (bf16 MXU operand for conv2): zero halos
    # unconditionally (tiny; megacore-safe), then write the lane-aligned core.
    mid_ref[:, :base] = jnp.zeros((cout, base), mid_ref.dtype)
    tail = lbuf - (base + lcore)
    if tail > 0:
        mid_ref[:, base + lcore:] = jnp.zeros((cout, tail), mid_ref.dtype)
    mid_ref[:, base:base + lcore] = mid.astype(mid_ref.dtype)

    # ---- conv2 (BN2-folded): 27 shifted tap matmuls over the padded mid -----
    acc2 = jnp.zeros((cout, lcore), jnp.float32)
    for t, dlt in enumerate(deltas):
        s = base + dlt
        acc2 = acc2 + jnp.dot(w2_ref[t], mid_ref[:, s:s + lcore],
                              preferred_element_type=jnp.float32)

    out = jnp.maximum(acc2 + b2_ref[...] + residual, 0.0) * mask
    o_ref[...] = out.astype(o_ref.dtype)


# --------------------------------------------------------------------------
# Wrappers (plain-JAX glue)
# --------------------------------------------------------------------------
def _pad_flat(x, base, lbuf):
    """(N,C,D,H,W) -> (N,C,lbuf) zero-padded flat slab; voxel q at lane base+q."""
    n, c, d, h, w = x.shape
    xp = jnp.pad(x, ((0, 0), (0, 0), (1, 1), (1, 1), (1, 1)))
    xf = xp.reshape(n, c, (d + 2) * (h + 2) * (w + 2))
    return jnp.pad(xf, ((0, 0), (0, 0), (base, lbuf - base - xf.shape[-1])))


def basic_block_pallas(x, w01, w2, b1, b2):
    """BasicBlock forward (eval-mode BN folded). NCDHW in / out."""
    n, cin, D, H, W = x.shape
    cout = w2.shape[1]
    Dp, Hp, Wp = D + 2, H + 2, W + 2
    pfull = Dp * Hp * Wp
    max_delta = Hp * Wp + Wp + 1
    base = _round_up(max_delta, 128)
    lcore = _round_up(pfull, 128)
    lbuf = _round_up(base + lcore + max_delta, 128)

    xb = _pad_flat(x, base, lbuf).astype(jnp.bfloat16)   # bf16 MXU operand

    # Interior-voxel mask over the flattened padded coordinate q in [0, lcore).
    q = jnp.arange(lcore)
    dp = q // (Hp * Wp)
    hp = (q % (Hp * Wp)) // Wp
    wp = q % Wp
    mask = (((dp >= 1) & (dp <= D) & (hp >= 1) & (hp <= H)
             & (wp >= 1) & (wp <= W)).astype(jnp.float32))[None, :]

    kernel = functools.partial(_basic_block_kernel, spatial=(D, H, W))

    out_raw = pl.pallas_call(
        kernel,
        out_shape=jax.ShapeDtypeStruct((n, cout, lcore), jnp.float32),
        grid_spec=pltpu.PrefetchScalarGridSpec(
            num_scalar_prefetch=0,
            grid=(n,),
            in_specs=[
                pl.BlockSpec((None, cin, lbuf), lambda i: (i, 0, 0)),
                pl.BlockSpec(w01.shape, lambda i: (0, 0, 0)),
                pl.BlockSpec(w2.shape, lambda i: (0, 0, 0)),
                pl.BlockSpec(b1.shape, lambda i: (0, 0)),
                pl.BlockSpec(b2.shape, lambda i: (0, 0)),
                pl.BlockSpec(mask.shape, lambda i: (0, 0)),
            ],
            out_specs=pl.BlockSpec((None, cout, lcore), lambda i: (i, 0, 0)),
            scratch_shapes=[
                pltpu.VMEM((cout, lbuf), jnp.bfloat16),   # padded mid activation
            ],
        ),
        compiler_params=pltpu.CompilerParams(
            dimension_semantics=("parallel",),
            vmem_limit_bytes=32 * 1024 * 1024,
        ),
    )(xb, w01, w2, b1, b2, mask)

    # Compact the padded-flat output back to dense NCDHW (tiny XLA slice).
    y = out_raw[:, :, :pfull].reshape(n, cout, Dp, Hp, Wp)
    return y[:, :, 1:1 + D, 1:1 + H, 1:1 + W]


def _fold_params(params):
    """Fold eval-mode BN into conv weights; return per-tap bf16 weights + f32 bias."""
    w0, w1, w2 = params["w0"], params["w1"], params["w2"]
    g1, be1, m1, v1, eps1 = params["bn1"]
    g2, be2, m2, v2, eps2 = params["bn2"]
    s1 = g1 / jnp.sqrt(v1 + eps1)
    b1 = be1 - m1 * s1
    s2 = g2 / jnp.sqrt(v2 + eps2)
    b2 = be2 - m2 * s2

    def w_tap(w):  # (cout, cin, 3, 3, 3) -> (27, cout, cin), tap = kd*9+kh*3+kw
        co, ci = w.shape[0], w.shape[1]
        return jnp.transpose(w, (2, 3, 4, 0, 1)).reshape(27, co, ci)

    w01 = jnp.concatenate([w_tap(w0), w_tap(w1) * s1[None, :, None]], axis=1)
    w2t = w_tap(w2) * s2[None, :, None]
    return (w01.astype(jnp.bfloat16), w2t.astype(jnp.bfloat16),
            b1[:, None].astype(jnp.float32), b2[:, None].astype(jnp.float32))


def up3d_forward(x1, x2, params):
    """Up3d.forward: BasicBlock(cat([x2, x1], 1) or x1) -> nearest 2x upsample."""
    x = x1 if x2 is None else jnp.concatenate([x2, x1], axis=1)
    w01, w2t, b1, b2 = _fold_params(params)
    y = basic_block_pallas(x, w01, w2t, b1, b2)          # (N, Cout, D, H, W)
    n, c, d, h, w = y.shape
    # nn.Upsample(scale_factor=2, mode='nearest') as one broadcast+reshape.
    y = jnp.broadcast_to(y[:, :, :, None, :, None, :, None],
                         (n, c, d, 2, h, 2, w, 2))
    return y.reshape(n, c, 2 * d, 2 * h, 2 * w)


# --------------------------------------------------------------------------
# Deterministic parameter init (shapes follow the PyTorch module __init__)
# --------------------------------------------------------------------------
def init_params(key, in_planes, planes):
    k0, k1, k2, kb = jax.random.split(key, 4)

    def conv_w(k, cin, cout):
        # PyTorch Conv3d weight layout (cout, cin, 3, 3, 3), no bias.
        fan_in = cin * 27
        return (jax.random.normal(k, (cout, cin, 3, 3, 3), jnp.float32)
                / jnp.sqrt(fan_in))

    eps = 1e-5
    kg1, kb1, km1, kv1, kg2, kb2, km2, kv2 = jax.random.split(kb, 8)

    def bn(kg, kbe, km, kv):
        # Eval-mode BN with (slightly randomized) running stats to exercise folding.
        gamma = 1.0 + 0.1 * jax.random.normal(kg, (planes,), jnp.float32)
        beta = 0.1 * jax.random.normal(kbe, (planes,), jnp.float32)
        mean = 0.1 * jax.random.normal(km, (planes,), jnp.float32)
        var = jnp.abs(1.0 + 0.1 * jax.random.normal(kv, (planes,), jnp.float32))
        return (gamma, beta, mean, var, eps)

    return dict(w0=conv_w(k0, in_planes, planes),
                w1=conv_w(k1, in_planes, planes),
                w2=conv_w(k2, planes, planes),
                bn1=bn(kg1, kb1, km1, kv1),
                bn2=bn(kg2, kb2, km2, kv2))


# --------------------------------------------------------------------------
# Pure-JAX references (for correctness check)
# --------------------------------------------------------------------------
def _conv3d(x, w, operand_dtype=None):
    if operand_dtype is not None:
        x = x.astype(operand_dtype)
        w = w.astype(operand_dtype)
    return lax.conv_general_dilated(
        x, w, window_strides=(1, 1, 1),
        padding=((1, 1), (1, 1), (1, 1)),
        dimension_numbers=("NCDHW", "OIDHW", "NCDHW"),
        preferred_element_type=jnp.float32)


def _up3d_ref(x1, x2, params, *, operand_dtype=None, fold_bn=False):
    """Reference. operand_dtype=bf16 + fold_bn=True matches kernel precision."""
    x = x1 if x2 is None else jnp.concatenate([x2, x1], axis=1)
    w0, w1, w2 = params["w0"], params["w1"], params["w2"]
    g1, be1, m1, v1, eps1 = params["bn1"]
    g2, be2, m2, v2, eps2 = params["bn2"]
    rb = lambda v: v.reshape(1, -1, 1, 1, 1)

    residual = _conv3d(x, w0, operand_dtype)
    if fold_bn:
        s1 = g1 / jnp.sqrt(v1 + eps1)
        s2 = g2 / jnp.sqrt(v2 + eps2)
        out = _conv3d(x, w1 * s1[:, None, None, None, None], operand_dtype)
        out = jnp.maximum(out + rb(be1 - m1 * s1), 0.0)
        out = _conv3d(out, w2 * s2[:, None, None, None, None], operand_dtype)
        out = out + rb(be2 - m2 * s2)
    else:
        out = _conv3d(x, w1, operand_dtype)
        out = (out - rb(m1)) / jnp.sqrt(rb(v1) + eps1) * rb(g1) + rb(be1)
        out = jnp.maximum(out, 0.0)
        out = _conv3d(out, w2, operand_dtype)
        out = (out - rb(m2)) / jnp.sqrt(rb(v2) + eps2) * rb(g2) + rb(be2)
    out = jnp.maximum(out + residual, 0.0)
    out = jnp.repeat(jnp.repeat(jnp.repeat(out, 2, axis=2), 2, axis=3), 2, axis=4)
    return out


# --------------------------------------------------------------------------
if __name__ == "__main__":
    key = jax.random.PRNGKey(0)
    kx1, kx2, kp = jax.random.split(key, 3)

    N, C, D, H, W = 2, 4, 8, 8, 8        # in_channels = 4
    out_channels = 4

    x1 = jax.random.normal(kx1, (N, C, D, H, W), jnp.float32)  # NCDHW
    x2 = jax.random.normal(kx2, (N, C, D, H, W), jnp.float32)  # NCDHW (skip)

    # Up3d(in_channels=4, out_channels=4, single_upsampling=False)
    # => BasicBlock(in_planes=8, planes=4)
    params = init_params(kp, 2 * C, out_channels)

    out = jax.block_until_ready(up3d_forward(x1, x2, params))
    assert out.shape == (N, out_channels, 2 * D, 2 * H, 2 * W), out.shape

    # Tight check vs a precision-matched reference (bf16 MXU operands, BN folded
    # into the weights exactly as the kernel does; f32 accumulation).
    ref_m = _up3d_ref(x1, x2, params, operand_dtype=jnp.bfloat16, fold_bn=True)
    err_m = float(jnp.max(jnp.abs(out - ref_m)))
    assert jnp.allclose(out, ref_m, rtol=5e-3, atol=5e-3), err_m

    # Loose sanity check vs the full-f32 reference (bounds bf16 quantization noise).
    ref_f = _up3d_ref(x1, x2, params)
    err_f = float(jnp.max(jnp.abs(out - ref_f)))
    assert jnp.allclose(out, ref_f, rtol=5e-2, atol=5e-2), err_f

    print("KERNEL_OK")
</pallas_src>

<mosaic_0001>
module attributes {stable_mosaic.version = 11 : i64} {
  func.func @_basic_block_kernel(%arg0: i32, %arg1: memref<1x8x1280xbf16, #tpu.memory_space<vmem>>, %arg2: memref<27x8x8xbf16, #tpu.memory_space<vmem>>, %arg3: memref<27x4x4xbf16, #tpu.memory_space<vmem>>, %arg4: memref<4x1xf32, #tpu.memory_space<vmem>>, %arg5: memref<4x1xf32, #tpu.memory_space<vmem>>, %arg6: memref<1x1024xf32, #tpu.memory_space<vmem>>, %arg7: memref<1x4x1024xf32, #tpu.memory_space<vmem>>, %arg8: memref<4x1280xbf16, #tpu.memory_space<vmem>>) attributes {dimension_semantics = [#tpu.dimension_semantics<parallel>], iteration_bounds = array<i64: 2>, scalar_prefetch = 0 : i64, scratch_operands = 1 : i64, tpu.core_type = #tpu.core_type<tc>, window_params = [{transform_indices = @transform_0, window_bounds = array<i64: 1, 8, 1280>}, {pipeline_mode = #tpu.pipeline_mode<synchronous>, transform_indices = @transform_1, window_bounds = array<i64: 27, 8, 8>}, {pipeline_mode = #tpu.pipeline_mode<synchronous>, transform_indices = @transform_2, window_bounds = array<i64: 27, 4, 4>}, {pipeline_mode = #tpu.pipeline_mode<synchronous>, transform_indices = @transform_3, window_bounds = array<i64: 4, 1>}, {pipeline_mode = #tpu.pipeline_mode<synchronous>, transform_indices = @transform_4, window_bounds = array<i64: 4, 1>}, {pipeline_mode = #tpu.pipeline_mode<synchronous>, transform_indices = @transform_5, window_bounds = array<i64: 1, 1024>}, {transform_indices = @transform_6, window_bounds = array<i64: 1, 4, 1024>}]} {
    %c0 = arith.constant 0 : index
    %c0_0 = arith.constant 0 : index
    %0 = vector.load %arg6[%c0, %c0_0] : memref<1x1024xf32, #tpu.memory_space<vmem>>, vector<1x1024xf32>
    %cst = arith.constant 0.000000e+00 : f32
    %1 = vector.broadcast %cst : f32 to vector<8x1024xf32>
    %c0_1 = arith.constant 0 : index
    %c0_2 = arith.constant 0 : index
    %c0_3 = arith.constant 0 : index
    %2 = vector.load %arg2[%c0_1, %c0_2, %c0_3] : memref<27x8x8xbf16, #tpu.memory_space<vmem>>, vector<1x8x8xbf16>
    %3 = vector.shape_cast %2 : vector<1x8x8xbf16> to vector<8x8xbf16>
    %c0_4 = arith.constant 0 : index
    %c0_5 = arith.constant 0 : index
    %c17 = arith.constant 17 : index
    %4 = vector.load %arg1[%c0_4, %c0_5, %c17] : memref<1x8x1280xbf16, #tpu.memory_space<vmem>>, vector<1x8x1024xbf16>
    %5 = vector.shape_cast %4 : vector<1x8x1024xbf16> to vector<8x1024xbf16>
    %cst_6 = arith.constant dense<0.000000e+00> : vector<8x1024xf32>
    %6 = tpu.matmul %3, %5, %cst_6 {dimension_numbers = #tpu.dot_dimension_numbers<[1], [0], [0], [1], [0, 0, 1, 1], [], []>} : vector<8x8xbf16>, vector<8x1024xbf16>, vector<8x1024xf32> -> vector<8x1024xf32>
    %7 = arith.addf %1, %6 : vector<8x1024xf32>
    %c1 = arith.constant 1 : index
    %c0_7 = arith.constant 0 : index
    %c0_8 = arith.constant 0 : index
    %8 = vector.load %arg2[%c1, %c0_7, %c0_8] : memref<27x8x8xbf16, #tpu.memory_space<vmem>>, vector<1x8x8xbf16>
    %9 = vector.shape_cast %8 : vector<1x8x8xbf16> to vector<8x8xbf16>
    %c0_9 = arith.constant 0 : index
    %c0_10 = arith.constant 0 : index
    %c18 = arith.constant 18 : index
    %10 = vector.load %arg1[%c0_9, %c0_10, %c18] : memref<1x8x1280xbf16, #tpu.memory_space<vmem>>, vector<1x8x1024xbf16>
    %11 = vector.shape_cast %10 : vector<1x8x1024xbf16> to vector<8x1024xbf16>
    %cst_11 = arith.constant dense<0.000000e+00> : vector<8x1024xf32>
    %12 = tpu.matmul %9, %11, %cst_11 {dimension_numbers = #tpu.dot_dimension_numbers<[1], [0], [0], [1], [0, 0, 1, 1], [], []>} : vector<8x8xbf16>, vector<8x1024xbf16>, vector<8x1024xf32> -> vector<8x1024xf32>
    %13 = arith.addf %7, %12 : vector<8x1024xf32>
    %c2 = arith.constant 2 : index
    %c0_12 = arith.constant 0 : index
    %c0_13 = arith.constant 0 : index
    %14 = vector.load %arg2[%c2, %c0_12, %c0_13] : memref<27x8x8xbf16, #tpu.memory_space<vmem>>, vector<1x8x8xbf16>
    %15 = vector.shape_cast %14 : vector<1x8x8xbf16> to vector<8x8xbf16>
    %c0_14 = arith.constant 0 : index
    %c0_15 = arith.constant 0 : index
    %c19 = arith.constant 19 : index
    %16 = vector.load %arg1[%c0_14, %c0_15, %c19] : memref<1x8x1280xbf16, #tpu.memory_space<vmem>>, vector<1x8x1024xbf16>
    %17 = vector.shape_cast %16 : vector<1x8x1024xbf16> to vector<8x1024xbf16>
    %cst_16 = arith.constant dense<0.000000e+00> : vector<8x1024xf32>
    %18 = tpu.matmul %15, %17, %cst_16 {dimension_numbers = #tpu.dot_dimension_numbers<[1], [0], [0], [1], [0, 0, 1, 1], [], []>} : vector<8x8xbf16>, vector<8x1024xbf16>, vector<8x1024xf32> -> vector<8x1024xf32>
    %19 = arith.addf %13, %18 : vector<8x1024xf32>
    %c3 = arith.constant 3 : index
    %c0_17 = arith.constant 0 : index
    %c0_18 = arith.constant 0 : index
    %20 = vector.load %arg2[%c3, %c0_17, %c0_18] : memref<27x8x8xbf16, #tpu.memory_space<vmem>>, vector<1x8x8xbf16>
    %21 = vector.shape_cast %20 : vector<1x8x8xbf16> to vector<8x8xbf16>
    %c0_19 = arith.constant 0 : index
    %c0_20 = arith.constant 0 : index
    %c27 = arith.constant 27 : index
    %22 = vector.load %arg1[%c0_19, %c0_20, %c27] : memref<1x8x1280xbf16, #tpu.memory_space<vmem>>, vector<1x8x1024xbf16>
    %23 = vector.shape_cast %22 : vector<1x8x1024xbf16> to vector<8x1024xbf16>
    %cst_21 = arith.constant dense<0.000000e+00> : vector<8x1024xf32>
    %24 = tpu.matmul %21, %23, %cst_21 {dimension_numbers = #tpu.dot_dimension_numbers<[1], [0], [0], [1], [0, 0, 1, 1], [], []>} : vector<8x8xbf16>, vector<8x1024xbf16>, vector<8x1024xf32> -> vector<8x1024xf32>
    %25 = arith.addf %19, %24 : vector<8x1024xf32>
    %c4 = arith.constant 4 : index
    %c0_22 = arith.constant 0 : index
    %c0_23 = arith.constant 0 : index
    %26 = vector.load %arg2[%c4, %c0_22, %c0_23] : memref<27x8x8xbf16, #tpu.memory_space<vmem>>, vector<1x8x8xbf16>
    %27 = vector.shape_cast %26 : vector<1x8x8xbf16> to vector<8x8xbf16>
    %c0_24 = arith.constant 0 : index
    %c0_25 = arith.constant 0 : index
    %c28 = arith.constant 28 : index
    %28 = vector.load %arg1[%c0_24, %c0_25, %c28] : memref<1x8x1280xbf16, #tpu.memory_space<vmem>>, vector<1x8x1024xbf16>
    %29 = vector.shape_cast %28 : vector<1x8x1024xbf16> to vector<8x1024xbf16>
    %cst_26 = arith.constant dense<0.000000e+00> : vector<8x1024xf32>
    %30 = tpu.matmul %27, %29, %cst_26 {dimension_numbers = #tpu.dot_dimension_numbers<[1], [0], [0], [1], [0, 0, 1, 1], [], []>} : vector<8x8xbf16>, vector<8x1024xbf16>, vector<8x1024xf32> -> vector<8x1024xf32>
    %31 = arith.addf %25, %30 : vector<8x1024xf32>
    %c5 = arith.constant 5 : index
    %c0_27 = arith.constant 0 : index
    %c0_28 = arith.constant 0 : index
    %32 = vector.load %arg2[%c5, %c0_27, %c0_28] : memref<27x8x8xbf16, #tpu.memory_space<vmem>>, vector<1x8x8xbf16>
    %33 = vector.shape_cast %32 : vector<1x8x8xbf16> to vector<8x8xbf16>
    %c0_29 = arith.constant 0 : index
    %c0_30 = arith.constant 0 : index
    %c29 = arith.constant 29 : index
    %34 = vector.load %arg1[%c0_29, %c0_30, %c29] : memref<1x8x1280xbf16, #tpu.memory_space<vmem>>, vector<1x8x1024xbf16>
    %35 = vector.shape_cast %34 : vector<1x8x1024xbf16> to vector<8x1024xbf16>
    %cst_31 = arith.constant dense<0.000000e+00> : vector<8x1024xf32>
    %36 = tpu.matmul %33, %35, %cst_31 {dimension_numbers = #tpu.dot_dimension_numbers<[1], [0], [0], [1], [0, 0, 1, 1], [], []>} : vector<8x8xbf16>, vector<8x1024xbf16>, vector<8x1024xf32> -> vector<8x1024xf32>
    %37 = arith.addf %31, %36 : vector<8x1024xf32>
    %c6 = arith.constant 6 : index
    %c0_32 = arith.constant 0 : index
    %c0_33 = arith.constant 0 : index
    %38 = vector.load %arg2[%c6, %c0_32, %c0_33] : memref<27x8x8xbf16, #tpu.memory_space<vmem>>, vector<1x8x8xbf16>
    %39 = vector.shape_cast %38 : vector<1x8x8xbf16> to vector<8x8xbf16>
    %c0_34 = arith.constant 0 : index
    %c0_35 = arith.constant 0 : index
    %c37 = arith.constant 37 : index
    %40 = vector.load %arg1[%c0_34, %c0_35, %c37] : memref<1x8x1280xbf16, #tpu.memory_space<vmem>>, vector<1x8x1024xbf16>
    %41 = vector.shape_cast %40 : vector<1x8x1024xbf16> to vector<8x1024xbf16>
    %cst_36 = arith.constant dense<0.000000e+00> : vector<8x1024xf32>
    %42 = tpu.matmul %39, %41, %cst_36 {dimension_numbers = #tpu.dot_dimension_numbers<[1], [0], [0], [1], [0, 0, 1, 1], [], []>} : vector<8x8xbf16>, vector<8x1024xbf16>, vector<8x1024xf32> -> vector<8x1024xf32>
    %43 = arith.addf %37, %42 : vector<8x1024xf32>
    %c7 = arith.constant 7 : index
    %c0_37 = arith.constant 0 : index
    %c0_38 = arith.constant 0 : index
    %44 = vector.load %arg2[%c7, %c0_37, %c0_38] : memref<27x8x8xbf16, #tpu.memory_space<vmem>>, vector<1x8x8xbf16>
    %45 = vector.shape_cast %44 : vector<1x8x8xbf16> to vector<8x8xbf16>
    %c0_39 = arith.constant 0 : index
    %c0_40 = arith.constant 0 : index
    %c38 = arith.constant 38 : index
    %46 = vector.load %arg1[%c0_39, %c0_40, %c38] : memref<1x8x1280xbf16, #tpu.memory_space<vmem>>, vector<1x8x1024xbf16>
    %47 = vector.shape_cast %46 : vector<1x8x1024xbf16> to vector<8x1024xbf16>
    %cst_41 = arith.constant dense<0.000000e+00> : vector<8x1024xf32>
    %48 = tpu.matmul %45, %47, %cst_41 {dimension_numbers = #tpu.dot_dimension_numbers<[1], [0], [0], [1], [0, 0, 1, 1], [], []>} : vector<8x8xbf16>, vector<8x1024xbf16>, vector<8x1024xf32> -> vector<8x1024xf32>
    %49 = arith.addf %43, %48 : vector<8x1024xf32>
    %c8 = arith.constant 8 : index
    %c0_42 = arith.constant 0 : index
    %c0_43 = arith.constant 0 : index
    %50 = vector.load %arg2[%c8, %c0_42, %c0_43] : memref<27x8x8xbf16, #tpu.memory_space<vmem>>, vector<1x8x8xbf16>
    %51 = vector.shape_cast %50 : vector<1x8x8xbf16> to vector<8x8xbf16>
    %c0_44 = arith.constant 0 : index
    %c0_45 = arith.constant 0 : index
    %c39 = arith.constant 39 : index
    %52 = vector.load %arg1[%c0_44, %c0_45, %c39] : memref<1x8x1280xbf16, #tpu.memory_space<vmem>>, vector<1x8x1024xbf16>
    %53 = vector.shape_cast %52 : vector<1x8x1024xbf16> to vector<8x1024xbf16>
    %cst_46 = arith.constant dense<0.000000e+00> : vector<8x1024xf32>
    %54 = tpu.matmul %51, %53, %cst_46 {dimension_numbers = #tpu.dot_dimension_numbers<[1], [0], [0], [1], [0, 0, 1, 1], [], []>} : vector<8x8xbf16>, vector<8x1024xbf16>, vector<8x1024xf32> -> vector<8x1024xf32>
    %55 = arith.addf %49, %54 : vector<8x1024xf32>
    %c9 = arith.constant 9 : index
    %c0_47 = arith.constant 0 : index
    %c0_48 = arith.constant 0 : index
    %56 = vector.load %arg2[%c9, %c0_47, %c0_48] : memref<27x8x8xbf16, #tpu.memory_space<vmem>>, vector<1x8x8xbf16>
    %57 = vector.shape_cast %56 : vector<1x8x8xbf16> to vector<8x8xbf16>
    %c0_49 = arith.constant 0 : index
    %c0_50 = arith.constant 0 : index
    %c117 = arith.constant 117 : index
    %58 = vector.load %arg1[%c0_49, %c0_50, %c117] : memref<1x8x1280xbf16, #tpu.memory_space<vmem>>, vector<1x8x1024xbf16>
    %59 = vector.shape_cast %58 : vector<1x8x1024xbf16> to vector<8x1024xbf16>
    %cst_51 = arith.constant dense<0.000000e+00> : vector<8x1024xf32>
    %60 = tpu.matmul %57, %59, %cst_51 {dimension_numbers = #tpu.dot_dimension_numbers<[1], [0], [0], [1], [0, 0, 1, 1], [], []>} : vector<8x8xbf16>, vector<8x1024xbf16>, vector<8x1024xf32> -> vector<8x1024xf32>
    %61 = arith.addf %55, %60 : vector<8x1024xf32>
    %c10 = arith.constant 10 : index
    %c0_52 = arith.constant 0 : index
    %c0_53 = arith.constant 0 : index
    %62 = vector.load %arg2[%c10, %c0_52, %c0_53] : memref<27x8x8xbf16, #tpu.memory_space<vmem>>, vector<1x8x8xbf16>
    %63 = vector.shape_cast %62 : vector<1x8x8xbf16> to vector<8x8xbf16>
    %c0_54 = arith.constant 0 : index
    %c0_55 = arith.constant 0 : index
    %c118 = arith.constant 118 : index
    %64 = vector.load %arg1[%c0_54, %c0_55, %c118] : memref<1x8x1280xbf16, #tpu.memory_space<vmem>>, vector<1x8x1024xbf16>
    %65 = vector.shape_cast %64 : vector<1x8x1024xbf16> to vector<8x1024xbf16>
    %cst_56 = arith.constant dense<0.000000e+00> : vector<8x1024xf32>
    %66 = tpu.matmul %63, %65, %cst_56 {dimension_numbers = #tpu.dot_dimension_numbers<[1], [0], [0], [1], [0, 0, 1, 1], [], []>} : vector<8x8xbf16>, vector<8x1024xbf16>, vector<8x1024xf32> -> vector<8x1024xf32>
    %67 = arith.addf %61, %66 : vector<8x1024xf32>
    %c11 = arith.constant 11 : index
    %c0_57 = arith.constant 0 : index
    %c0_58 = arith.constant 0 : index
    %68 = vector.load %arg2[%c11, %c0_57, %c0_58] : memref<27x8x8xbf16, #tpu.memory_space<vmem>>, vector<1x8x8xbf16>
    %69 = vector.shape_cast %68 : vector<1x8x8xbf16> to vector<8x8xbf16>
    %c0_59 = arith.constant 0 : index
    %c0_60 = arith.constant 0 : index
    %c119 = arith.constant 119 : index
    %70 = vector.load %arg1[%c0_59, %c0_60, %c119] : memref<1x8x1280xbf16, #tpu.memory_space<vmem>>, vector<1x8x1024xbf16>
    %71 = vector.shape_cast %70 : vector<1x8x1024xbf16> to vector<8x1024xbf16>
    %cst_61 = arith.constant dense<0.000000e+00> : vector<8x1024xf32>
    %72 = tpu.matmul %69, %71, %cst_61 {dimension_numbers = #tpu.dot_dimension_numbers<[1], [0], [0], [1], [0, 0, 1, 1], [], []>} : vector<8x8xbf16>, vector<8x1024xbf16>, vector<8x1024xf32> -> vector<8x1024xf32>
    %73 = arith.addf %67, %72 : vector<8x1024xf32>
    %c12 = arith.constant 12 : index
    %c0_62 = arith.constant 0 : index
    %c0_63 = arith.constant 0 : index
    %74 = vector.load %arg2[%c12, %c0_62, %c0_63] : memref<27x8x8xbf16, #tpu.memory_space<vmem>>, vector<1x8x8xbf16>
    %75 = vector.shape_cast %74 : vector<1x8x8xbf16> to vector<8x8xbf16>
    %c0_64 = arith.constant 0 : index
    %c0_65 = arith.constant 0 : index
    %c127 = arith.constant 127 : index
    %76 = vector.load %arg1[%c0_64, %c0_65, %c127] : memref<1x8x1280xbf16, #tpu.memory_space<vmem>>, vector<1x8x1024xbf16>
    %77 = vector.shape_cast %76 : vector<1x8x1024xbf16> to vector<8x1024xbf16>
    %cst_66 = arith.constant dense<0.000000e+00> : vector<8x1024xf32>
    %78 = tpu.matmul %75, %77, %cst_66 {dimension_numbers = #tpu.dot_dimension_numbers<[1], [0], [0], [1], [0, 0, 1, 1], [], []>} : vector<8x8xbf16>, vector<8x1024xbf16>, vector<8x1024xf32> -> vector<8x1024xf32>
    %79 = arith.addf %73, %78 : vector<8x1024xf32>
    %c13 = arith.constant 13 : index
    %c0_67 = arith.constant 0 : index
    %c0_68 = arith.constant 0 : index
    %80 = vector.load %arg2[%c13, %c0_67, %c0_68] : memref<27x8x8xbf16, #tpu.memory_space<vmem>>, vector<1x8x8xbf16>
    %81 = vector.shape_cast %80 : vector<1x8x8xbf16> to vector<8x8xbf16>
    %c0_69 = arith.constant 0 : index
    %c0_70 = arith.constant 0 : index
    %c128 = arith.constant 128 : index
    %82 = vector.load %arg1[%c0_69, %c0_70, %c128] : memref<1x8x1280xbf16, #tpu.memory_space<vmem>>, vector<1x8x1024xbf16>
    %83 = vector.shape_cast %82 : vector<1x8x1024xbf16> to vector<8x1024xbf16>
    %cst_71 = arith.constant dense<0.000000e+00> : vector<8x1024xf32>
    %84 = tpu.matmul %81, %83, %cst_71 {dimension_numbers = #tpu.dot_dimension_numbers<[1], [0], [0], [1], [0, 0, 1, 1], [], []>} : vector<8x8xbf16>, vector<8x1024xbf16>, vector<8x1024xf32> -> vector<8x1024xf32>
    %85 = arith.addf %79, %84 : vector<8x1024xf32>
    %c14 = arith.constant 14 : index
    %c0_72 = arith.constant 0 : index
    %c0_73 = arith.constant 0 : index
    %86 = vector.load %arg2[%c14, %c0_72, %c0_73] : memref<27x8x8xbf16, #tpu.memory_space<vmem>>, vector<1x8x8xbf16>
    %87 = vector.shape_cast %86 : vector<1x8x8xbf16> to vector<8x8xbf16>
    %c0_74 = arith.constant 0 : index
    %c0_75 = arith.constant 0 : index
    %c129 = arith.constant 129 : index
    %88 = vector.load %arg1[%c0_74, %c0_75, %c129] : memref<1x8x1280xbf16, #tpu.memory_space<vmem>>, vector<1x8x1024xbf16>
    %89 = vector.shape_cast %88 : vector<1x8x1024xbf16> to vector<8x1024xbf16>
    %cst_76 = arith.constant dense<0.000000e+00> : vector<8x1024xf32>
    %90 = tpu.matmul %87, %89, %cst_76 {dimension_numbers = #tpu.dot_dimension_numbers<[1], [0], [0], [1], [0, 0, 1, 1], [], []>} : vector<8x8xbf16>, vector<8x1024xbf16>, vector<8x1024xf32> -> vector<8x1024xf32>
    %91 = arith.addf %85, %90 : vector<8x1024xf32>
    %c15 = arith.constant 15 : index
    %c0_77 = arith.constant 0 : index
    %c0_78 = arith.constant 0 : index
    %92 = vector.load %arg2[%c15, %c0_77, %c0_78] : memref<27x8x8xbf16, #tpu.memory_space<vmem>>, vector<1x8x8xbf16>
    %93 = vector.shape_cast %92 : vector<1x8x8xbf16> to vector<8x8xbf16>
    %c0_79 = arith.constant 0 : index
    %c0_80 = arith.constant 0 : index
    %c137 = arith.constant 137 : index
    %94 = vector.load %arg1[%c0_79, %c0_80, %c137] : memref<1x8x1280xbf16, #tpu.memory_space<vmem>>, vector<1x8x1024xbf16>
    %95 = vector.shape_cast %94 : vector<1x8x1024xbf16> to vector<8x1024xbf16>
    %cst_81 = arith.constant dense<0.000000e+00> : vector<8x1024xf32>
    %96 = tpu.matmul %93, %95, %cst_81 {dimension_numbers = #tpu.dot_dimension_numbers<[1], [0], [0], [1], [0, 0, 1, 1], [], []>} : vector<8x8xbf16>, vector<8x1024xbf16>, vector<8x1024xf32> -> vector<8x1024xf32>
    %97 = arith.addf %91, %96 : vector<8x1024xf32>
    %c16 = arith.constant 16 : index
    %c0_82 = arith.constant 0 : index
    %c0_83 = arith.constant 0 : index
    %98 = vector.load %arg2[%c16, %c0_82, %c0_83] : memref<27x8x8xbf16, #tpu.memory_space<vmem>>, vector<1x8x8xbf16>
    %99 = vector.shape_cast %98 : vector<1x8x8xbf16> to vector<8x8xbf16>
    %c0_84 = arith.constant 0 : index
    %c0_85 = arith.constant 0 : index
    %c138 = arith.constant 138 : index
    %100 = vector.load %arg1[%c0_84, %c0_85, %c138] : memref<1x8x1280xbf16, #tpu.memory_space<vmem>>, vector<1x8x1024xbf16>
    %101 = vector.shape_cast %100 : vector<1x8x1024xbf16> to vector<8x1024xbf16>
    %cst_86 = arith.constant dense<0.000000e+00> : vector<8x1024xf32>
    %102 = tpu.matmul %99, %101, %cst_86 {dimension_numbers = #tpu.dot_dimension_numbers<[1], [0], [0], [1], [0, 0, 1, 1], [], []>} : vector<8x8xbf16>, vector<8x1024xbf16>, vector<8x1024xf32> -> vector<8x1024xf32>
    %103 = arith.addf %97, %102 : vector<8x1024xf32>
    %c17_87 = arith.constant 17 : index
    %c0_88 = arith.constant 0 : index
    %c0_89 = arith.constant 0 : index
    %104 = vector.load %arg2[%c17_87, %c0_88, %c0_89] : memref<27x8x8xbf16, #tpu.memory_space<vmem>>, vector<1x8x8xbf16>
    %105 = vector.shape_cast %104 : vector<1x8x8xbf16> to vector<8x8xbf16>
    %c0_90 = arith.constant 0 : index
    %c0_91 = arith.constant 0 : index
    %c139 = arith.constant 139 : index
    %106 = vector.load %arg1[%c0_90, %c0_91, %c139] : memref<1x8x1280xbf16, #tpu.memory_space<vmem>>, vector<1x8x1024xbf16>
    %107 = vector.shape_cast %106 : vector<1x8x1024xbf16> to vector<8x1024xbf16>
    %cst_92 = arith.constant dense<0.000000e+00> : vector<8x1024xf32>
    %108 = tpu.matmul %105, %107, %cst_92 {dimension_numbers = #tpu.dot_dimension_numbers<[1], [0], [0], [1], [0, 0, 1, 1], [], []>} : vector<8x8xbf16>, vector<8x1024xbf16>, vector<8x1024xf32> -> vector<8x1024xf32>
    %109 = arith.addf %103, %108 : vector<8x1024xf32>
    %c18_93 = arith.constant 18 : index
    %c0_94 = arith.constant 0 : index
    %c0_95 = arith.constant 0 : index
    %110 = vector.load %arg2[%c18_93, %c0_94, %c0_95] : memref<27x8x8xbf16, #tpu.memory_space<vmem>>, vector<1x8x8xbf16>
    %111 = vector.shape_cast %110 : vector<1x8x8xbf16> to vector<8x8xbf16>
    %c0_96 = arith.constant 0 : index
    %c0_97 = arith.constant 0 : index
    %c217 = arith.constant 217 : index
    %112 = vector.load %arg1[%c0_96, %c0_97, %c217] : memref<1x8x1280xbf16, #tpu.memory_space<vmem>>, vector<1x8x1024xbf16>
    %113 = vector.shape_cast %112 : vector<1x8x1024xbf16> to vector<8x1024xbf16>
    %cst_98 = arith.constant dense<0.000000e+00> : vector<8x1024xf32>
    %114 = tpu.matmul %111, %113, %cst_98 {dimension_numbers = #tpu.dot_dimension_numbers<[1], [0], [0], [1], [0, 0, 1, 1], [], []>} : vector<8x8xbf16>, vector<8x1024xbf16>, vector<8x1024xf32> -> vector<8x1024xf32>
    %115 = arith.addf %109, %114 : vector<8x1024xf32>
    %c19_99 = arith.constant 19 : index
    %c0_100 = arith.constant 0 : index
    %c0_101 = arith.constant 0 : index
    %116 = vector.load %arg2[%c19_99, %c0_100, %c0_101] : memref<27x8x8xbf16, #tpu.memory_space<vmem>>, vector<1x8x8xbf16>
    %117 = vector.shape_cast %116 : vector<1x8x8xbf16> to vector<8x8xbf16>
    %c0_102 = arith.constant 0 : index
    %c0_103 = arith.constant 0 : index
    %c218 = arith.constant 218 : index
    %118 = vector.load %arg1[%c0_102, %c0_103, %c218] : memref<1x8x1280xbf16, #tpu.memory_space<vmem>>, vector<1x8x1024xbf16>
    %119 = vector.shape_cast %118 : vector<1x8x1024xbf16> to vector<8x1024xbf16>
    %cst_104 = arith.constant dense<0.000000e+00> : vector<8x1024xf32>
    %120 = tpu.matmul %117, %119, %cst_104 {dimension_numbers = #tpu.dot_dimension_numbers<[1], [0], [0], [1], [0, 0, 1, 1], [], []>} : vector<8x8xbf16>, vector<8x1024xbf16>, vector<8x1024xf32> -> vector<8x1024xf32>
    %121 = arith.addf %115, %120 : vector<8x1024xf32>
    %c20 = arith.constant 20 : index
    %c0_105 = arith.constant 0 : index
    %c0_106 = arith.constant 0 : index
    %122 = vector.load %arg2[%c20, %c0_105, %c0_106] : memref<27x8x8xbf16, #tpu.memory_space<vmem>>, vector<1x8x8xbf16>
    %123 = vector.shape_cast %122 : vector<1x8x8xbf16> to vector<8x8xbf16>
    %c0_107 = arith.constant 0 : index
    %c0_108 = arith.constant 0 : index
    %c219 = arith.constant 219 : index
    %124 = vector.load %arg1[%c0_107, %c0_108, %c219] : memref<1x8x1280xbf16, #tpu.memory_space<vmem>>, vector<1x8x1024xbf16>
    %125 = vector.shape_cast %124 : vector<1x8x1024xbf16> to vector<8x1024xbf16>
    %cst_109 = arith.constant dense<0.000000e+00> : vector<8x1024xf32>
    %126 = tpu.matmul %123, %125, %cst_109 {dimension_numbers = #tpu.dot_dimension_numbers<[1], [0], [0], [1], [0, 0, 1, 1], [], []>} : vector<8x8xbf16>, vector<8x1024xbf16>, vector<8x1024xf32> -> vector<8x1024xf32>
    %127 = arith.addf %121, %126 : vector<8x1024xf32>
    %c21 = arith.constant 21 : index
    %c0_110 = arith.constant 0 : index
    %c0_111 = arith.constant 0 : index
    %128 = vector.load %arg2[%c21, %c0_110, %c0_111] : memref<27x8x8xbf16, #tpu.memory_space<vmem>>, vector<1x8x8xbf16>
    %129 = vector.shape_cast %128 : vector<1x8x8xbf16> to vector<8x8xbf16>
    %c0_112 = arith.constant 0 : index
    %c0_113 = arith.constant 0 : index
    %c227 = arith.constant 227 : index
    %130 = vector.load %arg1[%c0_112, %c0_113, %c227] : memref<1x8x1280xbf16, #tpu.memory_space<vmem>>, vector<1x8x1024xbf16>
    %131 = vector.shape_cast %130 : vector<1x8x1024xbf16> to vector<8x1024xbf16>
    %cst_114 = arith.constant dense<0.000000e+00> : vector<8x1024xf32>
    %132 = tpu.matmul %129, %131, %cst_114 {dimension_numbers = #tpu.dot_dimension_numbers<[1], [0], [0], [1], [0, 0, 1, 1], [], []>} : vector<8x8xbf16>, vector<8x1024xbf16>, vector<8x1024xf32> -> vector<8x1024xf32>
    %133 = arith.addf %127, %132 : vector<8x1024xf32>
    %c22 = arith.constant 22 : index
    %c0_115 = arith.constant 0 : index
    %c0_116 = arith.constant 0 : index
    %134 = vector.load %arg2[%c22, %c0_115, %c0_116] : memref<27x8x8xbf16, #tpu.memory_space<vmem>>, vector<1x8x8xbf16>
    %135 = vector.shape_cast %134 : vector<1x8x8xbf16> to vector<8x8xbf16>
    %c0_117 = arith.constant 0 : index
    %c0_118 = arith.constant 0 : index
    %c228 = arith.constant 228 : index
    %136 = vector.load %arg1[%c0_117, %c0_118, %c228] : memref<1x8x1280xbf16, #tpu.memory_space<vmem>>, vector<1x8x1024xbf16>
    %137 = vector.shape_cast %136 : vector<1x8x1024xbf16> to vector<8x1024xbf16>
    %cst_119 = arith.constant dense<0.000000e+00> : vector<8x1024xf32>
    %138 = tpu.matmul %135, %137, %cst_119 {dimension_numbers = #tpu.dot_dimension_numbers<[1], [0], [0], [1], [0, 0, 1, 1], [], []>} : vector<8x8xbf16>, vector<8x1024xbf16>, vector<8x1024xf32> -> vector<8x1024xf32>
    %139 = arith.addf %133, %138 : vector<8x1024xf32>
    %c23 = arith.constant 23 : index
    %c0_120 = arith.constant 0 : index
    %c0_121 = arith.constant 0 : index
    %140 = vector.load %arg2[%c23, %c0_120, %c0_121] : memref<27x8x8xbf16, #tpu.memory_space<vmem>>, vector<1x8x8xbf16>
    %141 = vector.shape_cast %140 : vector<1x8x8xbf16> to vector<8x8xbf16>
    %c0_122 = arith.constant 0 : index
    %c0_123 = arith.constant 0 : index
    %c229 = arith.constant 229 : index
    %142 = vector.load %arg1[%c0_122, %c0_123, %c229] : memref<1x8x1280xbf16, #tpu.memory_space<vmem>>, vector<1x8x1024xbf16>
    %143 = vector.shape_cast %142 : vector<1x8x1024xbf16> to vector<8x1024xbf16>
    %cst_124 = arith.constant dense<0.000000e+00> : vector<8x1024xf32>
    %144 = tpu.matmul %141, %143, %cst_124 {dimension_numbers = #tpu.dot_dimension_numbers<[1], [0], [0], [1], [0, 0, 1, 1], [], []>} : vector<8x8xbf16>, vector<8x1024xbf16>, vector<8x1024xf32> -> vector<8x1024xf32>
    %145 = arith.addf %139, %144 : vector<8x1024xf32>
    %c24 = arith.constant 24 : index
    %c0_125 = arith.constant 0 : index
    %c0_126 = arith.constant 0 : index
    %146 = vector.load %arg2[%c24, %c0_125, %c0_126] : memref<27x8x8xbf16, #tpu.memory_space<vmem>>, vector<1x8x8xbf16>
    %147 = vector.shape_cast %146 : vector<1x8x8xbf16> to vector<8x8xbf16>
    %c0_127 = arith.constant 0 : index
    %c0_128 = arith.constant 0 : index
    %c237 = arith.constant 237 : index
    %148 = vector.load %arg1[%c0_127, %c0_128, %c237] : memref<1x8x1280xbf16, #tpu.memory_space<vmem>>, vector<1x8x1024xbf16>
    %149 = vector.shape_cast %148 : vector<1x8x1024xbf16> to vector<8x1024xbf16>
    %cst_129 = arith.constant dense<0.000000e+00> : vector<8x1024xf32>
    %150 = tpu.matmul %147, %149, %cst_129 {dimension_numbers = #tpu.dot_dimension_numbers<[1], [0], [0], [1], [0, 0, 1, 1], [], []>} : vector<8x8xbf16>, vector<8x1024xbf16>, vector<8x1024xf32> -> vector<8x1024xf32>
    %151 = arith.addf %145, %150 : vector<8x1024xf32>
    %c25 = arith.constant 25 : index
    %c0_130 = arith.constant 0 : index
    %c0_131 = arith.constant 0 : index
    %152 = vector.load %arg2[%c25, %c0_130, %c0_131] : memref<27x8x8xbf16, #tpu.memory_space<vmem>>, vector<1x8x8xbf16>
    %153 = vector.shape_cast %152 : vector<1x8x8xbf16> to vector<8x8xbf16>
    %c0_132 = arith.constant 0 : index
    %c0_133 = arith.constant 0 : index
    %c238 = arith.constant 238 : index
    %154 = vector.load %arg1[%c0_132, %c0_133, %c238] : memref<1x8x1280xbf16, #tpu.memory_space<vmem>>, vector<1x8x1024xbf16>
    %155 = vector.shape_cast %154 : vector<1x8x1024xbf16> to vector<8x1024xbf16>
    %cst_134 = arith.constant dense<0.000000e+00> : vector<8x1024xf32>
    %156 = tpu.matmul %153, %155, %cst_134 {dimension_numbers = #tpu.dot_dimension_numbers<[1], [0], [0], [1], [0, 0, 1, 1], [], []>} : vector<8x8xbf16>, vector<8x1024xbf16>, vector<8x1024xf32> -> vector<8x1024xf32>
    %157 = arith.addf %151, %156 : vector<8x1024xf32>
    %c26 = arith.constant 26 : index
    %c0_135 = arith.constant 0 : index
    %c0_136 = arith.constant 0 : index
    %158 = vector.load %arg2[%c26, %c0_135, %c0_136] : memref<27x8x8xbf16, #tpu.memory_space<vmem>>, vector<1x8x8xbf16>
    %159 = vector.shape_cast %158 : vector<1x8x8xbf16> to vector<8x8xbf16>
    %c0_137 = arith.constant 0 : index
    %c0_138 = arith.constant 0 : index
    %c239 = arith.constant 239 : index
    %160 = vector.load %arg1[%c0_137, %c0_138, %c239] : memref<1x8x1280xbf16, #tpu.memory_space<vmem>>, vector<1x8x1024xbf16>
    %161 = vector.shape_cast %160 : vector<1x8x1024xbf16> to vector<8x1024xbf16>
    %cst_139 = arith.constant dense<0.000000e+00> : vector<8x1024xf32>
    %162 = tpu.matmul %159, %161, %cst_139 {dimension_numbers = #tpu.dot_dimension_numbers<[1], [0], [0], [1], [0, 0, 1, 1], [], []>} : vector<8x8xbf16>, vector<8x1024xbf16>, vector<8x1024xf32> -> vector<8x1024xf32>
    %163 = arith.addf %157, %162 : vector<8x1024xf32>
    %164 = vector.extract_strided_slice %163 {offsets = [0, 0], sizes = [4, 1024], strides = [1, 1]} : vector<8x1024xf32> to vector<4x1024xf32>
    %165 = vector.extract_strided_slice %163 {offsets = [4, 0], sizes = [4, 1024], strides = [1, 1]} : vector<8x1024xf32> to vector<4x1024xf32>
    %c0_140 = arith.constant 0 : index
    %c0_141 = arith.constant 0 : index
    %166 = vector.load %arg4[%c0_140, %c0_141] : memref<4x1xf32, #tpu.memory_space<vmem>>, vector<4x1xf32>
    %167 = vector.broadcast %166 : vector<4x1xf32> to vector<4x1024xf32>
    %168 = arith.addf %165, %167 : vector<4x1024xf32>
    %cst_142 = arith.constant 0.000000e+00 : f32
    %169 = vector.broadcast %cst_142 : f32 to vector<4x1024xf32>
    %170 = arith.maximumf %168, %169 : vector<4x1024xf32>
    %171 = vector.broadcast %0 : vector<1x1024xf32> to vector<4x1024xf32>
    %172 = arith.mulf %170, %171 : vector<4x1024xf32>
    %cst_143 = arith.constant 0.000000e+00 : bf16
    %173 = vector.broadcast %cst_143 : bf16 to vector<4x128xbf16>
    %c0_144 = arith.constant 0 : index
    %c0_145 = arith.constant 0 : index
    %174 = vector.load %arg8[%c0_144, %c0_145] : memref<4x1280xbf16, #tpu.memory_space<vmem>>, vector<4x128xbf16>
    tpu.vector_store %arg8[%c0_144, %c0_145], %173 {strides = array<i32>} : memref<4x1280xbf16, #tpu.memory_space<vmem>>, vector<4x128xbf16>,
    %cst_146 = arith.constant 0.000000e+00 : bf16
    %175 = vector.broadcast %cst_146 : bf16 to vector<4x128xbf16>
    %c0_147 = arith.constant 0 : index
    %c1152 = arith.constant 1152 : index
    %176 = vector.load %arg8[%c0_147, %c1152] : memref<4x1280xbf16, #tpu.memory_space<vmem>>, vector<4x128xbf16>
    tpu.vector_store %arg8[%c0_147, %c1152], %175 {strides = array<i32>} : memref<4x1280xbf16, #tpu.memory_space<vmem>>, vector<4x128xbf16>,
    %177 = arith.truncf %172 : vector<4x1024xf32> to vector<4x1024xbf16>
    %c0_148 = arith.constant 0 : index
    %c128_149 = arith.constant 128 : index
    %178 = vector.load %arg8[%c0_148, %c128_149] : memref<4x1280xbf16, #tpu.memory_space<vmem>>, vector<4x1024xbf16>
    tpu.vector_store %arg8[%c0_148, %c128_149], %177 {strides = array<i32>} : memref<4x1280xbf16, #tpu.memory_space<vmem>>, vector<4x1024xbf16>,
    %cst_150 = arith.constant 0.000000e+00 : f32
    %179 = vector.broadcast %cst_150 : f32 to vector<4x1024xf32>
    %c0_151 = arith.constant 0 : index
    %c0_152 = arith.constant 0 : index
    %c0_153 = arith.constant 0 : index
    %180 = vector.load %arg3[%c0_151, %c0_152, %c0_153] : memref<27x4x4xbf16, #tpu.memory_space<vmem>>, vector<1x4x4xbf16>
    %181 = vector.shape_cast %180 : vector<1x4x4xbf16> to vector<4x4xbf16>
    %c0_154 = arith.constant 0 : index
    %c17_155 = arith.constant 17 : index
    %182 = vector.load %arg8[%c0_154, %c17_155] : memref<4x1280xbf16, #tpu.memory_space<vmem>>, vector<4x1024xbf16>
    %cst_156 = arith.constant dense<0.000000e+00> : vector<4x1024xf32>
    %183 = tpu.matmul %181, %182, %cst_156 {dimension_numbers = #tpu.dot_dimension_numbers<[1], [0], [0], [1], [0, 0, 1, 1], [], []>} : vector<4x4xbf16>, vector<4x1024xbf16>, vector<4x1024xf32> -> vector<4x1024xf32>
    %184 = arith.addf %179, %183 : vector<4x1024xf32>
    %c1_157 = arith.constant 1 : index
    %c0_158 = arith.constant 0 : index
    %c0_159 = arith.constant 0 : index
    %185 = vector.load %arg3[%c1_157, %c0_158, %c0_159] : memref<27x4x4xbf16, #tpu.memory_space<vmem>>, vector<1x4x4xbf16>
    %186 = vector.shape_cast %185 : vector<1x4x4xbf16> to vector<4x4xbf16>
    %c0_160 = arith.constant 0 : index
    %c18_161 = arith.constant 18 : index
    %187 = vector.load %arg8[%c0_160, %c18_161] : memref<4x1280xbf16, #tpu.memory_space<vmem>>, vector<4x1024xbf16>
    %cst_162 = arith.constant dense<0.000000e+00> : vector<4x1024xf32>
    %188 = tpu.matmul %186, %187, %cst_162 {dimension_numbers = #tpu.dot_dimension_numbers<[1], [0], [0], [1], [0, 0, 1, 1], [], []>} : vector<4x4xbf16>, vector<4x1024xbf16>, vector<4x1024xf32> -> vector<4x1024xf32>
    %189 = arith.addf %184, %188 : vector<4x1024xf32>
    %c2_163 = arith.constant 2 : index
    %c0_164 = arith.constant 0 : index
    %c0_165 = arith.constant 0 : index
    %190 = vector.load %arg3[%c2_163, %c0_164, %c0_165] : memref<27x4x4xbf16, #tpu.memory_space<vmem>>, vector<1x4x4xbf16>
    %191 = vector.shape_cast %190 : vector<1x4x4xbf16> to vector<4x4xbf16>
    %c0_166 = arith.constant 0 : index
    %c19_167 = arith.constant 19 : index
    %192 = vector.load %arg8[%c0_166, %c19_167] : memref<4x1280xbf16, #tpu.memory_space<vmem>>, vector<4x1024xbf16>
    %cst_168 = arith.constant dense<0.000000e+00> : vector<4x1024xf32>
    %193 = tpu.matmul %191, %192, %cst_168 {dimension_numbers = #tpu.dot_dimension_numbers<[1], [0], [0], [1], [0, 0, 1, 1], [], []>} : vector<4x4xbf16>, vector<4x1024xbf16>, vector<4x1024xf32> -> vector<4x1024xf32>
    %194 = arith.addf %189, %193 : vector<4x1024xf32>
    %c3_169 = arith.constant 3 : index
    %c0_170 = arith.constant 0 : index
    %c0_171 = arith.constant 0 : index
    %195 = vector.load %arg3[%c3_169, %c0_170, %c0_171] : memref<27x4x4xbf16, #tpu.memory_space<vmem>>, vector<1x4x4xbf16>
    %196 = vector.shape_cast %195 : vector<1x4x4xbf16> to vector<4x4xbf16>
    %c0_172 = arith.constant 0 : index
    %c27_173 = arith.constant 27 : index
    %197 = vector.load %arg8[%c0_172, %c27_173] : memref<4x1280xbf16, #tpu.memory_space<vmem>>, vector<4x1024xbf16>
    %cst_174 = arith.constant dense<0.000000e+00> : vector<4x1024xf32>
    %198 = tpu.matmul %196, %197, %cst_174 {dimension_numbers = #tpu.dot_dimension_numbers<[1], [0], [0], [1], [0, 0, 1, 1], [], []>} : vector<4x4xbf16>, vector<4x1024xbf16>, vector<4x1024xf32> -> vector<4x1024xf32>
    %199 = arith.addf %194, %198 : vector<4x1024xf32>
    %c4_175 = arith.constant 4 : index
    %c0_176 = arith.constant 0 : index
    %c0_177 = arith.constant 0 : index
    %200 = vector.load %arg3[%c4_175, %c0_176, %c0_177] : memref<27x4x4xbf16, #tpu.memory_space<vmem>>, vector<1x4x4xbf16>
    %201 = vector.shape_cast %200 : vector<1x4x4xbf16> to vector<4x4xbf16>
    %c0_178 = arith.constant 0 : index
    %c28_179 = arith.constant 28 : index
    %202 = vector.load %arg8[%c0_178, %c28_179] : memref<4x1280xbf16, #tpu.memory_space<vmem>>, vector<4x1024xbf16>
    %cst_180 = arith.constant dense<0.000000e+00> : vector<4x1024xf32>
    %203 = tpu.matmul %201, %202, %cst_180 {dimension_numbers = #tpu.dot_dimension_numbers<[1], [0], [0], [1], [0, 0, 1, 1], [], []>} : vector<4x4xbf16>, vector<4x1024xbf16>, vector<4x1024xf32> -> vector<4x1024xf32>
    %204 = arith.addf %199, %203 : vector<4x1024xf32>
    %c5_181 = arith.constant 5 : index
    %c0_182 = arith.constant 0 : index
    %c0_183 = arith.constant 0 : index
    %205 = vector.load %arg3[%c5_181, %c0_182, %c0_183] : memref<27x4x4xbf16, #tpu.memory_space<vmem>>, vector<1x4x4xbf16>
    %206 = vector.shape_cast %205 : vector<1x4x4xbf16> to vector<4x4xbf16>
    %c0_184 = arith.constant 0 : index
    %c29_185 = arith.constant 29 : index
    %207 = vector.load %arg8[%c0_184, %c29_185] : memref<4x1280xbf16, #tpu.memory_space<vmem>>, vector<4x1024xbf16>
    %cst_186 = arith.constant dense<0.000000e+00> : vector<4x1024xf32>
    %208 = tpu.matmul %206, %207, %cst_186 {dimension_numbers = #tpu.dot_dimension_numbers<[1], [0], [0], [1], [0, 0, 1, 1], [], []>} : vector<4x4xbf16>, vector<4x1024xbf16>, vector<4x1024xf32> -> vector<4x1024xf32>
    %209 = arith.addf %204, %208 : vector<4x1024xf32>
    %c6_187 = arith.constant 6 : index
    %c0_188 = arith.constant 0 : index
    %c0_189 = arith.constant 0 : index
    %210 = vector.load %arg3[%c6_187, %c0_188, %c0_189] : memref<27x4x4xbf16, #tpu.memory_space<vmem>>, vector<1x4x4xbf16>
    %211 = vector.shape_cast %210 : vector<1x4x4xbf16> to vector<4x4xbf16>
    %c0_190 = arith.constant 0 : index
    %c37_191 = arith.constant 37 : index
    %212 = vector.load %arg8[%c0_190, %c37_191] : memref<4x1280xbf16, #tpu.memory_space<vmem>>, vector<4x1024xbf16>
    %cst_192 = arith.constant dense<0.000000e+00> : vector<4x1024xf32>
    %213 = tpu.matmul %211, %212, %cst_192 {dimension_numbers = #tpu.dot_dimension_numbers<[1], [0], [0], [1], [0, 0, 1, 1], [], []>} : vector<4x4xbf16>, vector<4x1024xbf16>, vector<4x1024xf32> -> vector<4x1024xf32>
    %214 = arith.addf %209, %213 : vector<4x1024xf32>
    %c7_193 = arith.constant 7 : index
    %c0_194 = arith.constant 0 : index
    %c0_195 = arith.constant 0 : index
    %215 = vector.load %arg3[%c7_193, %c0_194, %c0_195] : memref<27x4x4xbf16, #tpu.memory_space<vmem>>, vector<1x4x4xbf16>
    %216 = vector.shape_cast %215 : vector<1x4x4xbf16> to vector<4x4xbf16>
    %c0_196 = arith.constant 0 : index
    %c38_197 = arith.constant 38 : index
    %217 = vector.load %arg8[%c0_196, %c38_197] : memref<4x1280xbf16, #tpu.memory_space<vmem>>, vector<4x1024xbf16>
    %cst_198 = arith.constant dense<0.000000e+00> : vector<4x1024xf32>
    %218 = tpu.matmul %216, %217, %cst_198 {dimension_numbers = #tpu.dot_dimension_numbers<[1], [0], [0], [1], [0, 0, 1, 1], [], []>} : vector<4x4xbf16>, vector<4x1024xbf16>, vector<4x1024xf32> -> vector<4x1024xf32>
    %219 = arith.addf %214, %218 : vector<4x1024xf32>
    %c8_199 = arith.constant 8 : index
    %c0_200 = arith.constant 0 : index
    %c0_201 = arith.constant 0 : index
    %220 = vector.load %arg3[%c8_199, %c0_200, %c0_201] : memref<27x4x4xbf16, #tpu.memory_space<vmem>>, vector<1x4x4xbf16>
    %221 = vector.shape_cast %220 : vector<1x4x4xbf16> to vector<4x4xbf16>
    %c0_202 = arith.constant 0 : index
    %c39_203 = arith.constant 39 : index
    %222 = vector.load %arg8[%c0_202, %c39_203] : memref<4x1280xbf16, #tpu.memory_space<vmem>>, vector<4x1024xbf16>
    %cst_204 = arith.constant dense<0.000000e+00> : vector<4x1024xf32>
    %223 = tpu.matmul %221, %222, %cst_204 {dimension_numbers = #tpu.dot_dimension_numbers<[1], [0], [0], [1], [0, 0, 1, 1], [], []>} : vector<4x4xbf16>, vector<4x1024xbf16>, vector<4x1024xf32> -> vector<4x1024xf32>
    %224 = arith.addf %219, %223 : vector<4x1024xf32>
    %c9_205 = arith.constant 9 : index
    %c0_206 = arith.constant 0 : index
    %c0_207 = arith.constant 0 : index
    %225 = vector.load %arg3[%c9_205, %c0_206, %c0_207] : memref<27x4x4xbf16, #tpu.memory_space<vmem>>, vector<1x4x4xbf16>
    %226 = vector.shape_cast %225 : vector<1x4x4xbf16> to vector<4x4xbf16>
    %c0_208 = arith.constant 0 : index
    %c117_209 = arith.constant 117 : index
    %227 = vector.load %arg8[%c0_208, %c117_209] : memref<4x1280xbf16, #tpu.memory_space<vmem>>, vector<4x1024xbf16>
    %cst_210 = arith.constant dense<0.000000e+00> : vector<4x1024xf32>
    %228 = tpu.matmul %226, %227, %cst_210 {dimension_numbers = #tpu.dot_dimension_numbers<[1], [0], [0], [1], [0, 0, 1, 1], [], []>} : vector<4x4xbf16>, vector<4x1024xbf16>, vector<4x1024xf32> -> vector<4x1024xf32>
    %229 = arith.addf %224, %228 : vector<4x1024xf32>
    %c10_211 = arith.constant 10 : index
    %c0_212 = arith.constant 0 : index
    %c0_213 = arith.constant 0 : index
    %230 = vector.load %arg3[%c10_211, %c0_212, %c0_213] : memref<27x4x4xbf16, #tpu.memory_space<vmem>>, vector<1x4x4xbf16>
    %231 = vector.shape_cast %230 : vector<1x4x4xbf16> to vector<4x4xbf16>
    %c0_214 = arith.constant 0 : index
    %c118_215 = arith.constant 118 : index
    %232 = vector.load %arg8[%c0_214, %c118_215] : memref<4x1280xbf16, #tpu.memory_space<vmem>>, vector<4x1024xbf16>
    %cst_216 = arith.constant dense<0.000000e+00> : vector<4x1024xf32>
    %233 = tpu.matmul %231, %232, %cst_216 {dimension_numbers = #tpu.dot_dimension_numbers<[1], [0], [0], [1], [0, 0, 1, 1], [], []>} : vector<4x4xbf16>, vector<4x1024xbf16>, vector<4x1024xf32> -> vector<4x1024xf32>
    %234 = arith.addf %229, %233 : vector<4x1024xf32>
    %c11_217 = arith.constant 11 : index
    %c0_218 = arith.constant 0 : index
    %c0_219 = arith.constant 0 : index
    %235 = vector.load %arg3[%c11_217, %c0_218, %c0_219] : memref<27x4x4xbf16, #tpu.memory_space<vmem>>, vector<1x4x4xbf16>
    %236 = vector.shape_cast %235 : vector<1x4x4xbf16> to vector<4x4xbf16>
    %c0_220 = arith.constant 0 : index
    %c119_221 = arith.constant 119 : index
    %237 = vector.load %arg8[%c0_220, %c119_221] : memref<4x1280xbf16, #tpu.memory_space<vmem>>, vector<4x1024xbf16>
    %cst_222 = arith.constant dense<0.000000e+00> : vector<4x1024xf32>
    %238 = tpu.matmul %236, %237, %cst_222 {dimension_numbers = #tpu.dot_dimension_numbers<[1], [0], [0], [1], [0, 0, 1, 1], [], []>} : vector<4x4xbf16>, vector<4x1024xbf16>, vector<4x1024xf32> -> vector<4x1024xf32>
    %239 = arith.addf %234, %238 : vector<4x1024xf32>
    %c12_223 = arith.constant 12 : index
    %c0_224 = arith.constant 0 : index
    %c0_225 = arith.constant 0 : index
    %240 = vector.load %arg3[%c12_223, %c0_224, %c0_225] : memref<27x4x4xbf16, #tpu.memory_space<vmem>>, vector<1x4x4xbf16>
    %241 = vector.shape_cast %240 : vector<1x4x4xbf16> to vector<4x4xbf16>
    %c0_226 = arith.constant 0 : index
    %c127_227 = arith.constant 127 : index
    %242 = vector.load %arg8[%c0_226, %c127_227] : memref<4x1280xbf16, #tpu.memory_space<vmem>>, vector<4x1024xbf16>
    %cst_228 = arith.constant dense<0.000000e+00> : vector<4x1024xf32>
    %243 = tpu.matmul %241, %242, %cst_228 {dimension_numbers = #tpu.dot_dimension_numbers<[1], [0], [0], [1], [0, 0, 1, 1], [], []>} : vector<4x4xbf16>, vector<4x1024xbf16>, vector<4x1024xf32> -> vector<4x1024xf32>
    %244 = arith.addf %239, %243 : vector<4x1024xf32>
    %c13_229 = arith.constant 13 : index
    %c0_230 = arith.constant 0 : index
    %c0_231 = arith.constant 0 : index
    %245 = vector.load %arg3[%c13_229, %c0_230, %c0_231] : memref<27x4x4xbf16, #tpu.memory_space<vmem>>, vector<1x4x4xbf16>
    %246 = vector.shape_cast %245 : vector<1x4x4xbf16> to vector<4x4xbf16>
    %c0_232 = arith.constant 0 : index
    %c128_233 = arith.constant 128 : index
    %247 = vector.load %arg8[%c0_232, %c128_233] : memref<4x1280xbf16, #tpu.memory_space<vmem>>, vector<4x1024xbf16>
    %cst_234 = arith.constant dense<0.000000e+00> : vector<4x1024xf32>
    %248 = tpu.matmul %246, %247, %cst_234 {dimension_numbers = #tpu.dot_dimension_numbers<[1], [0], [0], [1], [0, 0, 1, 1], [], []>} : vector<4x4xbf16>, vector<4x1024xbf16>, vector<4x1024xf32> -> vector<4x1024xf32>
    %249 = arith.addf %244, %248 : vector<4x1024xf32>
    %c14_235 = arith.constant 14 : index
    %c0_236 = arith.constant 0 : index
    %c0_237 = arith.constant 0 : index
    %250 = vector.load %arg3[%c14_235, %c0_236, %c0_237] : memref<27x4x4xbf16, #tpu.memory_space<vmem>>, vector<1x4x4xbf16>
    %251 = vector.shape_cast %250 : vector<1x4x4xbf16> to vector<4x4xbf16>
    %c0_238 = arith.constant 0 : index
    %c129_239 = arith.constant 129 : index
    %252 = vector.load %arg8[%c0_238, %c129_239] : memref<4x1280xbf16, #tpu.memory_space<vmem>>, vector<4x1024xbf16>
    %cst_240 = arith.constant dense<0.000000e+00> : vector<4x1024xf32>
    %253 = tpu.matmul %251, %252, %cst_240 {dimension_numbers = #tpu.dot_dimension_numbers<[1], [0], [0], [1], [0, 0, 1, 1], [], []>} : vector<4x4xbf16>, vector<4x1024xbf16>, vector<4x1024xf32> -> vector<4x1024xf32>
    %254 = arith.addf %249, %253 : vector<4x1024xf32>
    %c15_241 = arith.constant 15 : index
    %c0_242 = arith.constant 0 : index
    %c0_243 = arith.constant 0 : index
    %255 = vector.load %arg3[%c15_241, %c0_242, %c0_243] : memref<27x4x4xbf16, #tpu.memory_space<vmem>>, vector<1x4x4xbf16>
    %256 = vector.shape_cast %255 : vector<1x4x4xbf16> to vector<4x4xbf16>
    %c0_244 = arith.constant 0 : index
    %c137_245 = arith.constant 137 : index
    %257 = vector.load %arg8[%c0_244, %c137_245] : memref<4x1280xbf16, #tpu.memory_space<vmem>>, vector<4x1024xbf16>
    %cst_246 = arith.constant dense<0.000000e+00> : vector<4x1024xf32>
    %258 = tpu.matmul %256, %257, %cst_246 {dimension_numbers = #tpu.dot_dimension_numbers<[1], [0], [0], [1], [0, 0, 1, 1], [], []>} : vector<4x4xbf16>, vector<4x1024xbf16>, vector<4x1024xf32> -> vector<4x1024xf32>
    %259 = arith.addf %254, %258 : vector<4x1024xf32>
    %c16_247 = arith.constant 16 : index
    %c0_248 = arith.constant 0 : index
    %c0_249 = arith.constant 0 : index
    %260 = vector.load %arg3[%c16_247, %c0_248, %c0_249] : memref<27x4x4xbf16, #tpu.memory_space<vmem>>, vector<1x4x4xbf16>
    %261 = vector.shape_cast %260 : vector<1x4x4xbf16> to vector<4x4xbf16>
    %c0_250 = arith.constant 0 : index
    %c138_251 = arith.constant 138 : index
    %262 = vector.load %arg8[%c0_250, %c138_251] : memref<4x1280xbf16, #tpu.memory_space<vmem>>, vector<4x1024xbf16>
    %cst_252 = arith.constant dense<0.000000e+00> : vector<4x1024xf32>
    %263 = tpu.matmul %261, %262, %cst_252 {dimension_numbers = #tpu.dot_dimension_numbers<[1], [0], [0], [1], [0, 0, 1, 1], [], []>} : vector<4x4xbf16>, vector<4x1024xbf16>, vector<4x1024xf32> -> vector<4x1024xf32>
    %264 = arith.addf %259, %263 : vector<4x1024xf32>
    %c17_253 = arith.constant 17 : index
    %c0_254 = arith.constant 0 : index
    %c0_255 = arith.constant 0 : index
    %265 = vector.load %arg3[%c17_253, %c0_254, %c0_255] : memref<27x4x4xbf16, #tpu.memory_space<vmem>>, vector<1x4x4xbf16>
    %266 = vector.shape_cast %265 : vector<1x4x4xbf16> to vector<4x4xbf16>
    %c0_256 = arith.constant 0 : index
    %c139_257 = arith.constant 139 : index
    %267 = vector.load %arg8[%c0_256, %c139_257] : memref<4x1280xbf16, #tpu.memory_space<vmem>>, vector<4x1024xbf16>
    %cst_258 = arith.constant dense<0.000000e+00> : vector<4x1024xf32>
    %268 = tpu.matmul %266, %267, %cst_258 {dimension_numbers = #tpu.dot_dimension_numbers<[1], [0], [0], [1], [0, 0, 1, 1], [], []>} : vector<4x4xbf16>, vector<4x1024xbf16>, vector<4x1024xf32> -> vector<4x1024xf32>
    %269 = arith.addf %264, %268 : vector<4x1024xf32>
    %c18_259 = arith.constant 18 : index
    %c0_260 = arith.constant 0 : index
    %c0_261 = arith.constant 0 : index
    %270 = vector.load %arg3[%c18_259, %c0_260, %c0_261] : memref<27x4x4xbf16, #tpu.memory_space<vmem>>, vector<1x4x4xbf16>
    %271 = vector.shape_cast %270 : vector<1x4x4xbf16> to vector<4x4xbf16>
    %c0_262 = arith.constant 0 : index
    %c217_263 = arith.constant 217 : index
    %272 = vector.load %arg8[%c0_262, %c217_263] : memref<4x1280xbf16, #tpu.memory_space<vmem>>, vector<4x1024xbf16>
    %cst_264 = arith.constant dense<0.000000e+00> : vector<4x1024xf32>
    %273 = tpu.matmul %271, %272, %cst_264 {dimension_numbers = #tpu.dot_dimension_numbers<[1], [0], [0], [1], [0, 0, 1, 1], [], []>} : vector<4x4xbf16>, vector<4x1024xbf16>, vector<4x1024xf32> -> vector<4x1024xf32>
    %274 = arith.addf %269, %273 : vector<4x1024xf32>
    %c19_265 = arith.constant 19 : index
    %c0_266 = arith.constant 0 : index
    %c0_267 = arith.constant 0 : index
    %275 = vector.load %arg3[%c19_265, %c0_266, %c0_267] : memref<27x4x4xbf16, #tpu.memory_space<vmem>>, vector<1x4x4xbf16>
    %276 = vector.shape_cast %275 : vector<1x4x4xbf16> to vector<4x4xbf16>
    %c0_268 = arith.constant 0 : index
    %c218_269 = arith.constant 218 : index
    %277 = vector.load %arg8[%c0_268, %c218_269] : memref<4x1280xbf16, #tpu.memory_space<vmem>>, vector<4x1024xbf16>
    %cst_270 = arith.constant dense<0.000000e+00> : vector<4x1024xf32>
    %278 = tpu.matmul %276, %277, %cst_270 {dimension_numbers = #tpu.dot_dimension_numbers<[1], [0], [0], [1], [0, 0, 1, 1], [], []>} : vector<4x4xbf16>, vector<4x1024xbf16>, vector<4x1024xf32> -> vector<4x1024xf32>
    %279 = arith.addf %274, %278 : vector<4x1024xf32>
    %c20_271 = arith.constant 20 : index
    %c0_272 = arith.constant 0 : index
    %c0_273 = arith.constant 0 : index
    %280 = vector.load %arg3[%c20_271, %c0_272, %c0_273] : memref<27x4x4xbf16, #tpu.memory_space<vmem>>, vector<1x4x4xbf16>
    %281 = vector.shape_cast %280 : vector<1x4x4xbf16> to vector<4x4xbf16>
    %c0_274 = arith.constant 0 : index
    %c219_275 = arith.constant 219 : index
    %282 = vector.load %arg8[%c0_274, %c219_275] : memref<4x1280xbf16, #tpu.memory_space<vmem>>, vector<4x1024xbf16>
    %cst_276 = arith.constant dense<0.000000e+00> : vector<4x1024xf32>
    %283 = tpu.matmul %281, %282, %cst_276 {dimension_numbers = #tpu.dot_dimension_numbers<[1], [0], [0], [1], [0, 0, 1, 1], [], []>} : vector<4x4xbf16>, vector<4x1024xbf16>, vector<4x1024xf32> -> vector<4x1024xf32>
    %284 = arith.addf %279, %283 : vector<4x1024xf32>
    %c21_277 = arith.constant 21 : index
    %c0_278 = arith.constant 0 : index
    %c0_279 = arith.constant 0 : index
    %285 = vector.load %arg3[%c21_277, %c0_278, %c0_279] : memref<27x4x4xbf16, #tpu.memory_space<vmem>>, vector<1x4x4xbf16>
    %286 = vector.shape_cast %285 : vector<1x4x4xbf16> to vector<4x4xbf16>
    %c0_280 = arith.constant 0 : index
    %c227_281 = arith.constant 227 : index
    %287 = vector.load %arg8[%c0_280, %c227_281] : memref<4x1280xbf16, #tpu.memory_space<vmem>>, vector<4x1024xbf16>
    %cst_282 = arith.constant dense<0.000000e+00> : vector<4x1024xf32>
    %288 = tpu.matmul %286, %287, %cst_282 {dimension_numbers = #tpu.dot_dimension_numbers<[1], [0], [0], [1], [0, 0, 1, 1], [], []>} : vector<4x4xbf16>, vector<4x1024xbf16>, vector<4x1024xf32> -> vector<4x1024xf32>
    %289 = arith.addf %284, %288 : vector<4x1024xf32>
    %c22_283 = arith.constant 22 : index
    %c0_284 = arith.constant 0 : index
    %c0_285 = arith.constant 0 : index
    %290 = vector.load %arg3[%c22_283, %c0_284, %c0_285] : memref<27x4x4xbf16, #tpu.memory_space<vmem>>, vector<1x4x4xbf16>
    %291 = vector.shape_cast %290 : vector<1x4x4xbf16> to vector<4x4xbf16>
    %c0_286 = arith.constant 0 : index
    %c228_287 = arith.constant 228 : index
    %292 = vector.load %arg8[%c0_286, %c228_287] : memref<4x1280xbf16, #tpu.memory_space<vmem>>, vector<4x1024xbf16>
    %cst_288 = arith.constant dense<0.000000e+00> : vector<4x1024xf32>
    %293 = tpu.matmul %291, %292, %cst_288 {dimension_numbers = #tpu.dot_dimension_numbers<[1], [0], [0], [1], [0, 0, 1, 1], [], []>} : vector<4x4xbf16>, vector<4x1024xbf16>, vector<4x1024xf32> -> vector<4x1024xf32>
    %294 = arith.addf %289, %293 : vector<4x1024xf32>
    %c23_289 = arith.constant 23 : index
    %c0_290 = arith.constant 0 : index
    %c0_291 = arith.constant 0 : index
    %295 = vector.load %arg3[%c23_289, %c0_290, %c0_291] : memref<27x4x4xbf16, #tpu.memory_space<vmem>>, vector<1x4x4xbf16>
    %296 = vector.shape_cast %295 : vector<1x4x4xbf16> to vector<4x4xbf16>
    %c0_292 = arith.constant 0 : index
    %c229_293 = arith.constant 229 : index
    %297 = vector.load %arg8[%c0_292, %c229_293] : memref<4x1280xbf16, #tpu.memory_space<vmem>>, vector<4x1024xbf16>
    %cst_294 = arith.constant dense<0.000000e+00> : vector<4x1024xf32>
    %298 = tpu.matmul %296, %297, %cst_294 {dimension_numbers = #tpu.dot_dimension_numbers<[1], [0], [0], [1], [0, 0, 1, 1], [], []>} : vector<4x4xbf16>, vector<4x1024xbf16>, vector<4x1024xf32> -> vector<4x1024xf32>
    %299 = arith.addf %294, %298 : vector<4x1024xf32>
    %c24_295 = arith.constant 24 : index
    %c0_296 = arith.constant 0 : index
    %c0_297 = arith.constant 0 : index
    %300 = vector.load %arg3[%c24_295, %c0_296, %c0_297] : memref<27x4x4xbf16, #tpu.memory_space<vmem>>, vector<1x4x4xbf16>
    %301 = vector.shape_cast %300 : vector<1x4x4xbf16> to vector<4x4xbf16>
    %c0_298 = arith.constant 0 : index
    %c237_299 = arith.constant 237 : index
    %302 = vector.load %arg8[%c0_298, %c237_299] : memref<4x1280xbf16, #tpu.memory_space<vmem>>, vector<4x1024xbf16>
    %cst_300 = arith.constant dense<0.000000e+00> : vector<4x1024xf32>
    %303 = tpu.matmul %301, %302, %cst_300 {dimension_numbers = #tpu.dot_dimension_numbers<[1], [0], [0], [1], [0, 0, 1, 1], [], []>} : vector<4x4xbf16>, vector<4x1024xbf16>, vector<4x1024xf32> -> vector<4x1024xf32>
    %304 = arith.addf %299, %303 : vector<4x1024xf32>
    %c25_301 = arith.constant 25 : index
    %c0_302 = arith.constant 0 : index
    %c0_303 = arith.constant 0 : index
    %305 = vector.load %arg3[%c25_301, %c0_302, %c0_303] : memref<27x4x4xbf16, #tpu.memory_space<vmem>>, vector<1x4x4xbf16>
    %306 = vector.shape_cast %305 : vector<1x4x4xbf16> to vector<4x4xbf16>
    %c0_304 = arith.constant 0 : index
    %c238_305 = arith.constant 238 : index
    %307 = vector.load %arg8[%c0_304, %c238_305] : memref<4x1280xbf16, #tpu.memory_space<vmem>>, vector<4x1024xbf16>
    %cst_306 = arith.constant dense<0.000000e+00> : vector<4x1024xf32>
    %308 = tpu.matmul %306, %307, %cst_306 {dimension_numbers = #tpu.dot_dimension_numbers<[1], [0], [0], [1], [0, 0, 1, 1], [], []>} : vector<4x4xbf16>, vector<4x1024xbf16>, vector<4x1024xf32> -> vector<4x1024xf32>
    %309 = arith.addf %304, %308 : vector<4x1024xf32>
    %c26_307 = arith.constant 26 : index
    %c0_308 = arith.constant 0 : index
    %c0_309 = arith.constant 0 : index
    %310 = vector.load %arg3[%c26_307, %c0_308, %c0_309] : memref<27x4x4xbf16, #tpu.memory_space<vmem>>, vector<1x4x4xbf16>
    %311 = vector.shape_cast %310 : vector<1x4x4xbf16> to vector<4x4xbf16>
    %c0_310 = arith.constant 0 : index
    %c239_311 = arith.constant 239 : index
    %312 = vector.load %arg8[%c0_310, %c239_311] : memref<4x1280xbf16, #tpu.memory_space<vmem>>, vector<4x1024xbf16>
    %cst_312 = arith.constant dense<0.000000e+00> : vector<4x1024xf32>
    %313 = tpu.matmul %311, %312, %cst_312 {dimension_numbers = #tpu.dot_dimension_numbers<[1], [0], [0], [1], [0, 0, 1, 1], [], []>} : vector<4x4xbf16>, vector<4x1024xbf16>, vector<4x1024xf32> -> vector<4x1024xf32>
    %314 = arith.addf %309, %313 : vector<4x1024xf32>
    %c0_313 = arith.constant 0 : index
    %c0_314 = arith.constant 0 : index
    %315 = vector.load %arg5[%c0_313, %c0_314] : memref<4x1xf32, #tpu.memory_space<vmem>>, vector<4x1xf32>
    %316 = vector.broadcast %315 : vector<4x1xf32> to vector<4x1024xf32>
    %317 = arith.addf %314, %316 : vector<4x1024xf32>
    %318 = arith.addf %317, %164 : vector<4x1024xf32>
    %cst_315 = arith.constant 0.000000e+00 : f32
    %319 = vector.broadcast %cst_315 : f32 to vector<4x1024xf32>
    %320 = arith.maximumf %318, %319 : vector<4x1024xf32>
    %321 = vector.broadcast %0 : vector<1x1024xf32> to vector<4x1024xf32>
    %322 = arith.mulf %320, %321 : vector<4x1024xf32>
    %c0_316 = arith.constant 0 : index
    %c0_317 = arith.constant 0 : index
    %c0_318 = arith.constant 0 : index
    %323 = vector.load %arg7[%c0_316, %c0_317, %c0_318] : memref<1x4x1024xf32, #tpu.memory_space<vmem>>, vector<1x4x1024xf32>
    %324 = vector.shape_cast %323 : vector<1x4x1024xf32> to vector<4x1024xf32>
    %325 = vector.shape_cast %322 : vector<4x1024xf32> to vector<1x4x1024xf32>
    tpu.vector_store %arg7[%c0_316, %c0_317, %c0_318], %325 {strides = array<i32>} : memref<1x4x1024xf32, #tpu.memory_space<vmem>>, vector<1x4x1024xf32>,
    return
  }
  func.func @transform_0(%arg0: i32) -> (i32, i32, i32) {
    %c0_i32 = arith.constant 0 : i32
    %c0_i32_0 = arith.constant 0 : i32
    %c0_i32_1 = arith.constant 0 : i32
    return %arg0, %c0_i32, %c0_i32_0 : i32, i32, i32
  }
  func.func @transform_1(%arg0: i32) -> (i32, i32, i32) {
    %c0_i32 = arith.constant 0 : i32
    %c0_i32_0 = arith.constant 0 : i32
    %c0_i32_1 = arith.constant 0 : i32
    %c0_i32_2 = arith.constant 0 : i32
    return %c0_i32, %c0_i32_0, %c0_i32_1 : i32, i32, i32
  }
  func.func @transform_2(%arg0: i32) -> (i32, i32, i32) {
    %c0_i32 = arith.constant 0 : i32
    %c0_i32_0 = arith.constant 0 : i32
    %c0_i32_1 = arith.constant 0 : i32
    %c0_i32_2 = arith.constant 0 : i32
    return %c0_i32, %c0_i32_0, %c0_i32_1 : i32, i32, i32
  }
  func.func @transform_3(%arg0: i32) -> (i32, i32) {
    %c0_i32 = arith.constant 0 : i32
    %c0_i32_0 = arith.constant 0 : i32
    %c0_i32_1 = arith.constant 0 : i32
    return %c0_i32, %c0_i32_0 : i32, i32
  }
  func.func @transform_4(%arg0: i32) -> (i32, i32) {
    %c0_i32 = arith.constant 0 : i32
    %c0_i32_0 = arith.constant 0 : i32
    %c0_i32_1 = arith.constant 0 : i32
    return %c0_i32, %c0_i32_0 : i32, i32
  }
  func.func @transform_5(%arg0: i32) -> (i32, i32) {
    %c0_i32 = arith.constant 0 : i32
    %c0_i32_0 = arith.constant 0 : i32
    %c0_i32_1 = arith.constant 0 : i32
    return %c0_i32, %c0_i32_0 : i32, i32
  }
  func.func @transform_6(%arg0: i32) -> (i32, i32, i32) {
    %c0_i32 = arith.constant 0 : i32
    %c0_i32_0 = arith.constant 0 : i32
    %c0_i32_1 = arith.constant 0 : i32
    return %arg0, %c0_i32, %c0_i32_0 : i32, i32, i32
  }
}

</mosaic_0001>

<bundles_post_ra>
// kernel: tpu_custom_call.1
= control target key start
LH: loop header
LB: loop body
LE: loop exit
PB: predicated region body
PF: predicated region fallthrough
CT: control target
= control target key end

     0   :  { %11 = vsyncpa [#allocation4], 0  ;;  %s18485_s0 = inlined_call_operand.vmem [shape: bf16[2,8,1280], index: 0, kind: input, shape index: {}]   ;;  %s18486_s1 = inlined_call_operand.vmem [shape: bf16[27,8,8], index: 1, kind: input, shape index: {}]   ;;  %s18487_s2 = inlined_call_operand.vmem [shape: bf16[27,4,4], index: 2, kind: input, shape index: {}]   ;;  %s18488_s3 = inlined_call_operand.vmem [shape: f32[4,1], index: 3, kind: input, shape index: {}]   ;;  %s18489_s4 = inlined_call_operand.vmem [shape: f32[4,1], index: 4, kind: input, shape index: {}]   ;;  %s18490_s5 = inlined_call_operand.vmem [shape: f32[1,1024], index: 5, kind: input, shape index: {}]   ;;  %s18491_s6 = inlined_call_operand.hbm [shape: f32[2,4,1024], index: 6, kind: output, shape index: {}]  }
   0x1   :  { %13 = vsyncpa [#allocation4 + $0x1], 0  ;;  %s15196_s21 = smov 0   ;;  %s15198_s22 = smov 0  }
   0x2   :  { %s15200_s23 = smov 0   ;;  %s15202_s24 = smov 0  }
   0x3 LB: > { %s15217_s25 = sadd.s32 4294967295, %s15130_s24   ;;  %s14007_s26 = sadd.s32 4294967294, %s15130_s24   ;;  %s15130_s24 = sphi %s15202_s24, %s18648_s24   ;;  %s15126_s23 = sphi %s15200_s23, %s18647_s23   ;;  %s15122_s22 = sphi %s15198_s22, %s18646_s22   ;;  %s15118_s21 = sphi %s15196_s21, %s18645_s21  }
   0x4   : > { %s15221_s27 = sadd.s32 1, %s15130_s24   ;;  %s157_s28 = sadd.s32 1, %s15126_s23 }
   0x5   : > { %s154_s29 = ssub.s32 %s15130_s24, %s15221_s27  ;;  %p167_p0 = scmp.ne.s32.totalorder %s15126_s23, %s15122_s22 }
   0x6   : > { %p155_p1 = scmp.eq.s32.totalorder %s154_s29, 0  ;;  %p168_p2 = scmp.eq.s32.totalorder %s15217_s25, 1 }
   0x7   : > { %p173_p3 = scmp.ne.s32.totalorder %s15122_s22, %s15118_s21  ;;  %p174_p4 = scmp.eq.s32.totalorder %s14007_s26, 1 }
   0x8   : > { %s15232_s30 = scalar_select %p155_p1, %s15126_s23, %s157_s28  }
   0x9   : > { %p15234_p5 = por %p168_p2, %p167_p0  ;;  %p15238_p6 = por %p174_p4, %p173_p3 }
   0xa   : > { %p14010_p7 = scmp.ge.s32.totalorder %s15130_s24, 1  ;;  %p215_p8 = scmp.lt.s32.totalorder %s15130_s24, 3 }
   0xc   : > { %p216_p9 = pnand %p14010_p7, %p215_p8 }
   0xd   : > { %p245_p10 = scmp.lt.s32.totalorder (!%p216_p9), %s15217_s25, 1  ;;  %s15132_s14 = smov (!%p216_p9), 110   ;;  %v15133_v7 = vmov (!%p216_p9), 0   ;;  %vm301_vm0 = vcmask (!%p216_p9), 900096   ;;  %vm314_vm1 = vcmask (!%p216_p9), 1043456   ;;  %vm310_vm2 = vcmask (!%p216_p9), 64512  }
   0xe   : > { %219 = sbr.rel (%p216_p9) target bundleno = 1668 (0x684), region = 44  ;;  %371 = vmatprep.mubr.bf16.mxu0 (!%p216_p9), %v15133_v7  ;;  %6518 = vst [vmem:[#allocation2] sm:$0x3] (!%p216_p9), %v15133_v7  ;;  %6519 = vst [vmem:[#allocation2 + $0x12] sm:$0x3] (!%p216_p9), %v15133_v7  ;;  %412 = vmatprep.mubr.bf16.mxu1 (!%p216_p9), %v15133_v7  ;;  %s15134_s15 = smov (!%p216_p9), 111  }
   0xf   : > { %15042 = vset.pattern.permute.xlu0 (!%p216_p9), %v15133_v7  ;;  %s15135_s16 = smov (!%p216_p9), 109   ;;  %s15136_s17 = smov (!%p216_p9), 101   ;;  %v14013_v24 = vld [vmem:[%s18486_s1 + $0x4] sm:$0xf] (!%p216_p9)  ;;  %vm521_vm3 = vcmask (!%p216_p9), 908288   ;;  %vm741_vm4 = vcmask (!%p216_p9), 891904  }
  0x10   : > { %s15137_s18 = smov (!%p216_p9), 100   ;;  %s15138_s19 = smov (!%p216_p9), 99   ;;  %v252_v44 = vld [vmem:[%s18486_s1] sm:$0xf] (!%p216_p9)  ;;  %vm969_vm5 = vcmask (!%p216_p9), 826368   ;;  %vm1197_vm6 = vcmask (!%p216_p9), 818176  }
  0x11   : > { %s15139_s20 = smov (!%p216_p9), 91   ;;  %s15140_s29 = smov (!%p216_p9), 90   ;;  %vm1425_vm7 = vcmask (!%p216_p9), 809984   ;;  %vm1653_vm8 = vcmask (!%p216_p9), 744448   ;;  %vm1881_vm9 = vcmask (!%p216_p9), 736256   ;;  %vm2109_vm10 = vcmask (!%p216_p9), 728064  }
  0x12   : > { %s15141_s11 = smov (!%p216_p9), 89   ;;  %s15142_s28 = smov (!%p216_p9), 11   ;;  %vm2337_vm11 = vcmask (!%p216_p9), 89088   ;;  %vm2565_vm12 = vcmask (!%p216_p9), 80896   ;;  %vm2793_vm13 = vcmask (!%p216_p9), 72704   ;;  %vm18510_vm14 = vcmask (!%p216_p9), 7168  }
  0x13   : > { %s18494_s12 = smov (!%p216_p9), 10   ;;  %s18498_s26 = smov (!%p216_p9), 1   ;;  %vm18511_vm15 = vcmask (!%p216_p9), 1039360  }
  0x15   : > { %s246_s9 = scalar_select %p245_p10, %s15217_s25, 1 }
  0x17   : > { %s14974_s10 = smul.u32 40, %s246_s9 }
  0x19   : > { %s15249_s13 = scalar_lea.vmem %s18485_s0, %s14974_s10  ;;  %s18492_s10 = smov 9  }
  0x1a   : > { %v254_v0 = vld [vmem:[%s15249_s13 + $0x8] sm:$0xff]  ;;  %v253_v1 = vld [vmem:[%s15249_s13] sm:$0xff]  ;;  %v255_v6 = vld [vmem:[%s15249_s13 + $0x10] sm:$0xff] }
  0x1b   : > { %v15253_v2 = vcombine.low %v254_v0, %v254_v0  ;;  %v15255_v3 = vcombine.low %v253_v1, %v253_v1  ;;  %v15261_v4 = vcombine.high %v254_v0, %v254_v0  ;;  %v15263_v5 = vcombine.high %v253_v1, %v253_v1  ;;  %v256_v10 = vld [vmem:[%s15249_s13 + $0x18] sm:$0xff]  ;;  %v15293_v13 = vld [vmem:[%s15249_s13 + $0x20] ss:$0 sps:$4 sm:$0xff]  }
  0x1c   : > { %v15275_v8 = vcombine.high %v255_v6, %v255_v6  ;;  %v15277_v9 = vcombine.low %v255_v6, %v255_v6  ;;  %v15284_v11 = vcombine.high %v256_v10, %v256_v10  ;;  %v15286_v12 = vcombine.low %v256_v10, %v256_v10 }
  0x1d   : > { %287 = vrot.lane.b32.xlu1 %v15253_v2, %s15132_s14  ;;  %283 = vrot.lane.b32.xlu0 %v15255_v3, %s15132_s14 }
  0x21   : > { %289 = vrot.lane.b32.xlu1 %v15261_v4, %s15132_s14  ;;  %285 = vrot.lane.b32.xlu0 %v15263_v5, %s15132_s14 }
  0x25   : > { %293 = vrot.lane.b32.xlu1 %v15275_v8, %s15132_s14  ;;  %291 = vrot.lane.b32.xlu0 %v15277_v9, %s15132_s14 }
  0x29   : > { %297 = vrot.lane.b32.xlu1 %v15284_v11, %s15132_s14  ;;  %295 = vrot.lane.b32.xlu0 %v15286_v12, %s15132_s14 }
  0x2d   : > { %503 = vrot.lane.b32.xlu1 %v15255_v3, %s15134_s15  ;;  %299 = vrot.lane.b32.xlu0 %v15293_v13, %s15132_s14 }
  0x31   : > { %507 = vrot.lane.b32.xlu1 %v15253_v2, %s15134_s15  ;;  %505 = vrot.lane.b32.xlu0 %v15263_v5, %s15134_s15 }
  0x35   : > { %511 = vrot.lane.b32.xlu1 %v15277_v9, %s15134_s15  ;;  %509 = vrot.lane.b32.xlu0 %v15261_v4, %s15134_s15 }
  0x39   : > { %515 = vrot.lane.b32.xlu1 %v15286_v12, %s15134_s15  ;;  %513 = vrot.lane.b32.xlu0 %v15275_v8, %s15134_s15 }
  0x3d   : > { %519 = vrot.lane.b32.xlu1 %v15293_v13, %s15134_s15  ;;  %517 = vrot.lane.b32.xlu0 %v15284_v11, %s15134_s15 }
  0x41   : > { %725 = vrot.lane.b32.xlu1 %v15263_v5, %s15135_s16  ;;  %723 = vrot.lane.b32.xlu0 %v15255_v3, %s15135_s16 }
  0x45   : > { %729 = vrot.lane.b32.xlu1 %v15261_v4, %s15135_s16  ;;  %727 = vrot.lane.b32.xlu0 %v15253_v2, %s15135_s16 }
  0x49   : > { %733 = vrot.lane.b32.xlu1 %v15275_v8, %s15135_s16  ;;  %731 = vrot.lane.b32.xlu0 %v15277_v9, %s15135_s16 }
  0x4d   : > { %737 = vrot.lane.b32.xlu1 %v15284_v11, %s15135_s16  ;;  %735 = vrot.lane.b32.xlu0 %v15286_v12, %s15135_s16 }
  0x51   : > { %951 = vrot.lane.b32.xlu1 %v15255_v3, %s15136_s17  ;;  %739 = vrot.lane.b32.xlu0 %v15293_v13, %s15135_s16 }
  0x55   : > { %955 = vrot.lane.b32.xlu1 %v15253_v2, %s15136_s17  ;;  %953 = vrot.lane.b32.xlu0 %v15263_v5, %s15136_s17 }
  0x59   : > { %959 = vrot.lane.b32.xlu1 %v15277_v9, %s15136_s17  ;;  %957 = vrot.lane.b32.xlu0 %v15261_v4, %s15136_s17 }
  0x5d   : > { %963 = vrot.lane.b32.xlu1 %v15286_v12, %s15136_s17  ;;  %961 = vrot.lane.b32.xlu0 %v15275_v8, %s15136_s17 }
  0x61   : > { %967 = vrot.lane.b32.xlu1 %v15293_v13, %s15136_s17  ;;  %965 = vrot.lane.b32.xlu0 %v15284_v11, %s15136_s17 }
  0x65   : > { %1181 = vrot.lane.b32.xlu1 %v15263_v5, %s15137_s18  ;;  %1179 = vrot.lane.b32.xlu0 %v15255_v3, %s15137_s18 }
  0x69   : > { %1185 = vrot.lane.b32.xlu1 %v15261_v4, %s15137_s18  ;;  %1183 = vrot.lane.b32.xlu0 %v15253_v2, %s15137_s18 }
  0x6d   : > { %1189 = vrot.lane.b32.xlu1 %v15275_v8, %s15137_s18  ;;  %1187 = vrot.lane.b32.xlu0 %v15277_v9, %s15137_s18 }
  0x71   : > { %1193 = vrot.lane.b32.xlu1 %v15284_v11, %s15137_s18  ;;  %1191 = vrot.lane.b32.xlu0 %v15286_v12, %s15137_s18 }
  0x75   : > { %1407 = vrot.lane.b32.xlu1 %v15255_v3, %s15138_s19  ;;  %1195 = vrot.lane.b32.xlu0 %v15293_v13, %s15137_s18 }
  0x79   : > { %1411 = vrot.lane.b32.xlu1 %v15253_v2, %s15138_s19  ;;  %1409 = vrot.lane.b32.xlu0 %v15263_v5, %s15138_s19 }
  0x7d   : > { %1415 = vrot.lane.b32.xlu1 %v15277_v9, %s15138_s19  ;;  %1413 = vrot.lane.b32.xlu0 %v15261_v4, %s15138_s19 }
  0x81   : > { %1419 = vrot.lane.b32.xlu1 %v15286_v12, %s15138_s19  ;;  %1417 = vrot.lane.b32.xlu0 %v15275_v8, %s15138_s19 }
  0x85   : > { %1423 = vrot.lane.b32.xlu1 %v15293_v13, %s15138_s19  ;;  %1421 = vrot.lane.b32.xlu0 %v15284_v11, %s15138_s19 }
  0x89   : > { %1637 = vrot.lane.b32.xlu1 %v15263_v5, %s15139_s20  ;;  %1635 = vrot.lane.b32.xlu0 %v15255_v3, %s15139_s20 }
  0x8d   : > { %1641 = vrot.lane.b32.xlu1 %v15261_v4, %s15139_s20  ;;  %1639 = vrot.lane.b32.xlu0 %v15253_v2, %s15139_s20 }
  0x8f   : > { %v288_v14 = vpop.permute.xlu1 %287  ;;  %v284_v15 = vpop.permute.xlu0 %283 }
  0x91   : > { %1645 = vrot.lane.b32.xlu1 %v15275_v8, %s15139_s20  ;;  %1643 = vrot.lane.b32.xlu0 %v15277_v9, %s15139_s20 }
  0x93   : > { %v290_v16 = vpop.permute.xlu1 %289  ;;  %v286_v17 = vpop.permute.xlu0 %285 }
  0x94   : > { %v303_v18 = vsel %vm301_vm0, %v286_v17, %v288_v14  ;;  %v302_v19 = vsel %vm301_vm0, %v284_v15, %v286_v17  ;;  %v304_v23 = vsel %vm301_vm0, %v288_v14, %v290_v16  ;;  %v14039_v14 = vld [vmem:[%s18486_s1 + $0x8] sm:$0xf] }
  0x95   : > { %1649 = vrot.lane.b32.xlu1 %v15284_v11, %s15139_s20  ;;  %1647 = vrot.lane.b32.xlu0 %v15286_v12, %s15139_s20  ;;  %v316_v20 = vsel %vm314_vm1, %v302_v19, 0  ;;  %v322_v26 = vsel %vm314_vm1, %v304_v23, 0 }
  0x96   : > { %14023 = vmatprep.subr.msk.bf16.mxu0 %vm314_vm1, %v303_v18 }
  0x97   : > { %340 = vmatpush1.bf16.msra.mxu0 %v316_v20  ;;  %v294_v21 = vpop.permute.xlu1 %293  ;;  %v292_v22 = vpop.permute.xlu0 %291 }
  0x98   : > { %v305_v25 = vsel %vm301_vm0, %v290_v16, %v292_v22  ;;  %v306_v27 = vsel %vm301_vm0, %v292_v22, %v294_v21 }
  0x99   : > { %1863 = vrot.lane.b32.xlu1 %v15255_v3, %s15140_s29  ;;  %1651 = vrot.lane.b32.xlu0 %v15293_v13, %s15139_s20  ;;  %v328_v31 = vsel %vm314_vm1, %v306_v27, 0 }
  0x9a   : > { %14025 = vmatprep.subr.msk.bf16.mxu1 %vm314_vm1, %v305_v25  ;;  %14024 = vmatmul.mubr.msk.bf16.vlgmr.msra.gmra.mrb[0].mxu0 %vm310_vm2, %v14013_v24 }
  0x9b   : > { %381 = vmatpush1.bf16.msra.mxu1 %v322_v26  ;;  %v298_v28 = vpop.permute.xlu1 %297  ;;  %v296_v29 = vpop.permute.xlu0 %295  ;;  %453 = vmatprep.mubr.bf16.mxu0 %v15133_v7 }
  0x9c   : > { %v307_v30 = vsel %vm301_vm0, %v294_v21, %v296_v29  ;;  %v308_v32 = vsel %vm301_vm0, %v296_v29, %v298_v28 }
  0x9d   : > { %1867 = vrot.lane.b32.xlu1 %v15253_v2, %s15140_s29  ;;  %1865 = vrot.lane.b32.xlu0 %v15263_v5, %s15140_s29  ;;  %v334_v36 = vsel %vm314_vm1, %v308_v32, 0 }
  0x9e   : > { %14027 = vmatprep.subr.msk.bf16.mxu0 %vm314_vm1, %v307_v30  ;;  %14026 = vmatmul.mubr.msk.bf16.vlgmr.msra.gmra.mrb[0].mxu1 %vm310_vm2, %v14013_v24 }
  0x9f   : > { %422 = vmatpush1.bf16.msra.mxu0 %v328_v31  ;;  %v504_v33 = vpop.permute.xlu1 %503  ;;  %v300_v34 = vpop.permute.xlu0 %299  ;;  %494 = vmatprep.mubr.bf16.mxu1 %v15133_v7 }
  0xa0   : > { %v309_v35 = vsel %vm301_vm0, %v298_v28, %v300_v34  ;;  %v14048_v34 = vld [vmem:[%s18486_s1 + $0xc] sm:$0xf] }
  0xa1   : > { %1871 = vrot.lane.b32.xlu1 %v15277_v9, %s15140_s29  ;;  %1869 = vrot.lane.b32.xlu0 %v15261_v4, %s15140_s29 }
  0xa2   : > { %14029 = vmatprep.subr.msk.bf16.mxu1 %vm314_vm1, %v309_v35  ;;  %14028 = vmatmul.mubr.msk.bf16.vlgmr.msra.gmra.mrb[4].mxu0 %vm310_vm2, %v14013_v24 }
  0xa3   : > { %463 = vmatpush1.bf16.msra.mxu1 %v334_v36  ;;  %v508_v37 = vpop.permute.xlu1 %507  ;;  %v506_v38 = vpop.permute.xlu0 %505  ;;  %589 = vmatprep.mubr.bf16.mxu0 %v15133_v7 }
  0xa4   : > { %v522_v39 = vsel %vm521_vm3, %v504_v33, %v506_v38  ;;  %v523_v40 = vsel %vm521_vm3, %v506_v38, %v508_v37 }
  0xa5   : > { %1875 = vrot.lane.b32.xlu1 %v15286_v12, %s15140_s29  ;;  %1873 = vrot.lane.b32.xlu0 %v15275_v8, %s15140_s29  ;;  %v534_v41 = vsel %vm314_vm1, %v522_v39, 0 }
  0xa6   : > { %14031 = vmatprep.subr.msk.bf16.mxu0 %vm314_vm1, %v523_v40  ;;  %14030 = vmatmul.mubr.msk.bf16.vlgmr.msra.gmra.mrb[4].mxu1 %vm310_vm2, %v14013_v24 }
  0xa7   : > { %558 = vmatpush1.bf16.msra.mxu0 %v534_v41  ;;  %v512_v42 = vpop.permute.xlu1 %511  ;;  %v510_v43 = vpop.permute.xlu0 %509  ;;  %630 = vmatprep.mubr.bf16.mxu1 %v15133_v7 }
  0xa8   : > { %v524_v45 = vsel %vm521_vm3, %v508_v37, %v510_v43  ;;  %v525_v46 = vsel %vm521_vm3, %v510_v43, %v512_v42 }
  0xa9   : > { %1879 = vrot.lane.b32.xlu1 %v15293_v13, %s15140_s29  ;;  %1877 = vrot.lane.b32.xlu0 %v15284_v11, %s15140_s29  ;;  %v540_v47 = vsel %vm314_vm1, %v524_v45, 0 }
  0xaa   : > { %14033 = vmatprep.subr.msk.bf16.mxu1 %vm314_vm1, %v525_v46  ;;  %14032 = vmatmul.mubr.msk.bf16.vlgmr.msra.gmra.mrb[0].mxu0 %vm310_vm2, %v252_v44 }
  0xab   : > { %599 = vmatpush1.bf16.msra.mxu1 %v540_v47  ;;  %v516_v48 = vpop.permute.xlu1 %515  ;;  %v514_v49 = vpop.permute.xlu0 %513  ;;  %671 = vmatprep.mubr.bf16.mxu0 %v15133_v7 }
  0xac   : > { %v526_v50 = vsel %vm521_vm3, %v512_v42, %v514_v49  ;;  %v527_v51 = vsel %vm521_vm3, %v514_v49, %v516_v48 }
  0xad   : > { %2093 = vrot.lane.b32.xlu1 %v15263_v5, %s15141_s11  ;;  %2091 = vrot.lane.b32.xlu0 %v15255_v3, %s15141_s11  ;;  %v546_v52 = vsel %vm314_vm1, %v526_v50, 0 }
  0xae   : > { %14035 = vmatprep.subr.msk.bf16.mxu0 %vm314_vm1, %v527_v51  ;;  %14034 = vmatmul.mubr.msk.bf16.vlgmr.msra.gmra.mrb[0].mxu1 %vm310_vm2, %v252_v44 }
  0xaf   : > { %640 = vmatpush1.bf16.msra.mxu0 %v546_v52  ;;  %v520_v53 = vpop.permute.xlu1 %519  ;;  %v518_v54 = vpop.permute.xlu0 %517  ;;  %712 = vmatprep.mubr.bf16.mxu1 %v15133_v7 }
  0xb0   : > { %v528_v55 = vsel %vm521_vm3, %v516_v48, %v518_v54  ;;  %v529_v56 = vsel %vm521_vm3, %v518_v54, %v520_v53 }
  0xb1   : > { %2097 = vrot.lane.b32.xlu1 %v15261_v4, %s15141_s11  ;;  %2095 = vrot.lane.b32.xlu0 %v15253_v2, %s15141_s11  ;;  %v552_v57 = vsel %vm314_vm1, %v528_v55, 0 }
  0xb2   : > { %14037 = vmatprep.subr.msk.bf16.mxu1 %vm314_vm1, %v529_v56  ;;  %14036 = vmatmul.mubr.msk.bf16.vlgmr.msra.gmra.mrb[4].mxu0 %vm310_vm2, %v252_v44 }
  0xb3   : > { %681 = vmatpush1.bf16.msra.mxu1 %v552_v57  ;;  %v726_v58 = vpop.permute.xlu1 %725  ;;  %v724_v59 = vpop.permute.xlu0 %723  ;;  %809 = vmatprep.mubr.bf16.mxu0 %v15133_v7 }
  0xb4   : > { %v742_v60 = vsel %vm741_vm4, %v724_v59, %v726_v58 }
  0xb5   : > { %2101 = vrot.lane.b32.xlu1 %v15275_v8, %s15141_s11  ;;  %2099 = vrot.lane.b32.xlu0 %v15277_v9, %s15141_s11  ;;  %v754_v0 = vsel %vm314_vm1, %v742_v60, 0 }
  0xb6   : > { %14038 = vmatmul.mubr.msk.bf16.vlgmr.msra.gmra.mrb[4].mxu1 %vm310_vm2, %v252_v44 }
  0xb7   : > { %v730_v61 = vpop.permute.xlu1 %729  ;;  %v728_v62 = vpop.permute.xlu0 %727  ;;  %850 = vmatprep.mubr.bf16.mxu1 %v15133_v7 }
  0xb8   : > { %v743_v63 = vsel %vm741_vm4, %v726_v58, %v728_v62  ;;  %v744_v1 = vsel %vm741_vm4, %v728_v62, %v730_v61  ;;  %v14057_v58 = vld [vmem:[%s18486_s1 + $0x10] sm:$0xf] }
  0xb9   : > { %2105 = vrot.lane.b32.xlu1 %v15284_v11, %s15141_s11  ;;  %2103 = vrot.lane.b32.xlu0 %v15286_v12, %s15141_s11  ;;  %v760_v16 = vsel %vm314_vm1, %v744_v1, 0 }
  0xba   : > { %14040 = vmatprep.subr.msk.bf16.mxu0 %vm314_vm1, %v743_v63 }
  0xbb   : > { %778 = vmatpush1.bf16.msra.mxu0 %v754_v0  ;;  %v734_v6 = vpop.permute.xlu1 %733  ;;  %v732_v10 = vpop.permute.xlu0 %731 }
  0xbc   : > { %v745_v15 = vsel %vm741_vm4, %v730_v61, %v732_v10  ;;  %v746_v17 = vsel %vm741_vm4, %v732_v10, %v734_v6 }
  0xbd   : > { %2319 = vrot.lane.b32.xlu1 %v15255_v3, %s15142_s28  ;;  %2107 = vrot.lane.b32.xlu0 %v15293_v13, %s15141_s11  ;;  %v766_v21 = vsel %vm314_vm1, %v746_v17, 0 }
  0xbe   : > { %14042 = vmatprep.subr.msk.bf16.mxu1 %vm314_vm1, %v745_v15  ;;  %14041 = vmatmul.mubr.msk.bf16.vlgmr.msra.gmra.mrb[0].mxu0 %vm310_vm2, %v14039_v14 }
  0xbf   : > { %819 = vmatpush1.bf16.msra.mxu1 %v760_v16  ;;  %v738_v18 = vpop.permute.xlu1 %737  ;;  %v736_v19 = vpop.permute.xlu0 %735  ;;  %891 = vmatprep.mubr.bf16.mxu0 %v15133_v7 }
  0xc0   : > { %v747_v20 = vsel %vm741_vm4, %v734_v6, %v736_v19  ;;  %v748_v22 = vsel %vm741_vm4, %v736_v19, %v738_v18 }
  0xc1   : > { %2323 = vrot.lane.b32.xlu1 %v15253_v2, %s15142_s28  ;;  %2321 = vrot.lane.b32.xlu0 %v15263_v5, %s15142_s28  ;;  %v772_v26 = vsel %vm314_vm1, %v748_v22, 0 }
  0xc2   : > { %14044 = vmatprep.subr.msk.bf16.mxu0 %vm314_vm1, %v747_v20  ;;  %14043 = vmatmul.mubr.msk.bf16.vlgmr.msra.gmra.mrb[0].mxu1 %vm310_vm2, %v14039_v14 }
  0xc3   : > { %860 = vmatpush1.bf16.msra.mxu0 %v766_v21  ;;  %v952_v23 = vpop.permute.xlu1 %951  ;;  %v740_v24 = vpop.permute.xlu0 %739  ;;  %932 = vmatprep.mubr.bf16.mxu1 %v15133_v7 }
  0xc4   : > { %v749_v25 = vsel %vm741_vm4, %v738_v18, %v740_v24  ;;  %v14066_v24 = vld [vmem:[%s18486_s1 + $0x14] sm:$0xf] }
  0xc5   : > { %2327 = vrot.lane.b32.xlu1 %v15277_v9, %s15142_s28  ;;  %2325 = vrot.lane.b32.xlu0 %v15261_v4, %s15142_s28 }
  0xc6   : > { %14046 = vmatprep.subr.msk.bf16.mxu1 %vm314_vm1, %v749_v25  ;;  %14045 = vmatmul.mubr.msk.bf16.vlgmr.msra.gmra.mrb[4].mxu0 %vm310_vm2, %v14039_v14 }
  0xc7   : > { %901 = vmatpush1.bf16.msra.mxu1 %v772_v26  ;;  %v956_v27 = vpop.permute.xlu1 %955  ;;  %v954_v28 = vpop.permute.xlu0 %953  ;;  %1037 = vmatprep.mubr.bf16.mxu0 %v15133_v7 }
  0xc8   : > { %v970_v29 = vsel %vm969_vm5, %v952_v23, %v954_v28  ;;  %v971_v30 = vsel %vm969_vm5, %v954_v28, %v956_v27 }
  0xc9   : > { %2331 = vrot.lane.b32.xlu1 %v15286_v12, %s15142_s28  ;;  %2329 = vrot.lane.b32.xlu0 %v15275_v8, %s15142_s28  ;;  %v982_v31 = vsel %vm314_vm1, %v970_v29, 0 }
  0xca   : > { %14049 = vmatprep.subr.msk.bf16.mxu0 %vm314_vm1, %v971_v30  ;;  %14047 = vmatmul.mubr.msk.bf16.vlgmr.msra.gmra.mrb[4].mxu1 %vm310_vm2, %v14039_v14 }
  0xcb   : > { %1006 = vmatpush1.bf16.msra.mxu0 %v982_v31  ;;  %v960_v32 = vpop.permute.xlu1 %959  ;;  %v958_v33 = vpop.permute.xlu0 %957  ;;  %1078 = vmatprep.mubr.bf16.mxu1 %v15133_v7 }
  0xcc   : > { %v972_v35 = vsel %vm969_vm5, %v956_v27, %v958_v33  ;;  %v973_v36 = vsel %vm969_vm5, %v958_v33, %v960_v32 }
  0xcd   : > { %2335 = vrot.lane.b32.xlu1 %v15293_v13, %s15142_s28  ;;  %2333 = vrot.lane.b32.xlu0 %v15284_v11, %s15142_s28  ;;  %v988_v37 = vsel %vm314_vm1, %v972_v35, 0 }
  0xce   : > { %14051 = vmatprep.subr.msk.bf16.mxu1 %vm314_vm1, %v973_v36  ;;  %14050 = vmatmul.mubr.msk.bf16.vlgmr.msra.gmra.mrb[0].mxu0 %vm310_vm2, %v14048_v34 }
  0xcf   : > { %1047 = vmatpush1.bf16.msra.mxu1 %v988_v37  ;;  %v964_v38 = vpop.permute.xlu1 %963  ;;  %v962_v39 = vpop.permute.xlu0 %961  ;;  %1119 = vmatprep.mubr.bf16.mxu0 %v15133_v7 }
  0xd0   : > { %v974_v40 = vsel %vm969_vm5, %v960_v32, %v962_v39  ;;  %v975_v41 = vsel %vm969_vm5, %v962_v39, %v964_v38 }
  0xd1   : > { %2549 = vrot.lane.b32.xlu1 %v15263_v5, %s18494_s12  ;;  %2547 = vrot.lane.b32.xlu0 %v15255_v3, %s18494_s12  ;;  %v994_v42 = vsel %vm314_vm1, %v974_v40, 0 }
  0xd2   : > { %14053 = vmatprep.subr.msk.bf16.mxu0 %vm314_vm1, %v975_v41  ;;  %14052 = vmatmul.mubr.msk.bf16.vlgmr.msra.gmra.mrb[0].mxu1 %vm310_vm2, %v14048_v34  ;;  %v3457_v41 = vld [vmem:[%s15249_s13 + $0xc] sm:$0xff] }
  0xd3   : > { %1088 = vmatpush1.bf16.msra.mxu0 %v994_v42  ;;  %v968_v43 = vpop.permute.xlu1 %967  ;;  %v966_v44 = vpop.permute.xlu0 %965  ;;  %1160 = vmatprep.mubr.bf16.mxu1 %v15133_v7 }
  0xd4   : > { %v976_v45 = vsel %vm969_vm5, %v964_v38, %v966_v44  ;;  %v977_v46 = vsel %vm969_vm5, %v966_v44, %v968_v43 }
  0xd5   : > { %2553 = vrot.lane.b32.xlu1 %v15261_v4, %s18494_s12  ;;  %2551 = vrot.lane.b32.xlu0 %v15253_v2, %s18494_s12  ;;  %v1000_v47 = vsel %vm314_vm1, %v976_v45, 0 }
  0xd6   : > { %14055 = vmatprep.subr.msk.bf16.mxu1 %vm314_vm1, %v977_v46  ;;  %14054 = vmatmul.mubr.msk.bf16.vlgmr.msra.gmra.mrb[4].mxu0 %vm310_vm2, %v14048_v34 }
  0xd7   : > { %1129 = vmatpush1.bf16.msra.mxu1 %v1000_v47  ;;  %v1182_v48 = vpop.permute.xlu1 %1181  ;;  %v1180_v49 = vpop.permute.xlu0 %1179  ;;  %1265 = vmatprep.mubr.bf16.mxu0 %v15133_v7 }
  0xd8   : > { %v1198_v50 = vsel %vm1197_vm6, %v1180_v49, %v1182_v48 }
  0xd9   : > { %2557 = vrot.lane.b32.xlu1 %v15275_v8, %s18494_s12  ;;  %2555 = vrot.lane.b32.xlu0 %v15277_v9, %s18494_s12  ;;  %v1210_v54 = vsel %vm314_vm1, %v1198_v50, 0 }
  0xda   : > { %14056 = vmatmul.mubr.msk.bf16.vlgmr.msra.gmra.mrb[4].mxu1 %vm310_vm2, %v14048_v34 }
  0xdb   : > { %v1186_v51 = vpop.permute.xlu1 %1185  ;;  %v1184_v52 = vpop.permute.xlu0 %1183  ;;  %1306 = vmatprep.mubr.bf16.mxu1 %v15133_v7 }
  0xdc   : > { %v1199_v53 = vsel %vm1197_vm6, %v1182_v48, %v1184_v52  ;;  %v1200_v55 = vsel %vm1197_vm6, %v1184_v52, %v1186_v51  ;;  %v3458_v48 = vld [vmem:[%s15249_s13 + $0x14] sm:$0xff] }
  0xdd   : > { %2561 = vrot.lane.b32.xlu1 %v15284_v11, %s18494_s12  ;;  %2559 = vrot.lane.b32.xlu0 %v15286_v12, %s18494_s12  ;;  %v1216_v60 = vsel %vm314_vm1, %v1200_v55, 0  ;;  %v15705_v52 = vcombine.low %v3458_v48, %v3458_v48  ;;  %v3459_v55 = vld [vmem:[%s15249_s13 + $0x1c] sm:$0xff] }
  0xde   : > { %14058 = vmatprep.subr.msk.bf16.mxu0 %vm314_vm1, %v1199_v53  ;;  %v15707_v53 = vcombine.high %v3457_v41, %v3457_v41 }
  0xdf   : > { %1234 = vmatpush1.bf16.msra.mxu0 %v1210_v54  ;;  %v1190_v56 = vpop.permute.xlu1 %1189  ;;  %v1188_v57 = vpop.permute.xlu0 %1187 }
  0xe0   : > { %v1201_v59 = vsel %vm1197_vm6, %v1186_v51, %v1188_v57  ;;  %v1202_v61 = vsel %vm1197_vm6, %v1188_v57, %v1190_v56 }
  0xe1   : > { %2775 = vrot.lane.b32.xlu1 %v15255_v3, %s18492_s10  ;;  %2563 = vrot.lane.b32.xlu0 %v15293_v13, %s18494_s12  ;;  %v1222_v1 = vsel %vm314_vm1, %v1202_v61, 0  ;;  %s18496_s12 = smov 127   ;;  %v15722_v61 = vcombine.high %v3458_v48, %v3458_v48 }
  0xe2   : > { %14060 = vmatprep.subr.msk.bf16.mxu1 %vm314_vm1, %v1201_v59  ;;  %14059 = vmatmul.mubr.msk.bf16.vlgmr.msra.gmra.mrb[0].mxu0 %vm310_vm2, %v14057_v58 }
  0xe3   : > { %1275 = vmatpush1.bf16.msra.mxu1 %v1216_v60  ;;  %v1194_v62 = vpop.permute.xlu1 %1193  ;;  %v1192_v63 = vpop.permute.xlu0 %1191  ;;  %1347 = vmatprep.mubr.bf16.mxu0 %v15133_v7  ;;  %v15720_v60 = vcombine.low %v3459_v55, %v3459_v55 }
  0xe4   : > { %v1203_v0 = vsel %vm1197_vm6, %v1190_v56, %v1192_v63  ;;  %v1204_v6 = vsel %vm1197_vm6, %v1192_v63, %v1194_v62 }
  0xe5   : > { %2779 = vrot.lane.b32.xlu1 %v15253_v2, %s18492_s10  ;;  %2777 = vrot.lane.b32.xlu0 %v15263_v5, %s18492_s10  ;;  %v1228_v16 = vsel %vm314_vm1, %v1204_v6, 0 }
  0xe6   : > { %14062 = vmatprep.subr.msk.bf16.mxu0 %vm314_vm1, %v1203_v0  ;;  %14061 = vmatmul.mubr.msk.bf16.vlgmr.msra.gmra.mrb[0].mxu1 %vm310_vm2, %v14057_v58 }
  0xe7   : > { %1316 = vmatpush1.bf16.msra.mxu0 %v1222_v1  ;;  %v1408_v10 = vpop.permute.xlu1 %1407  ;;  %v1196_v14 = vpop.permute.xlu0 %1195  ;;  %1388 = vmatprep.mubr.bf16.mxu1 %v15133_v7 }
  0xe8   : > { %v1205_v15 = vsel %vm1197_vm6, %v1194_v62, %v1196_v14  ;;  %v15736_v14 = vld [vmem:[%s15249_s13 + $0x24] ss:$0 sps:$4 sm:$0xff]  }
  0xe9   : > { %2783 = vrot.lane.b32.xlu1 %v15277_v9, %s18492_s10  ;;  %2781 = vrot.lane.b32.xlu0 %v15261_v4, %s18492_s10 }
  0xea   : > { %14064 = vmatprep.subr.msk.bf16.mxu1 %vm314_vm1, %v1205_v15  ;;  %14063 = vmatmul.mubr.msk.bf16.vlgmr.msra.gmra.mrb[4].mxu0 %vm310_vm2, %v14057_v58  ;;  %v15738_v15 = vcombine.high %v3459_v55, %v3459_v55 }
  0xeb   : > { %1357 = vmatpush1.bf16.msra.mxu1 %v1228_v16  ;;  %v1412_v17 = vpop.permute.xlu1 %1411  ;;  %v1410_v18 = vpop.permute.xlu0 %1409  ;;  %1493 = vmatprep.mubr.bf16.mxu0 %v15133_v7 }
  0xec   : > { %v1426_v19 = vsel %vm1425_vm7, %v1408_v10, %v1410_v18  ;;  %v1427_v20 = vsel %vm1425_vm7, %v1410_v18, %v1412_v17  ;;  %v14084_v18 = vld [vmem:[%s18486_s1 + $0x1c] sm:$0xf] }
  0xed   : > { %2787 = vrot.lane.b32.xlu1 %v15286_v12, %s18492_s10  ;;  %2785 = vrot.lane.b32.xlu0 %v15275_v8, %s18492_s10  ;;  %v1438_v21 = vsel %vm314_vm1, %v1426_v19, 0 }
  0xee   : > { %14067 = vmatprep.subr.msk.bf16.mxu0 %vm314_vm1, %v1427_v20  ;;  %14065 = vmatmul.mubr.msk.bf16.vlgmr.msra.gmra.mrb[4].mxu1 %vm310_vm2, %v14057_v58 }
  0xef   : > { %1462 = vmatpush1.bf16.msra.mxu0 %v1438_v21  ;;  %v1416_v22 = vpop.permute.xlu1 %1415  ;;  %v1414_v23 = vpop.permute.xlu0 %1413  ;;  %1534 = vmatprep.mubr.bf16.mxu1 %v15133_v7 }
  0xf0   : > { %v1428_v25 = vsel %vm1425_vm7, %v1412_v17, %v1414_v23  ;;  %v1429_v26 = vsel %vm1425_vm7, %v1414_v23, %v1416_v22 }
  0xf1   : > { %2791 = vrot.lane.b32.xlu1 %v15293_v13, %s18492_s10  ;;  %2789 = vrot.lane.b32.xlu0 %v15284_v11, %s18492_s10  ;;  %v1444_v27 = vsel %vm314_vm1, %v1428_v25, 0  ;;  %s18502_s10 = smov 119  }
  0xf2   : > { %14069 = vmatprep.subr.msk.bf16.mxu1 %vm314_vm1, %v1429_v26  ;;  %14068 = vmatmul.mubr.msk.bf16.vlgmr.msra.gmra.mrb[0].mxu0 %vm310_vm2, %v14066_v24 }
  0xf3   : > { %1503 = vmatpush1.bf16.msra.mxu1 %v1444_v27  ;;  %v1420_v28 = vpop.permute.xlu1 %1419  ;;  %v1418_v29 = vpop.permute.xlu0 %1417  ;;  %1575 = vmatprep.mubr.bf16.mxu0 %v15133_v7 }
  0xf4   : > { %v1430_v30 = vsel %vm1425_vm7, %v1416_v22, %v1418_v29  ;;  %v1431_v31 = vsel %vm1425_vm7, %v1418_v29, %v1420_v28 }
  0xf5   : > { %3005 = vrot.lane.b32.xlu1 %v15263_v5, %s18498_s26  ;;  %3003 = vrot.lane.b32.xlu0 %v15255_v3, %s18498_s26  ;;  %v1450_v32 = vsel %vm314_vm1, %v1430_v30, 0 }
  0xf6   : > { %14071 = vmatprep.subr.msk.bf16.mxu0 %vm314_vm1, %v1431_v31  ;;  %14070 = vmatmul.mubr.msk.bf16.vlgmr.msra.gmra.mrb[0].mxu1 %vm310_vm2, %v14066_v24 }
  0xf7   : > { %1544 = vmatpush1.bf16.msra.mxu0 %v1450_v32  ;;  %v1424_v33 = vpop.permute.xlu1 %1423  ;;  %v1422_v34 = vpop.permute.xlu0 %1421  ;;  %1616 = vmatprep.mubr.bf16.mxu1 %v15133_v7 }
  0xf8   : > { %v1432_v35 = vsel %vm1425_vm7, %v1420_v28, %v1422_v34  ;;  %v1433_v36 = vsel %vm1425_vm7, %v1422_v34, %v1424_v33 }
  0xf9   : > { %3009 = vrot.lane.b32.xlu1 %v15261_v4, %s18498_s26  ;;  %3007 = vrot.lane.b32.xlu0 %v15253_v2, %s18498_s26  ;;  %v1456_v3 = vsel %vm314_vm1, %v1432_v35, 0  ;;  %v3456_v2 = vld [vmem:[%s15249_s13 + $0x4] sm:$0xff] }
  0xfa   : > { %14073 = vmatprep.subr.msk.bf16.mxu1 %vm314_vm1, %v1433_v36  ;;  %14072 = vmatmul.mubr.msk.bf16.vlgmr.msra.gmra.mrb[4].mxu0 %vm310_vm2, %v14066_v24  ;;  %v15692_v46 = vcombine.high %v3456_v2, %v3456_v2 }
  0xfb   : > { %1585 = vmatpush1.bf16.msra.mxu1 %v1456_v3  ;;  %v1638_v5 = vpop.permute.xlu1 %1637  ;;  %v1636_v37 = vpop.permute.xlu0 %1635  ;;  %1721 = vmatprep.mubr.bf16.mxu0 %v15133_v7 }
  0xfc   : > { %v1654_v4 = vsel %vm1653_vm8, %v1636_v37, %v1638_v5 }
  0xfd   : > { %3013 = vrot.lane.b32.xlu1 %v15275_v8, %s18498_s26  ;;  %3011 = vrot.lane.b32.xlu0 %v15277_v9, %s18498_s26  ;;  %v15676_v8 = vcombine.low %v3456_v2, %v3456_v2  ;;  %v1666_v9 = vsel %vm314_vm1, %v1654_v4, 0 }
  0xfe   : > { %14074 = vmatmul.mubr.msk.bf16.vlgmr.msra.gmra.mrb[4].mxu1 %vm310_vm2, %v14066_v24 }
  0xff   : > { %v1642_v38 = vpop.permute.xlu1 %1641  ;;  %v1640_v39 = vpop.permute.xlu0 %1639  ;;  %1762 = vmatprep.mubr.bf16.mxu1 %v15133_v7 }
 0x100   : > { %v1655_v40 = vsel %vm1653_vm8, %v1638_v5, %v1640_v39  ;;  %v1656_v42 = vsel %vm1653_vm8, %v1640_v39, %v1642_v38 }
 0x101   : > { %3017 = vrot.lane.b32.xlu1 %v15284_v11, %s18498_s26  ;;  %3015 = vrot.lane.b32.xlu0 %v15286_v12, %s18498_s26  ;;  %v14075_v11 = vld [vmem:[%s18486_s1 + $0x18] sm:$0xf]  ;;  %v15690_v12 = vcombine.low %v3457_v41, %v3457_v41  ;;  %v1672_v47 = vsel %vm314_vm1, %v1656_v42, 0 }
 0x102   : > { %14076 = vmatprep.subr.msk.bf16.mxu0 %vm314_vm1, %v1655_v40 }
 0x103   : > { %1690 = vmatpush1.bf16.msra.mxu0 %v1666_v9  ;;  %v1646_v43 = vpop.permute.xlu1 %1645  ;;  %v1644_v44 = vpop.permute.xlu0 %1643 }
 0x104   : > { %v1657_v45 = vsel %vm1653_vm8, %v1642_v38, %v1644_v44  ;;  %v1658_v49 = vsel %vm1653_vm8, %v1644_v44, %v1646_v43  ;;  %v14093_v38 = vld [vmem:[%s18486_s1 + $0x20] sm:$0xf] }
 0x105   : > { %3484 = vrot.lane.b32.xlu1 %v15676_v8, %s18496_s12  ;;  %3019 = vrot.lane.b32.xlu0 %v15293_v13, %s18498_s26  ;;  %v1678_v54 = vsel %vm314_vm1, %v1658_v49, 0  ;;  %s18500_s26 = smov 118  }
 0x106   : > { %14078 = vmatprep.subr.msk.bf16.mxu1 %vm314_vm1, %v1657_v45  ;;  %14077 = vmatmul.mubr.msk.bf16.vlgmr.msra.gmra.mrb[0].mxu0 %vm310_vm2, %v14075_v11 }
 0x107   : > { %1731 = vmatpush1.bf16.msra.mxu1 %v1672_v47  ;;  %v1650_v50 = vpop.permute.xlu1 %1649  ;;  %v1648_v51 = vpop.permute.xlu0 %1647  ;;  %1803 = vmatprep.mubr.bf16.mxu0 %v15133_v7 }
 0x108   : > { %v1659_v13 = vsel %vm1653_vm8, %v1646_v43, %v1648_v51  ;;  %v1660_v56 = vsel %vm1653_vm8, %v1648_v51, %v1650_v50 }
 0x109   : > { %3488 = vrot.lane.b32.xlu1 %v15690_v12, %s18496_s12  ;;  %3486 = vrot.lane.b32.xlu0 %v15692_v46, %s18496_s12  ;;  %v1684_v62 = vsel %vm314_vm1, %v1660_v56, 0 }
 0x10a   : > { %14080 = vmatprep.subr.msk.bf16.mxu0 %vm314_vm1, %v1659_v13  ;;  %14079 = vmatmul.mubr.msk.bf16.vlgmr.msra.gmra.mrb[0].mxu1 %vm310_vm2, %v14075_v11 }
 0x10b   : > { %1772 = vmatpush1.bf16.msra.mxu0 %v1678_v54  ;;  %v1864_v57 = vpop.permute.xlu1 %1863  ;;  %v1652_v58 = vpop.permute.xlu0 %1651  ;;  %1844 = vmatprep.mubr.bf16.mxu1 %v15133_v7 }
 0x10c   : > { %v1661_v59 = vsel %vm1653_vm8, %v1650_v50, %v1652_v58  ;;  %v14102_v58 = vld [vmem:[%s18486_s1 + $0x24] sm:$0xf] }
 0x10d   : > { %3492 = vrot.lane.b32.xlu1 %v15705_v52, %s18496_s12  ;;  %3490 = vrot.lane.b32.xlu0 %v15707_v53, %s18496_s12 }
 0x10e   : > { %14082 = vmatprep.subr.msk.bf16.mxu1 %vm314_vm1, %v1661_v59  ;;  %14081 = vmatmul.mubr.msk.bf16.vlgmr.msra.gmra.mrb[4].mxu0 %vm310_vm2, %v14075_v11 }
 0x10f   : > { %1813 = vmatpush1.bf16.msra.mxu1 %v1684_v62  ;;  %v1868_v63 = vpop.permute.xlu1 %1867  ;;  %v1866_v0 = vpop.permute.xlu0 %1865  ;;  %1949 = vmatprep.mubr.bf16.mxu0 %v15133_v7 }
 0x110   : > { %v1882_v1 = vsel %vm1881_vm9, %v1864_v57, %v1866_v0  ;;  %v1883_v6 = vsel %vm1881_vm9, %v1866_v0, %v1868_v63 }
 0x111   : > { %3496 = vrot.lane.b32.xlu1 %v15720_v60, %s18496_s12  ;;  %3494 = vrot.lane.b32.xlu0 %v15722_v61, %s18496_s12  ;;  %v1894_v10 = vsel %vm314_vm1, %v1882_v1, 0 }
 0x112   : > { %14085 = vmatprep.subr.msk.bf16.mxu0 %vm314_vm1, %v1883_v6  ;;  %14083 = vmatmul.mubr.msk.bf16.vlgmr.msra.gmra.mrb[4].mxu1 %vm310_vm2, %v14075_v11 }
 0x113   : > { %1918 = vmatpush1.bf16.msra.mxu0 %v1894_v10  ;;  %v1872_v16 = vpop.permute.xlu1 %1871  ;;  %v1870_v17 = vpop.permute.xlu0 %1869  ;;  %1990 = vmatprep.mubr.bf16.mxu1 %v15133_v7 }
 0x114   : > { %v1884_v19 = vsel %vm1881_vm9, %v1868_v63, %v1870_v17  ;;  %v1885_v20 = vsel %vm1881_vm9, %v1870_v17, %v1872_v16 }
 0x115   : > { %3500 = vrot.lane.b32.xlu1 %v15736_v14, %s18496_s12  ;;  %3498 = vrot.lane.b32.xlu0 %v15738_v15, %s18496_s12  ;;  %v1900_v21 = vsel %vm314_vm1, %v1884_v19, 0  ;;  %s18506_s12 = smov 117  }
 0x116   : > { %14087 = vmatprep.subr.msk.bf16.mxu1 %vm314_vm1, %v1885_v20  ;;  %14086 = vmatmul.mubr.msk.bf16.vlgmr.msra.gmra.mrb[0].mxu0 %vm310_vm2, %v14084_v18 }
 0x117   : > { %1959 = vmatpush1.bf16.msra.mxu1 %v1900_v21  ;;  %v1876_v22 = vpop.permute.xlu1 %1875  ;;  %v1874_v23 = vpop.permute.xlu0 %1873  ;;  %2031 = vmatprep.mubr.bf16.mxu0 %v15133_v7 }
 0x118   : > { %v1886_v24 = vsel %vm1881_vm9, %v1872_v16, %v1874_v23  ;;  %v1887_v25 = vsel %vm1881_vm9, %v1874_v23, %v1876_v22 }
 0x119   : > { %3714 = vrot.lane.b32.xlu1 %v15692_v46, %s18502_s10  ;;  %3712 = vrot.lane.b32.xlu0 %v15676_v8, %s18502_s10  ;;  %v1906_v26 = vsel %vm314_vm1, %v1886_v24, 0 }
 0x11a   : > { %14089 = vmatprep.subr.msk.bf16.mxu0 %vm314_vm1, %v1887_v25  ;;  %14088 = vmatmul.mubr.msk.bf16.vlgmr.msra.gmra.mrb[0].mxu1 %vm310_vm2, %v14084_v18 }
 0x11b   : > { %2000 = vmatpush1.bf16.msra.mxu0 %v1906_v26  ;;  %v1880_v27 = vpop.permute.xlu1 %1879  ;;  %v1878_v28 = vpop.permute.xlu0 %1877  ;;  %2072 = vmatprep.mubr.bf16.mxu1 %v15133_v7 }
 0x11c   : > { %v1888_v29 = vsel %vm1881_vm9, %v1876_v22, %v1878_v28  ;;  %v1889_v30 = vsel %vm1881_vm9, %v1878_v28, %v1880_v27 }
 0x11d   : > { %3718 = vrot.lane.b32.xlu1 %v15707_v53, %s18502_s10  ;;  %3716 = vrot.lane.b32.xlu0 %v15690_v12, %s18502_s10  ;;  %v1912_v31 = vsel %vm314_vm1, %v1888_v29, 0 }
 0x11e   : > { %14091 = vmatprep.subr.msk.bf16.mxu1 %vm314_vm1, %v1889_v30  ;;  %14090 = vmatmul.mubr.msk.bf16.vlgmr.msra.gmra.mrb[4].mxu0 %vm310_vm2, %v14084_v18 }
 0x11f   : > { %2041 = vmatpush1.bf16.msra.mxu1 %v1912_v31  ;;  %v2094_v32 = vpop.permute.xlu1 %2093  ;;  %v2092_v33 = vpop.permute.xlu0 %2091  ;;  %2177 = vmatprep.mubr.bf16.mxu0 %v15133_v7 }
 0x120   : > { %v2110_v34 = vsel %vm2109_vm10, %v2092_v33, %v2094_v32 }
 0x121   : > { %3722 = vrot.lane.b32.xlu1 %v15722_v61, %s18502_s10  ;;  %3720 = vrot.lane.b32.xlu0 %v15705_v52, %s18502_s10  ;;  %v2122_v5 = vsel %vm314_vm1, %v2110_v34, 0 }
 0x122   : > { %14092 = vmatmul.mubr.msk.bf16.vlgmr.msra.gmra.mrb[4].mxu1 %vm310_vm2, %v14084_v18 }
 0x123   : > { %v2098_v35 = vpop.permute.xlu1 %2097  ;;  %v2096_v36 = vpop.permute.xlu0 %2095  ;;  %2218 = vmatprep.mubr.bf16.mxu1 %v15133_v7 }
 0x124   : > { %v2111_v3 = vsel %vm2109_vm10, %v2094_v32, %v2096_v36  ;;  %v2112_v37 = vsel %vm2109_vm10, %v2096_v36, %v2098_v35  ;;  %v14111_v32 = vld [vmem:[%s18486_s1 + $0x28] sm:$0xf] }
 0x125   : > { %3726 = vrot.lane.b32.xlu1 %v15738_v15, %s18502_s10  ;;  %3724 = vrot.lane.b32.xlu0 %v15720_v60, %s18502_s10  ;;  %v2128_v40 = vsel %vm314_vm1, %v2112_v37, 0 }
 0x126   : > { %14094 = vmatprep.subr.msk.bf16.mxu0 %vm314_vm1, %v2111_v3 }
 0x127   : > { %2146 = vmatpush1.bf16.msra.mxu0 %v2122_v5  ;;  %v2102_v2 = vpop.permute.xlu1 %2101  ;;  %v2100_v4 = vpop.permute.xlu0 %2099 }
 0x128   : > { %v2113_v39 = vsel %vm2109_vm10, %v2098_v35, %v2100_v4  ;;  %v2114_v9 = vsel %vm2109_vm10, %v2100_v4, %v2102_v2 }
 0x129   : > { %3940 = vrot.lane.b32.xlu1 %v15676_v8, %s18500_s26  ;;  %3728 = vrot.lane.b32.xlu0 %v15736_v14, %s18502_s10  ;;  %v2134_v44 = vsel %vm314_vm1, %v2114_v9, 0  ;;  %s18504_s10 = smov 39  }
 0x12a   : > { %14096 = vmatprep.subr.msk.bf16.mxu1 %vm314_vm1, %v2113_v39  ;;  %14095 = vmatmul.mubr.msk.bf16.vlgmr.msra.gmra.mrb[0].mxu0 %vm310_vm2, %v14093_v38 }
 0x12b   : > { %2187 = vmatpush1.bf16.msra.mxu1 %v2128_v40  ;;  %v2106_v41 = vpop.permute.xlu1 %2105  ;;  %v2104_v42 = vpop.permute.xlu0 %2103  ;;  %2259 = vmatprep.mubr.bf16.mxu0 %v15133_v7 }
 0x12c   : > { %v2115_v43 = vsel %vm2109_vm10, %v2102_v2, %v2104_v42  ;;  %v2116_v11 = vsel %vm2109_vm10, %v2104_v42, %v2106_v41 }
 0x12d   : > { %3944 = vrot.lane.b32.xlu1 %v15690_v12, %s18500_s26  ;;  %3942 = vrot.lane.b32.xlu0 %v15692_v46, %s18500_s26  ;;  %v2140_v49 = vsel %vm314_vm1, %v2116_v11, 0 }
 0x12e   : > { %14098 = vmatprep.subr.msk.bf16.mxu0 %vm314_vm1, %v2115_v43  ;;  %14097 = vmatmul.mubr.msk.bf16.vlgmr.msra.gmra.mrb[0].mxu1 %vm310_vm2, %v14093_v38 }
 0x12f   : > { %2228 = vmatpush1.bf16.msra.mxu0 %v2134_v44  ;;  %v2320_v45 = vpop.permute.xlu1 %2319  ;;  %v2108_v47 = vpop.permute.xlu0 %2107  ;;  %2300 = vmatprep.mubr.bf16.mxu1 %v15133_v7 }
 0x130   : > { %v2117_v48 = vsel %vm2109_vm10, %v2106_v41, %v2108_v47  ;;  %v14120_v47 = vld [vmem:[%s18486_s1 + $0x2c] sm:$0xf] }
 0x131   : > { %3948 = vrot.lane.b32.xlu1 %v15705_v52, %s18500_s26  ;;  %3946 = vrot.lane.b32.xlu0 %v15707_v53, %s18500_s26 }
 0x132   : > { %14100 = vmatprep.subr.msk.bf16.mxu1 %vm314_vm1, %v2117_v48  ;;  %14099 = vmatmul.mubr.msk.bf16.vlgmr.msra.gmra.mrb[4].mxu0 %vm310_vm2, %v14093_v38 }
 0x133   : > { %2269 = vmatpush1.bf16.msra.mxu1 %v2140_v49  ;;  %v2324_v50 = vpop.permute.xlu1 %2323  ;;  %v2322_v51 = vpop.permute.xlu0 %2321  ;;  %2405 = vmatprep.mubr.bf16.mxu0 %v15133_v7 }
 0x134   : > { %v2338_v13 = vsel %vm2337_vm11, %v2320_v45, %v2322_v51  ;;  %v2339_v54 = vsel %vm2337_vm11, %v2322_v51, %v2324_v50 }
 0x135   : > { %3952 = vrot.lane.b32.xlu1 %v15720_v60, %s18500_s26  ;;  %3950 = vrot.lane.b32.xlu0 %v15722_v61, %s18500_s26  ;;  %v2350_v55 = vsel %vm314_vm1, %v2338_v13, 0 }
 0x136   : > { %14103 = vmatprep.subr.msk.bf16.mxu0 %vm314_vm1, %v2339_v54  ;;  %14101 = vmatmul.mubr.msk.bf16.vlgmr.msra.gmra.mrb[4].mxu1 %vm310_vm2, %v14093_v38 }
 0x137   : > { %2374 = vmatpush1.bf16.msra.mxu0 %v2350_v55  ;;  %v2328_v56 = vpop.permute.xlu1 %2327  ;;  %v2326_v57 = vpop.permute.xlu0 %2325  ;;  %2446 = vmatprep.mubr.bf16.mxu1 %v15133_v7 }
 0x138   : > { %v2340_v59 = vsel %vm2337_vm11, %v2324_v50, %v2326_v57  ;;  %v2341_v62 = vsel %vm2337_vm11, %v2326_v57, %v2328_v56 }
 0x139   : > { %3956 = vrot.lane.b32.xlu1 %v15736_v14, %s18500_s26  ;;  %3954 = vrot.lane.b32.xlu0 %v15738_v15, %s18500_s26  ;;  %v2356_v63 = vsel %vm314_vm1, %v2340_v59, 0  ;;  %s18526_s26 = smov 38  }
 0x13a   : > { %14105 = vmatprep.subr.msk.bf16.mxu1 %vm314_vm1, %v2341_v62  ;;  %14104 = vmatmul.mubr.msk.bf16.vlgmr.msra.gmra.mrb[0].mxu0 %vm310_vm2, %v14102_v58 }
 0x13b   : > { %2415 = vmatpush1.bf16.msra.mxu1 %v2356_v63  ;;  %v2332_v0 = vpop.permute.xlu1 %2331  ;;  %v2330_v1 = vpop.permute.xlu0 %2329  ;;  %2487 = vmatprep.mubr.bf16.mxu0 %v15133_v7 }
 0x13c   : > { %v2342_v6 = vsel %vm2337_vm11, %v2328_v56, %v2330_v1  ;;  %v2343_v10 = vsel %vm2337_vm11, %v2330_v1, %v2332_v0 }
 0x13d   : > { %4170 = vrot.lane.b32.xlu1 %v15692_v46, %s18506_s12  ;;  %4168 = vrot.lane.b32.xlu0 %v15676_v8, %s18506_s12  ;;  %v2362_v16 = vsel %vm314_vm1, %v2342_v6, 0 }
 0x13e   : > { %14107 = vmatprep.subr.msk.bf16.mxu0 %vm314_vm1, %v2343_v10  ;;  %14106 = vmatmul.mubr.msk.bf16.vlgmr.msra.gmra.mrb[0].mxu1 %vm310_vm2, %v14102_v58 }
 0x13f   : > { %2456 = vmatpush1.bf16.msra.mxu0 %v2362_v16  ;;  %v2336_v17 = vpop.permute.xlu1 %2335  ;;  %v2334_v18 = vpop.permute.xlu0 %2333  ;;  %2528 = vmatprep.mubr.bf16.mxu1 %v15133_v7 }
 0x140   : > { %v2344_v19 = vsel %vm2337_vm11, %v2332_v0, %v2334_v18  ;;  %v2345_v20 = vsel %vm2337_vm11, %v2334_v18, %v2336_v17 }
 0x141   : > { %4174 = vrot.lane.b32.xlu1 %v15707_v53, %s18506_s12  ;;  %4172 = vrot.lane.b32.xlu0 %v15690_v12, %s18506_s12  ;;  %v2368_v21 = vsel %vm314_vm1, %v2344_v19, 0 }
 0x142   : > { %14109 = vmatprep.subr.msk.bf16.mxu1 %vm314_vm1, %v2345_v20  ;;  %14108 = vmatmul.mubr.msk.bf16.vlgmr.msra.gmra.mrb[4].mxu0 %vm310_vm2, %v14102_v58 }
 0x143   : > { %2497 = vmatpush1.bf16.msra.mxu1 %v2368_v21  ;;  %v2550_v22 = vpop.permute.xlu1 %2549  ;;  %v2548_v23 = vpop.permute.xlu0 %2547  ;;  %2633 = vmatprep.mubr.bf16.mxu0 %v15133_v7 }
 0x144   : > { %v2566_v24 = vsel %vm2565_vm12, %v2548_v23, %v2550_v22 }
 0x145   : > { %4178 = vrot.lane.b32.xlu1 %v15722_v61, %s18506_s12  ;;  %4176 = vrot.lane.b32.xlu0 %v15705_v52, %s18506_s12  ;;  %v2578_v28 = vsel %vm314_vm1, %v2566_v24, 0 }
 0x146   : > { %14110 = vmatmul.mubr.msk.bf16.vlgmr.msra.gmra.mrb[4].mxu1 %vm310_vm2, %v14102_v58 }
 0x147   : > { %v2554_v25 = vpop.permute.xlu1 %2553  ;;  %v2552_v26 = vpop.permute.xlu0 %2551  ;;  %2674 = vmatprep.mubr.bf16.mxu1 %v15133_v7 }
 0x148   : > { %v2567_v27 = vsel %vm2565_vm12, %v2550_v22, %v2552_v26  ;;  %v2568_v29 = vsel %vm2565_vm12, %v2552_v26, %v2554_v25  ;;  %v14129_v22 = vld [vmem:[%s18486_s1 + $0x30] sm:$0xf] }
 0x149   : > { %4182 = vrot.lane.b32.xlu1 %v15738_v15, %s18506_s12  ;;  %4180 = vrot.lane.b32.xlu0 %v15720_v60, %s18506_s12  ;;  %v2584_v34 = vsel %vm314_vm1, %v2568_v29, 0 }
 0x14a   : > { %14112 = vmatprep.subr.msk.bf16.mxu0 %vm314_vm1, %v2567_v27 }
 0x14b   : > { %2602 = vmatpush1.bf16.msra.mxu0 %v2578_v28  ;;  %v2558_v30 = vpop.permute.xlu1 %2557  ;;  %v2556_v31 = vpop.permute.xlu0 %2555 }
 0x14c   : > { %v2569_v33 = vsel %vm2565_vm12, %v2554_v25, %v2556_v31  ;;  %v2570_v35 = vsel %vm2565_vm12, %v2556_v31, %v2558_v30 }
 0x14d   : > { %4396 = vrot.lane.b32.xlu1 %v15676_v8, %s18504_s10  ;;  %4184 = vrot.lane.b32.xlu0 %v15736_v14, %s18506_s12  ;;  %v2590_v37 = vsel %vm314_vm1, %v2570_v35, 0  ;;  %s18508_s12 = smov 37  }
 0x14e   : > { %14114 = vmatprep.subr.msk.bf16.mxu1 %vm314_vm1, %v2569_v33  ;;  %14113 = vmatmul.mubr.msk.bf16.vlgmr.msra.gmra.mrb[0].mxu0 %vm310_vm2, %v14111_v32 }
 0x14f   : > { %2643 = vmatpush1.bf16.msra.mxu1 %v2584_v34  ;;  %v2562_v36 = vpop.permute.xlu1 %2561  ;;  %v2560_v3 = vpop.permute.xlu0 %2559  ;;  %2715 = vmatprep.mubr.bf16.mxu0 %v15133_v7  ;;  %v3259_v34 = vsel %vm314_vm1, %v15676_v8, 0 }
 0x150   : > { %v2571_v5 = vsel %vm2565_vm12, %v2558_v30, %v2560_v3  ;;  %v2572_v2 = vsel %vm2565_vm12, %v2560_v3, %v2562_v36 }
 0x151   : > { %4400 = vrot.lane.b32.xlu1 %v15690_v12, %s18504_s10  ;;  %4398 = vrot.lane.b32.xlu0 %v15692_v46, %s18504_s10  ;;  %v2596_v40 = vsel %vm314_vm1, %v2572_v2, 0 }
 0x152   : > { %14116 = vmatprep.subr.msk.bf16.mxu0 %vm314_vm1, %v2571_v5  ;;  %14115 = vmatmul.mubr.msk.bf16.vlgmr.msra.gmra.mrb[0].mxu1 %vm310_vm2, %v14111_v32  ;;  %v3265_v5 = vsel %vm314_vm1, %v15690_v12, 0 }
 0x153   : > { %2684 = vmatpush1.bf16.msra.mxu0 %v2590_v37  ;;  %v2776_v4 = vpop.permute.xlu1 %2775  ;;  %v2564_v38 = vpop.permute.xlu0 %2563  ;;  %2756 = vmatprep.mubr.bf16.mxu1 %v15133_v7 }
 0x154   : > { %v2573_v39 = vsel %vm2565_vm12, %v2562_v36, %v2564_v38  ;;  %v3271_v38 = vsel %vm314_vm1, %v15705_v52, 0 }
 0x155   : > { %4404 = vrot.lane.b32.xlu1 %v15705_v52, %s18504_s10  ;;  %4402 = vrot.lane.b32.xlu0 %v15707_v53, %s18504_s10 }
 0x156   : > { %14118 = vmatprep.subr.msk.bf16.mxu1 %vm314_vm1, %v2573_v39  ;;  %14117 = vmatmul.mubr.msk.bf16.vlgmr.msra.gmra.mrb[4].mxu0 %vm310_vm2, %v14111_v32 }
 0x157   : > { %2725 = vmatpush1.bf16.msra.mxu1 %v2596_v40  ;;  %v2780_v9 = vpop.permute.xlu1 %2779  ;;  %v2778_v41 = vpop.permute.xlu0 %2777  ;;  %2861 = vmatprep.mubr.bf16.mxu0 %v15133_v7 }
 0x158   : > { %v2794_v42 = vsel %vm2793_vm13, %v2776_v4, %v2778_v41  ;;  %v2795_v43 = vsel %vm2793_vm13, %v2778_v41, %v2780_v9  ;;  %v14138_v4 = vld [vmem:[%s18486_s1 + $0x34] sm:$0xf]  ;;  %v3277_v41 = vsel %vm314_vm1, %v15720_v60, 0 }
 0x159   : > { %4408 = vrot.lane.b32.xlu1 %v15720_v60, %s18504_s10  ;;  %4406 = vrot.lane.b32.xlu0 %v15722_v61, %s18504_s10  ;;  %v2806_v44 = vsel %vm314_vm1, %v2794_v42, 0 }
 0x15a   : > { %14121 = vmatprep.subr.msk.bf16.mxu0 %vm314_vm1, %v2795_v43  ;;  %14119 = vmatmul.mubr.msk.bf16.vlgmr.msra.gmra.mrb[4].mxu1 %vm310_vm2, %v14111_v32 }
 0x15b   : > { %2830 = vmatpush1.bf16.msra.mxu0 %v2806_v44  ;;  %v2784_v11 = vpop.permute.xlu1 %2783  ;;  %v2782_v45 = vpop.permute.xlu0 %2781  ;;  %2902 = vmatprep.mubr.bf16.mxu1 %v15133_v7 }
 0x15c   : > { %v2796_v48 = vsel %vm2793_vm13, %v2780_v9, %v2782_v45  ;;  %v2797_v49 = vsel %vm2793_vm13, %v2782_v45, %v2784_v11 }
 0x15d   : > { %4412 = vrot.lane.b32.xlu1 %v15736_v14, %s18504_s10  ;;  %4410 = vrot.lane.b32.xlu0 %v15738_v15, %s18504_s10  ;;  %v2812_v50 = vsel %vm314_vm1, %v2796_v48, 0  ;;  %s18512_s10 = smov 29  }
 0x15e   : > { %14123 = vmatprep.subr.msk.bf16.mxu1 %vm314_vm1, %v2797_v49  ;;  %14122 = vmatmul.mubr.msk.bf16.vlgmr.msra.gmra.mrb[0].mxu0 %vm310_vm2, %v14120_v47 }
 0x15f   : > { %2871 = vmatpush1.bf16.msra.mxu1 %v2812_v50  ;;  %v2788_v51 = vpop.permute.xlu1 %2787  ;;  %v2786_v13 = vpop.permute.xlu0 %2785  ;;  %2943 = vmatprep.mubr.bf16.mxu0 %v15133_v7 }
 0x160   : > { %v2798_v54 = vsel %vm2793_vm13, %v2784_v11, %v2786_v13  ;;  %v2799_v55 = vsel %vm2793_vm13, %v2786_v13, %v2788_v51 }
 0x161   : > { %4626 = vrot.lane.b32.xlu1 %v15692_v46, %s18526_s26  ;;  %4624 = vrot.lane.b32.xlu0 %v15676_v8, %s18526_s26  ;;  %v2818_v56 = vsel %vm314_vm1, %v2798_v54, 0 }
 0x162   : > { %14125 = vmatprep.subr.msk.bf16.mxu0 %vm314_vm1, %v2799_v55  ;;  %14124 = vmatmul.mubr.msk.bf16.vlgmr.msra.gmra.mrb[0].mxu1 %vm310_vm2, %v14120_v47 }
 0x163   : > { %2912 = vmatpush1.bf16.msra.mxu0 %v2818_v56  ;;  %v2792_v57 = vpop.permute.xlu1 %2791  ;;  %v2790_v58 = vpop.permute.xlu0 %2789  ;;  %2984 = vmatprep.mubr.bf16.mxu1 %v15133_v7 }
 0x164   : > { %v2800_v59 = vsel %vm2793_vm13, %v2788_v51, %v2790_v58  ;;  %v2801_v62 = vsel %vm2793_vm13, %v2790_v58, %v2792_v57  ;;  %v14155_v57 = vld [vmem:[%s18486_s1 + $0x38] sm:$0xf] }
 0x165   : > { %4630 = vrot.lane.b32.xlu1 %v15707_v53, %s18526_s26  ;;  %4628 = vrot.lane.b32.xlu0 %v15690_v12, %s18526_s26  ;;  %v2824_v63 = vsel %vm314_vm1, %v2800_v59, 0 }
 0x166   : > { %14127 = vmatprep.subr.msk.bf16.mxu1 %vm314_vm1, %v2801_v62  ;;  %14126 = vmatmul.mubr.msk.bf16.vlgmr.msra.gmra.mrb[4].mxu0 %vm310_vm2, %v14120_v47 }
 0x167   : > { %2953 = vmatpush1.bf16.msra.mxu1 %v2824_v63  ;;  %v3006_v0 = vpop.permute.xlu1 %3005  ;;  %v3004_v1 = vpop.permute.xlu0 %3003  ;;  %3089 = vmatprep.mubr.bf16.mxu0 %v15133_v7 }
 0x168   : > { %v3022_v6 = vsel %vm18510_vm14, %v3004_v1, %v3006_v0 }
 0x169   : > { %4634 = vrot.lane.b32.xlu1 %v15722_v61, %s18526_s26  ;;  %4632 = vrot.lane.b32.xlu0 %v15705_v52, %s18526_s26  ;;  %v3034_v18 = vsel %vm314_vm1, %v3022_v6, 0 }
 0x16a   : > { %14128 = vmatmul.mubr.msk.bf16.vlgmr.msra.gmra.mrb[4].mxu1 %vm310_vm2, %v14120_v47 }
 0x16b   : > { %v3010_v10 = vpop.permute.xlu1 %3009  ;;  %v3008_v16 = vpop.permute.xlu0 %3007  ;;  %3130 = vmatprep.mubr.bf16.mxu1 %v15133_v7 }
 0x16c   : > { %v3023_v17 = vsel %vm18510_vm14, %v3006_v0, %v3008_v16  ;;  %v3024_v19 = vsel %vm18510_vm14, %v3008_v16, %v3010_v10 }
 0x16d   : > { %4638 = vrot.lane.b32.xlu1 %v15738_v15, %s18526_s26  ;;  %4636 = vrot.lane.b32.xlu0 %v15720_v60, %s18526_s26  ;;  %v3040_v24 = vsel %vm314_vm1, %v3024_v19, 0 }
 0x16e   : > { %14130 = vmatprep.subr.msk.bf16.mxu0 %vm314_vm1, %v3023_v17 }
 0x16f   : > { %3058 = vmatpush1.bf16.msra.mxu0 %v3034_v18  ;;  %v3014_v20 = vpop.permute.xlu1 %3013  ;;  %v3012_v21 = vpop.permute.xlu0 %3011 }
 0x170   : > { %v3025_v23 = vsel %vm18510_vm14, %v3010_v10, %v3012_v21  ;;  %v3026_v25 = vsel %vm18510_vm14, %v3012_v21, %v3014_v20 }
 0x171   : > { %4852 = vrot.lane.b32.xlu1 %v15676_v8, %s18508_s12  ;;  %4640 = vrot.lane.b32.xlu0 %v15736_v14, %s18526_s26  ;;  %v3046_v29 = vsel %vm314_vm1, %v3026_v25, 0 }
 0x172   : > { %14131 = vmatmul.mubr.msk.bf16.vlgmr.msra.gmra.mrb[0].mxu0 %vm310_vm2, %v14129_v22  ;;  %14132 = vmatprep.subr.msk.bf16.mxu1 %vm314_vm1, %v3025_v23 }
 0x173   : > { %3099 = vmatpush1.bf16.msra.mxu1 %v3040_v24  ;;  %v3018_v26 = vpop.permute.xlu1 %3017  ;;  %v3016_v27 = vpop.permute.xlu0 %3015  ;;  %3171 = vmatprep.mubr.bf16.mxu0 %v15133_v7 }
 0x174   : > { %v3027_v28 = vsel %vm18510_vm14, %v3014_v20, %v3016_v27  ;;  %v3028_v30 = vsel %vm18510_vm14, %v3016_v27, %v3018_v26 }
 0x175   : > { %4856 = vrot.lane.b32.xlu1 %v15690_v12, %s18508_s12  ;;  %4854 = vrot.lane.b32.xlu0 %v15692_v46, %s18508_s12  ;;  %v3052_v35 = vsel %vm314_vm1, %v3028_v30, 0 }
 0x176   : > { %14133 = vmatmul.mubr.msk.bf16.vlgmr.msra.gmra.mrb[0].mxu1 %vm310_vm2, %v14129_v22  ;;  %14134 = vmatprep.subr.msk.bf16.mxu0 %vm314_vm1, %v3027_v28  ;;  %v14173_v28 = vld [vmem:[%s18486_s1 + $0x3c] sm:$0xf] }
 0x177   : > { %3140 = vmatpush1.bf16.msra.mxu0 %v3046_v29  ;;  %v3485_v31 = vpop.permute.xlu1 %3484  ;;  %v3020_v32 = vpop.permute.xlu0 %3019  ;;  %3212 = vmatprep.mubr.bf16.mxu1 %v15133_v7 }
 0x178   : > { %v3029_v33 = vsel %vm18510_vm14, %v3018_v26, %v3020_v32  ;;  %14147 = vmatprep.subr.msk.bf16.mxu0 %vm314_vm1, %v15692_v46  ;;  %vm18516_vm14 = vcmask 973824  }
 0x179   : > { %4860 = vrot.lane.b32.xlu1 %v15705_v52, %s18508_s12  ;;  %4858 = vrot.lane.b32.xlu0 %v15707_v53, %s18508_s12 }
 0x17a   : > { %14135 = vmatmul.mubr.msk.bf16.vlgmr.msra.gmra.mrb[4].mxu0 %vm310_vm2, %v14129_v22  ;;  %14136 = vmatprep.subr.msk.bf16.mxu1 %vm314_vm1, %v3029_v33 }
 0x17b   : > { %3181 = vmatpush1.bf16.msra.mxu1 %v3052_v35  ;;  %v3489_v36 = vpop.permute.xlu1 %3488  ;;  %v3487_v3 = vpop.permute.xlu0 %3486  ;;  %3283 = vmatpush1.bf16.msra.mxu0 %v3259_v34 }
 0x17c   : > { %3314 = vmatprep.mubr.bf16.mxu0 %v15133_v7  ;;  %14149 = vmatprep.subr.msk.bf16.mxu1 %vm314_vm1, %v15707_v53  ;;  %v3504_v39 = vsel %vm18511_vm15, %v3487_v3, %v3489_v36  ;;  %v3503_v42 = vsel %vm18511_vm15, %v3485_v31, %v3487_v3 }
 0x17d   : > { %4864 = vrot.lane.b32.xlu1 %v15720_v60, %s18508_s12  ;;  %4862 = vrot.lane.b32.xlu0 %v15722_v61, %s18508_s12  ;;  %v3515_v45 = vsel %vm314_vm1, %v3503_v42, 0 }
 0x17e   : > { %14137 = vmatmul.mubr.msk.bf16.vlgmr.msra.gmra.mrb[4].mxu1 %vm310_vm2, %v14129_v22  ;;  %14151 = vmatprep.subr.msk.bf16.mxu0 %vm314_vm1, %v15722_v61 }
 0x17f   : > { %v3493_v37 = vpop.permute.xlu1 %3492  ;;  %v3491_v2 = vpop.permute.xlu0 %3490  ;;  %3324 = vmatpush1.bf16.msra.mxu1 %v3265_v5  ;;  %3355 = vmatprep.mubr.bf16.mxu1 %v15133_v7 }
 0x180   : > { %14153 = vmatprep.subr.msk.bf16.mxu1 %vm314_vm1, %v15738_v15  ;;  %v3506_v43 = vsel %vm18511_vm15, %v3491_v2, %v3493_v37  ;;  %v3505_v47 = vsel %vm18511_vm15, %v3489_v36, %v3491_v2 }
 0x181   : > { %4868 = vrot.lane.b32.xlu1 %v15736_v14, %s18508_s12  ;;  %4866 = vrot.lane.b32.xlu0 %v15738_v15, %s18508_s12  ;;  %v3521_v51 = vsel %vm314_vm1, %v3505_v47, 0  ;;  %s18514_s12 = smov 28  }
 0x182   : > { %14148 = vmatmul.mubr.msk.bf16.vlgmr.msra.gmra.mrb[0].mxu0 %vm310_vm2, %v14138_v4 }
 0x183   : > { %3365 = vmatpush1.bf16.msra.mxu0 %v3271_v38  ;;  %v3497_v40 = vpop.permute.xlu1 %3496  ;;  %v3495_v9 = vpop.permute.xlu0 %3494  ;;  %3396 = vmatprep.mubr.bf16.mxu0 %v15133_v7 }
 0x184   : > { %14165 = vmatprep.subr.msk.bf16.mxu0 %vm314_vm1, %v3504_v39  ;;  %v3508_v48 = vsel %vm18511_vm15, %v3495_v9, %v3497_v40  ;;  %v3507_v13 = vsel %vm18511_vm15, %v3493_v37, %v3495_v9 }
 0x185   : > { %5082 = vrot.lane.b32.xlu1 %v15692_v46, %s18512_s10  ;;  %5080 = vrot.lane.b32.xlu0 %v15676_v8, %s18512_s10  ;;  %v3527_v59 = vsel %vm314_vm1, %v3507_v13, 0 }
 0x186   : > { %14150 = vmatmul.mubr.msk.bf16.vlgmr.msra.gmra.mrb[0].mxu1 %vm310_vm2, %v14138_v4 }
 0x187   : > { %3406 = vmatpush1.bf16.msra.mxu1 %v3277_v41  ;;  %v3501_v44 = vpop.permute.xlu1 %3500  ;;  %v3499_v11 = vpop.permute.xlu0 %3498  ;;  %3437 = vmatprep.mubr.bf16.mxu1 %v15133_v7 }
 0x188   : > { %14167 = vmatprep.subr.msk.bf16.mxu1 %vm314_vm1, %v3506_v43  ;;  %v3510_v54 = vsel %vm18511_vm15, %v3499_v11, %v3501_v44  ;;  %v3509_v62 = vsel %vm18511_vm15, %v3497_v40, %v3499_v11  ;;  %vm18519_vm15 = vcmask 965632   ;;  %v14182_v44 = vld [vmem:[%s18486_s1 + $0x40] sm:$0xf] }
 0x189   : > { %5086 = vrot.lane.b32.xlu1 %v15707_v53, %s18512_s10  ;;  %5084 = vrot.lane.b32.xlu0 %v15690_v12, %s18512_s10  ;;  %v3533_v6 = vsel %vm314_vm1, %v3509_v62, 0 }
 0x18a   : > { %14152 = vmatmul.mubr.msk.bf16.vlgmr.msra.gmra.mrb[4].mxu0 %vm310_vm2, %v14138_v4 }
 0x18b   : > { %3539 = vmatpush1.bf16.msra.mxu0 %v3515_v45  ;;  %v3715_v49 = vpop.permute.xlu1 %3714  ;;  %v3713_v50 = vpop.permute.xlu0 %3712  ;;  %3570 = vmatprep.mubr.bf16.mxu0 %v15133_v7 }
 0x18c   : > { %14169 = vmatprep.subr.msk.bf16.mxu0 %vm314_vm1, %v3508_v48  ;;  %v3731_v10 = vsel %vm18516_vm14, %v3713_v50, %v3715_v49 }
 0x18d   : > { %5090 = vrot.lane.b32.xlu1 %v15722_v61, %s18512_s10  ;;  %5088 = vrot.lane.b32.xlu0 %v15705_v52, %s18512_s10  ;;  %v3743_v19 = vsel %vm314_vm1, %v3731_v10, 0 }
 0x18e   : > { %14154 = vmatmul.mubr.msk.bf16.vlgmr.msra.gmra.mrb[4].mxu1 %vm310_vm2, %v14138_v4 }
 0x18f   : > { %3580 = vmatpush1.bf16.msra.mxu1 %v3521_v51  ;;  %v3719_v55 = vpop.permute.xlu1 %3718  ;;  %v3717_v56 = vpop.permute.xlu0 %3716  ;;  %3611 = vmatprep.mubr.bf16.mxu1 %v15133_v7 }
 0x190   : > { %14171 = vmatprep.subr.msk.bf16.mxu1 %vm314_vm1, %v3510_v54  ;;  %v3732_v58 = vsel %vm18516_vm14, %v3715_v49, %v3717_v56  ;;  %v3733_v20 = vsel %vm18516_vm14, %v3717_v56, %v3719_v55 }
 0x191   : > { %5094 = vrot.lane.b32.xlu1 %v15738_v15, %s18512_s10  ;;  %5092 = vrot.lane.b32.xlu0 %v15720_v60, %s18512_s10  ;;  %v3749_v24 = vsel %vm314_vm1, %v3733_v20, 0 }
 0x192   : > { %14166 = vmatmul.mubr.msk.bf16.vlgmr.msra.gmra.mrb[0].mxu0 %vm310_vm2, %v14155_v57 }
 0x193   : > { %3621 = vmatpush1.bf16.msra.mxu0 %v3527_v59  ;;  %v3723_v63 = vpop.permute.xlu1 %3722  ;;  %v3721_v0 = vpop.permute.xlu0 %3720  ;;  %3652 = vmatprep.mubr.bf16.mxu0 %v15133_v7 }
 0x194   : > { %14174 = vmatprep.subr.msk.bf16.mxu0 %vm314_vm1, %v3732_v58  ;;  %v3734_v1 = vsel %vm18516_vm14, %v3719_v55, %v3721_v0  ;;  %v3735_v25 = vsel %vm18516_vm14, %v3721_v0, %v3723_v63 }
 0x195   : > { %5308 = vrot.lane.b32.xlu1 %v15676_v8, %s18514_s12  ;;  %5096 = vrot.lane.b32.xlu0 %v15736_v14, %s18512_s10  ;;  %v3755_v30 = vsel %vm314_vm1, %v3735_v25, 0  ;;  %s18517_s10 = smov 27  }
 0x196   : > { %14168 = vmatmul.mubr.msk.bf16.vlgmr.msra.gmra.mrb[0].mxu1 %vm310_vm2, %v14155_v57 }
 0x197   : > { %3662 = vmatpush1.bf16.msra.mxu1 %v3533_v6  ;;  %v3727_v16 = vpop.permute.xlu1 %3726  ;;  %v3725_v17 = vpop.permute.xlu0 %3724  ;;  %3693 = vmatprep.mubr.bf16.mxu1 %v15133_v7  ;;  %v14191_v6 = vld [vmem:[%s18486_s1 + $0x44] sm:$0xf] }
 0x198   : > { %14176 = vmatprep.subr.msk.bf16.mxu1 %vm314_vm1, %v3734_v1  ;;  %v3736_v18 = vsel %vm18516_vm14, %v3723_v63, %v3725_v17  ;;  %v3737_v31 = vsel %vm18516_vm14, %v3725_v17, %v3727_v16 }
 0x199   : > { %5312 = vrot.lane.b32.xlu1 %v15690_v12, %s18514_s12  ;;  %5310 = vrot.lane.b32.xlu0 %v15692_v46, %s18514_s12  ;;  %v3761_v35 = vsel %vm314_vm1, %v3737_v31, 0 }
 0x19a   : > { %14170 = vmatmul.mubr.msk.bf16.vlgmr.msra.gmra.mrb[4].mxu0 %vm310_vm2, %v14155_v57 }
 0x19b   : > { %3767 = vmatpush1.bf16.msra.mxu0 %v3743_v19  ;;  %v3941_v21 = vpop.permute.xlu1 %3940  ;;  %v3729_v22 = vpop.permute.xlu0 %3728  ;;  %3798 = vmatprep.mubr.bf16.mxu0 %v15133_v7 }
 0x19c   : > { %14178 = vmatprep.subr.msk.bf16.mxu0 %vm314_vm1, %v3736_v18  ;;  %v3738_v23 = vsel %vm18516_vm14, %v3727_v16, %v3729_v22  ;;  %vm18520_vm14 = vcmask 957440  }
 0x19d   : > { %5316 = vrot.lane.b32.xlu1 %v15705_v52, %s18514_s12  ;;  %5314 = vrot.lane.b32.xlu0 %v15707_v53, %s18514_s12 }
 0x19e   : > { %14172 = vmatmul.mubr.msk.bf16.vlgmr.msra.gmra.mrb[4].mxu1 %vm310_vm2, %v14155_v57 }
 0x19f   : > { %3808 = vmatpush1.bf16.msra.mxu1 %v3749_v24  ;;  %v3945_v26 = vpop.permute.xlu1 %3944  ;;  %v3943_v27 = vpop.permute.xlu0 %3942  ;;  %3839 = vmatprep.mubr.bf16.mxu1 %v15133_v7 }
 0x1a0   : > { %14180 = vmatprep.subr.msk.bf16.mxu1 %vm314_vm1, %v3738_v23  ;;  %v3960_v29 = vsel %vm18519_vm15, %v3943_v27, %v3945_v26  ;;  %v3959_v36 = vsel %vm18519_vm15, %v3941_v21, %v3943_v27 }
 0x1a1   : > { %5320 = vrot.lane.b32.xlu1 %v15720_v60, %s18514_s12  ;;  %5318 = vrot.lane.b32.xlu0 %v15722_v61, %s18514_s12  ;;  %v3971_v2 = vsel %vm314_vm1, %v3959_v36, 0  ;;  %v14200_v36 = vld [vmem:[%s18486_s1 + $0x48] sm:$0xf] }
 0x1a2   : > { %14175 = vmatmul.mubr.msk.bf16.vlgmr.msra.gmra.mrb[0].mxu0 %vm310_vm2, %v14173_v28 }
 0x1a3   : > { %3849 = vmatpush1.bf16.msra.mxu0 %v3755_v30  ;;  %v3949_v32 = vpop.permute.xlu1 %3948  ;;  %v3947_v33 = vpop.permute.xlu0 %3946  ;;  %3880 = vmatprep.mubr.bf16.mxu0 %v15133_v7 }
 0x1a4   : > { %14183 = vmatprep.subr.msk.bf16.mxu0 %vm314_vm1, %v3960_v29  ;;  %v3962_v34 = vsel %vm18519_vm15, %v3947_v33, %v3949_v32  ;;  %v3961_v4 = vsel %vm18519_vm15, %v3945_v26, %v3947_v33  ;;  %v16217_v26 = vld [vmem:[%s15249_s13 + $0x24] ss:$0 sps:$4 sm:$0xff]   ;;  %s18524_s13 = smov 18  }
 0x1a5   : > { %5324 = vrot.lane.b32.xlu1 %v15736_v14, %s18514_s12  ;;  %5322 = vrot.lane.b32.xlu0 %v15738_v15, %s18514_s12  ;;  %v3977_v9 = vsel %vm314_vm1, %v3961_v4, 0  ;;  %s18521_s12 = smov 19  }
 0x1a6   : > { %14177 = vmatmul.mubr.msk.bf16.vlgmr.msra.gmra.mrb[0].mxu1 %vm310_vm2, %v14173_v28 }
 0x1a7   : > { %3890 = vmatpush1.bf16.msra.mxu1 %v3761_v35  ;;  %v3953_v3 = vpop.permute.xlu1 %3952  ;;  %v3951_v5 = vpop.permute.xlu0 %3950  ;;  %3921 = vmatprep.mubr.bf16.mxu1 %v15133_v7 }
 0x1a8   : > { %14185 = vmatprep.subr.msk.bf16.mxu1 %vm314_vm1, %v3962_v34  ;;  %v3964_v37 = vsel %vm18519_vm15, %v3951_v5, %v3953_v3  ;;  %v3963_v41 = vsel %vm18519_vm15, %v3949_v32, %v3951_v5 }
 0x1a9   : > { %5538 = vrot.lane.b32.xlu1 %v15692_v46, %s18517_s10  ;;  %5536 = vrot.lane.b32.xlu0 %v15676_v8, %s18517_s10  ;;  %v3983_v11 = vsel %vm314_vm1, %v3963_v41, 0 }
 0x1aa   : > { %14179 = vmatmul.mubr.msk.bf16.vlgmr.msra.gmra.mrb[4].mxu0 %vm310_vm2, %v14173_v28 }
 0x1ab   : > { %3995 = vmatpush1.bf16.msra.mxu0 %v3971_v2  ;;  %v3957_v38 = vpop.permute.xlu1 %3956  ;;  %v3955_v39 = vpop.permute.xlu0 %3954  ;;  %4026 = vmatprep.mubr.bf16.mxu0 %v15133_v7 }
 0x1ac   : > { %14187 = vmatprep.subr.msk.bf16.mxu0 %vm314_vm1, %v3964_v37  ;;  %v3966_v40 = vsel %vm18519_vm15, %v3955_v39, %v3957_v38  ;;  %v3965_v45 = vsel %vm18519_vm15, %v3953_v3, %v3955_v39  ;;  %vm18523_vm15 = vcmask 318464  }
 0x1ad   : > { %5542 = vrot.lane.b32.xlu1 %v15707_v53, %s18517_s10  ;;  %5540 = vrot.lane.b32.xlu0 %v15690_v12, %s18517_s10  ;;  %v3989_v50 = vsel %vm314_vm1, %v3965_v45, 0 }
 0x1ae   : > { %14181 = vmatmul.mubr.msk.bf16.vlgmr.msra.gmra.mrb[4].mxu1 %vm310_vm2, %v14173_v28 }
 0x1af   : > { %4036 = vmatpush1.bf16.msra.mxu1 %v3977_v9  ;;  %v4171_v42 = vpop.permute.xlu1 %4170  ;;  %v4169_v43 = vpop.permute.xlu0 %4168  ;;  %4067 = vmatprep.mubr.bf16.mxu1 %v15133_v7 }
 0x1b0   : > { %14189 = vmatprep.subr.msk.bf16.mxu1 %vm314_vm1, %v3966_v40  ;;  %v4187_v51 = vsel %vm18520_vm14, %v4169_v43, %v4171_v42 }
 0x1b1   : > { %5546 = vrot.lane.b32.xlu1 %v15722_v61, %s18517_s10  ;;  %5544 = vrot.lane.b32.xlu0 %v15705_v52, %s18517_s10  ;;  %v4199_v56 = vsel %vm314_vm1, %v4187_v51, 0  ;;  %v14209_v51 = vld [vmem:[%s18486_s1 + $0x4c] sm:$0xf] }
 0x1b2   : > { %14184 = vmatmul.mubr.msk.bf16.vlgmr.msra.gmra.mrb[0].mxu0 %vm310_vm2, %v14182_v44 }
 0x1b3   : > { %4077 = vmatpush1.bf16.msra.mxu0 %v3983_v11  ;;  %v4175_v47 = vpop.permute.xlu1 %4174  ;;  %v4173_v48 = vpop.permute.xlu0 %4172  ;;  %4108 = vmatprep.mubr.bf16.mxu0 %v15133_v7 }
 0x1b4   : > { %v4188_v49 = vsel %vm18520_vm14, %v4171_v42, %v4173_v48  ;;  %v4189_v57 = vsel %vm18520_vm14, %v4173_v48, %v4175_v47 }
 0x1b5   : > { %5550 = vrot.lane.b32.xlu1 %v15738_v15, %s18517_s10  ;;  %5548 = vrot.lane.b32.xlu0 %v15720_v60, %s18517_s10 }
 0x1b6   : > { %14186 = vmatmul.mubr.msk.bf16.vlgmr.msra.gmra.mrb[0].mxu1 %vm310_vm2, %v14182_v44  ;;  %14192 = vmatprep.subr.msk.bf16.mxu0 %vm314_vm1, %v4188_v49 }
 0x1b7   : > { %4118 = vmatpush1.bf16.msra.mxu1 %v3989_v50  ;;  %v4179_v13 = vpop.permute.xlu1 %4178  ;;  %v4177_v54 = vpop.permute.xlu0 %4176  ;;  %4149 = vmatprep.mubr.bf16.mxu1 %v15133_v7 }
 0x1b8   : > { %v4190_v55 = vsel %vm18520_vm14, %v4175_v47, %v4177_v54  ;;  %v4191_v63 = vsel %vm18520_vm14, %v4177_v54, %v4179_v13 }
 0x1b9   : > { %5764 = vrot.lane.b32.xlu1 %v15676_v8, %s18521_s12  ;;  %5552 = vrot.lane.b32.xlu0 %v15736_v14, %s18517_s10  ;;  %v4205_v14 = vsel %vm314_vm1, %v4189_v57, 0  ;;  %v4211_v16 = vsel %vm314_vm1, %v4191_v63, 0  ;;  %s15158_s10 = smov 17  }
 0x1ba   : > { %14188 = vmatmul.mubr.msk.bf16.vlgmr.msra.gmra.mrb[4].mxu0 %vm310_vm2, %v14182_v44  ;;  %14194 = vmatprep.subr.msk.bf16.mxu1 %vm314_vm1, %v4190_v55 }
 0x1bb   : > { %4223 = vmatpush1.bf16.msra.mxu0 %v4199_v56  ;;  %v4183_v58 = vpop.permute.xlu1 %4182  ;;  %v4181_v59 = vpop.permute.xlu0 %4180  ;;  %4254 = vmatprep.mubr.bf16.mxu0 %v15133_v7 }
 0x1bc   : > { %v4192_v62 = vsel %vm18520_vm14, %v4179_v13, %v4181_v59  ;;  %v4193_v17 = vsel %vm18520_vm14, %v4181_v59, %v4183_v58 }
 0x1bd   : > { %5768 = vrot.lane.b32.xlu1 %v15690_v12, %s18521_s12  ;;  %5766 = vrot.lane.b32.xlu0 %v15692_v46, %s18521_s12  ;;  %v4217_v21 = vsel %vm314_vm1, %v4193_v17, 0 }
 0x1be   : > { %14190 = vmatmul.mubr.msk.bf16.vlgmr.msra.gmra.mrb[4].mxu1 %vm310_vm2, %v14182_v44  ;;  %14196 = vmatprep.subr.msk.bf16.mxu0 %vm314_vm1, %v4192_v62 }
 0x1bf   : > { %4264 = vmatpush1.bf16.msra.mxu1 %v4205_v14  ;;  %v4397_v0 = vpop.permute.xlu1 %4396  ;;  %v4185_v1 = vpop.permute.xlu0 %4184  ;;  %4295 = vmatprep.mubr.bf16.mxu1 %v15133_v7 }
 0x1c0   : > { %v4194_v10 = vsel %vm18520_vm14, %v4183_v58, %v4185_v1  ;;  %vm18528_vm14 = vcmask 310272  }
 0x1c1   : > { %5772 = vrot.lane.b32.xlu1 %v15705_v52, %s18521_s12  ;;  %5770 = vrot.lane.b32.xlu0 %v15707_v53, %s18521_s12 }
 0x1c2   : > { %14193 = vmatmul.mubr.msk.bf16.vlgmr.msra.gmra.mrb[0].mxu0 %vm310_vm2, %v14191_v6  ;;  %14198 = vmatprep.subr.msk.bf16.mxu1 %vm314_vm1, %v4194_v10  ;;  %v14218_v10 = vld [vmem:[%s18486_s1 + $0x50] sm:$0xf] }
 0x1c3   : > { %4305 = vmatpush1.bf16.msra.mxu0 %v4211_v16  ;;  %v4401_v18 = vpop.permute.xlu1 %4400  ;;  %v4399_v19 = vpop.permute.xlu0 %4398  ;;  %4336 = vmatprep.mubr.bf16.mxu0 %v15133_v7 }
 0x1c4   : > { %v4416_v20 = vsel %vm18523_vm15, %v4399_v19, %v4401_v18  ;;  %v4415_v22 = vsel %vm18523_vm15, %v4397_v0, %v4399_v19 }
 0x1c5   : > { %5776 = vrot.lane.b32.xlu1 %v15720_v60, %s18521_s12  ;;  %5774 = vrot.lane.b32.xlu0 %v15722_v61, %s18521_s12  ;;  %v4427_v27 = vsel %vm314_vm1, %v4415_v22, 0 }
 0x1c6   : > { %14195 = vmatmul.mubr.msk.bf16.vlgmr.msra.gmra.mrb[0].mxu1 %vm310_vm2, %v14191_v6  ;;  %14201 = vmatprep.subr.msk.bf16.mxu0 %vm314_vm1, %v4416_v20 }
 0x1c7   : > { %4346 = vmatpush1.bf16.msra.mxu1 %v4217_v21  ;;  %v4405_v23 = vpop.permute.xlu1 %4404  ;;  %v4403_v24 = vpop.permute.xlu0 %4402  ;;  %4377 = vmatprep.mubr.bf16.mxu1 %v15133_v7 }
 0x1c8   : > { %v4418_v25 = vsel %vm18523_vm15, %v4403_v24, %v4405_v23  ;;  %v4417_v28 = vsel %vm18523_vm15, %v4401_v18, %v4403_v24 }
 0x1c9   : > { %5780 = vrot.lane.b32.xlu1 %v16217_v26, %s18521_s12  ;;  %5778 = vrot.lane.b32.xlu0 %v15738_v15, %s18521_s12  ;;  %v4433_v32 = vsel %vm314_vm1, %v4417_v28, 0  ;;  %s18538_s12 = smov 1  }
 0x1ca   : > { %14197 = vmatmul.mubr.msk.bf16.vlgmr.msra.gmra.mrb[4].mxu0 %vm310_vm2, %v14191_v6  ;;  %14203 = vmatprep.subr.msk.bf16.mxu1 %vm314_vm1, %v4418_v25 }
 0x1cb   : > { %4451 = vmatpush1.bf16.msra.mxu0 %v4427_v27  ;;  %v4409_v29 = vpop.permute.xlu1 %4408  ;;  %v4407_v30 = vpop.permute.xlu0 %4406  ;;  %4482 = vmatprep.mubr.bf16.mxu0 %v15133_v7 }
 0x1cc   : > { %v4420_v31 = vsel %vm18523_vm15, %v4407_v30, %v4409_v29  ;;  %v4419_v33 = vsel %vm18523_vm15, %v4405_v23, %v4407_v30 }
 0x1cd   : > { %5994 = vrot.lane.b32.xlu1 %v15692_v46, %s18524_s13  ;;  %5992 = vrot.lane.b32.xlu0 %v15676_v8, %s18524_s13  ;;  %v4439_v5 = vsel %vm314_vm1, %v4419_v33, 0  ;;  %v14227_v33 = vld [vmem:[%s18486_s1 + $0x54] sm:$0xf] }
 0x1ce   : > { %14199 = vmatmul.mubr.msk.bf16.vlgmr.msra.gmra.mrb[4].mxu1 %vm310_vm2, %v14191_v6  ;;  %14205 = vmatprep.subr.msk.bf16.mxu0 %vm314_vm1, %v4420_v31 }
 0x1cf   : > { %4492 = vmatpush1.bf16.msra.mxu1 %v4433_v32  ;;  %v4413_v34 = vpop.permute.xlu1 %4412  ;;  %v4411_v35 = vpop.permute.xlu0 %4410  ;;  %4523 = vmatprep.mubr.bf16.mxu1 %v15133_v7 }
 0x1d0   : > { %v4422_v3 = vsel %vm18523_vm15, %v4411_v35, %v4413_v34  ;;  %v4421_v37 = vsel %vm18523_vm15, %v4409_v29, %v4411_v35  ;;  %vm18529_vm15 = vcmask 302080  }
 0x1d1   : > { %5998 = vrot.lane.b32.xlu1 %v15707_v53, %s18524_s13  ;;  %5996 = vrot.lane.b32.xlu0 %v15690_v12, %s18524_s13  ;;  %v4445_v38 = vsel %vm314_vm1, %v4421_v37, 0 }
 0x1d2   : > { %14202 = vmatmul.mubr.msk.bf16.vlgmr.msra.gmra.mrb[0].mxu0 %vm310_vm2, %v14200_v36  ;;  %14207 = vmatprep.subr.msk.bf16.mxu1 %vm314_vm1, %v4422_v3 }
 0x1d3   : > { %4533 = vmatpush1.bf16.msra.mxu0 %v4439_v5  ;;  %v4627_v2 = vpop.permute.xlu1 %4626  ;;  %v4625_v4 = vpop.permute.xlu0 %4624  ;;  %4564 = vmatprep.mubr.bf16.mxu0 %v15133_v7 }
 0x1d4   : > { %v4643_v39 = vsel %vm18528_vm14, %v4625_v4, %v4627_v2 }
 0x1d5   : > { %6002 = vrot.lane.b32.xlu1 %v15722_v61, %s18524_s13  ;;  %6000 = vrot.lane.b32.xlu0 %v15705_v52, %s18524_s13  ;;  %v4655_v42 = vsel %vm314_vm1, %v4643_v39, 0 }
 0x1d6   : > { %14204 = vmatmul.mubr.msk.bf16.vlgmr.msra.gmra.mrb[0].mxu1 %vm310_vm2, %v14200_v36 }
 0x1d7   : > { %4574 = vmatpush1.bf16.msra.mxu1 %v4445_v38  ;;  %v4631_v40 = vpop.permute.xlu1 %4630  ;;  %v4629_v9 = vpop.permute.xlu0 %4628  ;;  %4605 = vmatprep.mubr.bf16.mxu1 %v15133_v7 }
 0x1d8   : > { %v4644_v41 = vsel %vm18528_vm14, %v4627_v2, %v4629_v9  ;;  %v4645_v43 = vsel %vm18528_vm14, %v4629_v9, %v4631_v40 }
 0x1d9   : > { %6006 = vrot.lane.b32.xlu1 %v15738_v15, %s18524_s13  ;;  %6004 = vrot.lane.b32.xlu0 %v15720_v60, %s18524_s13  ;;  %v4661_v47 = vsel %vm314_vm1, %v4645_v43, 0 }
 0x1da   : > { %14210 = vmatprep.subr.msk.bf16.mxu0 %vm314_vm1, %v4644_v41  ;;  %14206 = vmatmul.mubr.msk.bf16.vlgmr.msra.gmra.mrb[4].mxu0 %vm310_vm2, %v14200_v36 }
 0x1db   : > { %4679 = vmatpush1.bf16.msra.mxu0 %v4655_v42  ;;  %v4635_v44 = vpop.permute.xlu1 %4634  ;;  %v4633_v11 = vpop.permute.xlu0 %4632  ;;  %4710 = vmatprep.mubr.bf16.mxu0 %v15133_v7 }
 0x1dc   : > { %v4646_v45 = vsel %vm18528_vm14, %v4631_v40, %v4633_v11  ;;  %v4647_v48 = vsel %vm18528_vm14, %v4633_v11, %v4635_v44 }
 0x1dd   : > { %6220 = vrot.lane.b32.xlu1 %v15676_v8, %s15158_s10  ;;  %6008 = vrot.lane.b32.xlu0 %v16217_v26, %s18524_s13  ;;  %v4667_v13 = vsel %vm314_vm1, %v4647_v48, 0  ;;  %v14236_v48 = vld [vmem:[%s18486_s1 + $0x58] sm:$0xf]  ;;  %s18543_s13 = smov 39  }
 0x1de   : > { %14212 = vmatprep.subr.msk.bf16.mxu1 %vm314_vm1, %v4646_v45  ;;  %14208 = vmatmul.mubr.msk.bf16.vlgmr.msra.gmra.mrb[4].mxu1 %vm310_vm2, %v14200_v36 }
 0x1df   : > { %4720 = vmatpush1.bf16.msra.mxu1 %v4661_v47  ;;  %v4639_v49 = vpop.permute.xlu1 %4638  ;;  %v4637_v50 = vpop.permute.xlu0 %4636  ;;  %4751 = vmatprep.mubr.bf16.mxu1 %v15133_v7 }
 0x1e0   : > { %v4648_v8 = vsel %vm18528_vm14, %v4635_v44, %v4637_v50  ;;  %v4649_v54 = vsel %vm18528_vm14, %v4637_v50, %v4639_v49 }
 0x1e1   : > { %6224 = vrot.lane.b32.xlu1 %v15690_v12, %s15158_s10  ;;  %6222 = vrot.lane.b32.xlu0 %v15692_v46, %s15158_s10  ;;  %v4673_v12 = vsel %vm314_vm1, %v4649_v54, 0 }
 0x1e2   : > { %14214 = vmatprep.subr.msk.bf16.mxu0 %vm314_vm1, %v4648_v8  ;;  %14211 = vmatmul.mubr.msk.bf16.vlgmr.msra.gmra.mrb[0].mxu0 %vm310_vm2, %v14209_v51 }
 0x1e3   : > { %4761 = vmatpush1.bf16.msra.mxu0 %v4667_v13  ;;  %v4853_v55 = vpop.permute.xlu1 %4852  ;;  %v4641_v56 = vpop.permute.xlu0 %4640  ;;  %4792 = vmatprep.mubr.bf16.mxu0 %v15133_v7 }
 0x1e4   : > { %v4650_v57 = vsel %vm18528_vm14, %v4639_v49, %v4641_v56  ;;  %vm18530_vm14 = vcmask 236544  }
 0x1e5   : > { %6228 = vrot.lane.b32.xlu1 %v15705_v52, %s15158_s10  ;;  %6226 = vrot.lane.b32.xlu0 %v15707_v53, %s15158_s10 }
 0x1e6   : > { %14216 = vmatprep.subr.msk.bf16.mxu1 %vm314_vm1, %v4650_v57  ;;  %14213 = vmatmul.mubr.msk.bf16.vlgmr.msra.gmra.mrb[0].mxu1 %vm310_vm2, %v14209_v51 }
 0x1e7   : > { %4802 = vmatpush1.bf16.msra.mxu1 %v4673_v12  ;;  %v4857_v46 = vpop.permute.xlu1 %4856  ;;  %v4855_v58 = vpop.permute.xlu0 %4854  ;;  %4833 = vmatprep.mubr.bf16.mxu1 %v15133_v7 }
 0x1e8   : > { %v4871_v59 = vsel %vm18529_vm15, %v4853_v55, %v4855_v58  ;;  %v4872_v62 = vsel %vm18529_vm15, %v4855_v58, %v4857_v46 }
 0x1e9   : > { %6232 = vrot.lane.b32.xlu1 %v15720_v60, %s15158_s10  ;;  %6230 = vrot.lane.b32.xlu0 %v15722_v61, %s15158_s10  ;;  %v4883_v52 = vsel %vm314_vm1, %v4871_v59, 0  ;;  %v6446_v61 = vld [vmem:[%s18488_s3] sm:$0xf] }
 0x1ea   : > { %14219 = vmatprep.subr.msk.bf16.mxu0 %vm314_vm1, %v4872_v62  ;;  %14215 = vmatmul.mubr.msk.bf16.vlgmr.msra.gmra.mrb[4].mxu0 %vm310_vm2, %v14209_v51 }
 0x1eb   : > { %4907 = vmatpush1.bf16.msra.mxu0 %v4883_v52  ;;  %v4861_v53 = vpop.permute.xlu1 %4860  ;;  %v4859_v14 = vpop.permute.xlu0 %4858  ;;  %4938 = vmatprep.mubr.bf16.mxu0 %v15133_v7 }
 0x1ec   : > { %v4873_v63 = vsel %vm18529_vm15, %v4857_v46, %v4859_v14  ;;  %v4874_v0 = vsel %vm18529_vm15, %v4859_v14, %v4861_v53 }
 0x1ed   : > { %6236 = vrot.lane.b32.xlu1 %v16217_v26, %s15158_s10  ;;  %6234 = vrot.lane.b32.xlu0 %v15738_v15, %s15158_s10  ;;  %v4889_v60 = vsel %vm314_vm1, %v4873_v63, 0 }
 0x1ee   : > { %14221 = vmatprep.subr.msk.bf16.mxu1 %vm314_vm1, %v4874_v0  ;;  %14217 = vmatmul.mubr.msk.bf16.vlgmr.msra.gmra.mrb[4].mxu1 %vm310_vm2, %v14209_v51 }
 0x1ef   : > { %4948 = vmatpush1.bf16.msra.mxu1 %v4889_v60  ;;  %v4865_v1 = vpop.permute.xlu1 %4864  ;;  %v4863_v6 = vpop.permute.xlu0 %4862  ;;  %4979 = vmatprep.mubr.bf16.mxu1 %v15133_v7 }
 0x1f0   : > { %v4875_v15 = vsel %vm18529_vm15, %v4861_v53, %v4863_v6  ;;  %v4876_v16 = vsel %vm18529_vm15, %v4863_v6, %v4865_v1 }
 0x1f1   : > { %14223 = vmatprep.subr.msk.bf16.mxu0 %vm314_vm1, %v4876_v16  ;;  %v4895_v17 = vsel %vm314_vm1, %v4875_v15, 0  ;;  %6449 = vperm.xlu0 %15042, %v6446_v61  }
 0x1f2   : > { %14220 = vmatmul.mubr.msk.bf16.vlgmr.msra.gmra.mrb[0].mxu0 %vm310_vm2, %v14218_v10 }
 0x1f3   : > { %4989 = vmatpush1.bf16.msra.mxu0 %v4895_v17  ;;  %v4869_v18 = vpop.permute.xlu1 %4868  ;;  %v4867_v19 = vpop.permute.xlu0 %4866  ;;  %5020 = vmatprep.mubr.bf16.mxu0 %v15133_v7 }
 0x1f4   : > { %v4877_v20 = vsel %vm18529_vm15, %v4865_v1, %v4867_v19  ;;  %v4878_v21 = vsel %vm18529_vm15, %v4867_v19, %v4869_v18  ;;  %vm18531_vm15 = vcmask 228352   ;;  %v14245_v1 = vld [vmem:[%s18486_s1 + $0x5c] sm:$0xf] }
 0x1f5   : > { %14225 = vmatprep.subr.msk.bf16.mxu1 %vm314_vm1, %v4878_v21  ;;  %v4901_v22 = vsel %vm314_vm1, %v4877_v20, 0 }
 0x1f6   : > { %14222 = vmatmul.mubr.msk.bf16.vlgmr.msra.gmra.mrb[0].mxu1 %vm310_vm2, %v14218_v10 }
 0x1f7   : > { %5030 = vmatpush1.bf16.msra.mxu1 %v4901_v22  ;;  %v5083_v23 = vpop.permute.xlu1 %5082  ;;  %v5081_v24 = vpop.permute.xlu0 %5080  ;;  %5061 = vmatprep.mubr.bf16.mxu1 %v15133_v7 }
 0x1f8   : > { %v5099_v25 = vsel %vm18530_vm14, %v5081_v24, %v5083_v23 }
 0x1f9   : > { %v5111_v29 = vsel %vm314_vm1, %v5099_v25, 0 }
 0x1fa   : > { %14224 = vmatmul.mubr.msk.bf16.vlgmr.msra.gmra.mrb[4].mxu0 %vm310_vm2, %v14218_v10 }
 0x1fb   : > { %v5087_v26 = vpop.permute.xlu1 %5086  ;;  %v5085_v27 = vpop.permute.xlu0 %5084  ;;  %5166 = vmatprep.mubr.bf16.mxu0 %v15133_v7 }
 0x1fc   : > { %v5100_v28 = vsel %vm18530_vm14, %v5083_v23, %v5085_v27  ;;  %v5101_v30 = vsel %vm18530_vm14, %v5085_v27, %v5087_v26 }
 0x1fd   : > { %14228 = vmatprep.subr.msk.bf16.mxu0 %vm314_vm1, %v5100_v28  ;;  %v5117_v35 = vsel %vm314_vm1, %v5101_v30, 0 }
 0x1fe   : > { %5135 = vmatpush1.bf16.msra.mxu0 %v5111_v29  ;;  %14226 = vmatmul.mubr.msk.bf16.vlgmr.msra.gmra.mrb[4].mxu1 %vm310_vm2, %v14218_v10 }
 0x1ff   : > { %v5091_v31 = vpop.permute.xlu1 %5090  ;;  %v5089_v32 = vpop.permute.xlu0 %5088  ;;  %5207 = vmatprep.mubr.bf16.mxu1 %v15133_v7 }
 0x200   : > { %v5102_v34 = vsel %vm18530_vm14, %v5087_v26, %v5089_v32  ;;  %v5103_v36 = vsel %vm18530_vm14, %v5089_v32, %v5091_v31  ;;  %v14254_v32 = vld [vmem:[%s18486_s1 + $0x60] sm:$0xf] }
 0x201   : > { %14230 = vmatprep.subr.msk.bf16.mxu1 %vm314_vm1, %v5102_v34  ;;  %v5123_v2 = vsel %vm314_vm1, %v5103_v36, 0 }
 0x202   : > { %5176 = vmatpush1.bf16.msra.mxu1 %v5117_v35  ;;  %14229 = vmatmul.mubr.msk.bf16.vlgmr.msra.gmra.mrb[0].mxu0 %vm310_vm2, %v14227_v33 }
 0x203   : > { %v5095_v3 = vpop.permute.xlu1 %5094  ;;  %v5093_v5 = vpop.permute.xlu0 %5092  ;;  %5248 = vmatprep.mubr.bf16.mxu0 %v15133_v7 }
 0x204   : > { %v5104_v37 = vsel %vm18530_vm14, %v5091_v31, %v5093_v5  ;;  %v5105_v4 = vsel %vm18530_vm14, %v5093_v5, %v5095_v3 }
 0x205   : > { %14232 = vmatprep.subr.msk.bf16.mxu0 %vm314_vm1, %v5104_v37  ;;  %v5129_v9 = vsel %vm314_vm1, %v5105_v4, 0 }
 0x206   : > { %5217 = vmatpush1.bf16.msra.mxu0 %v5123_v2  ;;  %14231 = vmatmul.mubr.msk.bf16.vlgmr.msra.gmra.mrb[0].mxu1 %vm310_vm2, %v14227_v33 }
 0x207   : > { %v5309_v38 = vpop.permute.xlu1 %5308  ;;  %v5097_v39 = vpop.permute.xlu0 %5096  ;;  %5289 = vmatprep.mubr.bf16.mxu1 %v15133_v7 }
 0x208   : > { %v5106_v40 = vsel %vm18530_vm14, %v5095_v3, %v5097_v39  ;;  %vm18532_vm14 = vcmask 220160  }
 0x209   : > { %14234 = vmatprep.subr.msk.bf16.mxu1 %vm314_vm1, %v5106_v40 }
 0x20a   : > { %5258 = vmatpush1.bf16.msra.mxu1 %v5129_v9  ;;  %14233 = vmatmul.mubr.msk.bf16.vlgmr.msra.gmra.mrb[4].mxu0 %vm310_vm2, %v14227_v33 }
 0x20b   : > { %v5313_v41 = vpop.permute.xlu1 %5312  ;;  %v5311_v42 = vpop.permute.xlu0 %5310  ;;  %5394 = vmatprep.mubr.bf16.mxu0 %v15133_v7 }
 0x20c   : > { %v5327_v43 = vsel %vm18531_vm15, %v5309_v38, %v5311_v42  ;;  %v5328_v44 = vsel %vm18531_vm15, %v5311_v42, %v5313_v41 }
 0x20d   : > { %14237 = vmatprep.subr.msk.bf16.mxu0 %vm314_vm1, %v5328_v44  ;;  %v5339_v11 = vsel %vm314_vm1, %v5327_v43, 0 }
 0x20e   : > { %5363 = vmatpush1.bf16.msra.mxu0 %v5339_v11  ;;  %14235 = vmatmul.mubr.msk.bf16.vlgmr.msra.gmra.mrb[4].mxu1 %vm310_vm2, %v14227_v33 }
 0x20f   : > { %v5317_v45 = vpop.permute.xlu1 %5316  ;;  %v5315_v47 = vpop.permute.xlu0 %5314  ;;  %5435 = vmatprep.mubr.bf16.mxu1 %v15133_v7 }
 0x210   : > { %v5329_v49 = vsel %vm18531_vm15, %v5313_v41, %v5315_v47  ;;  %v5330_v50 = vsel %vm18531_vm15, %v5315_v47, %v5317_v45 }
 0x211   : > { %14239 = vmatprep.subr.msk.bf16.mxu1 %vm314_vm1, %v5330_v50  ;;  %v5345_v51 = vsel %vm314_vm1, %v5329_v49, 0 }
 0x212   : > { %5404 = vmatpush1.bf16.msra.mxu1 %v5345_v51  ;;  %14238 = vmatmul.mubr.msk.bf16.vlgmr.msra.gmra.mrb[0].mxu0 %vm310_vm2, %v14236_v48  ;;  %v14263_v51 = vld [vmem:[%s18486_s1 + $0x64] sm:$0xf] }
 0x213   : > { %v5321_v8 = vpop.permute.xlu1 %5320  ;;  %v5319_v13 = vpop.permute.xlu0 %5318  ;;  %5476 = vmatprep.mubr.bf16.mxu0 %v15133_v7 }
 0x214   : > { %v5331_v54 = vsel %vm18531_vm15, %v5317_v45, %v5319_v13  ;;  %v5332_v55 = vsel %vm18531_vm15, %v5319_v13, %v5321_v8 }
 0x215   : > { %14241 = vmatprep.subr.msk.bf16.mxu0 %vm314_vm1, %v5332_v55  ;;  %v5351_v56 = vsel %vm314_vm1, %v5331_v54, 0 }
 0x216   : > { %5445 = vmatpush1.bf16.msra.mxu0 %v5351_v56  ;;  %14240 = vmatmul.mubr.msk.bf16.vlgmr.msra.gmra.mrb[0].mxu1 %vm310_vm2, %v14236_v48 }
 0x217   : > { %v5325_v57 = vpop.permute.xlu1 %5324  ;;  %v5323_v12 = vpop.permute.xlu0 %5322  ;;  %5517 = vmatprep.mubr.bf16.mxu1 %v15133_v7 }
 0x218   : > { %v5333_v46 = vsel %vm18531_vm15, %v5321_v8, %v5323_v12  ;;  %v5334_v58 = vsel %vm18531_vm15, %v5323_v12, %v5325_v57  ;;  %vm18533_vm15 = vcmask 154624  }
 0x219   : > { %14243 = vmatprep.subr.msk.bf16.mxu1 %vm314_vm1, %v5334_v58  ;;  %v5357_v59 = vsel %vm314_vm1, %v5333_v46, 0 }
 0x21a   : > { %5486 = vmatpush1.bf16.msra.mxu1 %v5357_v59  ;;  %14242 = vmatmul.mubr.msk.bf16.vlgmr.msra.gmra.mrb[4].mxu0 %vm310_vm2, %v14236_v48 }
 0x21b   : > { %v5539_v62 = vpop.permute.xlu1 %5538  ;;  %v5537_v52 = vpop.permute.xlu0 %5536  ;;  %5622 = vmatprep.mubr.bf16.mxu0 %v15133_v7 }
 0x21c   : > { %v5555_v53 = vsel %vm18532_vm14, %v5537_v52, %v5539_v62 }
 0x21d   : > { %v5567_v60 = vsel %vm314_vm1, %v5555_v53, 0 }
 0x21e   : > { %14244 = vmatmul.mubr.msk.bf16.vlgmr.msra.gmra.mrb[4].mxu1 %vm310_vm2, %v14236_v48 }
 0x21f   : > { %v5543_v14 = vpop.permute.xlu1 %5542  ;;  %v5541_v63 = vpop.permute.xlu0 %5540  ;;  %5663 = vmatprep.mubr.bf16.mxu1 %v15133_v7 }
 0x220   : > { %v5556_v0 = vsel %vm18532_vm14, %v5539_v62, %v5541_v63  ;;  %v5557_v61 = vsel %vm18532_vm14, %v5541_v63, %v5543_v14 }
 0x221   : > { %14246 = vmatprep.subr.msk.bf16.mxu0 %vm314_vm1, %v5556_v0  ;;  %v5573_v16 = vsel %vm314_vm1, %v5557_v61, 0 }
 0x222   : > { %5591 = vmatpush1.bf16.msra.mxu0 %v5567_v60 }
 0x223   : > { %v5547_v6 = vpop.permute.xlu1 %5546  ;;  %v5545_v10 = vpop.permute.xlu0 %5544 }
 0x224   : > { %v5558_v15 = vsel %vm18532_vm14, %v5543_v14, %v5545_v10  ;;  %v5559_v17 = vsel %vm18532_vm14, %v5545_v10, %v5547_v6 }
 0x225   : > { %14248 = vmatprep.subr.msk.bf16.mxu1 %vm314_vm1, %v5558_v15  ;;  %14247 = vmatmul.mubr.msk.bf16.vlgmr.msra.gmra.mrb[0].mxu0 %vm310_vm2, %v14245_v1  ;;  %v5579_v21 = vsel %vm314_vm1, %v5559_v17, 0 }
 0x226   : > { %5632 = vmatpush1.bf16.msra.mxu1 %v5573_v16  ;;  %5704 = vmatprep.mubr.bf16.mxu0 %v15133_v7 }
 0x227   : > { %v5551_v18 = vpop.permute.xlu1 %5550  ;;  %v5549_v19 = vpop.permute.xlu0 %5548 }
 0x228   : > { %v5560_v20 = vsel %vm18532_vm14, %v5547_v6, %v5549_v19  ;;  %v5561_v22 = vsel %vm18532_vm14, %v5549_v19, %v5551_v18  ;;  %v14272_v6 = vld [vmem:[%s18486_s1 + $0x68] sm:$0xf] }
 0x229   : > { %14250 = vmatprep.subr.msk.bf16.mxu0 %vm314_vm1, %v5560_v20  ;;  %14249 = vmatmul.mubr.msk.bf16.vlgmr.msra.gmra.mrb[0].mxu1 %vm310_vm2, %v14245_v1  ;;  %v5585_v26 = vsel %vm314_vm1, %v5561_v22, 0 }
 0x22a   : > { %5673 = vmatpush1.bf16.msra.mxu0 %v5579_v21  ;;  %5745 = vmatprep.mubr.bf16.mxu1 %v15133_v7 }
 0x22b   : > { %v5765_v23 = vpop.permute.xlu1 %5764  ;;  %v5553_v24 = vpop.permute.xlu0 %5552 }
 0x22c   : > { %v5562_v25 = vsel %vm18532_vm14, %v5551_v18, %v5553_v24  ;;  %vm6010_vm14 = vcmask 146432  }
 0x22d   : > { %14252 = vmatprep.subr.msk.bf16.mxu1 %vm314_vm1, %v5562_v25  ;;  %14251 = vmatmul.mubr.msk.bf16.vlgmr.msra.gmra.mrb[4].mxu0 %vm310_vm2, %v14245_v1 }
 0x22e   : > { %5714 = vmatpush1.bf16.msra.mxu1 %v5585_v26  ;;  %5850 = vmatprep.mubr.bf16.mxu0 %v15133_v7 }
 0x22f   : > { %v5769_v27 = vpop.permute.xlu1 %5768  ;;  %v5767_v28 = vpop.permute.xlu0 %5766 }
 0x230   : > { %v5783_v29 = vsel %vm18533_vm15, %v5765_v23, %v5767_v28  ;;  %v5784_v30 = vsel %vm18533_vm15, %v5767_v28, %v5769_v27 }
 0x231   : > { %14255 = vmatprep.subr.msk.bf16.mxu0 %vm314_vm1, %v5784_v30  ;;  %v5795_v31 = vsel %vm314_vm1, %v5783_v29, 0  ;;  %14253 = vmatmul.mubr.msk.bf16.vlgmr.msra.gmra.mrb[4].mxu1 %vm310_vm2, %v14245_v1  ;;  %v6470_v29 = vlaneseq }
 0x232   : > { %5819 = vmatpush1.bf16.msra.mxu0 %v5795_v31  ;;  %5891 = vmatprep.mubr.bf16.mxu1 %v15133_v7 }
 0x233   : > { %v5773_v33 = vpop.permute.xlu1 %5772  ;;  %v5771_v34 = vpop.permute.xlu0 %5770  ;;  %v6471_v30 = vshrl.u32 %v6470_v29, 7 }
 0x234   : > { %v5785_v35 = vsel %vm18533_vm15, %v5769_v27, %v5771_v34  ;;  %v5786_v36 = vsel %vm18533_vm15, %v5771_v34, %v5773_v33  ;;  %v251_v34 = vld [vmem:[%s18490_s5] sm:$0xff] }
 0x235   : > { %14257 = vmatprep.subr.msk.bf16.mxu1 %vm314_vm1, %v5786_v36  ;;  %v5801_v3 = vsel %vm314_vm1, %v5785_v35, 0  ;;  %14256 = vmatmul.mubr.msk.bf16.vlgmr.msra.gmra.mrb[0].mxu0 %vm310_vm2, %v14254_v32  ;;  %v6476_v35 = vsub.s32 1, %v6471_v30 }
 0x236   : > { %5860 = vmatpush1.bf16.msra.mxu1 %v5801_v3  ;;  %5932 = vmatprep.mubr.bf16.mxu0 %v15133_v7 }
 0x237   : > { %v5777_v5 = vpop.permute.xlu1 %5776  ;;  %v5775_v37 = vpop.permute.xlu0 %5774 }
 0x238   : > { %v5787_v2 = vsel %vm18533_vm15, %v5773_v33, %v5775_v37  ;;  %v5788_v4 = vsel %vm18533_vm15, %v5775_v37, %v5777_v5  ;;  %v6472_v33 = vsub.s32 0, %v6471_v30  ;;  %v15159_v37 = vmov 1983009808  }
 0x239   : > { %14259 = vmatprep.subr.msk.bf16.mxu0 %vm314_vm1, %v5788_v4  ;;  %v5807_v38 = vsel %vm314_vm1, %v5787_v2, 0  ;;  %14258 = vmatmul.mubr.msk.bf16.vlgmr.msra.gmra.mrb[0].mxu1 %vm310_vm2, %v14254_v32  ;;  %v6539_v2 = vunpack.c.l.s4 %v15159_v37 }
 0x23a   : > { %5901 = vmatpush1.bf16.msra.mxu0 %v5807_v38  ;;  %5973 = vmatprep.mubr.bf16.mxu1 %v15133_v7  ;;  %v6480_v38 = vsub.s32 2, %v6471_v30 }
 0x23b   : > { %v5781_v39 = vpop.permute.xlu1 %5780  ;;  %v5779_v40 = vpop.permute.xlu0 %5778 }
 0x23c   : > { %v5789_v9 = vsel %vm18533_vm15, %v5777_v5, %v5779_v40  ;;  %v5790_v41 = vsel %vm18533_vm15, %v5779_v40, %v5781_v39  ;;  %vm6238_vm15 = vcmask 138240   ;;  %v16511_v5 = vrot.slane %v251_v34, %v6472_v33 }
 0x23d   : > { %14261 = vmatprep.subr.msk.bf16.mxu1 %vm314_vm1, %v5790_v41  ;;  %v5813_v42 = vsel %vm314_vm1, %v5789_v9, 0  ;;  %14260 = vmatmul.mubr.msk.bf16.vlgmr.msra.gmra.mrb[4].mxu0 %vm310_vm2, %v14254_v32  ;;  %v16516_v40 = vrot.slane %v251_v34, %v6476_v35  ;;  %v6484_v41 = vsub.s32 3, %v6471_v30 }
 0x23e   : > { %5942 = vmatpush1.bf16.msra.mxu1 %v5813_v42  ;;  %6078 = vmatprep.mubr.bf16.mxu0 %v15133_v7 }
 0x23f   : > { %v5995_v43 = vpop.permute.xlu1 %5994  ;;  %v5993_v44 = vpop.permute.xlu0 %5992 }
 0x240   : > { %v6011_v11 = vsel %vm6010_vm14, %v5993_v44, %v5995_v43 }
 0x241   : > { %14262 = vmatmul.mubr.msk.bf16.vlgmr.msra.gmra.mrb[4].mxu1 %vm310_vm2, %v14254_v32  ;;  %v6023_v49 = vsel %vm314_vm1, %v6011_v11, 0 }
 0x242   : > { %6119 = vmatprep.mubr.bf16.mxu1 %v15133_v7 }
 0x243   : > { %v5999_v45 = vpop.permute.xlu1 %5998  ;;  %v5997_v47 = vpop.permute.xlu0 %5996 }
 0x244   : > { %v6012_v48 = vsel %vm6010_vm14, %v5995_v43, %v5997_v47  ;;  %v6013_v50 = vsel %vm6010_vm14, %v5997_v47, %v5999_v45 }
 0x245   : > { %14264 = vmatprep.subr.msk.bf16.mxu0 %vm314_vm1, %v6012_v48  ;;  %v6029_v55 = vsel %vm314_vm1, %v6013_v50, 0  ;;  %v6540_v48 = vunpack.c.0.s8 %v6539_v2  ;;  %v16522_v50 = vrot.slane %v251_v34, %v6480_v38 }
 0x246   : > { %6047 = vmatpush1.bf16.msra.mxu0 %v6023_v49 }
 0x247   : > { %v6003_v8 = vpop.permute.xlu1 %6002  ;;  %v6001_v13 = vpop.permute.xlu0 %6000 }
 0x248   : > { %v6014_v54 = vsel %vm6010_vm14, %v5999_v45, %v6001_v13  ;;  %v6015_v56 = vsel %vm6010_vm14, %v6001_v13, %v6003_v8  ;;  %v6488_v45 = vsub.s32 4, %v6471_v30 }
 0x249   : > { %14265 = vmatmul.mubr.msk.bf16.vlgmr.msra.gmra.mrb[0].mxu0 %vm310_vm2, %v14263_v51  ;;  %14266 = vmatprep.subr.msk.bf16.mxu1 %vm314_vm1, %v6014_v54  ;;  %v6035_v58 = vsel %vm314_vm1, %v6015_v56, 0  ;;  %v16528_v54 = vrot.slane %v251_v34, %v6484_v41  ;;  %v6492_v56 = vsub.s32 5, %v6471_v30 }
 0x24a   : > { %6088 = vmatpush1.bf16.msra.mxu1 %v6029_v55  ;;  %6160 = vmatprep.mubr.bf16.mxu0 %v15133_v7 }
 0x24b   : > { %v6007_v57 = vpop.permute.xlu1 %6006  ;;  %v6005_v12 = vpop.permute.xlu0 %6004 }
 0x24c   : > { %v6016_v46 = vsel %vm6010_vm14, %v6003_v8, %v6005_v12  ;;  %v6017_v59 = vsel %vm6010_vm14, %v6005_v12, %v6007_v57 }
 0x24d   : > { %14267 = vmatmul.mubr.msk.bf16.vlgmr.msra.gmra.mrb[0].mxu1 %vm310_vm2, %v14263_v51  ;;  %14268 = vmatprep.subr.msk.bf16.mxu0 %vm314_vm1, %v6016_v46  ;;  %v6041_v14 = vsel %vm314_vm1, %v6017_v59, 0 }
 0x24e   : > { %6129 = vmatpush1.bf16.msra.mxu0 %v6035_v58  ;;  %6201 = vmatprep.mubr.bf16.mxu1 %v15133_v7 }
 0x24f   : > { %v6221_v62 = vpop.permute.xlu1 %6220  ;;  %v6009_v52 = vpop.permute.xlu0 %6008 }
 0x250   : > { %v6018_v53 = vsel %vm6010_vm14, %v6007_v57, %v6009_v52 }
 0x251   : > { %14269 = vmatmul.mubr.msk.bf16.vlgmr.msra.gmra.mrb[4].mxu0 %vm310_vm2, %v14263_v51  ;;  %14270 = vmatprep.subr.msk.bf16.mxu1 %vm314_vm1, %v6018_v53 }
 0x252   : > { %6170 = vmatpush1.bf16.msra.mxu1 %v6041_v14  ;;  %6306 = vmatprep.mubr.bf16.mxu0 %v15133_v7 }
 0x253   : > { %v6225_v63 = vpop.permute.xlu1 %6224  ;;  %v6223_v0 = vpop.permute.xlu0 %6222 }
 0x254   : > { %v6239_v60 = vsel %vm6238_vm15, %v6221_v62, %v6223_v0  ;;  %v6240_v61 = vsel %vm6238_vm15, %v6223_v0, %v6225_v63  ;;  %v16532_v62 = vrot.slane %v251_v34, %v6488_v45  ;;  %v6500_v0 = vsub.s32 7, %v6471_v30 }
 0x255   : > { %14271 = vmatmul.mubr.msk.bf16.vlgmr.msra.gmra.mrb[4].mxu1 %vm310_vm2, %v14263_v51  ;;  %14273 = vmatprep.subr.msk.bf16.mxu0 %vm314_vm1, %v6240_v61  ;;  %v6251_v1 = vsel %vm314_vm1, %v6239_v60, 0  ;;  %v16538_v60 = vsub.s32 %v6540_v48, %v6471_v30 }
 0x256   : > { %6275 = vmatpush1.bf16.msra.mxu0 %v6251_v1  ;;  %6347 = vmatprep.mubr.bf16.mxu1 %v15133_v7 }
 0x257   : > { %v6229_v10 = vpop.permute.xlu1 %6228  ;;  %v6227_v15 = vpop.permute.xlu0 %6226 }
 0x258   : > { %v6241_v16 = vsel %vm6238_vm15, %v6225_v63, %v6227_v15  ;;  %v6242_v17 = vsel %vm6238_vm15, %v6227_v15, %v6229_v10  ;;  %v6496_v63 = vsub.s32 6, %v6471_v30 }
 0x259   : > { %14274 = vmatmul.mubr.msk.bf16.vlgmr.msra.gmra.mrb[0].mxu0 %vm310_vm2, %v14272_v6  ;;  %14275 = vmatprep.subr.msk.bf16.mxu1 %vm314_vm1, %v6242_v17  ;;  %v6257_v18 = vsel %vm314_vm1, %v6241_v16, 0 }
 0x25a   : > { %6316 = vmatpush1.bf16.msra.mxu1 %v6257_v18  ;;  %6388 = vmatprep.mubr.bf16.mxu0 %v15133_v7 }
 0x25b   : > { %v6233_v19 = vpop.permute.xlu1 %6232  ;;  %v6231_v20 = vpop.permute.xlu0 %6230 }
 0x25c   : > { %v6243_v21 = vsel %vm6238_vm15, %v6229_v10, %v6231_v20  ;;  %v6244_v22 = vsel %vm6238_vm15, %v6231_v20, %v6233_v19 }
 0x25d   : > { %14276 = vmatmul.mubr.msk.bf16.vlgmr.msra.gmra.mrb[0].mxu1 %vm310_vm2, %v14272_v6  ;;  %14277 = vmatprep.subr.msk.bf16.mxu0 %vm314_vm1, %v6244_v22  ;;  %v6263_v23 = vsel %vm314_vm1, %v6243_v21, 0  ;;  %v16548_v22 = vrot.slane %v251_v34, %v6496_v63 }
 0x25e   : > { %6357 = vmatpush1.bf16.msra.mxu0 %v6263_v23  ;;  %6429 = vmatprep.mubr.bf16.mxu1 %v15133_v7 }
 0x25f   : > { %v6237_v24 = vpop.permute.xlu1 %6236  ;;  %v6235_v25 = vpop.permute.xlu0 %6234 }
 0x260   : > { %v6245_v26 = vsel %vm6238_vm15, %v6233_v19, %v6235_v25  ;;  %v6246_v27 = vsel %vm6238_vm15, %v6235_v25, %v6237_v24  ;;  %v16552_v24 = vrot.slane %v251_v34, %v6500_v0 }
 0x261   : > { %14278 = vmatmul.mubr.msk.bf16.vlgmr.msra.gmra.mrb[4].mxu0 %vm310_vm2, %v14272_v6  ;;  %14279 = vmatprep.subr.msk.bf16.mxu1 %vm314_vm1, %v6246_v27  ;;  %v6269_v28 = vsel %vm314_vm1, %v6245_v26, 0  ;;  %vm6654_vm1 = vcmask 1041408  }
 0x262   : > { %6398 = vmatpush1.bf16.msra.mxu1 %v6269_v28  ;;  %6711 = vmatprep.mubr.bf16.mxu0 %v15133_v7 }
 0x265   : > { %14280 = vmatmul.mubr.msk.bf16.vlgmr.msra.gmra.mrb[4].mxu1 %vm310_vm2, %v14272_v6  ;;  %v16542_v6 = vrot.slane %v251_v34, %v6492_v56  ;;  %vm6650_vm2 = vcmask 31744  }
 0x266   : > { %6752 = vmatprep.mubr.bf16.mxu1 %v15133_v7 }
 0x270   : > { %v6450_v31 = vpop.permute.xlu0 %6449 }
 0x271   : > { %v6451_v32 = vrot.slane %v6450_v31, 4 }
 0x32c   : > { %v16508_v36 = vpop.f32.mrb[0].mxu0 }
 0x32d   : > { %v6453_v3 = vadd.f32 %v6451_v32, %v16508_v36  ;;  %v16513_v4 = vpop.f32.mrb[1].mxu0 }
 0x32e   : > { %v6454_v39 = vadd.f32 %v6451_v32, %v16513_v4  ;;  %v6312_v9 = vpop.f32.mrb[2].mxu0 }
 0x32f   : > { %v6461_v42 = vmax.f32 %v6453_v3, 0.0  ;;  %v6313_v43 = vpop.f32.mrb[3].mxu0 }
 0x330   : > { %v6462_v44 = vmax.f32 %v6454_v39, 0.0  ;;  %v16518_v11 = vpop.f32.mrb[0].mxu1 }
 0x331   : > { %v6510_v47 = vmul.f32 %v16511_v5, %v6461_v42  ;;  %v6455_v49 = vadd.f32 %v6451_v32, %v16518_v11  ;;  %v16524_v51 = vpop.f32.mrb[1].mxu1 }
 0x332   : > { %v6511_v8 = vmul.f32 %v16516_v40, %v6462_v44  ;;  %v6456_v13 = vadd.f32 %v6451_v32, %v16524_v51  ;;  %v6353_v55 = vpop.f32.mrb[2].mxu1 }
 0x333   : > { %v6463_v57 = vmax.f32 %v6455_v49, 0.0  ;;  %v6354_v12 = vpop.f32.mrb[3].mxu1 }
 0x334   : > { %v14281_v46 = vpack.c.bf16 %v6511_v8, %v6510_v47  ;;  %v6464_v58 = vmax.f32 %v6456_v13, 0.0  ;;  %v16530_v59 = vpop.f32.mrb[4].mxu0 }
 0x335   : > { %v6512_v52 = vmul.f32 %v16522_v50, %v6463_v57  ;;  %v6457_v53 = vadd.f32 %v6451_v32, %v16530_v59  ;;  %v16536_v14 = vpop.f32.mrb[5].mxu0 }
 0x336   : > { %v6513_v61 = vmul.f32 %v16528_v54, %v6464_v58  ;;  %v6458_v1 = vadd.f32 %v6451_v32, %v16536_v14  ;;  %v6394_v10 = vpop.f32.mrb[6].mxu0  ;;  %v6544_v25 = vrot.slane %v14281_v46, %v16538_v60 }
 0x337   : > { %v6465_v15 = vmax.f32 %v6457_v53, 0.0  ;;  %v6395_v16 = vpop.f32.mrb[7].mxu0 }
 0x338   : > { %v14282_v17 = vpack.c.bf16 %v6513_v61, %v6512_v52  ;;  %v6466_v18 = vmax.f32 %v6458_v1, 0.0  ;;  %v16544_v19 = vpop.f32.mrb[4].mxu1 }
 0x339   : > { %v6514_v20 = vmul.f32 %v16532_v62, %v6465_v15  ;;  %v6459_v21 = vadd.f32 %v6451_v32, %v16544_v19  ;;  %v16550_v23 = vpop.f32.mrb[5].mxu1  ;;  %v16737_v15 = vld [vmem:[%s18487_s2 + $0x2] sm:$0x3] }
 0x33a   : > { %v6551_v26 = vrot.slane %v14282_v17, %v16538_v60  ;;  %v6515_v27 = vmul.f32 %v16542_v6, %v6466_v18  ;;  %v6460_v28 = vadd.f32 %v6451_v32, %v16550_v23  ;;  %v6435_v29 = vpop.f32.mrb[6].mxu1 }
 0x33b   : > { %v6467_v30 = vmax.f32 %v6459_v21, 0.0  ;;  %v6436_v31 = vpop.f32.mrb[7].mxu1 }
 0x33c   : > { %v6552_v33 = vcombine.high %v6544_v25, %v6551_v26  ;;  %v14283_v35 = vpack.c.bf16 %v6515_v27, %v6514_v20  ;;  %v6468_v3 = vmax.f32 %v6460_v28, 0.0 }
 0x33d   : > { %v6516_v37 = vmul.f32 %v16548_v22, %v6467_v30 }
 0x33e   : > { %6572 = vst [vmem:[#allocation2 + $0x2] sm:$0xff] %v6552_v33  ;;  %v6517_v34 = vmul.f32 %v16552_v24, %v6468_v3  ;;  %v6561_v38 = vrot.slane %v14283_v35, %v16538_v60 }
 0x340   : > { %v14284_v2 = vpack.c.bf16 %v6517_v34, %v6516_v37 }
 0x342   : > { %v6568_v39 = vrot.slane %v14284_v2, %v16538_v60 }
 0x344   : > { %v6569_v9 = vcombine.high %v6561_v38, %v6568_v39 }
 0x345   : > { %v7062_v41 = vld [vmem:[#allocation2] sm:$0xff] }
 0x346   : > { %6573 = vst [vmem:[#allocation2 + $0xa] sm:$0xff] %v6569_v9  ;;  %v16563_v32 = vrot.slane %v7062_v41, %v16538_v60  ;;  %v6583_v42 = vcombine.high %v7062_v41, %v7062_v41 }
 0x348   : > { %7109 = vrot.lane.b32.xlu0 %v16563_v32, %s15135_s16  ;;  %6624 = vrot.lane.b32.xlu1 %v16563_v32, %s15132_s14  ;;  %v16570_v43 = vrot.slane %v6583_v42, %v16538_v60  ;;  %v16578_v44 = vcombine.high %v16563_v32, %v16563_v32 }
 0x34a   : > { %v16594_v45 = vcombine.high %v16570_v43, %v16570_v43 }
 0x34c   : > { %6843 = vrot.lane.b32.xlu1 %v16563_v32, %s15134_s15  ;;  %6628 = vrot.lane.b32.xlu0 %v16570_v43, %s15132_s14 }
 0x34d   : > { %v16600_v47 = vld.sshfl [vmem:[#allocation2 + $0x10] sm:$0x3 pattern:$0x76325410]  ;;  %v6576_v48 = vld [vmem:[#allocation2 + $0x8] sm:$0xff] }
 0x34e   : > { %v16611_v49 = vrot.slane %v6576_v48, %v16538_v60  ;;  %v6600_v8 = vcombine.high %v6576_v48, %v6576_v48 }
 0x350   : > { %7383 = vrot.lane.b32.xlu1 %v16563_v32, %s15136_s17  ;;  %6845 = vrot.lane.b32.xlu0 %v16578_v44, %s15134_s15  ;;  %v16622_v13 = vrot.slane %v6600_v8, %v16538_v60  ;;  %v16626_v55 = vcombine.high %v16611_v49, %v16611_v49 }
 0x352   : > { %v16642_v56 = vcombine.high %v16622_v13, %v16622_v13 }
 0x354   : > { %6626 = vrot.lane.b32.xlu1 %v16578_v44, %s15132_s14  ;;  %7113 = vrot.lane.b32.xlu0 %v16570_v43, %s15135_s16 }
 0x358   : > { %6847 = vrot.lane.b32.xlu1 %v16570_v43, %s15134_s15  ;;  %7385 = vrot.lane.b32.xlu0 %v16578_v44, %s15136_s17 }
 0x35c   : > { %7111 = vrot.lane.b32.xlu1 %v16578_v44, %s15135_s16  ;;  %6849 = vrot.lane.b32.xlu0 %v16594_v45, %s15134_s15 }
 0x360   : > { %6640 = vrot.lane.b32.xlu0 %v16600_v47, %s15132_s14  ;;  %6630 = vrot.lane.b32.xlu1 %v16594_v45, %s15132_s14 }
 0x364   : > { %7125 = vrot.lane.b32.xlu0 %v16600_v47, %s15135_s16  ;;  %7115 = vrot.lane.b32.xlu1 %v16594_v45, %s15135_s16 }
 0x368   : > { %6632 = vrot.lane.b32.xlu0 %v16611_v49, %s15132_s14  ;;  %6859 = vrot.lane.b32.xlu1 %v16600_v47, %s15134_s15 }
 0x36c   : > { %7117 = vrot.lane.b32.xlu0 %v16611_v49, %s15135_s16  ;;  %6851 = vrot.lane.b32.xlu1 %v16611_v49, %s15134_s15 }
 0x370   : > { %6636 = vrot.lane.b32.xlu0 %v16622_v13, %s15132_s14  ;;  %6634 = vrot.lane.b32.xlu1 %v16626_v55, %s15132_s14 }
 0x374   : > { %6853 = vrot.lane.b32.xlu0 %v16626_v55, %s15134_s15  ;;  %6855 = vrot.lane.b32.xlu1 %v16622_v13, %s15134_s15 }
 0x378   : > { %7121 = vrot.lane.b32.xlu0 %v16622_v13, %s15135_s16  ;;  %7119 = vrot.lane.b32.xlu1 %v16626_v55, %s15135_s16 }
 0x37c   : > { %7389 = vrot.lane.b32.xlu0 %v16594_v45, %s15136_s17  ;;  %6638 = vrot.lane.b32.xlu1 %v16642_v56, %s15132_s14  ;;  %s242_s14 = sand.u32 1, %s15122_s22  }
 0x380   : > { %7393 = vrot.lane.b32.xlu0 %v16626_v55, %s15136_s17  ;;  %7387 = vrot.lane.b32.xlu1 %v16570_v43, %s15136_s17 }
 0x384   : > { %6857 = vrot.lane.b32.xlu0 %v16642_v56, %s15134_s15  ;;  %7391 = vrot.lane.b32.xlu1 %v16611_v49, %s15136_s17  ;;  %s18539_s15 = smov 127  }
 0x388   : > { %7657 = vrot.lane.b32.xlu0 %v16563_v32, %s15137_s18  ;;  %7395 = vrot.lane.b32.xlu1 %v16622_v13, %s15136_s17 }
 0x38c   : > { %7661 = vrot.lane.b32.xlu0 %v16570_v43, %s15137_s18  ;;  %7399 = vrot.lane.b32.xlu1 %v16600_v47, %s15136_s17 }
 0x390   : > { %7665 = vrot.lane.b32.xlu0 %v16611_v49, %s15137_s18  ;;  %7659 = vrot.lane.b32.xlu1 %v16578_v44, %s15137_s18 }
 0x394   : > { %7669 = vrot.lane.b32.xlu0 %v16622_v13, %s15137_s18  ;;  %7663 = vrot.lane.b32.xlu1 %v16594_v45, %s15137_s18 }
 0x398   : > { %7673 = vrot.lane.b32.xlu0 %v16600_v47, %s15137_s18  ;;  %7667 = vrot.lane.b32.xlu1 %v16626_v55, %s15137_s18 }
 0x39c   : > { %7933 = vrot.lane.b32.xlu0 %v16578_v44, %s15138_s19  ;;  %7123 = vrot.lane.b32.xlu1 %v16642_v56, %s15135_s16  ;;  %s18540_s16 = smov 119  }
 0x3a0   : > { %7937 = vrot.lane.b32.xlu0 %v16594_v45, %s15138_s19  ;;  %7931 = vrot.lane.b32.xlu1 %v16563_v32, %s15138_s19 }
 0x3a4   : > { %7397 = vrot.lane.b32.xlu0 %v16642_v56, %s15136_s17  ;;  %7935 = vrot.lane.b32.xlu1 %v16570_v43, %s15138_s19 }
 0x3a8   : > { %7941 = vrot.lane.b32.xlu0 %v16626_v55, %s15138_s19  ;;  %7939 = vrot.lane.b32.xlu1 %v16611_v49, %s15138_s19 }
 0x3ac   : > { %8205 = vrot.lane.b32.xlu0 %v16563_v32, %s15139_s20  ;;  %7943 = vrot.lane.b32.xlu1 %v16622_v13, %s15138_s19 }
 0x3b0   : > { %8209 = vrot.lane.b32.xlu0 %v16570_v43, %s15139_s20  ;;  %7947 = vrot.lane.b32.xlu1 %v16600_v47, %s15138_s19 }
 0x3b4   : > { %8213 = vrot.lane.b32.xlu0 %v16611_v49, %s15139_s20  ;;  %8207 = vrot.lane.b32.xlu1 %v16578_v44, %s15139_s20 }
 0x3b8   : > { %8217 = vrot.lane.b32.xlu0 %v16622_v13, %s15139_s20  ;;  %8211 = vrot.lane.b32.xlu1 %v16594_v45, %s15139_s20 }
 0x3ba   : > { %v16708_v57 = vpop.permute.xlu0 %7109  ;;  %v6625_v12 = vpop.permute.xlu1 %6624 }
 0x3bc   : > { %8221 = vrot.lane.b32.xlu0 %v16600_v47, %s15139_s20  ;;  %7671 = vrot.lane.b32.xlu1 %v16642_v56, %s15137_s18  ;;  %s18536_s18 = smov 10  }
 0x3be   : > { %v6844_v46 = vpop.permute.xlu1 %6843  ;;  %v6629_v58 = vpop.permute.xlu0 %6628 }
 0x3c0   : > { %8481 = vrot.lane.b32.xlu0 %v16578_v44, %s15140_s29  ;;  %8215 = vrot.lane.b32.xlu1 %v16626_v55, %s15139_s20 }
 0x3c2   : > { %v16718_v52 = vpop.permute.xlu1 %7383  ;;  %v6846_v53 = vpop.permute.xlu0 %6845 }
 0x3c3   : > { %v6861_v9 = vsel %vm521_vm3, %v6844_v46, %v6846_v53 }
 0x3c4   : > { %7945 = vrot.lane.b32.xlu0 %v16642_v56, %s15138_s19  ;;  %8479 = vrot.lane.b32.xlu1 %v16563_v32, %s15140_s29  ;;  %v6873_v8 = vsel %vm6654_vm1, %v6861_v9, 0  ;;  %s18547_s19 = smov 37  }
 0x3c6   : > { %v6627_v63 = vpop.permute.xlu1 %6626  ;;  %v16724_v0 = vpop.permute.xlu0 %7113 }
 0x3c7   : > { %v6642_v61 = vsel %vm301_vm0, %v6625_v12, %v6627_v63  ;;  %v6643_v1 = vsel %vm301_vm0, %v6627_v63, %v6629_v58 }
 0x3c8   : > { %14287 = vmatprep.subr.msk.bf16.mxu0 %vm6654_vm1, %v6643_v1  ;;  %8485 = vrot.lane.b32.xlu0 %v16594_v45, %s15140_s29  ;;  %v6656_v10 = vsel %vm6654_vm1, %v6642_v61, 0  ;;  %v16823_v1 = vld [vmem:[%s18487_s2] sm:$0x3] }
 0x3c9   : > { %8483 = vrot.lane.b32.xlu1 %v16570_v43, %s15140_s29  ;;  %6680 = vmatpush1.bf16.msra.mxu0 %v6656_v10 }
 0x3ca   : > { %v16739_v16 = vpop.permute.xlu1 %6847  ;;  %v16741_v17 = vpop.permute.xlu0 %7385 }
 0x3cb   : > { %v6862_v41 = vsel %vm521_vm3, %v6846_v53, %v16739_v16 }
 0x3cc   : > { %8489 = vrot.lane.b32.xlu0 %v16626_v55, %s15140_s29  ;;  %14288 = vmatmul.mubr.msk.bf16.vlgmr.msra.gmra.mrb[8].mxu0 %vm6650_vm2, %v16737_v15 }
 0x3cd   : > { %8487 = vrot.lane.b32.xlu1 %v16611_v49, %s15140_s29  ;;  %6793 = vmatprep.mubr.bf16.mxu0 %v15133_v7 }
 0x3ce   : > { %v16750_v18 = vpop.permute.xlu1 %7111  ;;  %v16752_v20 = vpop.permute.xlu0 %6849 }
 0x3d0   : > { %8753 = vrot.lane.b32.xlu0 %v16563_v32, %s15141_s11 }
 0x3d1   : > { %8491 = vrot.lane.b32.xlu1 %v16622_v13, %s15140_s29 }
 0x3d2   : > { %v6641_v21 = vpop.permute.xlu0 %6640  ;;  %v6631_v25 = vpop.permute.xlu1 %6630 }
 0x3d3   : > { %v6644_v28 = vsel %vm301_vm0, %v6629_v58, %v6631_v25 }
 0x3d4   : > { %8757 = vrot.lane.b32.xlu0 %v16570_v43, %s15141_s11  ;;  %v6662_v33 = vsel %vm6654_vm1, %v6644_v28, 0 }
 0x3d5   : > { %8495 = vrot.lane.b32.xlu1 %v16600_v47, %s15140_s29 }
 0x3d6   : > { %v16762_v26 = vpop.permute.xlu0 %7125  ;;  %v16764_v27 = vpop.permute.xlu1 %7115 }
 0x3d8   : > { %8761 = vrot.lane.b32.xlu0 %v16611_v49, %s15141_s11 }
 0x3d9   : > { %8755 = vrot.lane.b32.xlu1 %v16578_v44, %s15141_s11 }
 0x3da   : > { %v6633_v29 = vpop.permute.xlu0 %6632  ;;  %v16771_v30 = vpop.permute.xlu1 %6859 }
 0x3db   : > { %v6645_v31 = vsel %vm301_vm0, %v6631_v25, %v6633_v29 }
 0x3dc   : > { %8765 = vrot.lane.b32.xlu0 %v16622_v13, %s15141_s11  ;;  %14289 = vmatprep.subr.msk.bf16.mxu1 %vm6654_vm1, %v6645_v31  ;;  %v6863_v31 = vsel %vm521_vm3, %v16739_v16, %v16752_v20 }
 0x3dd   : > { %8219 = vrot.lane.b32.xlu1 %v16642_v56, %s15139_s20  ;;  %6721 = vmatpush1.bf16.msra.mxu1 %v6662_v33  ;;  %v6879_v16 = vsel %vm6654_vm1, %v6863_v31, 0 }
 0x3de   : > { %v16780_v35 = vpop.permute.xlu0 %7117  ;;  %v6852_v3 = vpop.permute.xlu1 %6851 }
 0x3e0   : > { %8769 = vrot.lane.b32.xlu0 %v16600_v47, %s15141_s11  ;;  %14290 = vmatmul.mubr.msk.bf16.vlgmr.msra.gmra.mrb[8].mxu1 %vm6650_vm2, %v16737_v15 }
 0x3e1   : > { %8759 = vrot.lane.b32.xlu1 %v16594_v45, %s15141_s11  ;;  %6834 = vmatprep.mubr.bf16.mxu1 %v15133_v7 }
 0x3e2   : > { %v6637_v37 = vpop.permute.xlu0 %6636  ;;  %v6635_v34 = vpop.permute.xlu1 %6634 }
 0x3e3   : > { %v6646_v2 = vsel %vm301_vm0, %v6633_v29, %v6635_v34  ;;  %v6647_v38 = vsel %vm301_vm0, %v6635_v34, %v6637_v37 }
 0x3e4   : > { %8493 = vrot.lane.b32.xlu0 %v16642_v56, %s15140_s29  ;;  %14291 = vmatprep.subr.msk.bf16.mxu0 %vm6654_vm1, %v6647_v38  ;;  %v6668_v39 = vsel %vm6654_vm1, %v6646_v2, 0  ;;  %s18537_s29 = smov 9  }
 0x3e5   : > { %8763 = vrot.lane.b32.xlu1 %v16626_v55, %s15141_s11  ;;  %6762 = vmatpush1.bf16.msra.mxu0 %v6668_v39 }
 0x3e6   : > { %v6854_v42 = vpop.permute.xlu0 %6853  ;;  %14295 = vmatprep.subr.msk.bf16.mxu0 %vm6654_vm1, %v6862_v41  ;;  %v6856_v48 = vpop.permute.xlu1 %6855 }
 0x3e7   : > { %v6866_v12 = vsel %vm521_vm3, %v6854_v42, %v6856_v48  ;;  %v6865_v53 = vsel %vm521_vm3, %v6852_v3, %v6854_v42  ;;  %v7130_v42 = vsel %vm741_vm4, %v16764_v27, %v16780_v35 }
 0x3e8   : > { %9029 = vrot.lane.b32.xlu0 %v16578_v44, %s15142_s28  ;;  %14292 = vmatmul.mubr.msk.bf16.vlgmr.msra.gmra.mrb[12].mxu0 %vm6650_vm2, %v16737_v15  ;;  %v6885_v29 = vsel %vm6654_vm1, %v6865_v53, 0 }
 0x3e9   : > { %9027 = vrot.lane.b32.xlu1 %v16563_v32, %s15142_s28  ;;  %6897 = vmatpush1.bf16.msra.mxu0 %v6873_v8 }
 0x3ea   : > { %v16809_v46 = vpop.permute.xlu0 %7121  ;;  %14299 = vmatprep.subr.msk.bf16.mxu0 %vm6654_vm1, %v6866_v12  ;;  %v7120_v58 = vpop.permute.xlu1 %7119  ;;  %6928 = vmatprep.mubr.bf16.mxu0 %v15133_v7  ;;  %v14303_v12 = vld [vmem:[%s18487_s2 + $0x4] sm:$0x3] }
 0x3eb   : > { %v7131_v41 = vsel %vm741_vm4, %v16780_v35, %v7120_v58 }
 0x3ec   : > { %9033 = vrot.lane.b32.xlu0 %v16594_v45, %s15142_s28  ;;  %v7151_v35 = vsel %vm6654_vm1, %v7131_v41, 0 }
 0x3ed   : > { %9031 = vrot.lane.b32.xlu1 %v16570_v43, %s15142_s28 }
 0x3ee   : > { %v16818_v63 = vpop.permute.xlu0 %7389  ;;  %v6639_v61 = vpop.permute.xlu1 %6638 }
 0x3ef   : > { %v6648_v10 = vsel %vm301_vm0, %v6637_v37, %v6639_v61  ;;  %v6649_v25 = vsel %vm301_vm0, %v6639_v61, %v6641_v21  ;;  %v7128_v21 = vsel %vm741_vm4, %v16750_v18, %v16724_v0  ;;  %v6864_v37 = vsel %vm521_vm3, %v16752_v20, %v6852_v3 }
 0x3f0   : > { %9037 = vrot.lane.b32.xlu0 %v16626_v55, %s15142_s28  ;;  %14293 = vmatprep.subr.msk.bf16.mxu1 %vm6654_vm1, %v6649_v25  ;;  %v6674_v28 = vsel %vm6654_vm1, %v6648_v10, 0  ;;  %v7127_v20 = vsel %vm741_vm4, %v16708_v57, %v16750_v18  ;;  %v7132_v18 = vsel %vm741_vm4, %v7120_v58, %v16809_v46  ;;  %v7129_v58 = vsel %vm741_vm4, %v16724_v0, %v16764_v27 }
 0x3f1   : > { %9035 = vrot.lane.b32.xlu1 %v16611_v49, %s15142_s28  ;;  %14296 = vmatmul.mubr.msk.bf16.vlgmr.msra.gmra.mrb[16].mxu0 %vm6650_vm2, %v16823_v1  ;;  %v7139_v57 = vsel %vm6654_vm1, %v7127_v20, 0  ;;  %v7145_v0 = vsel %vm6654_vm1, %v7129_v58, 0  ;;  %v7401_v27 = vsel %vm969_vm5, %v16718_v52, %v16741_v17  ;;  %vm18545_vm0 = vcmask 7168  }
 0x3f2   : > { %6979 = vmatpush1.bf16.msra.mxu0 %v6885_v29  ;;  %6803 = vmatpush1.bf16.msra.mxu1 %v6674_v28  ;;  %v16842_v33 = vpop.permute.xlu0 %7393  ;;  %v16846_v34 = vpop.permute.xlu1 %7387 }
 0x3f3   : > { %14305 = vmatprep.subr.msk.bf16.mxu0 %vm6654_vm1, %v7128_v21  ;;  %14297 = vmatprep.subr.msk.bf16.mxu1 %vm6654_vm1, %v6864_v37  ;;  %v7402_v53 = vsel %vm969_vm5, %v16741_v17, %v16846_v34 }
 0x3f4   : > { %9301 = vrot.lane.b32.xlu0 %v16563_v32, %s18536_s18  ;;  %7010 = vmatprep.mubr.bf16.mxu0 %v15133_v7 }
 0x3f5   : > { %9039 = vrot.lane.b32.xlu1 %v16622_v13, %s15142_s28  ;;  %14294 = vmatmul.mubr.msk.bf16.vlgmr.msra.gmra.mrb[12].mxu1 %vm6650_vm2, %v16737_v15 }
 0x3f6   : > { %6938 = vmatpush1.bf16.msra.mxu1 %v6879_v16  ;;  %v6858_v3 = vpop.permute.xlu0 %6857  ;;  %v16861_v2 = vpop.permute.xlu1 %7391  ;;  %6969 = vmatprep.mubr.bf16.mxu1 %v15133_v7  ;;  %v16961_v16 = vld [vmem:[%s18487_s2 + $0x6] sm:$0x3] }
 0x3f7   : > { %v6868_v38 = vsel %vm521_vm3, %v6858_v3, %v16771_v30  ;;  %v6867_v15 = vsel %vm521_vm3, %v6856_v48, %v6858_v3  ;;  %v7405_v31 = vsel %vm969_vm5, %v16861_v2, %v16842_v33  ;;  %vm18546_vm3 = vmmov %vm18545_vm0 }
 0x3f8   : > { %9305 = vrot.lane.b32.xlu0 %v16570_v43, %s18536_s18  ;;  %14301 = vmatprep.subr.msk.bf16.mxu1 %vm6654_vm1, %v6868_v38  ;;  %v6891_v9 = vsel %vm6654_vm1, %v6867_v15, 0  ;;  %v7425_v38 = vsel %vm6654_vm1, %v7405_v31, 0  ;;  %v7404_v15 = vsel %vm969_vm5, %v16818_v63, %v16861_v2  ;;  %v10315_v31 = vld [vmem:[#allocation2 + $0x2] sm:$0xff] }
 0x3f9   : > { %9043 = vrot.lane.b32.xlu1 %v16600_v47, %s15142_s28  ;;  %14300 = vmatmul.mubr.msk.bf16.vlgmr.msra.gmra.mrb[20].mxu0 %vm6650_vm2, %v16823_v1 }
 0x3fa   : > { %7163 = vmatpush1.bf16.msra.mxu0 %v7139_v57  ;;  %v16877_v30 = vpop.permute.xlu0 %7657  ;;  %v16879_v39 = vpop.permute.xlu1 %7395  ;;  %7194 = vmatprep.mubr.bf16.mxu0 %v15133_v7 }
 0x3fb   : > { %14309 = vmatprep.subr.msk.bf16.mxu0 %vm6654_vm1, %v7132_v18  ;;  %v7406_v52 = vsel %vm969_vm5, %v16842_v33, %v16879_v39 }
 0x3fc   : > { %9309 = vrot.lane.b32.xlu0 %v16611_v49, %s18536_s18 }
 0x3fd   : > { %8767 = vrot.lane.b32.xlu1 %v16642_v56, %s15141_s11  ;;  %14298 = vmatmul.mubr.msk.bf16.vlgmr.msra.gmra.mrb[16].mxu1 %vm6650_vm2, %v16823_v1  ;;  %s18552_s11 = smov 29  }
 0x3fe   : > { %7020 = vmatpush1.bf16.msra.mxu1 %v6891_v9  ;;  %v16895_v48 = vpop.permute.xlu0 %7661  ;;  %v16897_v8 = vpop.permute.xlu1 %7399  ;;  %7051 = vmatprep.mubr.bf16.mxu1 %v15133_v7 }
 0x3ff   : > { %14307 = vmatprep.subr.msk.bf16.mxu1 %vm6654_vm1, %v7130_v42 }
 0x400   : > { %9313 = vrot.lane.b32.xlu0 %v16622_v13, %s18536_s18 }
 0x401   : > { %9303 = vrot.lane.b32.xlu1 %v16578_v44, %s18536_s18  ;;  %14306 = vmatmul.mubr.msk.bf16.vlgmr.msra.gmra.mrb[24].mxu0 %vm6650_vm2, %v14303_v12 }
 0x402   : > { %7245 = vmatpush1.bf16.msra.mxu0 %v7151_v35  ;;  %v16916_v61 = vpop.permute.xlu0 %7665  ;;  %v7660_v10 = vpop.permute.xlu1 %7659  ;;  %7276 = vmatprep.mubr.bf16.mxu0 %v15133_v7 }
 0x403   : > { %14315 = vmatprep.subr.msk.bf16.mxu0 %vm6654_vm1, %v7402_v53 }
 0x404   : > { %9041 = vrot.lane.b32.xlu0 %v16642_v56, %s15142_s28 }
 0x405   : > { %9307 = vrot.lane.b32.xlu1 %v16594_v45, %s18536_s18  ;;  %14302 = vmatmul.mubr.msk.bf16.vlgmr.msra.gmra.mrb[20].mxu1 %vm6650_vm2, %v16823_v1  ;;  %v7413_v1 = vsel %vm6654_vm1, %v7401_v27, 0 }
 0x406   : > { %7204 = vmatpush1.bf16.msra.mxu1 %v7145_v0  ;;  %v16930_v25 = vpop.permute.xlu0 %7669  ;;  %v16932_v28 = vpop.permute.xlu1 %7663  ;;  %7235 = vmatprep.mubr.bf16.mxu1 %v15133_v7 }
 0x407   : > { %v7678_v58 = vsel %vm1197_vm6, %v16932_v28, %v16916_v61  ;;  %v7677_v0 = vsel %vm1197_vm6, %v16895_v48, %v16932_v28 }
 0x408   : > { %9317 = vrot.lane.b32.xlu0 %v16600_v47, %s18536_s18 }
 0x409   : > { %9311 = vrot.lane.b32.xlu1 %v16626_v55, %s18536_s18  ;;  %14310 = vmatmul.mubr.msk.bf16.vlgmr.msra.gmra.mrb[28].mxu0 %vm6650_vm2, %v14303_v12 }
 0x40a   : > { %7437 = vmatpush1.bf16.msra.mxu0 %v7413_v1  ;;  %v16944_v17 = vpop.permute.xlu0 %7673  ;;  %v7668_v29 = vpop.permute.xlu1 %7667  ;;  %7468 = vmatprep.mubr.bf16.mxu0 %v15133_v7 }
 0x40b   : > { %14319 = vmatprep.subr.msk.bf16.mxu0 %vm6654_vm1, %v7406_v52 }
 0x40c   : > { %9577 = vrot.lane.b32.xlu0 %v16578_v44, %s18537_s29 }
 0x40d   : > { %9575 = vrot.lane.b32.xlu1 %v16563_v32, %s18537_s29  ;;  %14308 = vmatmul.mubr.msk.bf16.vlgmr.msra.gmra.mrb[24].mxu1 %vm6650_vm2, %v14303_v12 }
 0x40e   : > { %v16956_v21 = vpop.permute.xlu0 %7933  ;;  %v7124_v37 = vpop.permute.xlu1 %7123  ;;  %7317 = vmatprep.mubr.bf16.mxu1 %v15133_v7 }
 0x40f   : > { %v7133_v20 = vsel %vm741_vm4, %v16809_v46, %v7124_v37  ;;  %v7134_v3 = vsel %vm741_vm4, %v7124_v37, %v16762_v26  ;;  %v7403_v46 = vsel %vm969_vm5, %v16846_v34, %v16818_v63  ;;  %v7676_v26 = vsel %vm1197_vm6, %v7660_v10, %v16895_v48  ;;  %vm18548_vm4 = vmmov %vm18545_vm0 }
 0x410   : > { %9581 = vrot.lane.b32.xlu0 %v16594_v45, %s18537_s29  ;;  %14311 = vmatprep.subr.msk.bf16.mxu1 %vm6654_vm1, %v7134_v3  ;;  %v7157_v33 = vsel %vm6654_vm1, %v7133_v20, 0  ;;  %v7419_v34 = vsel %vm6654_vm1, %v7403_v46, 0  ;;  %v7675_v63 = vsel %vm1197_vm6, %v16877_v30, %v7660_v10  ;;  %v7693_v48 = vsel %vm6654_vm1, %v7677_v0, 0 }
 0x411   : > { %9579 = vrot.lane.b32.xlu1 %v16570_v43, %s18537_s29  ;;  %14316 = vmatmul.mubr.msk.bf16.vlgmr.msra.gmra.mrb[32].mxu0 %vm6650_vm2, %v16961_v16  ;;  %v7687_v30 = vsel %vm6654_vm1, %v7675_v63, 0  ;;  %v10321_v37 = vcombine.high %v10315_v31, %v10315_v31 }
 0x412   : > { %7519 = vmatpush1.bf16.msra.mxu0 %v7425_v38  ;;  %7286 = vmatpush1.bf16.msra.mxu1 %v7157_v33  ;;  %v16982_v57 = vpop.permute.xlu0 %7937  ;;  %v7932_v18 = vpop.permute.xlu1 %7931 }
 0x413   : > { %14325 = vmatprep.subr.msk.bf16.mxu0 %vm6654_vm1, %v7676_v26  ;;  %14317 = vmatprep.subr.msk.bf16.mxu1 %vm6654_vm1, %v7404_v15  ;;  %v7949_v28 = vsel %vm1425_vm7, %v7932_v18, %v16956_v21 }
 0x414   : > { %9585 = vrot.lane.b32.xlu0 %v16626_v55, %s18537_s29  ;;  %7550 = vmatprep.mubr.bf16.mxu0 %v15133_v7 }
 0x415   : > { %9583 = vrot.lane.b32.xlu1 %v16611_v49, %s18537_s29  ;;  %14312 = vmatmul.mubr.msk.bf16.vlgmr.msra.gmra.mrb[28].mxu1 %vm6650_vm2, %v14303_v12 }
 0x416   : > { %7478 = vmatpush1.bf16.msra.mxu1 %v7419_v34  ;;  %v7398_v2 = vpop.permute.xlu0 %7397  ;;  %v16998_v9 = vpop.permute.xlu1 %7935  ;;  %7509 = vmatprep.mubr.bf16.mxu1 %v15133_v7 }
 0x417   : > { %v7408_v41 = vsel %vm969_vm5, %v7398_v2, %v16897_v8  ;;  %v7407_v42 = vsel %vm969_vm5, %v16879_v39, %v7398_v2  ;;  %v7680_v8 = vsel %vm1197_vm6, %v7668_v29, %v16930_v25  ;;  %v7679_v39 = vsel %vm1197_vm6, %v16916_v61, %v7668_v29  ;;  %vm18549_vm5 = vmmov %vm18545_vm0 }
 0x418   : > { %9849 = vrot.lane.b32.xlu0 %v16563_v32, %s18538_s12  ;;  %14321 = vmatprep.subr.msk.bf16.mxu1 %vm6654_vm1, %v7408_v41  ;;  %v7431_v32 = vsel %vm6654_vm1, %v7407_v42, 0  ;;  %v7699_v61 = vsel %vm6654_vm1, %v7679_v39, 0  ;;  %v7950_v27 = vsel %vm1425_vm7, %v16956_v21, %v16998_v9  ;;  %v7951_v63 = vsel %vm1425_vm7, %v16998_v9, %v16982_v57 }
 0x419   : > { %9587 = vrot.lane.b32.xlu1 %v16622_v13, %s18537_s29  ;;  %14320 = vmatmul.mubr.msk.bf16.vlgmr.msra.gmra.mrb[36].mxu0 %vm6650_vm2, %v16961_v16  ;;  %v7967_v9 = vsel %vm6654_vm1, %v7951_v63, 0 }
 0x41a   : > { %7711 = vmatpush1.bf16.msra.mxu0 %v7687_v30  ;;  %v7942_v12 = vpop.permute.xlu0 %7941  ;;  %v17015_v35 = vpop.permute.xlu1 %7939  ;;  %7742 = vmatprep.mubr.bf16.mxu0 %v15133_v7 }
 0x41b   : > { %14329 = vmatprep.subr.msk.bf16.mxu0 %vm6654_vm1, %v7680_v8  ;;  %v7953_v3 = vsel %vm1425_vm7, %v17015_v35, %v7942_v12  ;;  %v7952_v30 = vsel %vm1425_vm7, %v16982_v57, %v17015_v35 }
 0x41c   : > { %9853 = vrot.lane.b32.xlu0 %v16570_v43, %s18538_s12  ;;  %v17038_v43 = vld [vmem:[%s18487_s2 + $0x8] sm:$0x3]  ;;  %v7973_v34 = vsel %vm6654_vm1, %v7953_v3, 0 }
 0x41d   : > { %9315 = vrot.lane.b32.xlu1 %v16642_v56, %s18536_s18  ;;  %14318 = vmatmul.mubr.msk.bf16.vlgmr.msra.gmra.mrb[32].mxu1 %vm6650_vm2, %v16961_v16 }
 0x41e   : > { %7560 = vmatpush1.bf16.msra.mxu1 %v7431_v32  ;;  %v17031_v53 = vpop.permute.xlu0 %8205  ;;  %v17033_v10 = vpop.permute.xlu1 %7943  ;;  %7591 = vmatprep.mubr.bf16.mxu1 %v15133_v7 }
 0x41f   : > { %14327 = vmatprep.subr.msk.bf16.mxu1 %vm6654_vm1, %v7678_v58  ;;  %v7954_v21 = vsel %vm1425_vm7, %v7942_v12, %v17033_v10 }
 0x420   : > { %9857 = vrot.lane.b32.xlu0 %v16611_v49, %s18538_s12 }
 0x421   : > { %9591 = vrot.lane.b32.xlu1 %v16600_v47, %s18537_s29  ;;  %14326 = vmatmul.mubr.msk.bf16.vlgmr.msra.gmra.mrb[40].mxu0 %vm6650_vm2, %v17038_v43 }
 0x422   : > { %7793 = vmatpush1.bf16.msra.mxu0 %v7699_v61  ;;  %v17055_v1 = vpop.permute.xlu0 %8209  ;;  %v17057_v49 = vpop.permute.xlu1 %7947  ;;  %7824 = vmatprep.mubr.bf16.mxu0 %v15133_v7 }
 0x423   : > { %14335 = vmatprep.subr.msk.bf16.mxu0 %vm6654_vm1, %v7950_v27 }
 0x424   : > { %9589 = vrot.lane.b32.xlu0 %v16642_v56, %s18537_s29  ;;  %s18541_s29 = smov 118  }
 0x425   : > { %9851 = vrot.lane.b32.xlu1 %v16578_v44, %s18538_s12  ;;  %14322 = vmatmul.mubr.msk.bf16.vlgmr.msra.gmra.mrb[36].mxu1 %vm6650_vm2, %v16961_v16  ;;  %v7961_v44 = vsel %vm6654_vm1, %v7949_v28, 0  ;;  %v17192_v28 = vld [vmem:[%s18487_s2 + $0xc] sm:$0x3] }
 0x426   : > { %7752 = vmatpush1.bf16.msra.mxu1 %v7693_v48  ;;  %v17070_v52 = vpop.permute.xlu0 %8213  ;;  %v8208_v29 = vpop.permute.xlu1 %8207  ;;  %7783 = vmatprep.mubr.bf16.mxu1 %v15133_v7 }
 0x427   : > { %v8224_v2 = vsel %vm1653_vm8, %v8208_v29, %v17055_v1  ;;  %v8223_v57 = vsel %vm1653_vm8, %v17031_v53, %v8208_v29 }
 0x428   : > { %9861 = vrot.lane.b32.xlu0 %v16622_v13, %s18538_s12  ;;  %v17088_v13 = vrot.slane %v10315_v31, %v16538_v60  ;;  %v8235_v39 = vsel %vm6654_vm1, %v8223_v57, 0 }
 0x429   : > { %9855 = vrot.lane.b32.xlu1 %v16594_v45, %s18538_s12  ;;  %14330 = vmatmul.mubr.msk.bf16.vlgmr.msra.gmra.mrb[44].mxu0 %vm6650_vm2, %v17038_v43  ;;  %v17098_v45 = vrot.slane %v10321_v37, %v16538_v60 }
 0x42a   : > { %7985 = vmatpush1.bf16.msra.mxu0 %v7961_v44  ;;  %v17082_v16 = vpop.permute.xlu0 %8217  ;;  %v17084_v20 = vpop.permute.xlu1 %8211  ;;  %8016 = vmatprep.mubr.bf16.mxu0 %v15133_v7  ;;  %v17106_v46 = vcombine.high %v17088_v13, %v17088_v13 }
 0x42b   : > { %14339 = vmatprep.subr.msk.bf16.mxu0 %vm6654_vm1, %v7954_v21  ;;  %v8225_v31 = vsel %vm1653_vm8, %v17055_v1, %v17084_v20  ;;  %v17210_v21 = vld.sshfl [vmem:[#allocation2 + $0x12] sm:$0x3 pattern:$0x76325410] }
 0x42c   : > { %9865 = vrot.lane.b32.xlu0 %v16600_v47, %s18538_s12  ;;  %v17111_v47 = vld [vmem:[%s18487_s2 + $0xa] sm:$0x3]  ;;  %v8241_v1 = vsel %vm6654_vm1, %v8225_v31, 0 }
 0x42d   : > { %9859 = vrot.lane.b32.xlu1 %v16626_v55, %s18538_s12  ;;  %14328 = vmatmul.mubr.msk.bf16.vlgmr.msra.gmra.mrb[40].mxu1 %vm6650_vm2, %v17038_v43  ;;  %v10316_v55 = vld [vmem:[#allocation2 + $0xa] sm:$0xff] }
 0x42e   : > { %v17102_v33 = vpop.permute.xlu0 %8221  ;;  %v7672_v38 = vpop.permute.xlu1 %7671  ;;  %7865 = vmatprep.mubr.bf16.mxu1 %v15133_v7  ;;  %v10338_v0 = vcombine.high %v10316_v55, %v10316_v55 }
 0x42f   : > { %v7681_v26 = vsel %vm1197_vm6, %v16930_v25, %v7672_v38  ;;  %v7682_v15 = vsel %vm1197_vm6, %v7672_v38, %v16944_v17  ;;  %v17129_v25 = vcombine.high %v17098_v45, %v17098_v45  ;;  %v17132_v17 = vrot.slane %v10316_v55, %v16538_v60  ;;  %vm18550_vm6 = vmmov %vm18545_vm0 }
 0x430   : > { %10364 = vrot.lane.b32.xlu0 %v17106_v46, %s18539_s15  ;;  %14331 = vmatprep.subr.msk.bf16.mxu1 %vm6654_vm1, %v7682_v15  ;;  %v7705_v18 = vsel %vm6654_vm1, %v7681_v26, 0  ;;  %v17197_v29 = vrot.slane %v10338_v0, %v16538_v60 }
 0x431   : > { %10362 = vrot.lane.b32.xlu1 %v17088_v13, %s18539_s15  ;;  %14336 = vmatmul.mubr.msk.bf16.vlgmr.msra.gmra.mrb[48].mxu0 %vm6650_vm2, %v17111_v47  ;;  %v17156_v35 = vcombine.high %v17132_v17, %v17132_v17 }
 0x432   : > { %8067 = vmatpush1.bf16.msra.mxu0 %v7973_v34  ;;  %7834 = vmatpush1.bf16.msra.mxu1 %v7705_v18  ;;  %v8482_v41 = vpop.permute.xlu0 %8481  ;;  %v8216_v42 = vpop.permute.xlu1 %8215 }
 0x433   : > { %14345 = vmatprep.subr.msk.bf16.mxu0 %vm6654_vm1, %v8224_v2  ;;  %14337 = vmatprep.subr.msk.bf16.mxu1 %vm6654_vm1, %v7952_v30  ;;  %v8228_v53 = vsel %vm1653_vm8, %v8216_v42, %v17082_v16  ;;  %v8227_v27 = vsel %vm1653_vm8, %v17070_v52, %v8216_v42 }
 0x434   : > { %10368 = vrot.lane.b32.xlu0 %v17129_v25, %s18539_s15  ;;  %8098 = vmatprep.mubr.bf16.mxu0 %v15133_v7 }
 0x435   : > { %10366 = vrot.lane.b32.xlu1 %v17098_v45, %s18539_s15  ;;  %14332 = vmatmul.mubr.msk.bf16.vlgmr.msra.gmra.mrb[44].mxu1 %vm6650_vm2, %v17038_v43 }
 0x436   : > { %8026 = vmatpush1.bf16.msra.mxu1 %v7967_v9  ;;  %v7946_v8 = vpop.permute.xlu0 %7945  ;;  %v8480_v12 = vpop.permute.xlu1 %8479  ;;  %8057 = vmatprep.mubr.bf16.mxu1 %v15133_v7 }
 0x437   : > { %v7956_v32 = vsel %vm1425_vm7, %v7946_v8, %v17057_v49  ;;  %v7955_v58 = vsel %vm1425_vm7, %v17033_v10, %v7946_v8  ;;  %v8226_v49 = vsel %vm1653_vm8, %v17084_v20, %v17070_v52  ;;  %v8247_v52 = vsel %vm6654_vm1, %v8227_v27, 0  ;;  %vm18551_vm7 = vmmov %vm18545_vm0 }
 0x438   : > { %10372 = vrot.lane.b32.xlu0 %v17156_v35, %s18539_s15  ;;  %14341 = vmatprep.subr.msk.bf16.mxu1 %vm6654_vm1, %v7956_v32  ;;  %v7979_v10 = vsel %vm6654_vm1, %v7955_v58, 0  ;;  %v8497_v20 = vsel %vm1881_vm9, %v8480_v12, %v8482_v41  ;;  %v17271_v12 = vcombine.high %v17197_v29, %v17197_v29 }
 0x439   : > { %10370 = vrot.lane.b32.xlu1 %v17132_v17, %s18539_s15  ;;  %14340 = vmatmul.mubr.msk.bf16.vlgmr.msra.gmra.mrb[52].mxu0 %vm6650_vm2, %v17111_v47  ;;  %v8509_v26 = vsel %vm6654_vm1, %v8497_v20, 0 }
 0x43a   : > { %8259 = vmatpush1.bf16.msra.mxu0 %v8235_v39  ;;  %v17173_v43 = vpop.permute.xlu0 %8485  ;;  %8290 = vmatprep.mubr.bf16.mxu0 %v15133_v7 }
 0x43b   : > { %14349 = vmatprep.subr.msk.bf16.mxu0 %vm6654_vm1, %v8228_v53  ;;  %v8484_v61 = vpop.permute.xlu1 %8483 }
 0x43c   : > { %10636 = vrot.lane.b32.xlu0 %v17088_v13, %s18540_s16  ;;  %v8498_v44 = vsel %vm1881_vm9, %v8482_v41, %v8484_v61  ;;  %v17248_v41 = vld [vmem:[%s18487_s2 + $0xe] sm:$0x3]  ;;  %v8499_v57 = vsel %vm1881_vm9, %v8484_v61, %v17173_v43 }
 0x43d   : > { %9863 = vrot.lane.b32.xlu1 %v16642_v56, %s18538_s12  ;;  %14338 = vmatmul.mubr.msk.bf16.vlgmr.msra.gmra.mrb[48].mxu1 %vm6650_vm2, %v17111_v47  ;;  %v8515_v58 = vsel %vm6654_vm1, %v8499_v57, 0  ;;  %s18542_s12 = smov 117  }
 0x43e   : > { %8108 = vmatpush1.bf16.msra.mxu1 %v7979_v10  ;;  %v8490_v48 = vpop.permute.xlu0 %8489  ;;  %8139 = vmatprep.mubr.bf16.mxu1 %v15133_v7 }
 0x43f   : > { %14347 = vmatprep.subr.msk.bf16.mxu1 %vm6654_vm1, %v8226_v49  ;;  %v8488_v56 = vpop.permute.xlu1 %8487 }
 0x440   : > { %10640 = vrot.lane.b32.xlu0 %v17098_v45, %s18540_s16  ;;  %v8501_v63 = vsel %vm1881_vm9, %v8488_v56, %v8490_v48 }
 0x441   : > { %10374 = vrot.lane.b32.xlu1 %v17197_v29, %s18539_s15  ;;  %14346 = vmatmul.mubr.msk.bf16.vlgmr.msra.gmra.mrb[56].mxu0 %vm6650_vm2, %v17192_v28 }
 0x442   : > { %8341 = vmatpush1.bf16.msra.mxu0 %v8247_v52  ;;  %v8754_v37 = vpop.permute.xlu0 %8753  ;;  %8372 = vmatprep.mubr.bf16.mxu0 %v15133_v7 }
 0x443   : > { %14355 = vmatprep.subr.msk.bf16.mxu0 %vm6654_vm1, %v8498_v44  ;;  %v8492_v3 = vpop.permute.xlu1 %8491 }
 0x444   : > { %10644 = vrot.lane.b32.xlu0 %v17132_v17, %s18540_s16 }
 0x445   : > { %10378 = vrot.lane.b32.xlu1 %v17210_v21, %s18539_s15  ;;  %14342 = vmatmul.mubr.msk.bf16.vlgmr.msra.gmra.mrb[52].mxu1 %vm6650_vm2, %v17111_v47  ;;  %v8502_v47 = vsel %vm1881_vm9, %v8490_v48, %v8492_v3 }
 0x446   : > { %8300 = vmatpush1.bf16.msra.mxu1 %v8241_v1  ;;  %v17222_v38 = vpop.permute.xlu0 %8757  ;;  %8331 = vmatprep.mubr.bf16.mxu1 %v15133_v7 }
 0x447   : > { %v8496_v55 = vpop.permute.xlu1 %8495 }
 0x448   : > { %10648 = vrot.lane.b32.xlu0 %v17197_v29, %s18540_s16 }
 0x449   : > { %10638 = vrot.lane.b32.xlu1 %v17106_v46, %s18540_s16  ;;  %14350 = vmatmul.mubr.msk.bf16.vlgmr.msra.gmra.mrb[60].mxu0 %vm6650_vm2, %v17192_v28 }
 0x44a   : > { %8533 = vmatpush1.bf16.msra.mxu0 %v8509_v26  ;;  %v8762_v15 = vpop.permute.xlu0 %8761  ;;  %8564 = vmatprep.mubr.bf16.mxu0 %v15133_v7 }
 0x44b   : > { %14359 = vmatprep.subr.msk.bf16.mxu0 %vm6654_vm1, %v8502_v47  ;;  %v8756_v18 = vpop.permute.xlu1 %8755 }
 0x44c   : > { %10652 = vrot.lane.b32.xlu0 %v17210_v21, %s18540_s16  ;;  %v8772_v32 = vsel %vm2109_vm10, %v8756_v18, %v17222_v38 }
 0x44d   : > { %10642 = vrot.lane.b32.xlu1 %v17129_v25, %s18540_s16  ;;  %14348 = vmatmul.mubr.msk.bf16.vlgmr.msra.gmra.mrb[56].mxu1 %vm6650_vm2, %v17192_v28 }
 0x44e   : > { %v17241_v34 = vpop.permute.xlu0 %8765  ;;  %8413 = vmatprep.mubr.bf16.mxu1 %v15133_v7 }
 0x44f   : > { %v8220_v2 = vpop.permute.xlu1 %8219 }
 0x450   : > { %v8229_v30 = vsel %vm1653_vm8, %v17082_v16, %v8220_v2  ;;  %10912 = vrot.lane.b32.xlu0 %v17106_v46, %s18541_s29  ;;  %v8230_v42 = vsel %vm1653_vm8, %v8220_v2, %v17102_v33  ;;  %v8521_v16 = vsel %vm6654_vm1, %v8501_v63, 0  ;;  %v8500_v33 = vsel %vm1881_vm9, %v17173_v43, %v8488_v56  ;;  %vm18553_vm8 = vmmov %vm18545_vm0 }
 0x451   : > { %10646 = vrot.lane.b32.xlu1 %v17156_v35, %s18540_s16  ;;  %14351 = vmatprep.subr.msk.bf16.mxu1 %vm6654_vm1, %v8230_v42  ;;  %v8253_v9 = vsel %vm6654_vm1, %v8229_v30, 0  ;;  %v8771_v43 = vsel %vm2109_vm10, %v8754_v37, %v8756_v18 }
 0x452   : > { %14356 = vmatmul.mubr.msk.bf16.vlgmr.msra.gmra.mrb[64].mxu0 %vm6650_vm2, %v17248_v41  ;;  %8382 = vmatpush1.bf16.msra.mxu1 %v8253_v9  ;;  %v17265_v8 = vpop.permute.xlu0 %8769  ;;  %v8783_v49 = vsel %vm6654_vm1, %v8771_v43, 0 }
 0x453   : > { %8615 = vmatpush1.bf16.msra.mxu0 %v8521_v16  ;;  %14357 = vmatprep.subr.msk.bf16.mxu1 %vm6654_vm1, %v8500_v33  ;;  %v8760_v39 = vpop.permute.xlu1 %8759  ;;  %v17356_v33 = vld [vmem:[%s18487_s2 + $0x12] sm:$0x3] }
 0x454   : > { %14365 = vmatprep.subr.msk.bf16.mxu0 %vm6654_vm1, %v8772_v32  ;;  %10376 = vrot.lane.b32.xlu0 %v17271_v12, %s18539_s15  ;;  %v8774_v52 = vsel %vm2109_vm10, %v8760_v39, %v8762_v15  ;;  %v8773_v20 = vsel %vm2109_vm10, %v17222_v38, %v8760_v39  ;;  %s14011_s15 = sshll.u32 %s242_s14, 5 }
 0x455   : > { %10910 = vrot.lane.b32.xlu1 %v17088_v13, %s18541_s29  ;;  %14352 = vmatmul.mubr.msk.bf16.vlgmr.msra.gmra.mrb[60].mxu1 %vm6650_vm2, %v17192_v28  ;;  %v8789_v38 = vsel %vm6654_vm1, %v8773_v20, 0 }
 0x456   : > { %8574 = vmatpush1.bf16.msra.mxu1 %v8515_v58  ;;  %v8494_v53 = vpop.permute.xlu0 %8493  ;;  %8646 = vmatprep.mubr.bf16.mxu0 %v15133_v7 }
 0x457   : > { %v8764_v61 = vpop.permute.xlu1 %8763  ;;  %v8504_v0 = vsel %vm1881_vm9, %v8494_v53, %v8496_v55  ;;  %8605 = vmatprep.mubr.bf16.mxu1 %v15133_v7  ;;  %v8503_v27 = vsel %vm1881_vm9, %v8492_v3, %v8494_v53  ;;  %v14363_v3 = vld [vmem:[%s18487_s2 + $0x10] sm:$0x3]  ;;  %vm18554_vm9 = vmmov %vm18545_vm0 }
 0x458   : > { %10916 = vrot.lane.b32.xlu0 %v17129_v25, %s18541_s29  ;;  %14361 = vmatprep.subr.msk.bf16.mxu1 %vm6654_vm1, %v8504_v0  ;;  %v8776_v10 = vsel %vm2109_vm10, %v8764_v61, %v17241_v34  ;;  %v8527_v56 = vsel %vm6654_vm1, %v8503_v27, 0  ;;  %v8775_v44 = vsel %vm2109_vm10, %v8762_v15, %v8764_v61 }
 0x459   : > { %10914 = vrot.lane.b32.xlu1 %v17098_v45, %s18541_s29  ;;  %v8795_v55 = vsel %vm6654_vm1, %v8775_v44, 0 }
 0x45a   : > { %14360 = vmatmul.mubr.msk.bf16.vlgmr.msra.gmra.mrb[68].mxu0 %vm6650_vm2, %v17248_v41  ;;  %v9030_v48 = vpop.permute.xlu0 %9029 }
 0x45b   : > { %8807 = vmatpush1.bf16.msra.mxu0 %v8783_v49  ;;  %v9028_v28 = vpop.permute.xlu1 %9027  ;;  %8838 = vmatprep.mubr.bf16.mxu0 %v15133_v7 }
 0x45c   : > { %14369 = vmatprep.subr.msk.bf16.mxu0 %vm6654_vm1, %v8776_v10  ;;  %10920 = vrot.lane.b32.xlu0 %v17156_v35, %s18541_s29  ;;  %v9045_v18 = vsel %vm2337_vm11, %v9028_v28, %v9030_v48 }
 0x45d   : > { %10918 = vrot.lane.b32.xlu1 %v17132_v17, %s18541_s29  ;;  %14358 = vmatmul.mubr.msk.bf16.vlgmr.msra.gmra.mrb[64].mxu1 %vm6650_vm2, %v17248_v41  ;;  %v9057_v30 = vsel %vm6654_vm1, %v9045_v18, 0 }
 0x45e   : > { %8656 = vmatpush1.bf16.msra.mxu1 %v8527_v56  ;;  %v9034_v31 = vpop.permute.xlu0 %9033  ;;  %8687 = vmatprep.mubr.bf16.mxu1 %v15133_v7 }
 0x45f   : > { %14367 = vmatprep.subr.msk.bf16.mxu1 %vm6654_vm1, %v8774_v52  ;;  %v9032_v37 = vpop.permute.xlu1 %9031 }
 0x460   : > { %11184 = vrot.lane.b32.xlu0 %v17088_v13, %s18542_s12  ;;  %v9046_v1 = vsel %vm2337_vm11, %v9030_v48, %v9032_v37  ;;  %v9047_v53 = vsel %vm2337_vm11, %v9032_v37, %v9034_v31 }
 0x461   : > { %10922 = vrot.lane.b32.xlu1 %v17197_v29, %s18541_s29  ;;  %v9063_v10 = vsel %vm6654_vm1, %v9047_v53, 0 }
 0x462   : > { %14366 = vmatmul.mubr.msk.bf16.vlgmr.msra.gmra.mrb[72].mxu0 %vm6650_vm2, %v14363_v3  ;;  %v9038_v26 = vpop.permute.xlu0 %9037 }
 0x463   : > { %8889 = vmatpush1.bf16.msra.mxu0 %v8795_v55  ;;  %v9036_v47 = vpop.permute.xlu1 %9035  ;;  %8920 = vmatprep.mubr.bf16.mxu0 %v15133_v7 }
 0x464   : > { %14375 = vmatprep.subr.msk.bf16.mxu0 %vm6654_vm1, %v9046_v1  ;;  %11188 = vrot.lane.b32.xlu0 %v17098_v45, %s18542_s12  ;;  %v9049_v57 = vsel %vm2337_vm11, %v9036_v47, %v9038_v26  ;;  %v9048_v61 = vsel %vm2337_vm11, %v9034_v31, %v9036_v47  ;;  %v14383_v47 = vld [vmem:[%s18487_s2 + $0x14] sm:$0x3] }
 0x465   : > { %10926 = vrot.lane.b32.xlu1 %v17210_v21, %s18541_s29  ;;  %14362 = vmatmul.mubr.msk.bf16.vlgmr.msra.gmra.mrb[68].mxu1 %vm6650_vm2, %v17248_v41 }
 0x466   : > { %8848 = vmatpush1.bf16.msra.mxu1 %v8789_v38  ;;  %v9302_v15 = vpop.permute.xlu0 %9301  ;;  %8879 = vmatprep.mubr.bf16.mxu1 %v15133_v7 }
 0x467   : > { %v9040_v63 = vpop.permute.xlu1 %9039 }
 0x468   : > { %11192 = vrot.lane.b32.xlu0 %v17132_v17, %s18542_s12  ;;  %v9050_v2 = vsel %vm2337_vm11, %v9038_v26, %v9040_v63 }
 0x469   : > { %11186 = vrot.lane.b32.xlu1 %v17106_v46, %s18542_s12 }
 0x46a   : > { %14370 = vmatmul.mubr.msk.bf16.vlgmr.msra.gmra.mrb[76].mxu0 %vm6650_vm2, %v14363_v3  ;;  %v17342_v41 = vpop.permute.xlu0 %9305 }
 0x46b   : > { %9081 = vmatpush1.bf16.msra.mxu0 %v9057_v30  ;;  %v9044_v42 = vpop.permute.xlu1 %9043  ;;  %9112 = vmatprep.mubr.bf16.mxu0 %v15133_v7 }
 0x46c   : > { %14379 = vmatprep.subr.msk.bf16.mxu0 %vm6654_vm1, %v9050_v2  ;;  %11196 = vrot.lane.b32.xlu0 %v17197_v29, %s18542_s12 }
 0x46d   : > { %10650 = vrot.lane.b32.xlu1 %v17271_v12, %s18540_s16  ;;  %14368 = vmatmul.mubr.msk.bf16.vlgmr.msra.gmra.mrb[72].mxu1 %vm6650_vm2, %v14363_v3  ;;  %s18544_s16 = smov 38  }
 0x46e   : > { %v9310_v9 = vpop.permute.xlu0 %9309  ;;  %8961 = vmatprep.mubr.bf16.mxu1 %v15133_v7 }
 0x46f   : > { %v8768_v16 = vpop.permute.xlu1 %8767 }
 0x470   : > { %v8777_v32 = vsel %vm2109_vm10, %v17241_v34, %v8768_v16  ;;  %11200 = vrot.lane.b32.xlu0 %v17210_v21, %s18542_s12  ;;  %v8778_v39 = vsel %vm2109_vm10, %v8768_v16, %v17265_v8  ;;  %v9069_v34 = vsel %vm6654_vm1, %v9049_v57, 0  ;;  %vm18555_vm10 = vcmask 1039360  }
 0x471   : > { %11190 = vrot.lane.b32.xlu1 %v17129_v25, %s18542_s12  ;;  %14371 = vmatprep.subr.msk.bf16.mxu1 %vm6654_vm1, %v8778_v39  ;;  %v8801_v58 = vsel %vm6654_vm1, %v8777_v32, 0 }
 0x472   : > { %14376 = vmatmul.mubr.msk.bf16.vlgmr.msra.gmra.mrb[80].mxu0 %vm6650_vm2, %v17356_v33  ;;  %8930 = vmatpush1.bf16.msra.mxu1 %v8801_v58  ;;  %v17372_v43 = vpop.permute.xlu0 %9313 }
 0x473   : > { %9163 = vmatpush1.bf16.msra.mxu0 %v9069_v34  ;;  %14377 = vmatprep.subr.msk.bf16.mxu1 %vm6654_vm1, %v9048_v61  ;;  %v9304_v8 = vpop.permute.xlu1 %9303  ;;  %v17457_v34 = vld [vmem:[%s18487_s2 + $0x16] sm:$0x3] }
 0x474   : > { %10924 = vrot.lane.b32.xlu0 %v17271_v12, %s18541_s29  ;;  %v9320_v0 = vsel %vm2565_vm12, %v9304_v8, %v17342_v41  ;;  %9194 = vmatprep.mubr.bf16.mxu0 %v15133_v7  ;;  %v9319_v49 = vsel %vm2565_vm12, %v9302_v15, %v9304_v8  ;;  %s13934_s29 = scalar_lea.sflag [#allocation4], %s242_s14 }
 0x475   : > { %11194 = vrot.lane.b32.xlu1 %v17156_v35, %s18542_s12  ;;  %14372 = vmatmul.mubr.msk.bf16.vlgmr.msra.gmra.mrb[76].mxu1 %vm6650_vm2, %v14363_v3  ;;  %v9331_v52 = vsel %vm6654_vm1, %v9319_v49, 0 }
 0x476   : > { %14385 = vmatprep.subr.msk.bf16.mxu0 %vm6654_vm1, %v9320_v0  ;;  %9122 = vmatpush1.bf16.msra.mxu1 %v9063_v10  ;;  %v9042_v27 = vpop.permute.xlu0 %9041 }
 0x477   : > { %v9308_v48 = vpop.permute.xlu1 %9307  ;;  %v9052_v28 = vsel %vm2337_vm11, %v9042_v27, %v9044_v42  ;;  %9153 = vmatprep.mubr.bf16.mxu1 %v15133_v7  ;;  %v9051_v56 = vsel %vm2337_vm11, %v9040_v63, %v9042_v27  ;;  %vm18556_vm11 = vmmov %vm18555_vm10 }
 0x478   : > { %11460 = vrot.lane.b32.xlu0 %v17106_v46, %s18543_s13  ;;  %14381 = vmatprep.subr.msk.bf16.mxu1 %vm6654_vm1, %v9052_v28  ;;  %v9075_v3 = vsel %vm6654_vm1, %v9051_v56, 0  ;;  %v9322_v1 = vsel %vm2565_vm12, %v9308_v48, %v9310_v9  ;;  %v9321_v38 = vsel %vm2565_vm12, %v17342_v41, %v9308_v48 }
 0x479   : > { %11458 = vrot.lane.b32.xlu1 %v17088_v13, %s18543_s13  ;;  %v9337_v30 = vsel %vm6654_vm1, %v9321_v38, 0 }
 0x47a   : > { %14380 = vmatmul.mubr.msk.bf16.vlgmr.msra.gmra.mrb[84].mxu0 %vm6650_vm2, %v17356_v33  ;;  %v9318_v31 = vpop.permute.xlu0 %9317 }
 0x47b   : > { %9355 = vmatpush1.bf16.msra.mxu0 %v9331_v52  ;;  %v9312_v44 = vpop.permute.xlu1 %9311  ;;  %9386 = vmatprep.mubr.bf16.mxu0 %v15133_v7 }
 0x47c   : > { %11464 = vrot.lane.b32.xlu0 %v17129_v25, %s18543_s13  ;;  %v9324_v37 = vsel %vm2565_vm12, %v9312_v44, %v17372_v43  ;;  %v9323_v55 = vsel %vm2565_vm12, %v9310_v9, %v9312_v44 }
 0x47d   : > { %11462 = vrot.lane.b32.xlu1 %v17098_v45, %s18543_s13  ;;  %14378 = vmatmul.mubr.msk.bf16.vlgmr.msra.gmra.mrb[80].mxu1 %vm6650_vm2, %v17356_v33  ;;  %v9343_v15 = vsel %vm6654_vm1, %v9323_v55, 0 }
 0x47e   : > { %9204 = vmatpush1.bf16.msra.mxu1 %v9075_v3  ;;  %14389 = vmatprep.subr.msk.bf16.mxu0 %vm6654_vm1, %v9324_v37  ;;  %v9578_v20 = vpop.permute.xlu0 %9577 }
 0x47f   : > { %14387 = vmatprep.subr.msk.bf16.mxu1 %vm6654_vm1, %v9322_v1  ;;  %v9576_v26 = vpop.permute.xlu1 %9575  ;;  %9235 = vmatprep.mubr.bf16.mxu1 %v15133_v7 }
 0x480   : > { %11468 = vrot.lane.b32.xlu0 %v17156_v35, %s18543_s13  ;;  %v9593_v42 = vsel %vm2793_vm13, %v9576_v26, %v9578_v20 }
 0x481   : > { %11466 = vrot.lane.b32.xlu1 %v17132_v17, %s18543_s13  ;;  %v9605_v57 = vsel %vm6654_vm1, %v9593_v42, 0 }
 0x482   : > { %14386 = vmatmul.mubr.msk.bf16.vlgmr.msra.gmra.mrb[88].mxu0 %vm6650_vm2, %v14383_v47  ;;  %v9582_v18 = vpop.permute.xlu0 %9581 }
 0x483   : > { %9437 = vmatpush1.bf16.msra.mxu0 %v9343_v15  ;;  %v9580_v63 = vpop.permute.xlu1 %9579  ;;  %9468 = vmatprep.mubr.bf16.mxu0 %v15133_v7 }
 0x484   : > { %11472 = vrot.lane.b32.xlu0 %v17271_v12, %s18543_s13  ;;  %v9594_v2 = vsel %vm2793_vm13, %v9578_v20, %v9580_v63  ;;  %v9595_v10 = vsel %vm2793_vm13, %v9580_v63, %v9582_v18 }
 0x485   : > { %11470 = vrot.lane.b32.xlu1 %v17197_v29, %s18543_s13  ;;  %14382 = vmatmul.mubr.msk.bf16.vlgmr.msra.gmra.mrb[84].mxu1 %vm6650_vm2, %v17356_v33  ;;  %v9611_v28 = vsel %vm6654_vm1, %v9595_v10, 0 }
 0x486   : > { %9396 = vmatpush1.bf16.msra.mxu1 %v9337_v30  ;;  %14395 = vmatprep.subr.msk.bf16.mxu0 %vm6654_vm1, %v9594_v2  ;;  %v9586_v41 = vpop.permute.xlu0 %9585 }
 0x487   : > { %v9584_v9 = vpop.permute.xlu1 %9583  ;;  %9427 = vmatprep.mubr.bf16.mxu1 %v15133_v7 }
 0x488   : > { %11732 = vrot.lane.b32.xlu0 %v17088_v13, %s18544_s16  ;;  %v9597_v58 = vsel %vm2793_vm13, %v9584_v9, %v9586_v41  ;;  %v9596_v49 = vsel %vm2793_vm13, %v9582_v18, %v9584_v9  ;;  %v14403_v18 = vld [vmem:[%s18487_s2 + $0x18] sm:$0x3] }
 0x489   : > { %11474 = vrot.lane.b32.xlu1 %v17210_v21, %s18543_s13  ;;  %v9617_v27 = vsel %vm6654_vm1, %v9597_v58, 0  ;;  %s18560_s13 = smov 28  }
 0x48a   : > { %14390 = vmatmul.mubr.msk.bf16.vlgmr.msra.gmra.mrb[92].mxu0 %vm6650_vm2, %v14383_v47  ;;  %v9850_v16 = vpop.permute.xlu0 %9849 }
 0x48b   : > { %9629 = vmatpush1.bf16.msra.mxu0 %v9605_v57  ;;  %v9588_v33 = vpop.permute.xlu1 %9587  ;;  %9660 = vmatprep.mubr.bf16.mxu0 %v15133_v7 }
 0x48c   : > { %11736 = vrot.lane.b32.xlu0 %v17098_v45, %s18544_s16  ;;  %v9598_v32 = vsel %vm2793_vm13, %v9586_v41, %v9588_v33 }
 0x48d   : > { %11198 = vrot.lane.b32.xlu1 %v17271_v12, %s18542_s12  ;;  %14388 = vmatmul.mubr.msk.bf16.vlgmr.msra.gmra.mrb[88].mxu1 %vm6650_vm2, %v14383_v47 }
 0x48e   : > { %14399 = vmatprep.subr.msk.bf16.mxu0 %vm6654_vm1, %v9598_v32  ;;  %v17450_v39 = vpop.permute.xlu0 %9853  ;;  %9509 = vmatprep.mubr.bf16.mxu1 %v15133_v7 }
 0x48f   : > { %v9316_v53 = vpop.permute.xlu1 %9315 }
 0x490   : > { %v9325_v61 = vsel %vm2565_vm12, %v17372_v43, %v9316_v53  ;;  %11740 = vrot.lane.b32.xlu0 %v17132_v17, %s18544_s16  ;;  %v9326_v8 = vsel %vm2565_vm12, %v9316_v53, %v9318_v31  ;;  %vm18557_vm12 = vmmov %vm18555_vm10 }
 0x491   : > { %11734 = vrot.lane.b32.xlu1 %v17106_v46, %s18544_s16  ;;  %14391 = vmatprep.subr.msk.bf16.mxu1 %vm6654_vm1, %v9326_v8  ;;  %v9349_v0 = vsel %vm6654_vm1, %v9325_v61, 0 }
 0x492   : > { %14396 = vmatmul.mubr.msk.bf16.vlgmr.msra.gmra.mrb[96].mxu0 %vm6650_vm2, %v17457_v34  ;;  %9478 = vmatpush1.bf16.msra.mxu1 %v9349_v0  ;;  %v9858_v43 = vpop.permute.xlu0 %9857 }
 0x493   : > { %9711 = vmatpush1.bf16.msra.mxu0 %v9617_v27  ;;  %14397 = vmatprep.subr.msk.bf16.mxu1 %vm6654_vm1, %v9596_v49  ;;  %v9592_v48 = vpop.permute.xlu1 %9591  ;;  %v17565_v27 = vld [vmem:[%s18487_s2 + $0x1a] sm:$0x3] }
 0x494   : > { %11744 = vrot.lane.b32.xlu0 %v17197_v29, %s18544_s16  ;;  %9742 = vmatprep.mubr.bf16.mxu0 %v15133_v7 }
 0x495   : > { %11738 = vrot.lane.b32.xlu1 %v17129_v25, %s18544_s16  ;;  %14392 = vmatmul.mubr.msk.bf16.vlgmr.msra.gmra.mrb[92].mxu1 %vm6650_vm2, %v14383_v47 }
 0x496   : > { %9670 = vmatpush1.bf16.msra.mxu1 %v9611_v28  ;;  %v9590_v56 = vpop.permute.xlu0 %9589  ;;  %9701 = vmatprep.mubr.bf16.mxu1 %v15133_v7 }
 0x497   : > { %v9852_v52 = vpop.permute.xlu1 %9851  ;;  %v9600_v31 = vsel %vm2793_vm13, %v9590_v56, %v9592_v48  ;;  %v9599_v1 = vsel %vm2793_vm13, %v9588_v33, %v9590_v56  ;;  %v10130_v48 = vsel %vm6654_vm1, %v17132_v17, 0  ;;  %vm18558_vm13 = vmmov %vm18555_vm10 }
 0x498   : > { %v9867_v44 = vsel %vm18545_vm0, %v9850_v16, %v9852_v52  ;;  %11748 = vrot.lane.b32.xlu0 %v17210_v21, %s18544_s16  ;;  %14401 = vmatprep.subr.msk.bf16.mxu1 %vm6654_vm1, %v9600_v31  ;;  %v9868_v37 = vsel %vm18546_vm3, %v9852_v52, %v17450_v39  ;;  %v9623_v47 = vsel %vm6654_vm1, %v9599_v1, 0  ;;  %vm18559_vm0 = vmmov %vm18555_vm10 }
 0x499   : > { %11742 = vrot.lane.b32.xlu1 %v17156_v35, %s18544_s16  ;;  %14405 = vmatprep.subr.msk.bf16.mxu0 %vm6654_vm1, %v9868_v37  ;;  %v9879_v3 = vsel %vm6654_vm1, %v9867_v44, 0  ;;  %v10124_v37 = vsel %vm6654_vm1, %v17098_v45, 0  ;;  %vm18561_vm3 = vmmov %vm18559_vm0 }
 0x49a   : > { %14400 = vmatmul.mubr.msk.bf16.vlgmr.msra.gmra.mrb[100].mxu0 %vm6650_vm2, %v17457_v34  ;;  %v9862_v20 = vpop.permute.xlu0 %9861 }
 0x49b   : > { %9903 = vmatpush1.bf16.msra.mxu0 %v9879_v3  ;;  %v9856_v55 = vpop.permute.xlu1 %9855  ;;  %9934 = vmatprep.mubr.bf16.mxu0 %v15133_v7 }
 0x49c   : > { %12008 = vrot.lane.b32.xlu0 %v17106_v46, %s18547_s19  ;;  %v9870_v26 = vsel %vm18548_vm4, %v9856_v55, %v9858_v43  ;;  %v9869_v57 = vsel %vm18551_vm7, %v17450_v39, %v9856_v55  ;;  %vm18562_vm4 = vcmask 973824   ;;  %vm18565_vm7 = vmmov %vm18559_vm0 }
 0x49d   : > { %11746 = vrot.lane.b32.xlu1 %v17271_v12, %s18544_s16  ;;  %14398 = vmatmul.mubr.msk.bf16.vlgmr.msra.gmra.mrb[96].mxu1 %vm6650_vm2, %v17457_v34  ;;  %v9885_v39 = vsel %vm6654_vm1, %v9869_v57, 0  ;;  %s18569_s16 = smov 27  }
 0x49e   : > { %9752 = vmatpush1.bf16.msra.mxu1 %v9623_v47  ;;  %v9866_v38 = vpop.permute.xlu0 %9865  ;;  %9783 = vmatprep.mubr.bf16.mxu1 %v15133_v7 }
 0x49f   : > { %14407 = vmatprep.subr.msk.bf16.mxu1 %vm6654_vm1, %v9870_v26  ;;  %v9860_v15 = vpop.permute.xlu1 %9859  ;;  %v17510_v63 = vpop.f32.mrb[8].mxu0 }
 0x4a0   : > { %v9871_v2 = vsel %vm18549_vm5, %v9858_v43, %v9860_v15  ;;  %12012 = vrot.lane.b32.xlu0 %v17129_v25, %s18547_s19  ;;  %v9872_v30 = vsel %vm18550_vm6, %v9860_v15, %v9862_v20  ;;  %v17516_v41 = vpop.f32.mrb[9].mxu0  ;;  %vm18563_vm5 = vmmov %vm18562_vm4 }
 0x4a1   : > { %12006 = vrot.lane.b32.xlu1 %v17088_v13, %s18547_s19  ;;  %14409 = vmatprep.subr.msk.bf16.mxu0 %vm6654_vm1, %v9872_v30  ;;  %v9891_v42 = vsel %vm6654_vm1, %v9871_v2, 0  ;;  %v6717_v9 = vpop.f32.mrb[10].mxu0  ;;  %v10136_v30 = vsel %vm6654_vm1, %v17197_v29, 0  ;;  %vm18564_vm6 = vmmov %vm18559_vm0 }
 0x4a2   : > { %14406 = vmatmul.mubr.msk.bf16.vlgmr.msra.gmra.mrb[104].mxu0 %vm6650_vm2, %v14403_v18  ;;  %v10365_v16 = vpop.permute.xlu0 %10364  ;;  %v6718_v33 = vpop.f32.mrb[11].mxu0 }
 0x4a3   : > { %9985 = vmatpush1.bf16.msra.mxu0 %v9891_v42  ;;  %v10363_v32 = vpop.permute.xlu1 %10362  ;;  %10016 = vmatprep.mubr.bf16.mxu0 %v15133_v7 }
 0x4a4   : > { %14414 = vmatprep.subr.msk.bf16.mxu0 %vm6654_vm1, %v17106_v46  ;;  %12016 = vrot.lane.b32.xlu0 %v17156_v35, %s18547_s19 }
 0x4a5   : > { %12010 = vrot.lane.b32.xlu1 %v17098_v45, %s18547_s19  ;;  %14402 = vmatmul.mubr.msk.bf16.vlgmr.msra.gmra.mrb[100].mxu1 %vm6650_vm2, %v17457_v34  ;;  %v10118_v34 = vsel %vm6654_vm1, %v17088_v13, 0 }
 0x4a6   : > { %9944 = vmatpush1.bf16.msra.mxu1 %v9885_v39  ;;  %v17535_v58 = vpop.permute.xlu0 %10368  ;;  %9975 = vmatprep.mubr.bf16.mxu1 %v15133_v7  ;;  %v12508_v39 = vld [vmem:[#allocation2 + $0xa] sm:$0xff] }
 0x4a7   : > { %v17538_v53 = vpop.permute.xlu1 %10366 }
 0x4a8   : > { %12020 = vrot.lane.b32.xlu0 %v17271_v12, %s18547_s19  ;;  %v10381_v56 = vsel %vm18555_vm10, %v10365_v16, %v17538_v53  ;;  %vm18568_vm10 = vmmov %vm18562_vm4 }
 0x4a9   : > { %12014 = vrot.lane.b32.xlu1 %v17132_v17, %s18547_s19 }
 0x4aa   : > { %14410 = vmatmul.mubr.msk.bf16.vlgmr.msra.gmra.mrb[108].mxu0 %vm6650_vm2, %v14403_v18  ;;  %v17547_v61 = vpop.permute.xlu0 %10372 }
 0x4ab   : > { %10142 = vmatpush1.bf16.msra.mxu0 %v10118_v34  ;;  %v17549_v8 = vpop.permute.xlu1 %10370  ;;  %10173 = vmatprep.mubr.bf16.mxu0 %v15133_v7 }
 0x4ac   : > { %14418 = vmatprep.subr.msk.bf16.mxu0 %vm6654_vm1, %v17156_v35  ;;  %12280 = vrot.lane.b32.xlu0 %v17088_v13, %s18552_s11 }
 0x4ad   : > { %12018 = vrot.lane.b32.xlu1 %v17197_v29, %s18547_s19  ;;  %14408 = vmatmul.mubr.msk.bf16.vlgmr.msra.gmra.mrb[104].mxu1 %vm6650_vm2, %v14403_v18 }
 0x4ae   : > { %v17559_v0 = vpop.permute.xlu0 %10636  ;;  %10057 = vmatprep.mubr.bf16.mxu1 %v15133_v7 }
 0x4af   : > { %v9864_v10 = vpop.permute.xlu1 %9863 }
 0x4b0   : > { %v9873_v43 = vsel %vm18553_vm8, %v9862_v20, %v9864_v10  ;;  %12284 = vrot.lane.b32.xlu0 %v17098_v45, %s18552_s11  ;;  %v9874_v13 = vsel %vm18554_vm9, %v9864_v10, %v9866_v38  ;;  %v12507_v20 = vld [vmem:[#allocation2 + $0x2] sm:$0xff]  ;;  %vm18566_vm8 = vmmov %vm18562_vm4 }
 0x4b1   : > { %12022 = vrot.lane.b32.xlu1 %v17210_v21, %s18547_s19  ;;  %14411 = vmatprep.subr.msk.bf16.mxu1 %vm6654_vm1, %v9874_v13  ;;  %v9897_v49 = vsel %vm6654_vm1, %v9873_v43, 0  ;;  %v12513_v45 = vcombine.high %v12507_v20, %v12507_v20  ;;  %v17618_v38 = vrot.slane %v12507_v20, %v16538_v60  ;;  %v17678_v43 = vrot.slane %v12508_v39, %v16538_v60  ;;  %vm18567_vm9 = vmmov %vm18562_vm4  ;;  %s18579_s19 = smov 19  }
 0x4b2   : > { %14415 = vmatmul.mubr.msk.bf16.vlgmr.msra.gmra.mrb[112].mxu0 %vm6650_vm2, %v17565_v27  ;;  %10026 = vmatpush1.bf16.msra.mxu1 %v9897_v49  ;;  %v17579_v28 = vpop.permute.xlu0 %10640  ;;  %v12530_v13 = vcombine.high %v12508_v39, %v12508_v39 }
 0x4b3   : > { %10224 = vmatpush1.bf16.msra.mxu0 %v10130_v48  ;;  %14416 = vmatprep.subr.msk.bf16.mxu1 %vm6654_vm1, %v17129_v25  ;;  %v17585_v52 = vpop.permute.xlu1 %10374  ;;  %v17587_v31 = vpop.f32.mrb[8].mxu1  ;;  %v17638_v9 = vrot.slane %v12513_v45, %v16538_v60  ;;  %v17699_v20 = vcombine.high %v17678_v43, %v17678_v43 }
 0x4b4   : > { %14424 = vmatprep.subr.msk.bf16.mxu0 %vm6654_vm1, %v10381_v56  ;;  %12288 = vrot.lane.b32.xlu0 %v17132_v17, %s18552_s11  ;;  %v17592_v44 = vpop.f32.mrb[9].mxu1  ;;  %v10380_v17 = vsel %vm18556_vm11, %v10363_v32, %v10365_v16  ;;  %v10385_v15 = vsel %vm18557_vm12, %v17547_v61, %v17585_v52  ;;  %v17659_v32 = vld [vmem:[%s18487_s2 + $0x1c] sm:$0x3]  ;;  %vm18570_vm11 = vmmov %vm18562_vm4  ;;  %vm18571_vm12 = vcmask 965632  }
 0x4b5   : > { %12282 = vrot.lane.b32.xlu1 %v17106_v46, %s18552_s11  ;;  %14412 = vmatmul.mubr.msk.bf16.vlgmr.msra.gmra.mrb[108].mxu1 %vm6650_vm2, %v14403_v18  ;;  %v6758_v3 = vpop.f32.mrb[10].mxu1  ;;  %v10392_v46 = vsel %vm6654_vm1, %v10380_v17, 0  ;;  %v17667_v34 = vcombine.high %v17638_v9, %v17638_v9 }
 0x4b6   : > { %10183 = vmatpush1.bf16.msra.mxu1 %v10124_v37  ;;  %v17599_v1 = vpop.permute.xlu0 %10644  ;;  %10255 = vmatprep.mubr.bf16.mxu0 %v15133_v7  ;;  %v6759_v55 = vpop.f32.mrb[11].mxu1 }
 0x4b7   : > { %14420 = vmatprep.subr.msk.bf16.mxu1 %vm6654_vm1, %v17271_v12  ;;  %v17605_v26 = vpop.permute.xlu1 %10378  ;;  %10214 = vmatprep.mubr.bf16.mxu1 %v15133_v7  ;;  %v17703_v55 = vrot.slane %v12530_v13, %v16538_v60 }
 0x4b8   : > { %12292 = vrot.lane.b32.xlu0 %v17197_v29, %s18552_s11  ;;  %v10384_v29 = vsel %vm18559_vm0, %v17549_v8, %v17547_v61  ;;  %v10382_v61 = vsel %vm18561_vm3, %v17538_v53, %v17535_v58  ;;  %vm18573_vm0 = vmmov %vm18571_vm12 }
 0x4b9   : > { %12286 = vrot.lane.b32.xlu1 %v17129_v25, %s18552_s11  ;;  %v10398_v56 = vsel %vm6654_vm1, %v10382_v61, 0  ;;  %vm18574_vm3 = vmmov %vm18573_vm0 }
 0x4ba   : > { %14419 = vmatmul.mubr.msk.bf16.vlgmr.msra.gmra.mrb[116].mxu0 %vm6650_vm2, %v17565_v27  ;;  %v17615_v47 = vpop.permute.xlu0 %10648 }
 0x4bb   : > { %10416 = vmatpush1.bf16.msra.mxu0 %v10392_v46  ;;  %v10639_v18 = vpop.permute.xlu1 %10638  ;;  %v17623_v2 = vpop.f32.mrb[12].mxu0  ;;  %10447 = vmatprep.mubr.bf16.mxu0 %v15133_v7 }
 0x4bc   : > { %14428 = vmatprep.subr.msk.bf16.mxu0 %vm6654_vm1, %v10385_v15  ;;  %12296 = vrot.lane.b32.xlu0 %v17210_v21, %s18552_s11  ;;  %v17629_v25 = vpop.f32.mrb[13].mxu0  ;;  %v10383_v21 = vsel %vm18558_vm13, %v17535_v58, %v17549_v8  ;;  %v10404_v8 = vsel %vm6654_vm1, %v10384_v29, 0  ;;  %vm18572_vm13 = vmmov %vm18571_vm12 }
 0x4bd   : > { %12290 = vrot.lane.b32.xlu1 %v17156_v35, %s18552_s11  ;;  %14417 = vmatmul.mubr.msk.bf16.vlgmr.msra.gmra.mrb[112].mxu1 %vm6650_vm2, %v17565_v27  ;;  %v6799_v42 = vpop.f32.mrb[14].mxu0  ;;  %v17647_v35 = vcombine.high %v17618_v38, %v17618_v38 }
 0x4be   : > { %10265 = vmatpush1.bf16.msra.mxu1 %v10136_v30  ;;  %v17643_v57 = vpop.permute.xlu0 %10652  ;;  %v6800_v16 = vpop.f32.mrb[15].mxu0  ;;  %10296 = vmatprep.mubr.bf16.mxu1 %v15133_v7  ;;  %v17729_v30 = vcombine.high %v17703_v55, %v17703_v55 }
 0x4bf   : > { %14426 = vmatprep.subr.msk.bf16.mxu1 %vm6654_vm1, %v10383_v21  ;;  %v17654_v33 = vpop.permute.xlu1 %10642 }
 0x4c0   : > { %12556 = vrot.lane.b32.xlu0 %v17647_v35, %s18560_s13  ;;  %v10657_v13 = vsel %vm18567_vm9, %v17654_v33, %v17599_v1 }
 0x4c1   : > { %12294 = vrot.lane.b32.xlu1 %v17271_v12, %s18552_s11  ;;  %v10655_v12 = vsel %vm18562_vm4, %v10639_v18, %v17579_v28  ;;  %s18588_s11 = smov 18  }
 0x4c2   : > { %14425 = vmatmul.mubr.msk.bf16.vlgmr.msra.gmra.mrb[120].mxu0 %vm6650_vm2, %v17659_v32  ;;  %v17675_v10 = vpop.permute.xlu0 %10912 }
 0x4c3   : > { %10498 = vmatpush1.bf16.msra.mxu0 %v10404_v8  ;;  %v10647_v49 = vpop.permute.xlu1 %10646  ;;  %10529 = vmatprep.mubr.bf16.mxu0 %v15133_v7 }
 0x4c4   : > { %14434 = vmatprep.subr.msk.bf16.mxu0 %vm6654_vm1, %v10655_v12  ;;  %v6930_v58 = vpop.f32.mrb[16].mxu0  ;;  %12560 = vrot.lane.b32.xlu0 %v17667_v34, %s18560_s13  ;;  %v10659_v42 = vsel %vm18566_vm8, %v10647_v49, %v17615_v47  ;;  %vm18578_vm8 = vcmask 957440  }
 0x4c5   : > { %v17687_v53 = vadd.f32 %v6930_v58, %v17510_v63  ;;  %v6932_v48 = vpop.f32.mrb[17].mxu0  ;;  %12554 = vrot.lane.b32.xlu1 %v17618_v38, %s18560_s13  ;;  %14421 = vmatmul.mubr.msk.bf16.vlgmr.msra.gmra.mrb[116].mxu1 %vm6650_vm2, %v17565_v27  ;;  %v10654_v27 = vsel %vm18563_vm5, %v17559_v0, %v10639_v18  ;;  %v10658_v58 = vsel %vm18568_vm10, %v17599_v1, %v10647_v49  ;;  %vm18575_vm5 = vmmov %vm18562_vm4 }
 0x4c6   : > { %v17695_v37 = vadd.f32 %v6932_v48, %v17516_v41  ;;  %10457 = vmatpush1.bf16.msra.mxu1 %v10398_v56  ;;  %v10377_v3 = vpop.permute.xlu0 %10376  ;;  %v6934_v63 = vpop.f32.mrb[18].mxu0  ;;  %10488 = vmatprep.mubr.bf16.mxu1 %v15133_v7  ;;  %v10656_v1 = vsel %vm18570_vm11, %v17579_v28, %v17654_v33  ;;  %vm18580_vm9 = vmmov %vm18578_vm8 }
 0x4c7   : > { %v17707_v17 = vpop.permute.xlu1 %10910  ;;  %v10387_v41 = vsel %vm18564_vm6, %v10377_v3, %v17605_v26  ;;  %v6935_v45 = vpop.f32.mrb[19].mxu0  ;;  %v10386_v0 = vsel %vm18565_vm7, %v17585_v52, %v10377_v3  ;;  %v10666_v26 = vsel %vm6654_vm1, %v10654_v27, 0  ;;  %vm18576_vm6 = vmmov %vm18573_vm0 }
 0x4c8   : > { %12564 = vrot.lane.b32.xlu0 %v17699_v20, %s18560_s13  ;;  %14430 = vmatprep.subr.msk.bf16.mxu1 %vm6654_vm1, %v10387_v41  ;;  %v17714_v46 = vpop.f32.mrb[12].mxu1  ;;  %v10410_v61 = vsel %vm6654_vm1, %v10386_v0, 0  ;;  %v10678_v41 = vsel %vm6654_vm1, %v10658_v58, 0  ;;  %vm18577_vm7 = vmmov %vm18573_vm0 }
 0x4c9   : > { %12558 = vrot.lane.b32.xlu1 %v17638_v9, %s18560_s13  ;;  %v17718_v60 = vpop.f32.mrb[13].mxu1  ;;  %v17784_v0 = vld.sshfl [vmem:[#allocation2 + $0x12] sm:$0x3 pattern:$0x76325410]  ;;  %vm18581_vm10 = vmmov %vm18573_vm0 }
 0x4ca   : > { %14429 = vmatmul.mubr.msk.bf16.vlgmr.msra.gmra.mrb[124].mxu0 %vm6650_vm2, %v17659_v32  ;;  %v17725_v15 = vpop.permute.xlu0 %10916  ;;  %v6840_v18 = vpop.f32.mrb[14].mxu1  ;;  %vm18582_vm11 = vmmov %vm18578_vm8 }
 0x4cb   : > { %10690 = vmatpush1.bf16.msra.mxu0 %v10666_v26  ;;  %v17733_v21 = vpop.permute.xlu1 %10914  ;;  %v6841_v16 = vpop.f32.mrb[15].mxu1  ;;  %10721 = vmatprep.mubr.bf16.mxu0 %v15133_v7 }
 0x4cc   : > { %14438 = vmatprep.subr.msk.bf16.mxu0 %vm6654_vm1, %v10659_v42  ;;  %v7012_v52 = vpop.f32.mrb[20].mxu0  ;;  %12568 = vrot.lane.b32.xlu0 %v17729_v30, %s18560_s13  ;;  %v10929_v26 = vsel %vm18571_vm12, %v17675_v10, %v17733_v21  ;;  %v10672_v16 = vsel %vm6654_vm1, %v10656_v1, 0  ;;  %vm18583_vm12 = vmmov %vm18573_vm0 }
 0x4cd   : > { %v17740_v29 = vadd.f32 %v7012_v52, %v17623_v2  ;;  %v7014_v39 = vpop.f32.mrb[21].mxu0  ;;  %12562 = vrot.lane.b32.xlu1 %v17678_v43, %s18560_s13  ;;  %14427 = vmatmul.mubr.msk.bf16.vlgmr.msra.gmra.mrb[120].mxu1 %vm6650_vm2, %v17659_v32 }
 0x4ce   : > { %v17748_v8 = vadd.f32 %v7014_v39, %v17629_v25  ;;  %10539 = vmatpush1.bf16.msra.mxu1 %v10410_v61  ;;  %v17753_v12 = vpop.permute.xlu0 %10920  ;;  %v7016_v2 = vpop.f32.mrb[22].mxu0  ;;  %10570 = vmatprep.mubr.bf16.mxu1 %v15133_v7  ;;  %v17764_v25 = vld [vmem:[%s18487_s2 + $0x1e] sm:$0x3] }
 0x4cf   : > { %14436 = vmatprep.subr.msk.bf16.mxu1 %vm6654_vm1, %v10657_v13  ;;  %v17759_v48 = vpop.permute.xlu1 %10918  ;;  %v7017_v56 = vpop.f32.mrb[23].mxu0 }
 0x4d0   : > { %v6971_v3 = vpop.f32.mrb[16].mxu1  ;;  %12828 = vrot.lane.b32.xlu0 %v17618_v38, %s18569_s16 }
 0x4d1   : > { %v17769_v63 = vadd.f32 %v6971_v3, %v17587_v31  ;;  %v6973_v27 = vpop.f32.mrb[17].mxu1  ;;  %12566 = vrot.lane.b32.xlu1 %v17703_v55, %s18560_s13 }
 0x4d2   : > { %v17777_v49 = vadd.f32 %v6973_v27, %v17592_v44  ;;  %14435 = vmatmul.mubr.msk.bf16.vlgmr.msra.gmra.mrb[128].mxu0 %vm6650_vm2, %v17764_v25  ;;  %v17782_v45 = vpop.permute.xlu0 %11184  ;;  %v6975_v31 = vpop.f32.mrb[18].mxu1 }
 0x4d3   : > { %10772 = vmatpush1.bf16.msra.mxu0 %v10678_v41  ;;  %v17789_v18 = vpop.permute.xlu1 %10922  ;;  %v6976_v28 = vpop.f32.mrb[19].mxu1  ;;  %10803 = vmatprep.mubr.bf16.mxu0 %v15133_v7 }
 0x4d4   : > { %14444 = vmatprep.subr.msk.bf16.mxu0 %vm6654_vm1, %v10929_v26  ;;  %v7196_v44 = vpop.f32.mrb[24].mxu0  ;;  %12832 = vrot.lane.b32.xlu0 %v17638_v9, %s18569_s16 }
 0x4d5   : > { %v17796_v33 = vadd.f32 %v7196_v44, %v17687_v53  ;;  %v7198_v42 = vpop.f32.mrb[25].mxu0  ;;  %12570 = vrot.lane.b32.xlu1 %v17784_v0, %s18560_s13  ;;  %14431 = vmatmul.mubr.msk.bf16.vlgmr.msra.gmra.mrb[124].mxu1 %vm6650_vm2, %v17659_v32  ;;  %v10928_v53 = vsel %vm18572_vm13, %v17707_v17, %v17675_v10  ;;  %vm18584_vm13 = vmmov %vm18578_vm8 }
 0x4d6   : > { %v17804_v52 = vadd.f32 %v7198_v42, %v17695_v37  ;;  %10731 = vmatpush1.bf16.msra.mxu1 %v10672_v16  ;;  %v17806_v39 = vpop.permute.xlu0 %11188  ;;  %v7200_v61 = vpop.f32.mrb[26].mxu0  ;;  %10762 = vmatprep.mubr.bf16.mxu1 %v15133_v7  ;;  %v10940_v56 = vsel %vm6654_vm1, %v10928_v53, 0  ;;  %v17855_v16 = vld [vmem:[%s18487_s2 + $0x20] sm:$0x3] }
 0x4d7   : > { %v17812_v13 = vpop.permute.xlu1 %10926  ;;  %v7201_v2 = vpop.f32.mrb[27].mxu0 }
 0x4d8   : > { %v7053_v58 = vpop.f32.mrb[20].mxu1  ;;  %12836 = vrot.lane.b32.xlu0 %v17678_v43, %s18569_s16 }
 0x4d9   : > { %v17817_v32 = vadd.f32 %v7053_v58, %v17714_v46  ;;  %v7055_v37 = vpop.f32.mrb[21].mxu1  ;;  %12830 = vrot.lane.b32.xlu1 %v17647_v35, %s18569_s16  ;;  %v10933_v46 = vsel %vm18573_vm0, %v17753_v12, %v17789_v18  ;;  %vm18585_vm0 = vmmov %vm18578_vm8 }
 0x4da   : > { %v17823_v3 = vadd.f32 %v7055_v37, %v17718_v60  ;;  %14439 = vmatmul.mubr.msk.bf16.vlgmr.msra.gmra.mrb[132].mxu0 %vm6650_vm2, %v17764_v25  ;;  %v17827_v10 = vpop.permute.xlu0 %11192  ;;  %v7057_v17 = vpop.f32.mrb[22].mxu1 }
 0x4db   : > { %10964 = vmatpush1.bf16.msra.mxu0 %v10940_v56  ;;  %v11187_v27 = vpop.permute.xlu1 %11186  ;;  %v7058_v1 = vpop.f32.mrb[23].mxu1  ;;  %10995 = vmatprep.mubr.bf16.mxu0 %v15133_v7 }
 0x4dc   : > { %14448 = vmatprep.subr.msk.bf16.mxu0 %vm6654_vm1, %v10933_v46  ;;  %v7278_v41 = vpop.f32.mrb[28].mxu0  ;;  %12840 = vrot.lane.b32.xlu0 %v17703_v55, %s18569_s16  ;;  %v11203_v1 = vsel %vm18578_vm8, %v11187_v27, %v17806_v39  ;;  %vm18592_vm8 = vmmov %vm18585_vm0 }
 0x4dd   : > { %v17837_v60 = vadd.f32 %v7278_v41, %v17740_v29  ;;  %v7280_v31 = vpop.f32.mrb[29].mxu0  ;;  %12834 = vrot.lane.b32.xlu1 %v17667_v34, %s18569_s16  ;;  %14437 = vmatmul.mubr.msk.bf16.vlgmr.msra.gmra.mrb[128].mxu1 %vm6650_vm2, %v17764_v25  ;;  %v10932_v29 = vsel %vm18574_vm3, %v17759_v48, %v17753_v12  ;;  %vm18586_vm3 = vcmask 318464  }
 0x4de   : > { %v17844_v26 = vadd.f32 %v7280_v31, %v17748_v8  ;;  %v17846_v28 = vpop.permute.xlu0 %11196  ;;  %v7282_v44 = vpop.f32.mrb[30].mxu0  ;;  %10844 = vmatprep.mubr.bf16.mxu1 %v15133_v7  ;;  %v10952_v56 = vsel %vm6654_vm1, %v10932_v29, 0 }
 0x4df   : > { %v10651_v42 = vpop.permute.xlu1 %10650  ;;  %v7283_v61 = vpop.f32.mrb[31].mxu0 }
 0x4e0   : > { %v10660_v8 = vsel %vm18562_vm4, %v17615_v47, %v10651_v42  ;;  %v10661_v53 = vsel %vm18575_vm5, %v10651_v42, %v17643_v57  ;;  %v7237_v2 = vpop.f32.mrb[24].mxu1  ;;  %12844 = vrot.lane.b32.xlu0 %v17784_v0, %s18569_s16  ;;  %v10930_v47 = vsel %vm18576_vm6, %v17733_v21, %v17725_v15  ;;  %v10931_v57 = vsel %vm18577_vm7, %v17725_v15, %v17759_v48  ;;  %vm18587_vm4 = vmmov %vm18585_vm0 }
 0x4e1   : > { %v10684_v58 = vsel %vm6654_vm1, %v10660_v8, 0  ;;  %v17865_v12 = vadd.f32 %v7237_v2, %v17769_v63  ;;  %v7239_v37 = vpop.f32.mrb[25].mxu1  ;;  %12838 = vrot.lane.b32.xlu1 %v17699_v20, %s18569_s16  ;;  %14440 = vmatprep.subr.msk.bf16.mxu1 %vm6654_vm1, %v10661_v53  ;;  %v10946_v31 = vsel %vm6654_vm1, %v10930_v47, 0  ;;  %vm18589_vm5 = vmmov %vm18586_vm3 }
 0x4e2   : > { %v17878_v17 = vadd.f32 %v7239_v37, %v17777_v49  ;;  %14445 = vmatmul.mubr.msk.bf16.vlgmr.msra.gmra.mrb[136].mxu0 %vm6650_vm2, %v17855_v16  ;;  %10813 = vmatpush1.bf16.msra.mxu1 %v10684_v58  ;;  %v17882_v63 = vpop.permute.xlu0 %11200  ;;  %v7241_v46 = vpop.f32.mrb[26].mxu1  ;;  %vm18590_vm6 = vmmov %vm18586_vm3 }
 0x4e3   : > { %11046 = vmatpush1.bf16.msra.mxu0 %v10952_v56  ;;  %14446 = vmatprep.subr.msk.bf16.mxu1 %vm6654_vm1, %v10931_v57  ;;  %v17887_v21 = vpop.permute.xlu1 %11190  ;;  %v7242_v15 = vpop.f32.mrb[27].mxu1  ;;  %vm18591_vm7 = vmmov %vm18586_vm3 }
 0x4e4   : > { %14454 = vmatprep.subr.msk.bf16.mxu0 %vm6654_vm1, %v11203_v1  ;;  %v7470_v48 = vpop.f32.mrb[32].mxu0  ;;  %13104 = vrot.lane.b32.xlu0 %v17647_v35, %s18579_s19  ;;  %v11205_v1 = vsel %vm18584_vm13, %v17887_v21, %v17827_v10  ;;  %vm18597_vm13 = vmmov %vm18586_vm3 }
 0x4e5   : > { %v17893_v49 = vadd.f32 %v7470_v48, %v17796_v33  ;;  %v7472_v41 = vpop.f32.mrb[33].mxu0  ;;  %12842 = vrot.lane.b32.xlu1 %v17729_v30, %s18569_s16  ;;  %14441 = vmatmul.mubr.msk.bf16.vlgmr.msra.gmra.mrb[132].mxu1 %vm6650_vm2, %v17764_v25  ;;  %v11202_v33 = vsel %vm18580_vm9, %v17782_v45, %v11187_v27  ;;  %vm18593_vm9 = vmmov %vm18585_vm0  ;;  %s244_s16 = scalar_lea.vmem [#allocation3], %s14011_s15 }
 0x4e6   : > { %v17901_v44 = vadd.f32 %v7472_v41, %v17804_v52  ;;  %11005 = vmatpush1.bf16.msra.mxu1 %v10946_v31  ;;  %v10925_v29 = vpop.permute.xlu0 %10924  ;;  %11077 = vmatprep.mubr.bf16.mxu0 %v15133_v7  ;;  %v7474_v42 = vpop.f32.mrb[34].mxu0  ;;  %s13948_s17 = sshll.u32 %s244_s16, 4  ;;  %s18443_s17 = int_to_ptr.vmem [resolvable:$true] %s13948_s17 }
 0x4e7   : > { %v10935_v61 = vsel %vm18581_vm10, %v10925_v29, %v17812_v13  ;;  %v11195_v8 = vpop.permute.xlu1 %11194  ;;  %v7475_v53 = vpop.f32.mrb[35].mxu0  ;;  %11036 = vmatprep.mubr.bf16.mxu1 %v15133_v7  ;;  %v11214_v13 = vsel %vm6654_vm1, %v11202_v33, 0  ;;  %v10934_v27 = vsel %vm18583_vm12, %v17789_v18, %v10925_v29  ;;  %v17956_v29 = vld [vmem:[%s18487_s2 + $0x22] sm:$0x3]  ;;  %vm18594_vm10 = vmmov %vm18586_vm3  ;;  %vm18596_vm12 = vcmask 310272  }
 0x4e8   : > { %v7319_v25 = vpop.f32.mrb[28].mxu1  ;;  %13108 = vrot.lane.b32.xlu0 %v17667_v34, %s18579_s19  ;;  %14450 = vmatprep.subr.msk.bf16.mxu1 %vm6654_vm1, %v10935_v61  ;;  %v11207_v52 = vsel %vm18582_vm11, %v11195_v8, %v17846_v28  ;;  %v10958_v18 = vsel %vm6654_vm1, %v10934_v27, 0  ;;  %vm18595_vm11 = vmmov %vm18586_vm3 }
 0x4e9   : > { %v17915_v2 = vadd.f32 %v7319_v25, %v17817_v32  ;;  %v7321_v45 = vpop.f32.mrb[29].mxu1  ;;  %13102 = vrot.lane.b32.xlu1 %v17618_v38, %s18579_s19 }
 0x4ea   : > { %v17923_v58 = vadd.f32 %v7321_v45, %v17823_v3  ;;  %14449 = vmatmul.mubr.msk.bf16.vlgmr.msra.gmra.mrb[140].mxu0 %vm6650_vm2, %v17855_v16  ;;  %v11461_v37 = vpop.permute.xlu0 %11460  ;;  %v7323_v47 = vpop.f32.mrb[30].mxu1 }
 0x4eb   : > { %11238 = vmatpush1.bf16.msra.mxu0 %v11214_v13  ;;  %v11459_v32 = vpop.permute.xlu1 %11458  ;;  %v7324_v57 = vpop.f32.mrb[31].mxu1  ;;  %11269 = vmatprep.mubr.bf16.mxu0 %v15133_v7 }
 0x4ec   : > { %14458 = vmatprep.subr.msk.bf16.mxu0 %vm6654_vm1, %v11207_v52  ;;  %v7552_v56 = vpop.f32.mrb[36].mxu0  ;;  %13112 = vrot.lane.b32.xlu0 %v17699_v20, %s18579_s19 }
 0x4ed   : > { %v17933_v3 = vadd.f32 %v7552_v56, %v17837_v60  ;;  %v7554_v46 = vpop.f32.mrb[37].mxu0  ;;  %13106 = vrot.lane.b32.xlu1 %v17638_v9, %s18579_s19  ;;  %14447 = vmatmul.mubr.msk.bf16.vlgmr.msra.gmra.mrb[136].mxu1 %vm6650_vm2, %v17855_v16  ;;  %v11206_v60 = vsel %vm18585_vm0, %v17827_v10, %v11195_v8  ;;  %v11204_v8 = vsel %vm18587_vm4, %v17806_v39, %v17887_v21  ;;  %vm18598_vm0 = vmmov %vm18596_vm12 }
 0x4ee   : > { %v17943_v15 = vadd.f32 %v7554_v46, %v17844_v26  ;;  %11087 = vmatpush1.bf16.msra.mxu1 %v10958_v18  ;;  %v17945_v48 = vpop.permute.xlu0 %11464  ;;  %v7556_v41 = vpop.f32.mrb[38].mxu0  ;;  %11118 = vmatprep.mubr.bf16.mxu1 %v15133_v7  ;;  %v11226_v53 = vsel %vm6654_vm1, %v11206_v60, 0  ;;  %v11220_v39 = vsel %vm6654_vm1, %v11204_v8, 0  ;;  %v11476_v18 = vsel %vm18589_vm5, %v11459_v32, %v11461_v37  ;;  %vm18599_vm4 = vmmov %vm18598_vm0 }
 0x4ef   : > { %14456 = vmatprep.subr.msk.bf16.mxu1 %vm6654_vm1, %v11205_v1  ;;  %v17951_v31 = vpop.permute.xlu1 %11462  ;;  %v7557_v26 = vpop.f32.mrb[39].mxu0  ;;  %v11488_v60 = vsel %vm6654_vm1, %v11476_v18, 0  ;;  %vm18600_vm5 = vmmov %vm18598_vm0 }
 0x4f0   : > { %v7511_v42 = vpop.f32.mrb[32].mxu1  ;;  %13116 = vrot.lane.b32.xlu0 %v17729_v30, %s18579_s19  ;;  %v11477_v33 = vsel %vm18586_vm3, %v11461_v37, %v17951_v31 }
 0x4f1   : > { %v17963_v61 = vadd.f32 %v7511_v42, %v17865_v12  ;;  %v7513_v10 = vpop.f32.mrb[33].mxu1  ;;  %13110 = vrot.lane.b32.xlu1 %v17678_v43, %s18579_s19 }
 0x4f2   : > { %v17972_v25 = vadd.f32 %v7513_v10, %v17878_v17  ;;  %14455 = vmatmul.mubr.msk.bf16.vlgmr.msra.gmra.mrb[144].mxu0 %vm6650_vm2, %v17956_v29  ;;  %v11469_v52 = vpop.permute.xlu0 %11468  ;;  %v7515_v45 = vpop.f32.mrb[34].mxu1 }
 0x4f3   : > { %11320 = vmatpush1.bf16.msra.mxu0 %v11226_v53  ;;  %v11467_v12 = vpop.permute.xlu1 %11466  ;;  %v7516_v13 = vpop.f32.mrb[35].mxu1  ;;  %11351 = vmatprep.mubr.bf16.mxu0 %v15133_v7 }
 0x4f4   : > { %14464 = vmatprep.subr.msk.bf16.mxu0 %vm6654_vm1, %v11477_v33  ;;  %v7744_v27 = vpop.f32.mrb[40].mxu0  ;;  %13376 = vrot.lane.b32.xlu0 %v17618_v38, %s18588_s11  ;;  %v11480_v13 = vsel %vm18591_vm7, %v11467_v12, %v11469_v52  ;;  %vm18602_vm7 = vmmov %vm18598_vm0 }
 0x4f5   : > { %v17982_v17 = vadd.f32 %v7744_v27, %v17893_v49  ;;  %v7746_v21 = vpop.f32.mrb[41].mxu0  ;;  %13114 = vrot.lane.b32.xlu1 %v17703_v55, %s18579_s19  ;;  %14451 = vmatmul.mubr.msk.bf16.vlgmr.msra.gmra.mrb[140].mxu1 %vm6650_vm2, %v17855_v16 }
 0x4f6   : > { %v17989_v47 = vadd.f32 %v7746_v21, %v17901_v44  ;;  %11279 = vmatpush1.bf16.msra.mxu1 %v11220_v39  ;;  %v17991_v57 = vpop.permute.xlu0 %11472  ;;  %v7748_v56 = vpop.f32.mrb[42].mxu0  ;;  %11310 = vmatprep.mubr.bf16.mxu1 %v15133_v7 }
 0x4f7   : > { %v17995_v49 = vpop.permute.xlu1 %11470  ;;  %v7749_v46 = vpop.f32.mrb[43].mxu0 }
 0x4f8   : > { %v7593_v1 = vpop.f32.mrb[36].mxu1  ;;  %13380 = vrot.lane.b32.xlu0 %v17638_v9, %s18588_s11  ;;  %v11481_v16 = vsel %vm18590_vm6, %v11469_v52, %v17995_v49  ;;  %vm18601_vm6 = vmmov %vm18598_vm0 }
 0x4f9   : > { %v18002_v44 = vadd.f32 %v7593_v1, %v17915_v2  ;;  %v7595_v41 = vpop.f32.mrb[37].mxu1  ;;  %13118 = vrot.lane.b32.xlu1 %v17784_v0, %s18579_s19  ;;  %v11500_v1 = vsel %vm6654_vm1, %v11480_v13, 0 }
 0x4fa   : > { %v18008_v37 = vadd.f32 %v7595_v41, %v17923_v58  ;;  %14459 = vmatmul.mubr.msk.bf16.vlgmr.msra.gmra.mrb[148].mxu0 %vm6650_vm2, %v17956_v29  ;;  %v11733_v32 = vpop.permute.xlu0 %11732  ;;  %v7597_v26 = vpop.f32.mrb[38].mxu1 }
 0x4fb   : > { %11512 = vmatpush1.bf16.msra.mxu0 %v11488_v60  ;;  %v11475_v42 = vpop.permute.xlu1 %11474  ;;  %v7598_v33 = vpop.f32.mrb[39].mxu1  ;;  %11543 = vmatprep.mubr.bf16.mxu0 %v15133_v7 }
 0x4fc   : > { %14468 = vmatprep.subr.msk.bf16.mxu0 %vm6654_vm1, %v11481_v16  ;;  %v7826_v2 = vpop.f32.mrb[44].mxu0  ;;  %13384 = vrot.lane.b32.xlu0 %v17678_v43, %s18588_s11 }
 0x4fd   : > { %v18017_v10 = vadd.f32 %v7826_v2, %v17933_v3  ;;  %v7828_v58 = vpop.f32.mrb[45].mxu0  ;;  %13378 = vrot.lane.b32.xlu1 %v17647_v35, %s18588_s11  ;;  %14457 = vmatmul.mubr.msk.bf16.vlgmr.msra.gmra.mrb[144].mxu1 %vm6650_vm2, %v17956_v29  ;;  %v18033_v3 = vld [vmem:[%s18487_s2 + $0x24] sm:$0x3]  ;;  %v11483_v2 = vsel %vm18597_vm13, %v17991_v57, %v11475_v42 }
 0x4fe   : > { %v18024_v8 = vadd.f32 %v7828_v58, %v17943_v15  ;;  %v18026_v53 = vpop.permute.xlu0 %11736  ;;  %v7830_v45 = vpop.f32.mrb[46].mxu0  ;;  %11392 = vmatprep.mubr.bf16.mxu1 %v15133_v7 }
 0x4ff   : > { %v11199_v27 = vpop.permute.xlu1 %11198  ;;  %v7831_v39 = vpop.f32.mrb[47].mxu0 }
 0x500   : > { %v11208_v21 = vsel %vm18592_vm8, %v17846_v28, %v11199_v27  ;;  %v11209_v15 = vsel %vm18593_vm9, %v11199_v27, %v17882_v63  ;;  %v7785_v56 = vpop.f32.mrb[40].mxu1  ;;  %13388 = vrot.lane.b32.xlu0 %v17703_v55, %s18588_s11  ;;  %v11478_v28 = vsel %vm18594_vm10, %v17951_v31, %v17945_v48  ;;  %v11479_v63 = vsel %vm18595_vm11, %v17945_v48, %v11467_v12  ;;  %vm18603_vm8 = vmmov %vm18598_vm0 }
 0x501   : > { %v11232_v18 = vsel %vm6654_vm1, %v11208_v21, 0  ;;  %v18043_v52 = vadd.f32 %v7785_v56, %v17963_v61  ;;  %v7787_v46 = vpop.f32.mrb[41].mxu1  ;;  %13382 = vrot.lane.b32.xlu1 %v17667_v34, %s18588_s11  ;;  %14460 = vmatprep.subr.msk.bf16.mxu1 %vm6654_vm1, %v11209_v15  ;;  %vm18604_vm9 = vcmask 302080   ;;  %vm18606_vm11 = vmmov %vm18598_vm0 }
 0x502   : > { %v18055_v16 = vadd.f32 %v7787_v46, %v17972_v25  ;;  %14465 = vmatmul.mubr.msk.bf16.vlgmr.msra.gmra.mrb[152].mxu0 %vm6650_vm2, %v18033_v3  ;;  %11361 = vmatpush1.bf16.msra.mxu1 %v11232_v18  ;;  %v11741_v61 = vpop.permute.xlu0 %11740  ;;  %v7789_v41 = vpop.f32.mrb[42].mxu1  ;;  %v11494_v25 = vsel %vm6654_vm1, %v11478_v28, 0  ;;  %vm18605_vm10 = vmmov %vm18604_vm9 }
 0x503   : > { %11594 = vmatpush1.bf16.msra.mxu0 %v11500_v1  ;;  %14466 = vmatprep.subr.msk.bf16.mxu1 %vm6654_vm1, %v11479_v63  ;;  %v11735_v60 = vpop.permute.xlu1 %11734  ;;  %v7790_v26 = vpop.f32.mrb[43].mxu1  ;;  %vm18608_vm13 = vmmov %vm18604_vm9 }
 0x504   : > { %v11751_v31 = vsel %vm18596_vm12, %v11735_v60, %v18026_v53  ;;  %v8018_v48 = vpop.f32.mrb[48].mxu0  ;;  %13392 = vrot.lane.b32.xlu0 %v17784_v0, %s18588_s11  ;;  %11625 = vmatprep.mubr.bf16.mxu0 %v15133_v7  ;;  %v11750_v13 = vsel %vm18598_vm0, %v11733_v32, %v11735_v60  ;;  %v11482_v32 = vsel %vm18586_vm3, %v17995_v49, %v17991_v57  ;;  %vm18607_vm12 = vmmov %vm18604_vm9 }
 0x505   : > { %v18067_v12 = vadd.f32 %v8018_v48, %v17982_v17  ;;  %v8020_v33 = vpop.f32.mrb[49].mxu0  ;;  %13386 = vrot.lane.b32.xlu1 %v17699_v20, %s18588_s11  ;;  %14461 = vmatmul.mubr.msk.bf16.vlgmr.msra.gmra.mrb[148].mxu1 %vm6650_vm2, %v17956_v29  ;;  %v11762_v21 = vsel %vm6654_vm1, %v11750_v13, 0  ;;  %v11506_v57 = vsel %vm6654_vm1, %v11482_v32, 0  ;;  %vm18609_vm0 = vmmov %vm18604_vm9 }
 0x506   : > { %v18076_v58 = vadd.f32 %v8020_v33, %v17989_v47  ;;  %14474 = vmatprep.subr.msk.bf16.mxu0 %vm6654_vm1, %v11751_v31  ;;  %11553 = vmatpush1.bf16.msra.mxu1 %v11494_v25  ;;  %v18079_v45 = vpop.permute.xlu0 %11744  ;;  %v8022_v17 = vpop.f32.mrb[50].mxu0  ;;  %vm18610_vm3 = vmmov %vm18609_vm0 }
 0x507   : > { %14470 = vmatprep.subr.msk.bf16.mxu1 %vm6654_vm1, %v11483_v2  ;;  %v11739_v27 = vpop.permute.xlu1 %11738  ;;  %v8023_v39 = vpop.f32.mrb[51].mxu0  ;;  %11584 = vmatprep.mubr.bf16.mxu1 %v15133_v7 }
 0x508   : > { %v7867_v29 = vpop.f32.mrb[44].mxu1  ;;  %13652 = vrot.lane.b32.xlu0 %v17647_v35, %s15158_s10  ;;  %v11753_v63 = vsel %vm18600_vm5, %v11739_v27, %v11741_v61  ;;  %vm18612_vm5 = vcmask 236544  }
 0x509   : > { %v18087_v47 = vadd.f32 %v7867_v29, %v18002_v44  ;;  %v7869_v42 = vpop.f32.mrb[45].mxu1  ;;  %13390 = vrot.lane.b32.xlu1 %v17729_v30, %s18588_s11  ;;  %s15068_s11 = scalar_lea.vmem %s18443_s17, 512 }
 0x50a   : > { %v18096_v15 = vadd.f32 %v7869_v42, %v18008_v37  ;;  %14469 = vmatmul.mubr.msk.bf16.vlgmr.msra.gmra.mrb[156].mxu0 %vm6650_vm2, %v18033_v3  ;;  %v11749_v35 = vpop.permute.xlu0 %11748  ;;  %v7871_v56 = vpop.f32.mrb[46].mxu1  ;;  %p15069_p11 = scmp.ne.s32.totalorder %s18443_s17, %s15068_s11 }
 0x50b   : > { %11786 = vmatpush1.bf16.msra.mxu0 %v11762_v21  ;;  %v11743_v44 = vpop.permute.xlu1 %11742  ;;  %v7872_v18 = vpop.f32.mrb[47].mxu1  ;;  %11817 = vmatprep.mubr.bf16.mxu0 %v15133_v7 }
 0x50c   : > { %v11755_v46 = vsel %vm18599_vm4, %v11743_v44, %v18079_v45  ;;  %v8100_v28 = vpop.f32.mrb[52].mxu0  ;;  %13656 = vrot.lane.b32.xlu0 %v17667_v34, %s15158_s10  ;;  %vm18611_vm4 = vmmov %vm18609_vm0  ;;  %p15070_p12 = pnand %p15069_p11, %p15234_p5 }
 0x50d   : > { %v18107_v49 = vadd.f32 %v8100_v28, %v18017_v10  ;;  %v8102_v37 = vpop.f32.mrb[53].mxu0  ;;  %13650 = vrot.lane.b32.xlu1 %v17618_v38, %s15158_s10  ;;  %14467 = vmatmul.mubr.msk.bf16.vlgmr.msra.gmra.mrb[152].mxu1 %vm6650_vm2, %v18033_v3  ;;  %v11754_v10 = vsel %vm18601_vm6, %v11741_v61, %v11743_v44  ;;  %v18123_v38 = vld [vmem:[%s18487_s2 + $0x26] sm:$0x3]  ;;  %v11752_v61 = vsel %vm18602_vm7, %v18026_v53, %v11739_v27  ;;  %v13875_v27 = vld [vmem:[%s18489_s4] sm:$0xf]  ;;  %vm18613_vm6 = vmmov %vm18612_vm5 }
 0x50e   : > { %v18115_v1 = vadd.f32 %v8102_v37, %v18024_v8  ;;  %11635 = vmatpush1.bf16.msra.mxu1 %v11506_v57  ;;  %14478 = vmatprep.subr.msk.bf16.mxu0 %vm6654_vm1, %v11755_v46  ;;  %v12009_v34 = vpop.permute.xlu0 %12008  ;;  %v8104_v41 = vpop.f32.mrb[54].mxu0  ;;  %v11774_v25 = vsel %vm6654_vm1, %v11754_v10, 0  ;;  %v11768_v53 = vsel %vm6654_vm1, %v11752_v61, 0  ;;  %vm18614_vm7 = vmmov %vm18609_vm0  ;;  %p15071_p13 = pneg %p15070_p12 }
 0x50f   : > { %14476 = vmatprep.subr.msk.bf16.mxu1 %vm6654_vm1, %v11753_v63  ;;  %v11747_v60 = vpop.permute.xlu1 %11746  ;;  %v8105_v26 = vpop.f32.mrb[55].mxu0  ;;  %11666 = vmatprep.mubr.bf16.mxu1 %v15133_v7 }
 0x510   : > { %v8059_v8 = vpop.f32.mrb[48].mxu1  ;;  %13660 = vrot.lane.b32.xlu0 %v17699_v20, %s15158_s10  ;;  %v11757_v39 = vsel %vm18603_vm8, %v11747_v60, %v11749_v35  ;;  %v11756_v56 = vsel %vm18606_vm11, %v18079_v45, %v11747_v60  ;;  %vm18615_vm8 = vmmov %vm18612_vm5 }
 0x511   : > { %v18129_v31 = vadd.f32 %v8059_v8, %v18043_v52  ;;  %v8061_v48 = vpop.f32.mrb[49].mxu1  ;;  %13654 = vrot.lane.b32.xlu1 %v17638_v9, %s15158_s10  ;;  %v11780_v45 = vsel %vm6654_vm1, %v11756_v56, 0  ;;  %vm18618_vm11 = vmmov %vm18612_vm5 }
 0x512   : > { %v18137_v33 = vadd.f32 %v8061_v48, %v18055_v16  ;;  %14475 = vmatmul.mubr.msk.bf16.vlgmr.msra.gmra.mrb[160].mxu0 %vm6650_vm2, %v18123_v38  ;;  %v18141_v2 = vpop.permute.xlu0 %12012  ;;  %v8063_v20 = vpop.f32.mrb[50].mxu1 }
 0x513   : > { %11868 = vmatpush1.bf16.msra.mxu0 %v11774_v25  ;;  %v12007_v52 = vpop.permute.xlu1 %12006  ;;  %v8064_v17 = vpop.f32.mrb[51].mxu1  ;;  %11899 = vmatprep.mubr.bf16.mxu0 %v15133_v7 }
 0x514   : > { %v8292_v9 = vpop.f32.mrb[56].mxu0  ;;  %13664 = vrot.lane.b32.xlu0 %v17729_v30, %s15158_s10  ;;  %v12024_v42 = vsel %vm18604_vm9, %v12007_v52, %v12009_v34  ;;  %vm18616_vm9 = vmmov %vm18612_vm5 }
 0x515   : > { %v18148_v16 = vadd.f32 %v8292_v9, %v18067_v12  ;;  %v8294_v13 = vpop.f32.mrb[57].mxu0  ;;  %13658 = vrot.lane.b32.xlu1 %v17678_v43, %s15158_s10  ;;  %14471 = vmatmul.mubr.msk.bf16.vlgmr.msra.gmra.mrb[156].mxu1 %vm6650_vm2, %v18033_v3  ;;  %v12036_v44 = vsel %vm6654_vm1, %v12024_v42, 0 }
 0x516   : > { %v18159_v30 = vadd.f32 %v8294_v13, %v18076_v58  ;;  %11827 = vmatpush1.bf16.msra.mxu1 %v11768_v53  ;;  %v12017_v29 = vpop.permute.xlu0 %12016  ;;  %v8296_v12 = vpop.f32.mrb[58].mxu0  ;;  %11858 = vmatprep.mubr.bf16.mxu1 %v15133_v7 }
 0x517   : > { %14480 = vmatprep.subr.msk.bf16.mxu1 %vm6654_vm1, %v11757_v39  ;;  %v12011_v43 = vpop.permute.xlu1 %12010  ;;  %v8297_v3 = vpop.f32.mrb[59].mxu0 }
 0x518   : > { %v12025_v32 = vsel %vm18605_vm10, %v12009_v34, %v12011_v43  ;;  %v8141_v21 = vpop.f32.mrb[52].mxu1  ;;  %13878 = vperm.xlu0 %15042, %v13875_v27   ;;  %v12026_v25 = vsel %vm18610_vm3, %v12011_v43, %v18141_v2  ;;  %vm18617_vm10 = vmmov %vm18612_vm5 }
 0x519   : > { %v18166_v35 = vadd.f32 %v8141_v21, %v18087_v47  ;;  %v8143_v58 = vpop.f32.mrb[53].mxu1  ;;  %13662 = vrot.lane.b32.xlu1 %v17703_v55, %s15158_s10  ;;  %14484 = vmatprep.subr.msk.bf16.mxu0 %vm6654_vm1, %v12025_v32  ;;  %v12042_v27 = vsel %vm6654_vm1, %v12026_v25, 0 }
 0x51a   : > { %v18175_v18 = vadd.f32 %v8143_v58, %v18096_v15  ;;  %14479 = vmatmul.mubr.msk.bf16.vlgmr.msra.gmra.mrb[164].mxu0 %vm6650_vm2, %v18123_v38  ;;  %v12021_v46 = vpop.permute.xlu0 %12020  ;;  %v8145_v47 = vpop.f32.mrb[54].mxu1 }
 0x51b   : > { %12060 = vmatpush1.bf16.msra.mxu0 %v12036_v44  ;;  %v12015_v28 = vpop.permute.xlu1 %12014  ;;  %v8146_v57 = vpop.f32.mrb[55].mxu1  ;;  %12091 = vmatprep.mubr.bf16.mxu0 %v15133_v7 }
 0x51c   : > { %v12027_v55 = vsel %vm18607_vm12, %v18141_v2, %v12015_v28  ;;  %v8374_v37 = vpop.f32.mrb[60].mxu0  ;;  %v12028_v60 = vsel %vm18608_vm13, %v12015_v28, %v12017_v29  ;;  %vm18619_vm12 = vmmov %vm18612_vm5 }
 0x51d   : > { %v18184_v63 = vadd.f32 %v8374_v37, %v18107_v49  ;;  %v8376_v15 = vpop.f32.mrb[61].mxu0  ;;  %13666 = vrot.lane.b32.xlu1 %v17784_v0, %s15158_s10  ;;  %14477 = vmatmul.mubr.msk.bf16.vlgmr.msra.gmra.mrb[160].mxu1 %vm6650_vm2, %v18123_v38  ;;  %v18199_v0 = vld [vmem:[%s18487_s2 + $0x28] sm:$0x3]  ;;  %v12048_v20 = vsel %vm6654_vm1, %v12028_v60, 0  ;;  %v18240_v60 = vld [vmem:[%s18487_s2 + $0x2a] sm:$0x3]  ;;  %vm18620_vm13 = vmmov %vm18612_vm5 }
 0x51e   : > { %v18191_v34 = vadd.f32 %v8376_v15, %v18115_v1  ;;  %11909 = vmatpush1.bf16.msra.mxu1 %v11780_v45  ;;  %v12281_v41 = vpop.permute.xlu0 %12280  ;;  %v8378_v10 = vpop.f32.mrb[62].mxu0  ;;  %11940 = vmatprep.mubr.bf16.mxu1 %v15133_v7  ;;  %s14557_s10 = sshll.u32 %s15217_s25, 9  ;;  %s15160_s25 = smov [#allocation3]  }
 0x51f   : > { %14486 = vmatprep.subr.msk.bf16.mxu1 %vm6654_vm1, %v12027_v55  ;;  %v12019_v49 = vpop.permute.xlu1 %12018  ;;  %v8379_v26 = vpop.f32.mrb[63].mxu0  ;;  %s18441_s20 = scalar_lea.hbm %s18491_s6, %s14557_s10  ;;  %s15072_s28 = sshll.u32 %s15160_s25, 4  ;;  %s15073_s28 = int_to_ptr.vmem [resolvable:$false] %s15072_s28 }
 0x520   : > { %v12029_v8 = vsel %vm18609_vm0, %v12017_v29, %v12019_v49  ;;  %v8333_v1 = vpop.f32.mrb[56].mxu1  ;;  %v12030_v44 = vsel %vm18614_vm7, %v12019_v49, %v12021_v46  ;;  %vm18621_vm0 = vcmask 228352   ;;  %s15074_s12 = scalar_lea.vmem %s15073_s28, 1024  ;;  %p15075_p0 = scmp.lt.s32.totalorder %s18443_s17, %s15073_s28 }
 0x521   : > { %v8424_v48 = vadd.f32 %v8333_v1, %v18129_v31  ;;  %v8335_v61 = vpop.f32.mrb[57].mxu1  ;;  %14488 = vmatprep.subr.msk.bf16.mxu0 %vm6654_vm1, %v12029_v8  ;;  %vm18622_vm3 = vmmov %vm18621_vm0  ;;  %p15076_p1 = scmp.lt.s32.totalorder %s15074_s12, %s15068_s11 }
 0x522   : > { %v8425_v52 = vadd.f32 %v8335_v61, %v18137_v33  ;;  %14485 = vmatmul.mubr.msk.bf16.vlgmr.msra.gmra.mrb[168].mxu0 %vm6650_vm2, %v18199_v0  ;;  %v12285_v17 = vpop.permute.xlu0 %12284  ;;  %v8337_v9 = vpop.f32.mrb[58].mxu1  ;;  %vm18626_vm7 = vmmov %vm18621_vm0 }
 0x523   : > { %12142 = vmatpush1.bf16.msra.mxu0 %v12048_v20  ;;  %v12023_v53 = vpop.permute.xlu1 %12022  ;;  %v8338_v13 = vpop.f32.mrb[59].mxu1  ;;  %12173 = vmatprep.mubr.bf16.mxu0 %v15133_v7  ;;  %p15077_p2 = por %p15076_p1, %p15075_p0 }
 0x524   : > { %v12031_v31 = vsel %vm18611_vm4, %v12021_v46, %v12023_v53  ;;  %vm18623_vm4 = vmmov %vm18621_vm0 }
 0x525   : > { %v8566_v39 = vpop.f32.mrb[64].mxu0  ;;  %14481 = vmatmul.mubr.msk.bf16.vlgmr.msra.gmra.mrb[164].mxu1 %vm6650_vm2, %v18123_v38  ;;  %p15078_p3 = pnand %p15077_p2, %p15071_p13 }
 0x526   : > { %v8696_v33 = vadd.f32 %v8566_v39, %v18148_v16  ;;  %v8568_v2 = vpop.f32.mrb[65].mxu0  ;;  %12101 = vmatpush1.bf16.msra.mxu1 %v12042_v27  ;;  %v12289_v29 = vpop.permute.xlu0 %12288  ;;  %12132 = vmatprep.mubr.bf16.mxu1 %v15133_v7 }
 0x527   : > { %v8697_v12 = vadd.f32 %v8568_v2, %v18159_v30  ;;  %14490 = vmatprep.subr.msk.bf16.mxu1 %vm6654_vm1, %v12031_v31  ;;  %v12283_v42 = vpop.permute.xlu1 %12282  ;;  %v8570_v43 = vpop.f32.mrb[66].mxu0 }
 0x528   : > { %v12298_v3 = vsel %vm18612_vm5, %v12281_v41, %v12283_v42  ;;  %v12299_v32 = vsel %vm18613_vm6, %v12283_v42, %v12285_v17  ;;  %v8415_v21 = vpop.f32.mrb[60].mxu1  ;;  %v8571_v58 = vpop.f32.mrb[67].mxu0  ;;  %vm18624_vm5 = vmmov %vm18621_vm0 }
 0x529   : > { %v12310_v38 = vsel %vm6654_vm1, %v12298_v3, 0  ;;  %v8428_v16 = vadd.f32 %v8415_v21, %v18166_v35  ;;  %v8417_v56 = vpop.f32.mrb[61].mxu1  ;;  %14494 = vmatprep.subr.msk.bf16.mxu0 %vm6654_vm1, %v12299_v32  ;;  %v12054_v35 = vsel %vm6654_vm1, %v12030_v44, 0  ;;  %vm18625_vm6 = vmmov %vm18621_vm0 }
 0x52a   : > { %v8429_v30 = vadd.f32 %v8417_v56, %v18175_v18  ;;  %14489 = vmatmul.mubr.msk.bf16.vlgmr.msra.gmra.mrb[172].mxu0 %vm6650_vm2, %v18199_v0  ;;  %v12293_v47 = vpop.permute.xlu0 %12292  ;;  %v8419_v28 = vpop.f32.mrb[62].mxu1 }
 0x52b   : > { %12334 = vmatpush1.bf16.msra.mxu0 %v12310_v38  ;;  %v12287_v57 = vpop.permute.xlu1 %12286  ;;  %v8420_v55 = vpop.f32.mrb[63].mxu1  ;;  %12365 = vmatprep.mubr.bf16.mxu0 %v15133_v7 }
 0x52c   : > { %v12301_v37 = vsel %vm18615_vm8, %v12287_v57, %v12289_v29  ;;  %vm18627_vm8 = vmmov %vm18621_vm0 }
 0x52d   : > { %v8648_v45 = vpop.f32.mrb[68].mxu0  ;;  %14487 = vmatmul.mubr.msk.bf16.vlgmr.msra.gmra.mrb[168].mxu1 %vm6650_vm2, %v18199_v0 }
 0x52e   : > { %v8700_v18 = vadd.f32 %v8648_v45, %v18184_v63  ;;  %v8650_v46 = vpop.f32.mrb[69].mxu0  ;;  %12183 = vmatpush1.bf16.msra.mxu1 %v12054_v35  ;;  %v12297_v15 = vpop.permute.xlu0 %12296  ;;  %12214 = vmatprep.mubr.bf16.mxu1 %v15133_v7 }
 0x52f   : > { %v8701_v41 = vadd.f32 %v8650_v46, %v18191_v34  ;;  %14496 = vmatprep.subr.msk.bf16.mxu1 %vm6654_vm1, %v12301_v37  ;;  %v12291_v10 = vpop.permute.xlu1 %12290  ;;  %v8652_v49 = vpop.f32.mrb[70].mxu0  ;;  %v12300_v34 = vsel %vm18618_vm11, %v12285_v17, %v12287_v57 }
 0x530   : > { %v12302_v26 = vsel %vm18616_vm9, %v12289_v29, %v12291_v10  ;;  %v12303_v63 = vsel %vm18617_vm10, %v12291_v10, %v12293_v47  ;;  %v8607_v8 = vpop.f32.mrb[64].mxu1  ;;  %v8653_v1 = vpop.f32.mrb[71].mxu0  ;;  %v18270_v10 = vld [vmem:[%s18487_s2 + $0x2c] sm:$0x3]  ;;  %vm18628_vm9 = vmmov %vm18621_vm0  ;;  %vm18629_vm10 = vcmask 220160  }
 0x531   : > { %v12322_v61 = vsel %vm6654_vm1, %v12302_v26, 0  ;;  %v8698_v25 = vadd.f32 %v8607_v8, %v8424_v48  ;;  %v8609_v20 = vpop.f32.mrb[65].mxu1  ;;  %14498 = vmatprep.subr.msk.bf16.mxu0 %vm6654_vm1, %v12303_v63  ;;  %v12316_v48 = vsel %vm6654_vm1, %v12300_v34, 0  ;;  %vm18630_vm11 = vmmov %vm18629_vm10 }
 0x532   : > { %v8699_v9 = vadd.f32 %v8609_v20, %v8425_v52  ;;  %14495 = vmatmul.mubr.msk.bf16.vlgmr.msra.gmra.mrb[176].mxu0 %vm6650_vm2, %v18240_v60  ;;  %v12557_v53 = vpop.permute.xlu0 %12556  ;;  %v8611_v13 = vpop.f32.mrb[66].mxu1 }
 0x533   : > { %12416 = vmatpush1.bf16.msra.mxu0 %v12322_v61  ;;  %v12295_v31 = vpop.permute.xlu1 %12294  ;;  %v8612_v27 = vpop.f32.mrb[67].mxu1  ;;  %12447 = vmatprep.mubr.bf16.mxu0 %v15133_v7 }
 0x534   : > { %v12305_v39 = vsel %vm18619_vm12, %v12295_v31, %v12297_v15  ;;  %v12304_v56 = vsel %vm18620_vm13, %v12293_v47, %v12295_v31  ;;  %vm18631_vm12 = vmmov %vm18629_vm10 }
 0x535   : > { %v8840_v2 = vpop.f32.mrb[72].mxu0  ;;  %14491 = vmatmul.mubr.msk.bf16.vlgmr.msra.gmra.mrb[172].mxu1 %vm6650_vm2, %v18199_v0  ;;  %v12328_v37 = vsel %vm6654_vm1, %v12304_v56, 0  ;;  %vm18632_vm13 = vmmov %vm18629_vm10 }
 0x536   : > { %v8970_v17 = vadd.f32 %v8840_v2, %v8696_v33  ;;  %v8842_v52 = vpop.f32.mrb[73].mxu0  ;;  %12375 = vmatpush1.bf16.msra.mxu1 %v12316_v48  ;;  %v12561_v29 = vpop.permute.xlu0 %12560  ;;  %12406 = vmatprep.mubr.bf16.mxu1 %v15133_v7 }
 0x537   : > { %v8971_v42 = vadd.f32 %v8842_v52, %v8697_v12  ;;  %14500 = vmatprep.subr.msk.bf16.mxu1 %vm6654_vm1, %v12305_v39  ;;  %v12555_v43 = vpop.permute.xlu1 %12554  ;;  %v8844_v3 = vpop.f32.mrb[74].mxu0 }
 0x538   : > { %v8689_v32 = vpop.f32.mrb[68].mxu1  ;;  %v8845_v21 = vpop.f32.mrb[75].mxu0  ;;  %v12572_v44 = vsel %vm18621_vm0, %v12555_v43, %v12557_v53  ;;  %vm18633_vm0 = vmmov %vm18629_vm10 }
 0x539   : > { %v8702_v58 = vadd.f32 %v8689_v32, %v8428_v16  ;;  %v8691_v38 = vpop.f32.mrb[69].mxu1  ;;  %v12584_v16 = vsel %vm6654_vm1, %v12572_v44, 0 }
 0x53a   : > { %v8703_v0 = vadd.f32 %v8691_v38, %v8429_v30  ;;  %14499 = vmatmul.mubr.msk.bf16.vlgmr.msra.gmra.mrb[180].mxu0 %vm6650_vm2, %v18240_v60  ;;  %v12565_v33 = vpop.permute.xlu0 %12564  ;;  %v8693_v28 = vpop.f32.mrb[70].mxu1 }
 0x53b   : > { %v12559_v57 = vpop.permute.xlu1 %12558  ;;  %v8694_v12 = vpop.f32.mrb[71].mxu1  ;;  %12639 = vmatprep.mubr.bf16.mxu0 %v15133_v7 }
 0x53c   : > { %v12573_v55 = vsel %vm18622_vm3, %v12557_v53, %v12559_v57  ;;  %v12574_v61 = vsel %vm18624_vm5, %v12559_v57, %v12561_v29  ;;  %vm18634_vm3 = vmmov %vm18633_vm0 }
 0x53d   : > { %v8922_v35 = vpop.f32.mrb[76].mxu0  ;;  %14497 = vmatmul.mubr.msk.bf16.vlgmr.msra.gmra.mrb[176].mxu1 %vm6650_vm2, %v18240_v60  ;;  %14504 = vmatprep.subr.msk.bf16.mxu0 %vm6654_vm1, %v12573_v55  ;;  %vm18636_vm5 = vmmov %vm18633_vm0 }
 0x53e   : > { %v8974_v30 = vadd.f32 %v8922_v35, %v8700_v18  ;;  %v8924_v47 = vpop.f32.mrb[77].mxu0  ;;  %12457 = vmatpush1.bf16.msra.mxu1 %v12328_v37  ;;  %12608 = vmatpush1.bf16.msra.mxu0 %v12584_v16  ;;  %v12569_v45 = vpop.permute.xlu0 %12568 }
 0x53f   : > { %v8975_v46 = vadd.f32 %v8924_v47, %v8701_v41  ;;  %v12563_v15 = vpop.permute.xlu1 %12562  ;;  %v8926_v49 = vpop.f32.mrb[78].mxu0  ;;  %12488 = vmatprep.mubr.bf16.mxu1 %v15133_v7 }
 0x540   : > { %v12575_v26 = vsel %vm18623_vm4, %v12561_v29, %v12563_v15  ;;  %v8881_v63 = vpop.f32.mrb[72].mxu1  ;;  %v8927_v8 = vpop.f32.mrb[79].mxu0  ;;  %v12576_v41 = vsel %vm18625_vm6, %v12563_v15, %v12565_v33  ;;  %v18303_v49 = vld [vmem:[%s18487_s2 + $0x2e] sm:$0x3]  ;;  %vm18635_vm4 = vmmov %vm18633_vm0  ;;  %vm18637_vm6 = vcmask 154624  }
 0x541   : > { %v8972_v1 = vadd.f32 %v8881_v63, %v8698_v25  ;;  %v8883_v18 = vpop.f32.mrb[73].mxu1  ;;  %14506 = vmatprep.subr.msk.bf16.mxu1 %vm6654_vm1, %v12575_v26  ;;  %v12590_v25 = vsel %vm6654_vm1, %v12574_v61, 0  ;;  %v12596_v39 = vsel %vm6654_vm1, %v12576_v41, 0 }
 0x542   : > { %v8973_v20 = vadd.f32 %v8883_v18, %v8699_v9  ;;  %14505 = vmatmul.mubr.msk.bf16.vlgmr.msra.gmra.mrb[184].mxu0 %vm6650_vm2, %v18270_v10  ;;  %v12829_v34 = vpop.permute.xlu0 %12828  ;;  %v8885_v53 = vpop.f32.mrb[74].mxu1 }
 0x543   : > { %v12567_v13 = vpop.permute.xlu1 %12566  ;;  %v8886_v31 = vpop.f32.mrb[75].mxu1  ;;  %12721 = vmatprep.mubr.bf16.mxu0 %v15133_v7 }
 0x544   : > { %v12577_v27 = vsel %vm18626_vm7, %v12565_v33, %v12567_v13  ;;  %vm18638_vm7 = vmmov %vm18637_vm6 }
 0x545   : > { %v9114_v48 = vpop.f32.mrb[80].mxu0  ;;  %14501 = vmatmul.mubr.msk.bf16.vlgmr.msra.gmra.mrb[180].mxu1 %vm6650_vm2, %v18240_v60  ;;  %14508 = vmatprep.subr.msk.bf16.mxu0 %vm6654_vm1, %v12577_v27  ;;  %v12578_v60 = vsel %vm18628_vm9, %v12567_v13, %v12569_v45  ;;  %vm18640_vm9 = vmmov %vm18637_vm6 }
 0x546   : > { %v9244_v9 = vadd.f32 %v9114_v48, %v8970_v17  ;;  %v9116_v2 = vpop.f32.mrb[81].mxu0  ;;  %12649 = vmatpush1.bf16.msra.mxu1 %v12590_v25  ;;  %12690 = vmatpush1.bf16.msra.mxu0 %v12596_v39  ;;  %v12833_v52 = vpop.permute.xlu0 %12832 }
 0x547   : > { %v9245_v29 = vadd.f32 %v9116_v2, %v8971_v42  ;;  %v12571_v43 = vpop.permute.xlu1 %12570  ;;  %v9118_v3 = vpop.f32.mrb[82].mxu0  ;;  %12680 = vmatprep.mubr.bf16.mxu1 %v15133_v7 }
 0x548   : > { %v12579_v32 = vsel %vm18627_vm8, %v12569_v45, %v12571_v43  ;;  %v8963_v21 = vpop.f32.mrb[76].mxu1  ;;  %v9119_v38 = vpop.f32.mrb[83].mxu0  ;;  %vm18639_vm8 = vmmov %vm18637_vm6 }
 0x549   : > { %v8976_v56 = vadd.f32 %v8963_v21, %v8702_v58  ;;  %v8965_v44 = vpop.f32.mrb[77].mxu1  ;;  %14510 = vmatprep.subr.msk.bf16.mxu1 %vm6654_vm1, %v12579_v32  ;;  %v12602_v58 = vsel %vm6654_vm1, %v12578_v60, 0 }
 0x54a   : > { %v8977_v17 = vadd.f32 %v8965_v44, %v8703_v0  ;;  %14509 = vmatmul.mubr.msk.bf16.vlgmr.msra.gmra.mrb[188].mxu0 %vm6650_vm2, %v18270_v10  ;;  %v12837_v33 = vpop.permute.xlu0 %12836  ;;  %v8967_v42 = vpop.f32.mrb[78].mxu1 }
 0x54b   : > { %v12831_v28 = vpop.permute.xlu1 %12830  ;;  %v8968_v57 = vpop.f32.mrb[79].mxu1  ;;  %12913 = vmatprep.mubr.bf16.mxu0 %v15133_v7 }
 0x54c   : > { %v12846_v12 = vsel %vm18629_vm10, %v12829_v34, %v12831_v28  ;;  %v12847_v55 = vsel %vm18630_vm11, %v12831_v28, %v12833_v52  ;;  %vm18641_vm10 = vmmov %vm18637_vm6 }
 0x54d   : > { %v12858_v37 = vsel %vm6654_vm1, %v12846_v12, 0  ;;  %v9196_v16 = vpop.f32.mrb[84].mxu0  ;;  %14507 = vmatmul.mubr.msk.bf16.vlgmr.msra.gmra.mrb[184].mxu1 %vm6650_vm2, %v18270_v10  ;;  %14514 = vmatprep.subr.msk.bf16.mxu0 %vm6654_vm1, %v12847_v55  ;;  %vm18642_vm11 = vmmov %vm18637_vm6 }
 0x54e   : > { %v9248_v0 = vadd.f32 %v9196_v16, %v8974_v30  ;;  %v9198_v35 = vpop.f32.mrb[85].mxu0  ;;  %12731 = vmatpush1.bf16.msra.mxu1 %v12602_v58  ;;  %12882 = vmatpush1.bf16.msra.mxu0 %v12858_v37  ;;  %v12841_v47 = vpop.permute.xlu0 %12840 }
 0x54f   : > { %v9249_v45 = vadd.f32 %v9198_v35, %v8975_v46  ;;  %v12835_v15 = vpop.permute.xlu1 %12834  ;;  %v9200_v26 = vpop.f32.mrb[86].mxu0  ;;  %12762 = vmatprep.mubr.bf16.mxu1 %v15133_v7 }
 0x550   : > { %v12849_v63 = vsel %vm18631_vm12, %v12835_v15, %v12837_v33  ;;  %v9155_v8 = vpop.f32.mrb[80].mxu1  ;;  %v9201_v18 = vpop.f32.mrb[87].mxu0  ;;  %v12848_v41 = vsel %vm18632_vm13, %v12833_v52, %v12835_v15  ;;  %vm18643_vm12 = vmmov %vm18637_vm6 }
 0x551   : > { %v9246_v61 = vadd.f32 %v9155_v8, %v8972_v1  ;;  %v9157_v30 = vpop.f32.mrb[81].mxu1  ;;  %14516 = vmatprep.subr.msk.bf16.mxu1 %vm6654_vm1, %v12849_v63  ;;  %v12864_v1 = vsel %vm6654_vm1, %v12848_v41, 0  ;;  %vm18644_vm13 = vmmov %vm18637_vm6 }
 0x552   : > { %v9247_v46 = vadd.f32 %v9157_v30, %v8973_v20  ;;  %14515 = vmatmul.mubr.msk.bf16.vlgmr.msra.gmra.mrb[192].mxu0 %vm6650_vm2, %v18303_v49  ;;  %v12845_v34 = vpop.permute.xlu0 %12844  ;;  %v9159_v53 = vpop.f32.mrb[82].mxu1 }
 0x553   : > { %v12839_v13 = vpop.permute.xlu1 %12838  ;;  %v9160_v31 = vpop.f32.mrb[83].mxu1  ;;  %12995 = vmatprep.mubr.bf16.mxu0 %v15133_v7 }
 0x554   : > { %v12850_v27 = vsel %vm18633_vm0, %v12837_v33, %v12839_v13  ;;  %v12851_v25 = vsel %vm18634_vm3, %v12839_v13, %v12841_v47 }
 0x555   : > { %v12870_v39 = vsel %vm6654_vm1, %v12850_v27, 0  ;;  %v9388_v48 = vpop.f32.mrb[88].mxu0  ;;  %14511 = vmatmul.mubr.msk.bf16.vlgmr.msra.gmra.mrb[188].mxu1 %vm6650_vm2, %v18270_v10  ;;  %14518 = vmatprep.subr.msk.bf16.mxu0 %vm6654_vm1, %v12851_v25 }
 0x556   : > { %v9518_v20 = vadd.f32 %v9388_v48, %v9244_v9  ;;  %v9390_v2 = vpop.f32.mrb[89].mxu0  ;;  %12923 = vmatpush1.bf16.msra.mxu1 %v12864_v1  ;;  %12964 = vmatpush1.bf16.msra.mxu0 %v12870_v39  ;;  %v13105_v52 = vpop.permute.xlu0 %13104 }
 0x557   : > { %v9519_v43 = vadd.f32 %v9390_v2, %v9245_v29  ;;  %v12843_v3 = vpop.permute.xlu1 %12842  ;;  %v9392_v32 = vpop.f32.mrb[90].mxu0  ;;  %12954 = vmatprep.mubr.bf16.mxu1 %v15133_v7 }
 0x558   : > { %v12853_v21 = vsel %vm18635_vm4, %v12843_v3, %v12845_v34  ;;  %v9237_v38 = vpop.f32.mrb[84].mxu1  ;;  %v9393_v44 = vpop.f32.mrb[91].mxu0  ;;  %v12852_v10 = vsel %vm18636_vm5, %v12841_v47, %v12843_v3 }
 0x559   : > { %v9250_v60 = vadd.f32 %v9237_v38, %v8976_v56  ;;  %v9239_v33 = vpop.f32.mrb[85].mxu1  ;;  %14520 = vmatprep.subr.msk.bf16.mxu1 %vm6654_vm1, %v12853_v21  ;;  %v12876_v12 = vsel %vm6654_vm1, %v12852_v10, 0 }
 0x55a   : > { %v9251_v9 = vadd.f32 %v9239_v33, %v8977_v17  ;;  %14519 = vmatmul.mubr.msk.bf16.vlgmr.msra.gmra.mrb[196].mxu0 %vm6650_vm2, %v18303_v49  ;;  %v13109_v42 = vpop.permute.xlu0 %13108  ;;  %v9241_v29 = vpop.f32.mrb[86].mxu1 }
 0x55b   : > { %v13103_v28 = vpop.permute.xlu1 %13102  ;;  %v9242_v57 = vpop.f32.mrb[87].mxu1  ;;  %13187 = vmatprep.mubr.bf16.mxu0 %v15133_v7 }
 0x55c   : > { %v13120_v56 = vsel %vm18637_vm6, %v13103_v28, %v13105_v52 }
 0x55d   : > { %v9470_v55 = vpop.f32.mrb[92].mxu0  ;;  %14517 = vmatmul.mubr.msk.bf16.vlgmr.msra.gmra.mrb[192].mxu1 %vm6650_vm2, %v18303_v49  ;;  %v13132_v8 = vsel %vm6654_vm1, %v13120_v56, 0 }
 0x55e   : > { %v9522_v58 = vadd.f32 %v9470_v55, %v9248_v0  ;;  %v9472_v37 = vpop.f32.mrb[93].mxu0  ;;  %13005 = vmatpush1.bf16.msra.mxu1 %v12876_v12  ;;  %v13113_v17 = vpop.permute.xlu0 %13112  ;;  %13036 = vmatprep.mubr.bf16.mxu1 %v15133_v7 }
 0x55f   : > { %v9523_v16 = vadd.f32 %v9472_v37, %v9249_v45  ;;  %v13107_v35 = vpop.permute.xlu1 %13106  ;;  %v9474_v47 = vpop.f32.mrb[94].mxu0  ;;  %v18337_v45 = vld [vmem:[%s18487_s2 + $0x30] sm:$0x3] }
 0x560   : > { %v13121_v15 = vsel %vm18638_vm7, %v13105_v52, %v13107_v35  ;;  %v9429_v26 = vpop.f32.mrb[88].mxu1  ;;  %v9475_v63 = vpop.f32.mrb[95].mxu0  ;;  %v13122_v53 = vsel %vm18639_vm8, %v13107_v35, %v13109_v42 }
 0x561   : > { %v9520_v18 = vadd.f32 %v9429_v26, %v9246_v61  ;;  %v9431_v30 = vpop.f32.mrb[89].mxu1  ;;  %14524 = vmatprep.subr.msk.bf16.mxu0 %vm6654_vm1, %v13121_v15  ;;  %v13138_v61 = vsel %vm6654_vm1, %v13122_v53, 0  ;;  %v14532_v53 = vld [vmem:[%s18487_s2 + $0x32] sm:$0x3] }
 0x562   : > { %v9521_v41 = vadd.f32 %v9431_v30, %v9247_v46  ;;  %13156 = vmatpush1.bf16.msra.mxu0 %v13132_v8  ;;  %v13117_v0 = vpop.permute.xlu0 %13116  ;;  %v9433_v34 = vpop.f32.mrb[90].mxu1 }
 0x563   : > { %v13111_v13 = vpop.permute.xlu1 %13110  ;;  %v9434_v31 = vpop.f32.mrb[91].mxu1 }
 0x564   : > { %v13123_v27 = vsel %vm18640_vm9, %v13109_v42, %v13111_v13  ;;  %v13124_v46 = vsel %vm18641_vm10, %v13111_v13, %v13113_v17 }
 0x565   : > { %v9662_v25 = vpop.f32.mrb[96].mxu0  ;;  %14521 = vmatmul.mubr.msk.bf16.vlgmr.msra.gmra.mrb[196].mxu1 %vm6650_vm2, %v18303_v49  ;;  %14525 = vmatmul.mubr.msk.bf16.vlgmr.msra.gmra.mrb[200].mxu0 %vm6650_vm2, %v18337_v45  ;;  %v13144_v38 = vsel %vm6654_vm1, %v13124_v46, 0 }
 0x566   : > { %v9792_v1 = vadd.f32 %v9662_v25, %v9518_v20  ;;  %v9664_v39 = vpop.f32.mrb[97].mxu0  ;;  %14526 = vmatprep.subr.msk.bf16.mxu1 %vm6654_vm1, %v13123_v27  ;;  %v13377_v48 = vpop.permute.xlu0 %13376  ;;  %13228 = vmatprep.mubr.bf16.mxu1 %v15133_v7 }
 0x567   : > { %v9793_v2 = vadd.f32 %v9664_v39, %v9519_v43  ;;  %13197 = vmatpush1.bf16.msra.mxu1 %v13138_v61  ;;  %v13115_v52 = vpop.permute.xlu1 %13114  ;;  %v9666_v3 = vpop.f32.mrb[98].mxu0  ;;  %13269 = vmatprep.mubr.bf16.mxu0 %v15133_v7 }
 0x568   : > { %v13125_v49 = vsel %vm18642_vm11, %v13113_v17, %v13115_v52  ;;  %v9511_v32 = vpop.f32.mrb[92].mxu1  ;;  %v9667_v21 = vpop.f32.mrb[99].mxu0  ;;  %v13126_v43 = vsel %vm18643_vm12, %v13115_v52, %v13117_v0 }
 0x569   : > { %v9524_v44 = vadd.f32 %v9511_v32, %v9250_v60  ;;  %v9513_v20 = vpop.f32.mrb[93].mxu1  ;;  %14528 = vmatprep.subr.msk.bf16.mxu0 %vm6654_vm1, %v13125_v49  ;;  %v13150_v60 = vsel %vm6654_vm1, %v13126_v43, 0 }
 0x56a   : > { %v9525_v33 = vadd.f32 %v9513_v20, %v9251_v9  ;;  %13238 = vmatpush1.bf16.msra.mxu0 %v13144_v38  ;;  %v13381_v10 = vpop.permute.xlu0 %13380  ;;  %v9515_v42 = vpop.f32.mrb[94].mxu1 }
 0x56b   : > { %v13119_v29 = vpop.permute.xlu1 %13118  ;;  %v9516_v28 = vpop.f32.mrb[95].mxu1 }
 0x56c   : > { %v13127_v57 = vsel %vm18644_vm13, %v13117_v0, %v13119_v29 }
 0x56d   : > { %v9744_v12 = vpop.f32.mrb[100].mxu0  ;;  %14527 = vmatmul.mubr.msk.bf16.vlgmr.msra.gmra.mrb[200].mxu1 %vm6650_vm2, %v18337_v45  ;;  %14529 = vmatmul.mubr.msk.bf16.vlgmr.msra.gmra.mrb[204].mxu0 %vm6650_vm2, %v18337_v45 }
 0x56e   : > { %v9796_v55 = vadd.f32 %v9744_v12, %v9522_v58  ;;  %v9746_v9 = vpop.f32.mrb[101].mxu0  ;;  %14530 = vmatprep.subr.msk.bf16.mxu1 %vm6654_vm1, %v13127_v57  ;;  %v13385_v56 = vpop.permute.xlu0 %13384  ;;  %13310 = vmatprep.mubr.bf16.mxu1 %v15133_v7 }
 0x56f   : > { %v9797_v37 = vadd.f32 %v9746_v9, %v9523_v16  ;;  %13279 = vmatpush1.bf16.msra.mxu1 %v13150_v60  ;;  %v13379_v17 = vpop.permute.xlu1 %13378  ;;  %v9748_v35 = vpop.f32.mrb[102].mxu0  ;;  %13461 = vmatprep.mubr.bf16.mxu0 %v15133_v7 }
 0x570   : > { %v13394_v47 = vsel %vm6010_vm14, %v13377_v48, %v13379_v17  ;;  %v13395_v15 = vsel %vm6010_vm14, %v13379_v17, %v13381_v10  ;;  %v9703_v26 = vpop.f32.mrb[96].mxu1  ;;  %v9749_v63 = vpop.f32.mrb[103].mxu0 }
 0x571   : > { %v13406_v58 = vsel %vm6654_vm1, %v13394_v47, 0  ;;  %v9794_v8 = vadd.f32 %v9703_v26, %v9520_v18  ;;  %v9705_v30 = vpop.f32.mrb[97].mxu1  ;;  %14534 = vmatprep.subr.msk.bf16.mxu0 %vm6654_vm1, %v13395_v15 }
 0x572   : > { %v9795_v0 = vadd.f32 %v9705_v30, %v9521_v41  ;;  %13430 = vmatpush1.bf16.msra.mxu0 %v13406_v58  ;;  %v13389_v16 = vpop.permute.xlu0 %13388  ;;  %v9707_v34 = vpop.f32.mrb[98].mxu1 }
 0x573   : > { %v13383_v13 = vpop.permute.xlu1 %13382  ;;  %v9708_v31 = vpop.f32.mrb[99].mxu1 }
 0x574   : > { %v13396_v27 = vsel %vm6010_vm14, %v13381_v10, %v13383_v13  ;;  %v13397_v25 = vsel %vm6010_vm14, %v13383_v13, %v13385_v56 }
 0x575   : > { %v13412_v61 = vsel %vm6654_vm1, %v13396_v27, 0  ;;  %v9936_v18 = vpop.f32.mrb[104].mxu0  ;;  %14531 = vmatmul.mubr.msk.bf16.vlgmr.msra.gmra.mrb[204].mxu1 %vm6650_vm2, %v18337_v45  ;;  %14535 = vmatmul.mubr.msk.bf16.vlgmr.msra.gmra.mrb[208].mxu0 %vm6650_vm2, %v14532_v53 }
 0x576   : > { %v10066_v41 = vadd.f32 %v9936_v18, %v9792_v1  ;;  %v9938_v46 = vpop.f32.mrb[105].mxu0  ;;  %14536 = vmatprep.subr.msk.bf16.mxu1 %vm6654_vm1, %v13397_v25  ;;  %v13393_v39 = vpop.permute.xlu0 %13392  ;;  %13502 = vmatprep.mubr.bf16.mxu1 %v15133_v7 }
 0x577   : > { %v10067_v48 = vadd.f32 %v9938_v46, %v9793_v2  ;;  %13471 = vmatpush1.bf16.msra.mxu1 %v13412_v61  ;;  %v13387_v52 = vpop.permute.xlu1 %13386  ;;  %v9940_v3 = vpop.f32.mrb[106].mxu0  ;;  %13543 = vmatprep.mubr.bf16.mxu0 %v15133_v7 }
 0x578   : > { %v13398_v49 = vsel %vm6010_vm14, %v13385_v56, %v13387_v52  ;;  %v13399_v32 = vsel %vm6010_vm14, %v13387_v52, %v13389_v16  ;;  %v9785_v45 = vpop.f32.mrb[100].mxu1  ;;  %v9941_v21 = vpop.f32.mrb[107].mxu0 }
 0x579   : > { %v13418_v1 = vsel %vm6654_vm1, %v13398_v49, 0  ;;  %v9798_v38 = vadd.f32 %v9785_v45, %v9524_v44  ;;  %v9787_v20 = vpop.f32.mrb[101].mxu1  ;;  %14538 = vmatprep.subr.msk.bf16.mxu0 %vm6654_vm1, %v13399_v32 }
 0x57a   : > { %v9799_v10 = vadd.f32 %v9787_v20, %v9525_v33  ;;  %13512 = vmatpush1.bf16.msra.mxu0 %v13418_v1  ;;  %v13653_v2 = vpop.permute.xlu0 %13652  ;;  %v9789_v42 = vpop.f32.mrb[102].mxu1 }
 0x57b   : > { %v13391_v43 = vpop.permute.xlu1 %13390  ;;  %v9790_v29 = vpop.f32.mrb[103].mxu1 }
 0x57c   : > { %v13400_v28 = vsel %vm6010_vm14, %v13389_v16, %v13391_v43  ;;  %v13401_v57 = vsel %vm6010_vm14, %v13391_v43, %v13393_v39 }
 0x57d   : > { %v13424_v12 = vsel %vm6654_vm1, %v13400_v28, 0  ;;  %v10018_v60 = vpop.f32.mrb[108].mxu0  ;;  %14537 = vmatmul.mubr.msk.bf16.vlgmr.msra.gmra.mrb[208].mxu1 %vm6650_vm2, %v14532_v53  ;;  %14539 = vmatmul.mubr.msk.bf16.vlgmr.msra.gmra.mrb[212].mxu0 %vm6650_vm2, %v14532_v53 }
 0x57e   : > { %v10070_v44 = vadd.f32 %v10018_v60, %v9796_v55  ;;  %v10020_v9 = vpop.f32.mrb[109].mxu0  ;;  %14540 = vmatprep.subr.msk.bf16.mxu1 %vm6654_vm1, %v13401_v57  ;;  %v13657_v33 = vpop.permute.xlu0 %13656  ;;  %13584 = vmatprep.mubr.bf16.mxu1 %v15133_v7 }
 0x57f   : > { %v10071_v56 = vadd.f32 %v10020_v9, %v9797_v37  ;;  %13553 = vmatpush1.bf16.msra.mxu1 %v13424_v12  ;;  %v13651_v17 = vpop.permute.xlu1 %13650  ;;  %v10022_v35 = vpop.f32.mrb[110].mxu0  ;;  %13735 = vmatprep.mubr.bf16.mxu0 %v15133_v7 }
 0x580   : > { %v9977_v47 = vpop.f32.mrb[104].mxu1  ;;  %v10023_v15 = vpop.f32.mrb[111].mxu0  ;;  %v13668_v58 = vsel %vm6238_vm15, %v13651_v17, %v13653_v2 }
 0x581   : > { %v10068_v26 = vadd.f32 %v9977_v47, %v9794_v8  ;;  %v9979_v63 = vpop.f32.mrb[105].mxu1  ;;  %v13680_v31 = vsel %vm6654_vm1, %v13668_v58, 0 }
 0x582   : > { %v10069_v30 = vadd.f32 %v9979_v63, %v9795_v0  ;;  %v9981_v55 = vpop.f32.mrb[106].mxu1  ;;  %v13661_v27 = vpop.permute.xlu0 %13660  ;;  %v14542_v0 = vld [vmem:[%s18487_s2 + $0x34] sm:$0x3] }
 0x583   : > { %v13655_v16 = vpop.permute.xlu1 %13654  ;;  %v9982_v34 = vpop.f32.mrb[107].mxu1 }
 0x584   : > { %v13669_v13 = vsel %vm6238_vm15, %v13653_v2, %v13655_v16  ;;  %v13670_v25 = vsel %vm6238_vm15, %v13655_v16, %v13657_v33 }
 0x585   : > { %v10175_v37 = vpop.f32.mrb[112].mxu0  ;;  %14541 = vmatmul.mubr.msk.bf16.vlgmr.msra.gmra.mrb[212].mxu1 %vm6650_vm2, %v14532_v53  ;;  %14544 = vmatprep.subr.msk.bf16.mxu0 %vm6654_vm1, %v13669_v13  ;;  %v13686_v49 = vsel %vm6654_vm1, %v13670_v25, 0 }
 0x586   : > { %v10305_v8 = vadd.f32 %v10175_v37, %v10066_v41  ;;  %v10177_v61 = vpop.f32.mrb[113].mxu0  ;;  %13704 = vmatpush1.bf16.msra.mxu0 %v13680_v31  ;;  %13776 = vmatprep.mubr.bf16.mxu1 %v15133_v7  ;;  %v13665_v42 = vpop.permute.xlu0 %13664 }
 0x587   : > { %v10306_v18 = vadd.f32 %v10177_v61, %v10067_v48  ;;  %v13659_v46 = vpop.permute.xlu1 %13658  ;;  %v10179_v39 = vpop.f32.mrb[114].mxu0 }
 0x588   : > { %v13671_v52 = vsel %vm6238_vm15, %v13657_v33, %v13659_v46  ;;  %v10059_v53 = vpop.f32.mrb[108].mxu1  ;;  %v10180_v3 = vpop.f32.mrb[115].mxu0  ;;  %v13672_v41 = vsel %vm6238_vm15, %v13659_v46, %v13661_v27 }
 0x589   : > { %v10072_v32 = vadd.f32 %v10059_v53, %v9798_v38  ;;  %v10061_v45 = vpop.f32.mrb[109].mxu1  ;;  %14545 = vmatmul.mubr.msk.bf16.vlgmr.msra.gmra.mrb[216].mxu0 %vm6650_vm2, %v14542_v0  ;;  %14546 = vmatprep.subr.msk.bf16.mxu1 %vm6654_vm1, %v13671_v52  ;;  %v13692_v43 = vsel %vm6654_vm1, %v13672_v41, 0 }
 0x58a   : > { %v10073_v21 = vadd.f32 %v10061_v45, %v9799_v10  ;;  %13745 = vmatpush1.bf16.msra.mxu1 %v13686_v49  ;;  %v10063_v1 = vpop.f32.mrb[110].mxu1  ;;  %13817 = vmatprep.mubr.bf16.mxu0 %v15133_v7 }
 0x58b   : > { %v13663_v48 = vpop.permute.xlu1 %13662  ;;  %v10064_v20 = vpop.f32.mrb[111].mxu1 }
 0x58c   : > { %v13673_v2 = vsel %vm6238_vm15, %v13661_v27, %v13663_v48  ;;  %v13674_v29 = vsel %vm6238_vm15, %v13663_v48, %v13665_v42 }
 0x58d   : > { %v10257_v38 = vpop.f32.mrb[116].mxu0  ;;  %14547 = vmatmul.mubr.msk.bf16.vlgmr.msra.gmra.mrb[216].mxu1 %vm6650_vm2, %v14542_v0  ;;  %14548 = vmatprep.subr.msk.bf16.mxu0 %vm6654_vm1, %v13673_v2  ;;  %v13698_v35 = vsel %vm6654_vm1, %v13674_v29, 0 }
 0x58e   : > { %v10309_v28 = vadd.f32 %v10257_v38, %v10070_v44  ;;  %v10259_v10 = vpop.f32.mrb[117].mxu0  ;;  %13786 = vmatpush1.bf16.msra.mxu0 %v13692_v43  ;;  %13858 = vmatprep.mubr.bf16.mxu1 %v15133_v7 }
 0x58f   : > { %v10310_v57 = vadd.f32 %v10259_v10, %v10071_v56  ;;  %v13667_v12 = vpop.permute.xlu1 %13666  ;;  %v10261_v60 = vpop.f32.mrb[118].mxu0 }
 0x590   : > { %v13675_v9 = vsel %vm6238_vm15, %v13665_v42, %v13667_v12  ;;  %v10216_v33 = vpop.f32.mrb[112].mxu1  ;;  %v10262_v17 = vpop.f32.mrb[119].mxu0 }
 0x591   : > { %v10307_v47 = vadd.f32 %v10216_v33, %v10068_v26  ;;  %v10218_v15 = vpop.f32.mrb[113].mxu1  ;;  %14549 = vmatmul.mubr.msk.bf16.vlgmr.msra.gmra.mrb[220].mxu0 %vm6650_vm2, %v14542_v0  ;;  %14550 = vmatprep.subr.msk.bf16.mxu1 %vm6654_vm1, %v13675_v9 }
 0x592   : > { %v10308_v44 = vadd.f32 %v10218_v15, %v10069_v30  ;;  %13827 = vmatpush1.bf16.msra.mxu1 %v13698_v35  ;;  %v10220_v63 = vpop.f32.mrb[114].mxu1 }
 0x593   : > { %v10221_v58 = vpop.f32.mrb[115].mxu1 }
 0x595   : > { %v10449_v7 = vpop.f32.mrb[120].mxu0  ;;  %14551 = vmatmul.mubr.msk.bf16.vlgmr.msra.gmra.mrb[220].mxu1 %vm6650_vm2, %v14542_v0 }
 0x596   : > { %v10579_v56 = vadd.f32 %v10449_v7, %v10305_v8  ;;  %v10451_v55 = vpop.f32.mrb[121].mxu0 }
 0x597   : > { %v10580_v16 = vadd.f32 %v10451_v55, %v10306_v18  ;;  %v10453_v34 = vpop.f32.mrb[122].mxu0 }
 0x598   : > { %v10298_v13 = vpop.f32.mrb[116].mxu1  ;;  %v10454_v31 = vpop.f32.mrb[123].mxu0 }
 0x599   : > { %v10311_v37 = vadd.f32 %v10298_v13, %v10072_v32  ;;  %v10300_v26 = vpop.f32.mrb[117].mxu1 }
 0x59a   : > { %v10312_v27 = vadd.f32 %v10300_v26, %v10073_v21  ;;  %v10302_v25 = vpop.f32.mrb[118].mxu1 }
 0x59b   : > { %v10303_v61 = vpop.f32.mrb[119].mxu1 }
 0x59d   : > { %v10531_v46 = vpop.f32.mrb[124].mxu0 }
 0x59e   : > { %v10583_v39 = vadd.f32 %v10531_v46, %v10309_v28  ;;  %v10533_v30 = vpop.f32.mrb[125].mxu0 }
 0x59f   : > { %v10584_v52 = vadd.f32 %v10533_v30, %v10310_v57  ;;  %v10535_v53 = vpop.f32.mrb[126].mxu0 }
 0x5a0   : > { %v10490_v3 = vpop.f32.mrb[120].mxu1  ;;  %v10536_v49 = vpop.f32.mrb[127].mxu0 }
 0x5a1   : > { %v10581_v45 = vadd.f32 %v10490_v3, %v10307_v47  ;;  %v10492_v0 = vpop.f32.mrb[121].mxu1 }
 0x5a2   : > { %v10582_v8 = vadd.f32 %v10492_v0, %v10308_v44  ;;  %v10494_v41 = vpop.f32.mrb[122].mxu1 }
 0x5a3   : > { %v10495_v18 = vpop.f32.mrb[123].mxu1 }
 0x5a5   : > { %v10723_v1 = vpop.f32.mrb[128].mxu0 }
 0x5a6   : > { %v10853_v48 = vadd.f32 %v10723_v1, %v10579_v56  ;;  %v10725_v20 = vpop.f32.mrb[129].mxu0 }
 0x5a7   : > { %v10854_v32 = vadd.f32 %v10725_v20, %v10580_v16  ;;  %v10727_v2 = vpop.f32.mrb[130].mxu0 }
 0x5a8   : > { %v10572_v21 = vpop.f32.mrb[124].mxu1  ;;  %v10728_v42 = vpop.f32.mrb[131].mxu0 }
 0x5a9   : > { %v10585_v43 = vadd.f32 %v10572_v21, %v10311_v37  ;;  %v10574_v38 = vpop.f32.mrb[125].mxu1 }
 0x5aa   : > { %v10586_v29 = vadd.f32 %v10574_v38, %v10312_v27  ;;  %v10576_v28 = vpop.f32.mrb[126].mxu1 }
 0x5ab   : > { %v10577_v10 = vpop.f32.mrb[127].mxu1 }
 0x5ad   : > { %v10805_v57 = vpop.f32.mrb[132].mxu0 }
 0x5ae   : > { %v10857_v12 = vadd.f32 %v10805_v57, %v10583_v39  ;;  %v10807_v60 = vpop.f32.mrb[133].mxu0 }
 0x5af   : > { %v10858_v9 = vadd.f32 %v10807_v60, %v10584_v52  ;;  %v10809_v33 = vpop.f32.mrb[134].mxu0 }
 0x5b0   : > { %v10764_v17 = vpop.f32.mrb[128].mxu1  ;;  %v10810_v35 = vpop.f32.mrb[135].mxu0 }
 0x5b1   : > { %v10855_v47 = vadd.f32 %v10764_v17, %v10581_v45  ;;  %v10766_v15 = vpop.f32.mrb[129].mxu1 }
 0x5b2   : > { %v10856_v44 = vadd.f32 %v10766_v15, %v10582_v8  ;;  %v10768_v63 = vpop.f32.mrb[130].mxu1 }
 0x5b3   : > { %v10769_v58 = vpop.f32.mrb[131].mxu1 }
 0x5b5   : > { %v10997_v7 = vpop.f32.mrb[136].mxu0 }
 0x5b6   : > { %v11127_v56 = vadd.f32 %v10997_v7, %v10853_v48  ;;  %v10999_v55 = vpop.f32.mrb[137].mxu0 }
 0x5b7   : > { %v11128_v16 = vadd.f32 %v10999_v55, %v10854_v32  ;;  %v11001_v34 = vpop.f32.mrb[138].mxu0 }
 0x5b8   : > { %v10846_v13 = vpop.f32.mrb[132].mxu1  ;;  %v11002_v31 = vpop.f32.mrb[139].mxu0 }
 0x5b9   : > { %v10859_v37 = vadd.f32 %v10846_v13, %v10585_v43  ;;  %v10848_v26 = vpop.f32.mrb[133].mxu1 }
 0x5ba   : > { %v10860_v27 = vadd.f32 %v10848_v26, %v10586_v29  ;;  %v10850_v25 = vpop.f32.mrb[134].mxu1 }
 0x5bb   : > { %v10851_v61 = vpop.f32.mrb[135].mxu1 }
 0x5bd   : > { %v11079_v46 = vpop.f32.mrb[140].mxu0 }
 0x5be   : > { %v11131_v39 = vadd.f32 %v11079_v46, %v10857_v12  ;;  %v11081_v30 = vpop.f32.mrb[141].mxu0 }
 0x5bf   : > { %v11132_v52 = vadd.f32 %v11081_v30, %v10858_v9  ;;  %v11083_v53 = vpop.f32.mrb[142].mxu0 }
 0x5c0   : > { %v11038_v3 = vpop.f32.mrb[136].mxu1  ;;  %v11084_v49 = vpop.f32.mrb[143].mxu0 }
 0x5c1   : > { %v11129_v45 = vadd.f32 %v11038_v3, %v10855_v47  ;;  %v11040_v0 = vpop.f32.mrb[137].mxu1 }
 0x5c2   : > { %v11130_v8 = vadd.f32 %v11040_v0, %v10856_v44  ;;  %v11042_v41 = vpop.f32.mrb[138].mxu1 }
 0x5c3   : > { %v11043_v18 = vpop.f32.mrb[139].mxu1 }
 0x5c5   : > { %v11271_v1 = vpop.f32.mrb[144].mxu0 }
 0x5c6   : > { %v11401_v48 = vadd.f32 %v11271_v1, %v11127_v56  ;;  %v11273_v20 = vpop.f32.mrb[145].mxu0 }
 0x5c7   : > { %v11402_v32 = vadd.f32 %v11273_v20, %v11128_v16  ;;  %v11275_v2 = vpop.f32.mrb[146].mxu0 }
 0x5c8   : > { %v11120_v21 = vpop.f32.mrb[140].mxu1  ;;  %v11276_v42 = vpop.f32.mrb[147].mxu0 }
 0x5c9   : > { %v11133_v43 = vadd.f32 %v11120_v21, %v10859_v37  ;;  %v11122_v38 = vpop.f32.mrb[141].mxu1 }
 0x5ca   : > { %v11134_v29 = vadd.f32 %v11122_v38, %v10860_v27  ;;  %v11124_v28 = vpop.f32.mrb[142].mxu1 }
 0x5cb   : > { %v11125_v10 = vpop.f32.mrb[143].mxu1 }
 0x5cd   : > { %v11353_v57 = vpop.f32.mrb[148].mxu0 }
 0x5ce   : > { %v11405_v12 = vadd.f32 %v11353_v57, %v11131_v39  ;;  %v11355_v60 = vpop.f32.mrb[149].mxu0 }
 0x5cf   : > { %v11406_v9 = vadd.f32 %v11355_v60, %v11132_v52  ;;  %v11357_v33 = vpop.f32.mrb[150].mxu0 }
 0x5d0   : > { %v11312_v17 = vpop.f32.mrb[144].mxu1  ;;  %v11358_v35 = vpop.f32.mrb[151].mxu0 }
 0x5d1   : > { %v11403_v47 = vadd.f32 %v11312_v17, %v11129_v45  ;;  %v11314_v15 = vpop.f32.mrb[145].mxu1 }
 0x5d2   : > { %v11404_v44 = vadd.f32 %v11314_v15, %v11130_v8  ;;  %v11316_v63 = vpop.f32.mrb[146].mxu1 }
 0x5d3   : > { %v11317_v58 = vpop.f32.mrb[147].mxu1 }
 0x5d5   : > { %v11545_v7 = vpop.f32.mrb[152].mxu0 }
 0x5d6   : > { %v11675_v56 = vadd.f32 %v11545_v7, %v11401_v48  ;;  %v11547_v55 = vpop.f32.mrb[153].mxu0 }
 0x5d7   : > { %v11676_v16 = vadd.f32 %v11547_v55, %v11402_v32  ;;  %v11549_v34 = vpop.f32.mrb[154].mxu0 }
 0x5d8   : > { %v11394_v13 = vpop.f32.mrb[148].mxu1  ;;  %v11550_v31 = vpop.f32.mrb[155].mxu0 }
 0x5d9   : > { %v11407_v37 = vadd.f32 %v11394_v13, %v11133_v43  ;;  %v11396_v26 = vpop.f32.mrb[149].mxu1 }
 0x5da   : > { %v11408_v27 = vadd.f32 %v11396_v26, %v11134_v29  ;;  %v11398_v25 = vpop.f32.mrb[150].mxu1 }
 0x5db   : > { %v11399_v61 = vpop.f32.mrb[151].mxu1 }
 0x5dd   : > { %v11627_v46 = vpop.f32.mrb[156].mxu0 }
 0x5de   : > { %v11679_v39 = vadd.f32 %v11627_v46, %v11405_v12  ;;  %v11629_v30 = vpop.f32.mrb[157].mxu0 }
 0x5df   : > { %v11680_v52 = vadd.f32 %v11629_v30, %v11406_v9  ;;  %v11631_v53 = vpop.f32.mrb[158].mxu0 }
 0x5e0   : > { %v11586_v3 = vpop.f32.mrb[152].mxu1  ;;  %v11632_v49 = vpop.f32.mrb[159].mxu0 }
 0x5e1   : > { %v11677_v45 = vadd.f32 %v11586_v3, %v11403_v47  ;;  %v11588_v0 = vpop.f32.mrb[153].mxu1 }
 0x5e2   : > { %v11678_v8 = vadd.f32 %v11588_v0, %v11404_v44  ;;  %v11590_v41 = vpop.f32.mrb[154].mxu1 }
 0x5e3   : > { %v11591_v18 = vpop.f32.mrb[155].mxu1 }
 0x5e5   : > { %v11819_v1 = vpop.f32.mrb[160].mxu0 }
 0x5e6   : > { %v11949_v48 = vadd.f32 %v11819_v1, %v11675_v56  ;;  %v11821_v20 = vpop.f32.mrb[161].mxu0 }
 0x5e7   : > { %v11950_v32 = vadd.f32 %v11821_v20, %v11676_v16  ;;  %v11823_v2 = vpop.f32.mrb[162].mxu0 }
 0x5e8   : > { %v11668_v21 = vpop.f32.mrb[156].mxu1  ;;  %v11824_v42 = vpop.f32.mrb[163].mxu0 }
 0x5e9   : > { %v11681_v43 = vadd.f32 %v11668_v21, %v11407_v37  ;;  %v11670_v38 = vpop.f32.mrb[157].mxu1 }
 0x5ea   : > { %v11682_v29 = vadd.f32 %v11670_v38, %v11408_v27  ;;  %v11672_v28 = vpop.f32.mrb[158].mxu1 }
 0x5eb   : > { %v11673_v10 = vpop.f32.mrb[159].mxu1 }
 0x5ed   : > { %v11901_v57 = vpop.f32.mrb[164].mxu0 }
 0x5ee   : > { %v11953_v12 = vadd.f32 %v11901_v57, %v11679_v39  ;;  %v11903_v60 = vpop.f32.mrb[165].mxu0 }
 0x5ef   : > { %v11954_v9 = vadd.f32 %v11903_v60, %v11680_v52  ;;  %v11905_v33 = vpop.f32.mrb[166].mxu0 }
 0x5f0   : > { %v11860_v17 = vpop.f32.mrb[160].mxu1  ;;  %v11906_v35 = vpop.f32.mrb[167].mxu0 }
 0x5f1   : > { %v11951_v47 = vadd.f32 %v11860_v17, %v11677_v45  ;;  %v11862_v15 = vpop.f32.mrb[161].mxu1 }
 0x5f2   : > { %v11952_v44 = vadd.f32 %v11862_v15, %v11678_v8  ;;  %v11864_v63 = vpop.f32.mrb[162].mxu1 }
 0x5f3   : > { %v11865_v58 = vpop.f32.mrb[163].mxu1 }
 0x5f5   : > { %v12093_v7 = vpop.f32.mrb[168].mxu0 }
 0x5f6   : > { %v12223_v56 = vadd.f32 %v12093_v7, %v11949_v48  ;;  %v12095_v55 = vpop.f32.mrb[169].mxu0 }
 0x5f7   : > { %v12224_v16 = vadd.f32 %v12095_v55, %v11950_v32  ;;  %v12097_v34 = vpop.f32.mrb[170].mxu0 }
 0x5f8   : > { %v11942_v13 = vpop.f32.mrb[164].mxu1  ;;  %v12098_v31 = vpop.f32.mrb[171].mxu0 }
 0x5f9   : > { %v11955_v37 = vadd.f32 %v11942_v13, %v11681_v43  ;;  %v11944_v26 = vpop.f32.mrb[165].mxu1 }
 0x5fa   : > { %v11956_v27 = vadd.f32 %v11944_v26, %v11682_v29  ;;  %v11946_v25 = vpop.f32.mrb[166].mxu1 }
 0x5fb   : > { %v11947_v61 = vpop.f32.mrb[167].mxu1 }
 0x5fd   : > { %v12175_v46 = vpop.f32.mrb[172].mxu0 }
 0x5fe   : > { %v12227_v39 = vadd.f32 %v12175_v46, %v11953_v12  ;;  %v12177_v30 = vpop.f32.mrb[173].mxu0 }
 0x5ff   : > { %v12228_v52 = vadd.f32 %v12177_v30, %v11954_v9  ;;  %v12179_v53 = vpop.f32.mrb[174].mxu0 }
 0x600   : > { %v12134_v3 = vpop.f32.mrb[168].mxu1  ;;  %v12180_v49 = vpop.f32.mrb[175].mxu0 }
 0x601   : > { %v12225_v45 = vadd.f32 %v12134_v3, %v11951_v47  ;;  %v12136_v0 = vpop.f32.mrb[169].mxu1 }
 0x602   : > { %v12226_v8 = vadd.f32 %v12136_v0, %v11952_v44  ;;  %v12138_v41 = vpop.f32.mrb[170].mxu1 }
 0x603   : > { %v12139_v18 = vpop.f32.mrb[171].mxu1 }
 0x605   : > { %v12367_v1 = vpop.f32.mrb[176].mxu0 }
 0x606   : > { %v12497_v48 = vadd.f32 %v12367_v1, %v12223_v56  ;;  %v12369_v20 = vpop.f32.mrb[177].mxu0 }
 0x607   : > { %v12498_v32 = vadd.f32 %v12369_v20, %v12224_v16  ;;  %v12371_v2 = vpop.f32.mrb[178].mxu0 }
 0x608   : > { %v12216_v21 = vpop.f32.mrb[172].mxu1  ;;  %v12372_v42 = vpop.f32.mrb[179].mxu0 }
 0x609   : > { %v12229_v43 = vadd.f32 %v12216_v21, %v11955_v37  ;;  %v12218_v38 = vpop.f32.mrb[173].mxu1 }
 0x60a   : > { %v12230_v29 = vadd.f32 %v12218_v38, %v11956_v27  ;;  %v12220_v28 = vpop.f32.mrb[174].mxu1 }
 0x60b   : > { %v12221_v10 = vpop.f32.mrb[175].mxu1 }
 0x60d   : > { %v12449_v57 = vpop.f32.mrb[180].mxu0 }
 0x60e   : > { %v12501_v12 = vadd.f32 %v12449_v57, %v12227_v39  ;;  %v12451_v60 = vpop.f32.mrb[181].mxu0 }
 0x60f   : > { %v12502_v9 = vadd.f32 %v12451_v60, %v12228_v52  ;;  %v12453_v33 = vpop.f32.mrb[182].mxu0 }
 0x610   : > { %v12408_v17 = vpop.f32.mrb[176].mxu1  ;;  %v12454_v35 = vpop.f32.mrb[183].mxu0 }
 0x611   : > { %v12499_v47 = vadd.f32 %v12408_v17, %v12225_v45  ;;  %v12410_v15 = vpop.f32.mrb[177].mxu1 }
 0x612   : > { %v12500_v44 = vadd.f32 %v12410_v15, %v12226_v8  ;;  %v12412_v63 = vpop.f32.mrb[178].mxu1 }
 0x613   : > { %v12413_v58 = vpop.f32.mrb[179].mxu1 }
 0x615   : > { %v12641_v7 = vpop.f32.mrb[184].mxu0 }
 0x616   : > { %v12771_v56 = vadd.f32 %v12641_v7, %v12497_v48  ;;  %v12643_v55 = vpop.f32.mrb[185].mxu0 }
 0x617   : > { %v12772_v16 = vadd.f32 %v12643_v55, %v12498_v32  ;;  %v12645_v34 = vpop.f32.mrb[186].mxu0 }
 0x618   : > { %v12490_v13 = vpop.f32.mrb[180].mxu1  ;;  %v12646_v31 = vpop.f32.mrb[187].mxu0 }
 0x619   : > { %v12503_v37 = vadd.f32 %v12490_v13, %v12229_v43  ;;  %v12492_v26 = vpop.f32.mrb[181].mxu1 }
 0x61a   : > { %v12504_v27 = vadd.f32 %v12492_v26, %v12230_v29  ;;  %v12494_v25 = vpop.f32.mrb[182].mxu1 }
 0x61b   : > { %v12495_v61 = vpop.f32.mrb[183].mxu1 }
 0x61d   : > { %v12723_v46 = vpop.f32.mrb[188].mxu0 }
 0x61e   : > { %v12775_v39 = vadd.f32 %v12723_v46, %v12501_v12  ;;  %v12725_v30 = vpop.f32.mrb[189].mxu0 }
 0x61f   : > { %v12776_v52 = vadd.f32 %v12725_v30, %v12502_v9  ;;  %v12727_v53 = vpop.f32.mrb[190].mxu0 }
 0x620   : > { %v12682_v3 = vpop.f32.mrb[184].mxu1  ;;  %v12728_v49 = vpop.f32.mrb[191].mxu0 }
 0x621   : > { %v12773_v45 = vadd.f32 %v12682_v3, %v12499_v47  ;;  %v12684_v0 = vpop.f32.mrb[185].mxu1 }
 0x622   : > { %v12774_v8 = vadd.f32 %v12684_v0, %v12500_v44  ;;  %v12686_v41 = vpop.f32.mrb[186].mxu1 }
 0x623   : > { %v12687_v18 = vpop.f32.mrb[187].mxu1 }
 0x625   : > { %v12915_v1 = vpop.f32.mrb[192].mxu0 }
 0x626   : > { %v13045_v48 = vadd.f32 %v12915_v1, %v12771_v56  ;;  %v12917_v20 = vpop.f32.mrb[193].mxu0 }
 0x627   : > { %v13046_v32 = vadd.f32 %v12917_v20, %v12772_v16  ;;  %v12919_v2 = vpop.f32.mrb[194].mxu0 }
 0x628   : > { %v12764_v21 = vpop.f32.mrb[188].mxu1  ;;  %v12920_v42 = vpop.f32.mrb[195].mxu0 }
 0x629   : > { %v12777_v43 = vadd.f32 %v12764_v21, %v12503_v37  ;;  %v12766_v38 = vpop.f32.mrb[189].mxu1 }
 0x62a   : > { %v12778_v29 = vadd.f32 %v12766_v38, %v12504_v27  ;;  %v12768_v28 = vpop.f32.mrb[190].mxu1 }
 0x62b   : > { %v12769_v10 = vpop.f32.mrb[191].mxu1 }
 0x62d   : > { %v12997_v57 = vpop.f32.mrb[196].mxu0 }
 0x62e   : > { %v13049_v12 = vadd.f32 %v12997_v57, %v12775_v39  ;;  %v12999_v60 = vpop.f32.mrb[197].mxu0 }
 0x62f   : > { %v13050_v9 = vadd.f32 %v12999_v60, %v12776_v52  ;;  %v13001_v33 = vpop.f32.mrb[198].mxu0 }
 0x630   : > { %v12956_v17 = vpop.f32.mrb[192].mxu1  ;;  %v13002_v35 = vpop.f32.mrb[199].mxu0 }
 0x631   : > { %v13047_v47 = vadd.f32 %v12956_v17, %v12773_v45  ;;  %v12958_v15 = vpop.f32.mrb[193].mxu1 }
 0x632   : > { %v13048_v44 = vadd.f32 %v12958_v15, %v12774_v8  ;;  %v12960_v63 = vpop.f32.mrb[194].mxu1 }
 0x633   : > { %v12961_v58 = vpop.f32.mrb[195].mxu1 }
 0x638   : > { %v13038_v7 = vpop.f32.mrb[196].mxu1  ;;  %v13189_v56 = vpop.f32.mrb[200].mxu0 }
 0x639   : > { %v13051_v55 = vadd.f32 %v13038_v7, %v12777_v43  ;;  %v13319_v16 = vadd.f32 %v13189_v56, %v13045_v48  ;;  %v13040_v34 = vpop.f32.mrb[197].mxu1  ;;  %v13191_v13 = vpop.f32.mrb[201].mxu0 }
 0x63a   : > { %v13052_v31 = vadd.f32 %v13040_v34, %v12778_v29  ;;  %v13320_v37 = vadd.f32 %v13191_v13, %v13046_v32  ;;  %v13042_v26 = vpop.f32.mrb[198].mxu1  ;;  %v13193_v27 = vpop.f32.mrb[202].mxu0 }
 0x63b   : > { %v13043_v25 = vpop.f32.mrb[199].mxu1  ;;  %v13194_v61 = vpop.f32.mrb[203].mxu0 }
 0x63c   : > { %v13879_v27 = vpop.permute.xlu0 %13878 }
 0x640   : > { %v13230_v46 = vpop.f32.mrb[200].mxu1  ;;  %v13271_v39 = vpop.f32.mrb[204].mxu0 }
 0x641   : > { %v13321_v30 = vadd.f32 %v13230_v46, %v13047_v47  ;;  %v13323_v52 = vadd.f32 %v13271_v39, %v13049_v12  ;;  %v13232_v53 = vpop.f32.mrb[201].mxu1  ;;  %v13273_v3 = vpop.f32.mrb[205].mxu0 }
 0x642   : > { %v13322_v49 = vadd.f32 %v13232_v53, %v13048_v44  ;;  %v13324_v45 = vadd.f32 %v13273_v3, %v13050_v9  ;;  %v13234_v0 = vpop.f32.mrb[202].mxu1  ;;  %v13275_v8 = vpop.f32.mrb[206].mxu0 }
 0x643   : > { %v13235_v41 = vpop.f32.mrb[203].mxu1  ;;  %v13276_v18 = vpop.f32.mrb[207].mxu0 }
 0x648   : > { %v13312_v1 = vpop.f32.mrb[204].mxu1  ;;  %v13463_v48 = vpop.f32.mrb[208].mxu0 }
 0x649   : > { %v13325_v20 = vadd.f32 %v13312_v1, %v13051_v55  ;;  %v13593_v32 = vadd.f32 %v13463_v48, %v13319_v16  ;;  %v13314_v2 = vpop.f32.mrb[205].mxu1  ;;  %v13465_v21 = vpop.f32.mrb[209].mxu0 }
 0x64a   : > { %v13326_v42 = vadd.f32 %v13314_v2, %v13052_v31  ;;  %v13594_v43 = vadd.f32 %v13465_v21, %v13320_v37  ;;  %v13316_v38 = vpop.f32.mrb[206].mxu1  ;;  %v13467_v29 = vpop.f32.mrb[210].mxu0 }
 0x64b   : > { %v13317_v28 = vpop.f32.mrb[207].mxu1  ;;  %v13468_v10 = vpop.f32.mrb[211].mxu0 }
 0x650   : > { %v13504_v57 = vpop.f32.mrb[208].mxu1  ;;  %v13545_v12 = vpop.f32.mrb[212].mxu0 }
 0x651   : > { %v13595_v60 = vadd.f32 %v13504_v57, %v13321_v30  ;;  %v13597_v9 = vadd.f32 %v13545_v12, %v13323_v52  ;;  %v13506_v33 = vpop.f32.mrb[209].mxu1  ;;  %v13547_v17 = vpop.f32.mrb[213].mxu0 }
 0x652   : > { %v13596_v35 = vadd.f32 %v13506_v33, %v13322_v49  ;;  %v13598_v47 = vadd.f32 %v13547_v17, %v13324_v45  ;;  %v13508_v15 = vpop.f32.mrb[210].mxu1  ;;  %v13549_v44 = vpop.f32.mrb[214].mxu0 }
 0x653   : > { %v13509_v63 = vpop.f32.mrb[211].mxu1  ;;  %v13550_v58 = vpop.f32.mrb[215].mxu0 }
 0x658   : > { %v13586_v7 = vpop.f32.mrb[212].mxu1 }
 0x659   : > { %v13599_v56 = vadd.f32 %v13586_v7, %v13325_v20  ;;  %v13588_v55 = vpop.f32.mrb[213].mxu1 }
 0x65a   : > { %v13600_v16 = vadd.f32 %v13588_v55, %v13326_v42  ;;  %v13590_v34 = vpop.f32.mrb[214].mxu1 }
 0x65b   : > { %v13591_v13 = vpop.f32.mrb[215].mxu1 }
 0x65c   : > { %v13737_v31 = vpop.f32.mrb[216].mxu0 }
 0x65d   : > { %v13867_v37 = vadd.f32 %v13737_v31, %v13593_v32  ;;  %v13739_v26 = vpop.f32.mrb[217].mxu0 }
 0x65e   : > { %v13868_v25 = vadd.f32 %v13739_v26, %v13594_v43  ;;  %v13741_v61 = vpop.f32.mrb[218].mxu0 }
 0x65f   : > { %v13881_v46 = vadd.f32 %v13879_v27, %v13867_v37  ;;  %v13742_v39 = vpop.f32.mrb[219].mxu0 }
 0x660   : > { %v13882_v30 = vadd.f32 %v13879_v27, %v13868_v25  ;;  %v13778_v52 = vpop.f32.mrb[216].mxu1 }
 0x661   : > { %v13889_v53 = vadd.f32 %v13881_v46, %v16508_v36  ;;  %v13869_v3 = vadd.f32 %v13778_v52, %v13595_v60  ;;  %v13780_v49 = vpop.f32.mrb[217].mxu1 }
 0x662   : > { %v13890_v45 = vadd.f32 %v13882_v30, %v16513_v4  ;;  %v13870_v0 = vadd.f32 %v13780_v49, %v13596_v35  ;;  %v13782_v8 = vpop.f32.mrb[218].mxu1 }
 0x663   : > { %v13897_v41 = vmax.f32 %v13889_v53, 0.0  ;;  %v13883_v18 = vadd.f32 %v13879_v27, %v13869_v3  ;;  %v13783_v1 = vpop.f32.mrb[219].mxu1 }
 0x664   : > { %v13898_v48 = vmax.f32 %v13890_v45, 0.0  ;;  %v13884_v20 = vadd.f32 %v13879_v27, %v13870_v0  ;;  %v13819_v32 = vpop.f32.mrb[220].mxu0 }
 0x665   : > { %v13905_v2 = vmul.f32 %v13897_v41, %v16511_v5  ;;  %v13891_v21 = vadd.f32 %v13883_v18, %v16518_v11  ;;  %v13871_v36 = vadd.f32 %v13819_v32, %v13597_v9  ;;  %v13821_v42 = vpop.f32.mrb[221].mxu0 }
 0x666   : > { %v13906_v43 = vmul.f32 %v13898_v48, %v16516_v40  ;;  %v13892_v4 = vadd.f32 %v13884_v20, %v16524_v51  ;;  %v13872_v38 = vadd.f32 %v13821_v42, %v13598_v47  ;;  %v13823_v29 = vpop.f32.mrb[222].mxu0 }
 0x667   : > { %v13899_v28 = vmax.f32 %v13891_v21, 0.0  ;;  %v13885_v10 = vadd.f32 %v13879_v27, %v13871_v36  ;;  %v13824_v57 = vpop.f32.mrb[223].mxu0 }
 0x668   : > { %v13921_v12 = vcombine.low %v13905_v2, %v13906_v43  ;;  %v13900_v60 = vmax.f32 %v13892_v4, 0.0  ;;  %v13886_v33 = vadd.f32 %v13879_v27, %v13872_v38  ;;  %v13860_v17 = vpop.f32.mrb[220].mxu1 }
 0x669   : > { %v13907_v35 = vmul.f32 %v13899_v28, %v16522_v50  ;;  %v13893_v5 = vadd.f32 %v13885_v10, %v16530_v59  ;;  %v13873_v11 = vadd.f32 %v13860_v17, %v13599_v56  ;;  %v13862_v9 = vpop.f32.mrb[221].mxu1 }
 0x66a   : > { %13929 = vst [vmem:[%s244_s16] sm:$0xff] %v13921_v12  ;;  %v13908_v40 = vmul.f32 %v13900_v60, %v16528_v54  ;;  %v13894_v51 = vadd.f32 %v13886_v33, %v16536_v14  ;;  %v13874_v47 = vadd.f32 %v13862_v9, %v13600_v16  ;;  %v13864_v15 = vpop.f32.mrb[222].mxu1 }
 0x66b   : > { %v13901_v44 = vmax.f32 %v13893_v5, 0.0  ;;  %v13887_v63 = vadd.f32 %v13879_v27, %v13873_v11  ;;  %v13865_v58 = vpop.f32.mrb[223].mxu1 }
 0x66c   : > { %v13922_v7 = vcombine.low %v13907_v35, %v13908_v40  ;;  %v13902_v55 = vmax.f32 %v13894_v51, 0.0  ;;  %v13888_v34 = vadd.f32 %v13879_v27, %v13874_v47 }
 0x66d   : > { %v13909_v50 = vmul.f32 %v13901_v44, %v16532_v62  ;;  %v13895_v59 = vadd.f32 %v13887_v63, %v16544_v19 }
 0x66e   : > { %13930 = vst [vmem:[%s244_s16 + $0x8] sm:$0xff] %v13922_v7  ;;  %v13910_v56 = vmul.f32 %v13902_v55, %v16542_v6  ;;  %v13896_v54 = vadd.f32 %v13888_v34, %v16550_v23 }
 0x66f   : > { %v13903_v14 = vmax.f32 %v13895_v59, 0.0 }
 0x670   : > { %v13923_v16 = vcombine.low %v13909_v50, %v13910_v56  ;;  %v13904_v13 = vmax.f32 %v13896_v54, 0.0 }
 0x671   : > { %v13911_v31 = vmul.f32 %v13903_v14, %v16548_v22 }
 0x672   : > { %13931 = vst [vmem:[%s244_s16 + $0x10] sm:$0xff] %v13923_v16  ;;  %v13912_v37 = vmul.f32 %v13904_v13, %v16552_v24 }
 0x674   : > { %v13924_v62 = vcombine.low %v13911_v31, %v13912_v37 }
 0x676   : > { %13932 = vst [vmem:[%s244_s16 + $0x18] sm:$0xff] %v13924_v62 }
 0x677   : > { %15081 = shalt.err (!%p15078_p3)
}
 0x678   : > { %s15082_s9 = scalar_lea.hbm %s18441_s20, 512  ;;  %s15086_s14 = scalar_lea.hbm %s18491_s6, 1024 }
 0x679   : > { %p15083_p4 = scmp.ne.s32.totalorder %s18441_s20, %s15082_s9  ;;  %p15087_p9 = scmp.lt.u32.totalorder %s18441_s20, %s18491_s6 }
 0x67a   : > { %p15088_p10 = scmp.lt.u32.totalorder %s15086_s14, %s15082_s9  ;;  %p15090_p12 = scmp.lt.u32.totalorder %s15082_s9, %s18441_s20 }
 0x67b   : > { %p15084_p7 = pnand %p15083_p4, %p15234_p5 }
 0x67c   : > { %p15089_p11 = por %p15088_p10, %p15087_p9 }
 0x67d   : > { %p15085_p8 = pneg %p15084_p7 }
 0x67e   : > { %p15091_p13 = por %p15090_p12, %p15089_p11 }
 0x680   : > { %p15092_p0 = pnand %p15091_p13, %p15085_p8 }
 0x682   : > { %15095 = shalt.err (!%p15092_p0)
}
 0x683   : > { %14975 = dma.vmem_to_hbm [thread:$0]  (%p15234_p5), %s18443_s17, 512, %s18441_s20, %s13934_s29  }
 0x684 PF: > { %p14981_p1 = scmp.ge.s32.totalorder %s15130_s24, 2  ;;  %s13960_s10 = sand.u32 1, %s15118_s21  }
 0x685   : > { %s13961_s18 = scalar_lea.sflag [#allocation4], %s13960_s10 }
 0x686   : > { %p14978_p2 = pnand %p14981_p1, %p15238_p6 }
 0x688   : > { %15113 = dma.done.wait (!%p14978_p2), %s13961_s18, 512  }
 0x689   : > { %15115 = vsyncadd (!%p14978_p2), %s13961_s18, 4294966784  ;;  %p16_p3 = scmp.ge.s32.totalorder %s15221_s27, 4   ;;  %s18645_s21 = smov %s15122_s22 }
 0x68a   : > { %s18646_s22 = smov %s15126_s23  ;;  %s18647_s23 = smov %s15232_s30 }
 0x68b   : > { %s18648_s24 = smov %s15221_s27  ;;  %18 = sbr.rel (!%p16_p3) target bundleno = 3 (0x3), region = 131 }
 0x692   :  { %13966 = vsyncpa [#allocation4], 1 }
 0x693   :  { %13968 = vsyncpa [#allocation4 + $0x1], 1 }

</bundles_post_ra>
